<compile_context>
chip_gen: v5e
topology: v5e:2x2
jax: 0.10.0
libtpu: 0.0.40
codegen_flags: <defaults>
</compile_context>

<pallas_src>
import inspect

import jax
import jax.numpy as jnp
from jax import lax
from jax.experimental import pallas as pl
from jax.experimental.pallas import tpu as pltpu

C = 2048        # channels (lin1 expects 2*2048 input features)
H = W = 14      # MaxPool2d(14) on 14x14 input == global spatial pooling
HW = H * W      # 196 (pads to 256 lanes in VMEM)
HID = 100       # lin1 / FC hidden width
HIDP = 128      # hidden width zero-padded to a full lane tile
CCHUNK = 128    # channel rows per in-kernel chunk (~32 f32 vregs at 196->256)
EPS = 1e-8


def qualitynet_kernel(x_ref, w1t_ref, b1_ref, w2t_ref, b2_ref, w3t_ref, b3_ref,
                      out_ref, pooled_ref):
    """One grid step processes a block of `bt` samples in native NCHW layout.

    x_ref      : (bt, C, HW)   raw activations (HW=196, lane-padded to 256)
    w1t_ref    : (HIDP, 2C)    [W1_max^T | W1_min^T], zero-padded to HIDP rows
    w2t_ref    : (HIDP, HIDP)  FC weight^T (zero-padded)
    w3t_ref    : (1, HIDP)     lin2 weight^T (zero-padded)
    b*_ref     : matching biases as column vectors
    out_ref    : (1, 1, bt)    sigmoid outputs for this block
    pooled_ref : (2C, bt)      VMEM scratch; rows [0, C) hold the max-pool
                               columns, rows [C, 2C) the min-pool columns
    """
    bt = x_ref.shape[0]
    nchunks = C // CCHUNK

    # ---- channel-L2 normalize + global spatial max/min pool, chunked over C.
    # C sits on the sublane axis, HW on the lane axis, so the norm is a
    # sublane reduction and the pooling a lane reduction — no transposes and
    # no (C, HW) intermediate is ever materialized (review #1).
    for i in range(bt):                      # static unroll, bt <= 8 (review #2)
        # Pass 1: nsq[hw] = sum_c x[i, c, hw]^2, accumulated chunk by chunk.
        def nsq_body(c, acc):
            r0 = pl.multiple_of(c * CCHUNK, CCHUNK)
            blk = x_ref[i, pl.ds(r0, CCHUNK), :]                     # (CH, HW)
            return acc + jnp.sum(blk * blk, axis=0, keepdims=True)   # (1, HW)

        nsq = lax.fori_loop(0, nchunks, nsq_body,
                            jnp.zeros((1, HW), jnp.float32))
        # Exact reciprocal on the tiny (1, HW) vector (keeps 1e-4 tolerance);
        # one broadcast multiply per chunk instead of a full (C, HW) divide.
        inv = pl.reciprocal(jnp.sqrt(nsq) + EPS, approx=False)       # (1, HW)

        # Pass 2: re-load each chunk, scale by inv while it is still in vregs
        # and reduce max/min over the HW (lane) axis immediately -> (CH, 1).
        # Mosaic masks lane reductions to the logical 196-lane extent, so the
        # 196->256 lane padding (stale VMEM) cannot leak into min/max.
        def pool_body(c, carry):
            r0 = pl.multiple_of(c * CCHUNK, CCHUNK)
            blk = x_ref[i, pl.ds(r0, CCHUNK), :] * inv               # (CH, HW)
            pooled_ref[pl.ds(r0, CCHUNK), pl.ds(i, 1)] = (
                jnp.max(blk, axis=1, keepdims=True))                 # (CH, 1)
            pooled_ref[pl.ds(pl.multiple_of(C + r0, CCHUNK), CCHUNK),
                       pl.ds(i, 1)] = jnp.min(blk, axis=1, keepdims=True)
            return carry

        lax.fori_loop(0, nchunks, pool_body, 0)

    # ---- tiny MLP head on the pooled features (single fused lin1 GEMM, #6).
    pooled = pooled_ref[...]                                         # (2C, bt)
    h1 = jnp.dot(w1t_ref[...], pooled,
                 preferred_element_type=jnp.float32) + b1_ref[...]   # (HIDP, bt)
    h1 = jnp.maximum(h1, 0.0)                                        # relu
    h2 = jnp.dot(w2t_ref[...], h1,
                 preferred_element_type=jnp.float32) + b2_ref[...]   # (HIDP, bt)
    h2 = jnp.maximum(h2, 0.0)                                        # relu
    # TODO(synk): dropout (p=0.2) is identity at eval/inference time.
    logit = jnp.dot(w3t_ref[...], h2,
                    preferred_element_type=jnp.float32) + b3_ref[...]  # (1, bt)
    out_ref[0] = 1.0 / (1.0 + jnp.exp(-logit))                       # sigmoid


def _device_kind() -> str:
    try:
        return jax.devices()[0].device_kind.lower()
    except Exception:  # pragma: no cover - defensive
        return ""


def _is_v7x() -> bool:
    return "v7" in _device_kind()


def _pick_block_batch(batch: int, prefer_even_blocks: bool) -> int:
    """Samples per grid step.  With the chunked normalize+pool, the big VMEM
    consumers are only the double-buffered x block (2 x bt x 2 MiB), ~2 MiB of
    pooled scratch and ~2 MiB of weights, so bt=8 (~38 MiB) fits every
    generation, including v7x's 64 MiB/TC (review #4).  On v7x prefer a bt
    that yields an even block count so CORE_PARALLEL can use both
    TensorCores without padding the batch (review #5)."""
    cands = [bt for bt in (8, 4, 2, 1) if batch % bt == 0]
    if prefer_even_blocks:
        for bt in cands:
            nb = batch // bt
            if nb >= 2 and nb % 2 == 0:
                return bt
    return cands[0]


def _supports_pipeline_mode() -> bool:
    try:
        return (hasattr(pl, "Buffered")
                and "pipeline_mode" in inspect.signature(pl.BlockSpec).parameters)
    except (TypeError, ValueError):  # pragma: no cover - defensive
        return False


@jax.jit
def qualitynet_forward(v_nchw, w1, b1, w2, b2, w3, b3):
    """v_nchw: (B, C, H, W) float32; Linear weights passed as (in, out)."""
    B = v_nchw.shape[0]
    # Native NCHW: (B, C, H, W) -> (B, C, HW) is a free reshape (no transpose,
    # no pad, no cast -> no extra HBM pass).
    x = v_nchw.reshape(B, C, HW).astype(jnp.float32)

    # Zero-pad hidden width 100 -> 128 (padded units stay exactly 0 through
    # the relus, so results are unchanged) and pre-transpose all weights
    # host-side.  lin1's weight is kept as one (HIDP, 2C) matrix so the kernel
    # runs a single GEMM over the fused (2C, bt) pooled scratch.
    pad = HIDP - HID
    w1t = jnp.pad(w1.astype(jnp.float32), ((0, 0), (0, pad))).T      # (HIDP, 2C)
    b1t = jnp.pad(b1.astype(jnp.float32), (0, pad)).reshape(HIDP, 1)
    w2t = jnp.pad(w2.astype(jnp.float32), ((0, pad), (0, pad))).T    # (HIDP, HIDP)
    b2t = jnp.pad(b2.astype(jnp.float32), (0, pad)).reshape(HIDP, 1)
    w3t = jnp.pad(w3.astype(jnp.float32), ((0, pad), (0, 0))).T      # (1, HIDP)
    b3r = b3.astype(jnp.float32).reshape(1, 1)

    is_v7x = _is_v7x()
    core_parallel = getattr(pltpu, "CORE_PARALLEL", None)
    bt = _pick_block_batch(B, prefer_even_blocks=is_v7x and core_parallel is not None)
    num_blocks = B // bt
    use_buffered = _supports_pipeline_mode()

    def const_spec(shape, single_buffer=False):
        kwargs = {}
        if single_buffer and use_buffered:
            # Constant across the grid: one VMEM buffer is enough (saves ~2 MiB).
            kwargs["pipeline_mode"] = pl.Buffered(1)
        return pl.BlockSpec(shape, lambda b: tuple(0 for _ in shape), **kwargs)

    if is_v7x and core_parallel is not None and num_blocks % 2 == 0:
        # v7x has 2 TensorCores/chip: shard the batch-block axis across them.
        dim_semantics = (core_parallel,)
    else:
        dim_semantics = ("parallel",)

    # Leave headroom below physical VMEM (64 MiB/TC on v7x, 128 MiB on v5e/v6e).
    vmem_limit = (48 << 20) if is_v7x else (96 << 20)

    out = pl.pallas_call(
        qualitynet_kernel,
        out_shape=jax.ShapeDtypeStruct((num_blocks, 1, bt), jnp.float32),
        grid_spec=pltpu.PrefetchScalarGridSpec(
            num_scalar_prefetch=0,
            grid=(num_blocks,),
            in_specs=[
                pl.BlockSpec((bt, C, HW), lambda b: (b, 0, 0)),   # x, native NCHW
                const_spec((HIDP, 2 * C), single_buffer=True),    # [W1a^T | W1b^T]
                const_spec((HIDP, 1)),                            # b1
                const_spec((HIDP, HIDP), single_buffer=True),     # W2^T
                const_spec((HIDP, 1)),                            # b2
                const_spec((1, HIDP)),                            # W3^T
                const_spec((1, 1)),                               # b3
            ],
            out_specs=pl.BlockSpec((1, 1, bt), lambda b: (b, 0, 0)),
            scratch_shapes=[
                pltpu.VMEM((2 * C, bt), jnp.float32),  # fused max|min pooled columns
            ],
        ),
        compiler_params=pltpu.CompilerParams(
            dimension_semantics=dim_semantics,
            vmem_limit_bytes=vmem_limit,
        ),
    )(x, w1t, b1t, w2t, b2t, w3t, b3r)
    # (num_blocks, 1, bt) -> (B, 1); row-major flatten preserves sample order.
    return out.reshape(B, 1)


def reference_forward(v_nchw, w1, b1, w2, b2, w3, b3):
    """Pure-JAX reference of the PyTorch forward (eval mode)."""
    norm = jnp.sqrt(jnp.sum(v_nchw * v_nchw, axis=1, keepdims=True))
    vn = v_nchw / (norm + EPS)
    maxp = jnp.max(vn, axis=(2, 3))                      # (B, C)
    minp = jnp.min(vn, axis=(2, 3))                      # (B, C)
    feat = jnp.concatenate([maxp, minp], axis=1)         # (B, 2C)
    h1 = jax.nn.relu(feat @ w1 + b1)
    h2 = jax.nn.relu(h1 @ w2 + b2)
    return jax.nn.sigmoid(h2 @ w3 + b3)


def init_params(key):
    """Deterministic uniform(-1/sqrt(fan_in), 1/sqrt(fan_in)) like PyTorch Linear."""
    k1, k2, k3, k4, k5, k6 = jax.random.split(key, 6)

    def lin(kw, kb, fan_in, fan_out):
        bound = 1.0 / jnp.sqrt(fan_in)
        w = jax.random.uniform(kw, (fan_in, fan_out), jnp.float32, -bound, bound)
        b = jax.random.uniform(kb, (fan_out,), jnp.float32, -bound, bound)
        return w, b

    w1, b1 = lin(k1, k2, 2 * C, HID)   # lin1: 4096 -> 100
    w2, b2 = lin(k3, k4, HID, HID)     # FC:   100 -> 100
    w3, b3 = lin(k5, k6, HID, 1)       # lin2: 100 -> 1
    return w1, b1, w2, b2, w3, b3


if __name__ == "__main__":
    B = 2
    key = jax.random.PRNGKey(0)
    kx, kp = jax.random.split(key)
    v = jax.random.normal(kx, (B, C, H, W), dtype=jnp.float32)

    params = init_params(kp)

    out = qualitynet_forward(v, *params)
    out = jax.block_until_ready(out)

    ref = reference_forward(v, *params)
    assert out.shape == (B, 1), out.shape
    assert jnp.allclose(out, ref, atol=1e-4, rtol=1e-4), (out, ref)

    print("KERNEL_OK")
</pallas_src>

<mosaic_0001>
module attributes {stable_mosaic.version = 11 : i64} {
  func.func @qualitynet_kernel(%arg0: i32, %arg1: memref<2x2048x196xf32, #tpu.memory_space<vmem>>, %arg2: memref<128x4096xf32, #tpu.memory_space<vmem>>, %arg3: memref<128x1xf32, #tpu.memory_space<vmem>>, %arg4: memref<128x128xf32, #tpu.memory_space<vmem>>, %arg5: memref<128x1xf32, #tpu.memory_space<vmem>>, %arg6: memref<1x128xf32, #tpu.memory_space<vmem>>, %arg7: memref<1x1xf32, #tpu.memory_space<vmem>>, %arg8: memref<1x1x2xf32, #tpu.memory_space<vmem>>, %arg9: memref<4096x2xf32, #tpu.memory_space<vmem>>) attributes {dimension_semantics = [#tpu.dimension_semantics<parallel>], iteration_bounds = array<i64: 1>, scalar_prefetch = 0 : i64, scratch_operands = 1 : i64, tpu.core_type = #tpu.core_type<tc>, window_params = [{transform_indices = @transform_0, window_bounds = array<i64: 2, 2048, 196>}, {pipeline_mode = #tpu.pipeline_mode<synchronous>, transform_indices = @transform_1, window_bounds = array<i64: 128, 4096>}, {pipeline_mode = #tpu.pipeline_mode<synchronous>, transform_indices = @transform_2, window_bounds = array<i64: 128, 1>}, {pipeline_mode = #tpu.pipeline_mode<synchronous>, transform_indices = @transform_3, window_bounds = array<i64: 128, 128>}, {pipeline_mode = #tpu.pipeline_mode<synchronous>, transform_indices = @transform_4, window_bounds = array<i64: 128, 1>}, {pipeline_mode = #tpu.pipeline_mode<synchronous>, transform_indices = @transform_5, window_bounds = array<i64: 1, 128>}, {pipeline_mode = #tpu.pipeline_mode<synchronous>, transform_indices = @transform_6, window_bounds = array<i64: 1, 1>}, {transform_indices = @transform_7, window_bounds = array<i64: 1, 1, 2>}]} {
    %cst = arith.constant 0.000000e+00 : f32
    %0 = vector.broadcast %cst : f32 to vector<1x196xf32>
    %c0_i32 = arith.constant 0 : i32
    %c16_i32 = arith.constant 16 : i32
    %1 = arith.addi %c0_i32, %c16_i32 : i32
    %c1_i32 = arith.constant 1 : i32
    %2 = scf.for %arg10 = %c0_i32 to %1 step %c1_i32 iter_args(%arg11 = %0) -> (vector<1x196xf32>)  : i32 {
      %c128_i32 = arith.constant 128 : i32
      %46 = arith.muli %arg10, %c128_i32 : i32
      %47 = tpu.assume_multiple %46, 128 : i32
      %c0_40 = arith.constant 0 : index
      %48 = arith.index_cast %47 : i32 to index
      %c0_41 = arith.constant 0 : index
      %49 = vector.load %arg1[%c0_40, %48, %c0_41] : memref<2x2048x196xf32, #tpu.memory_space<vmem>>, vector<1x128x196xf32>
      %50 = vector.shape_cast %49 : vector<1x128x196xf32> to vector<128x196xf32>
      %51 = arith.mulf %50, %50 : vector<128x196xf32>
      %cst_42 = arith.constant dense<0.000000e+00> : vector<196xf32>
      %52 = vector.multi_reduction <add>, %51, %cst_42 [0] : vector<128x196xf32> to vector<196xf32>
      %53 = vector.shape_cast %52 : vector<196xf32> to vector<1x196xf32>
      %54 = arith.addf %arg11, %53 : vector<1x196xf32>
      scf.yield %54 : vector<1x196xf32>
    }
    %c16_i32_0 = arith.constant 16 : i32
    %3 = math.sqrt %2 : vector<1x196xf32>
    %cst_1 = arith.constant 9.99999993E-9 : f32
    %4 = vector.broadcast %cst_1 : f32 to vector<1x196xf32>
    %5 = arith.addf %3, %4 : vector<1x196xf32>
    %6 = tpu.reciprocal %5 : vector<1x196xf32> -> vector<1x196xf32>
    %c0_i32_2 = arith.constant 0 : i32
    %c16_i32_3 = arith.constant 16 : i32
    %7 = arith.addi %c0_i32_2, %c16_i32_3 : i32
    %c1_i32_4 = arith.constant 1 : i32
    scf.for %arg10 = %c0_i32_2 to %7 step %c1_i32_4  : i32 {
      %c128_i32 = arith.constant 128 : i32
      %46 = arith.muli %arg10, %c128_i32 : i32
      %47 = tpu.assume_multiple %46, 128 : i32
      %c0_40 = arith.constant 0 : index
      %48 = arith.index_cast %47 : i32 to index
      %c0_41 = arith.constant 0 : index
      %49 = vector.load %arg1[%c0_40, %48, %c0_41] : memref<2x2048x196xf32, #tpu.memory_space<vmem>>, vector<1x128x196xf32>
      %50 = vector.shape_cast %49 : vector<1x128x196xf32> to vector<128x196xf32>
      %51 = vector.broadcast %6 : vector<1x196xf32> to vector<128x196xf32>
      %52 = arith.mulf %50, %51 : vector<128x196xf32>
      %cst_42 = arith.constant dense<0xFF800000> : vector<128xf32>
      %53 = vector.multi_reduction <maximumf>, %52, %cst_42 [1] : vector<128x196xf32> to vector<128xf32>
      %54 = vector.shape_cast %53 : vector<128xf32> to vector<128x1xf32>
      %55 = arith.index_cast %47 : i32 to index
      %c0_43 = arith.constant 0 : index
      %56 = vector.load %arg9[%55, %c0_43] : memref<4096x2xf32, #tpu.memory_space<vmem>>, vector<128x1xf32>
      tpu.vector_store %arg9[%55, %c0_43], %54 {strides = array<i32>} : memref<4096x2xf32, #tpu.memory_space<vmem>>, vector<128x1xf32>,
      %cst_44 = arith.constant dense<0x7F800000> : vector<128xf32>
      %57 = vector.multi_reduction <minimumf>, %52, %cst_44 [1] : vector<128x196xf32> to vector<128xf32>
      %58 = vector.shape_cast %57 : vector<128xf32> to vector<128x1xf32>
      %c2048_i32 = arith.constant 2048 : i32
      %59 = arith.addi %c2048_i32, %47 : i32
      %60 = tpu.assume_multiple %59, 128 : i32
      %61 = arith.index_cast %60 : i32 to index
      %c0_45 = arith.constant 0 : index
      %62 = vector.load %arg9[%61, %c0_45] : memref<4096x2xf32, #tpu.memory_space<vmem>>, vector<128x1xf32>
      tpu.vector_store %arg9[%61, %c0_45], %58 {strides = array<i32>} : memref<4096x2xf32, #tpu.memory_space<vmem>>, vector<128x1xf32>,
    }
    %c16_i32_5 = arith.constant 16 : i32
    %cst_6 = arith.constant 0.000000e+00 : f32
    %8 = vector.broadcast %cst_6 : f32 to vector<1x196xf32>
    %c0_i32_7 = arith.constant 0 : i32
    %c16_i32_8 = arith.constant 16 : i32
    %9 = arith.addi %c0_i32_7, %c16_i32_8 : i32
    %c1_i32_9 = arith.constant 1 : i32
    %10 = scf.for %arg10 = %c0_i32_7 to %9 step %c1_i32_9 iter_args(%arg11 = %8) -> (vector<1x196xf32>)  : i32 {
      %c128_i32 = arith.constant 128 : i32
      %46 = arith.muli %arg10, %c128_i32 : i32
      %47 = tpu.assume_multiple %46, 128 : i32
      %c1 = arith.constant 1 : index
      %48 = arith.index_cast %47 : i32 to index
      %c0_40 = arith.constant 0 : index
      %49 = vector.load %arg1[%c1, %48, %c0_40] : memref<2x2048x196xf32, #tpu.memory_space<vmem>>, vector<1x128x196xf32>
      %50 = vector.shape_cast %49 : vector<1x128x196xf32> to vector<128x196xf32>
      %51 = arith.mulf %50, %50 : vector<128x196xf32>
      %cst_41 = arith.constant dense<0.000000e+00> : vector<196xf32>
      %52 = vector.multi_reduction <add>, %51, %cst_41 [0] : vector<128x196xf32> to vector<196xf32>
      %53 = vector.shape_cast %52 : vector<196xf32> to vector<1x196xf32>
      %54 = arith.addf %arg11, %53 : vector<1x196xf32>
      scf.yield %54 : vector<1x196xf32>
    }
    %c16_i32_10 = arith.constant 16 : i32
    %11 = math.sqrt %10 : vector<1x196xf32>
    %cst_11 = arith.constant 9.99999993E-9 : f32
    %12 = vector.broadcast %cst_11 : f32 to vector<1x196xf32>
    %13 = arith.addf %11, %12 : vector<1x196xf32>
    %14 = tpu.reciprocal %13 : vector<1x196xf32> -> vector<1x196xf32>
    %c0_i32_12 = arith.constant 0 : i32
    %c16_i32_13 = arith.constant 16 : i32
    %15 = arith.addi %c0_i32_12, %c16_i32_13 : i32
    %c1_i32_14 = arith.constant 1 : i32
    scf.for %arg10 = %c0_i32_12 to %15 step %c1_i32_14  : i32 {
      %c128_i32 = arith.constant 128 : i32
      %46 = arith.muli %arg10, %c128_i32 : i32
      %47 = tpu.assume_multiple %46, 128 : i32
      %c1 = arith.constant 1 : index
      %48 = arith.index_cast %47 : i32 to index
      %c0_40 = arith.constant 0 : index
      %49 = vector.load %arg1[%c1, %48, %c0_40] : memref<2x2048x196xf32, #tpu.memory_space<vmem>>, vector<1x128x196xf32>
      %50 = vector.shape_cast %49 : vector<1x128x196xf32> to vector<128x196xf32>
      %51 = vector.broadcast %14 : vector<1x196xf32> to vector<128x196xf32>
      %52 = arith.mulf %50, %51 : vector<128x196xf32>
      %cst_41 = arith.constant dense<0xFF800000> : vector<128xf32>
      %53 = vector.multi_reduction <maximumf>, %52, %cst_41 [1] : vector<128x196xf32> to vector<128xf32>
      %54 = vector.shape_cast %53 : vector<128xf32> to vector<128x1xf32>
      %55 = arith.index_cast %47 : i32 to index
      %c1_42 = arith.constant 1 : index
      %56 = vector.load %arg9[%55, %c1_42] : memref<4096x2xf32, #tpu.memory_space<vmem>>, vector<128x1xf32>
      tpu.vector_store %arg9[%55, %c1_42], %54 {strides = array<i32>} : memref<4096x2xf32, #tpu.memory_space<vmem>>, vector<128x1xf32>,
      %cst_43 = arith.constant dense<0x7F800000> : vector<128xf32>
      %57 = vector.multi_reduction <minimumf>, %52, %cst_43 [1] : vector<128x196xf32> to vector<128xf32>
      %58 = vector.shape_cast %57 : vector<128xf32> to vector<128x1xf32>
      %c2048_i32 = arith.constant 2048 : i32
      %59 = arith.addi %c2048_i32, %47 : i32
      %60 = tpu.assume_multiple %59, 128 : i32
      %61 = arith.index_cast %60 : i32 to index
      %c1_44 = arith.constant 1 : index
      %62 = vector.load %arg9[%61, %c1_44] : memref<4096x2xf32, #tpu.memory_space<vmem>>, vector<128x1xf32>
      tpu.vector_store %arg9[%61, %c1_44], %58 {strides = array<i32>} : memref<4096x2xf32, #tpu.memory_space<vmem>>, vector<128x1xf32>,
    }
    %c16_i32_15 = arith.constant 16 : i32
    %c0 = arith.constant 0 : index
    %c0_16 = arith.constant 0 : index
    %16 = vector.load %arg9[%c0, %c0_16] : memref<4096x2xf32, #tpu.memory_space<vmem>>, vector<4096x2xf32>
    %c0_17 = arith.constant 0 : index
    %c0_18 = arith.constant 0 : index
    %17 = vector.load %arg2[%c0_17, %c0_18] : memref<128x4096xf32, #tpu.memory_space<vmem>>, vector<128x4096xf32>
    %cst_19 = arith.constant dense<0.000000e+00> : vector<128x2xf32>
    %18 = tpu.matmul %17, %16, %cst_19 {dimension_numbers = #tpu.dot_dimension_numbers<[1], [0], [0], [1], [0, 0, 1, 1], [], []>} : vector<128x4096xf32>, vector<4096x2xf32>, vector<128x2xf32> -> vector<128x2xf32>
    %c0_20 = arith.constant 0 : index
    %c0_21 = arith.constant 0 : index
    %19 = vector.load %arg3[%c0_20, %c0_21] : memref<128x1xf32, #tpu.memory_space<vmem>>, vector<128x1xf32>
    %20 = vector.broadcast %19 : vector<128x1xf32> to vector<128x2xf32>
    %21 = arith.addf %18, %20 : vector<128x2xf32>
    %cst_22 = arith.constant 0.000000e+00 : f32
    %22 = vector.broadcast %cst_22 : f32 to vector<128x2xf32>
    %23 = arith.maximumf %21, %22 : vector<128x2xf32>
    %c0_23 = arith.constant 0 : index
    %c0_24 = arith.constant 0 : index
    %24 = vector.load %arg4[%c0_23, %c0_24] : memref<128x128xf32, #tpu.memory_space<vmem>>, vector<128x128xf32>
    %cst_25 = arith.constant dense<0.000000e+00> : vector<128x2xf32>
    %25 = tpu.matmul %24, %23, %cst_25 {dimension_numbers = #tpu.dot_dimension_numbers<[1], [0], [0], [1], [0, 0, 1, 1], [], []>} : vector<128x128xf32>, vector<128x2xf32>, vector<128x2xf32> -> vector<128x2xf32>
    %c0_26 = arith.constant 0 : index
    %c0_27 = arith.constant 0 : index
    %26 = vector.load %arg5[%c0_26, %c0_27] : memref<128x1xf32, #tpu.memory_space<vmem>>, vector<128x1xf32>
    %27 = vector.broadcast %26 : vector<128x1xf32> to vector<128x2xf32>
    %28 = arith.addf %25, %27 : vector<128x2xf32>
    %cst_28 = arith.constant 0.000000e+00 : f32
    %29 = vector.broadcast %cst_28 : f32 to vector<128x2xf32>
    %30 = arith.maximumf %28, %29 : vector<128x2xf32>
    %c0_29 = arith.constant 0 : index
    %c0_30 = arith.constant 0 : index
    %31 = vector.load %arg6[%c0_29, %c0_30] : memref<1x128xf32, #tpu.memory_space<vmem>>, vector<1x128xf32>
    %cst_31 = arith.constant dense<0.000000e+00> : vector<1x2xf32>
    %32 = tpu.matmul %31, %30, %cst_31 {dimension_numbers = #tpu.dot_dimension_numbers<[1], [0], [0], [1], [0, 0, 1, 1], [], []>} : vector<1x128xf32>, vector<128x2xf32>, vector<1x2xf32> -> vector<1x2xf32>
    %c0_32 = arith.constant 0 : index
    %c0_33 = arith.constant 0 : index
    %33 = vector.load %arg7[%c0_32, %c0_33] : memref<1x1xf32, #tpu.memory_space<vmem>>, vector<1x1xf32>
    %34 = vector.broadcast %33 : vector<1x1xf32> to vector<1x2xf32>
    %35 = arith.addf %32, %34 : vector<1x2xf32>
    %cst_34 = arith.constant 0.000000e+00 : f32
    %36 = vector.broadcast %cst_34 : f32 to vector<1x2xf32>
    %37 = arith.subf %36, %35 : vector<1x2xf32>
    %38 = math.exp %37 : vector<1x2xf32>
    %cst_35 = arith.constant 1.000000e+00 : f32
    %39 = vector.broadcast %cst_35 : f32 to vector<1x2xf32>
    %40 = arith.addf %39, %38 : vector<1x2xf32>
    %cst_36 = arith.constant 1.000000e+00 : f32
    %41 = vector.broadcast %cst_36 : f32 to vector<1x2xf32>
    %42 = arith.divf %41, %40 : vector<1x2xf32>
    %c0_37 = arith.constant 0 : index
    %c0_38 = arith.constant 0 : index
    %c0_39 = arith.constant 0 : index
    %43 = vector.load %arg8[%c0_37, %c0_38, %c0_39] : memref<1x1x2xf32, #tpu.memory_space<vmem>>, vector<1x1x2xf32>
    %44 = vector.shape_cast %43 : vector<1x1x2xf32> to vector<1x2xf32>
    %45 = vector.shape_cast %42 : vector<1x2xf32> to vector<1x1x2xf32>
    tpu.vector_store %arg8[%c0_37, %c0_38, %c0_39], %45 {strides = array<i32>} : memref<1x1x2xf32, #tpu.memory_space<vmem>>, vector<1x1x2xf32>,
    return
  }
  func.func @transform_0(%arg0: i32) -> (i32, i32, i32) {
    %c0_i32 = arith.constant 0 : i32
    %c0_i32_0 = arith.constant 0 : i32
    %c0_i32_1 = arith.constant 0 : i32
    return %arg0, %c0_i32, %c0_i32_0 : i32, i32, i32
  }
  func.func @transform_1(%arg0: i32) -> (i32, i32) {
    %c0_i32 = arith.constant 0 : i32
    %c0_i32_0 = arith.constant 0 : i32
    %c0_i32_1 = arith.constant 0 : i32
    return %c0_i32, %c0_i32_0 : i32, i32
  }
  func.func @transform_2(%arg0: i32) -> (i32, i32) {
    %c0_i32 = arith.constant 0 : i32
    %c0_i32_0 = arith.constant 0 : i32
    %c0_i32_1 = arith.constant 0 : i32
    return %c0_i32, %c0_i32_0 : i32, i32
  }
  func.func @transform_3(%arg0: i32) -> (i32, i32) {
    %c0_i32 = arith.constant 0 : i32
    %c0_i32_0 = arith.constant 0 : i32
    %c0_i32_1 = arith.constant 0 : i32
    return %c0_i32, %c0_i32_0 : i32, i32
  }
  func.func @transform_4(%arg0: i32) -> (i32, i32) {
    %c0_i32 = arith.constant 0 : i32
    %c0_i32_0 = arith.constant 0 : i32
    %c0_i32_1 = arith.constant 0 : i32
    return %c0_i32, %c0_i32_0 : i32, i32
  }
  func.func @transform_5(%arg0: i32) -> (i32, i32) {
    %c0_i32 = arith.constant 0 : i32
    %c0_i32_0 = arith.constant 0 : i32
    %c0_i32_1 = arith.constant 0 : i32
    return %c0_i32, %c0_i32_0 : i32, i32
  }
  func.func @transform_6(%arg0: i32) -> (i32, i32) {
    %c0_i32 = arith.constant 0 : i32
    %c0_i32_0 = arith.constant 0 : i32
    %c0_i32_1 = arith.constant 0 : i32
    return %c0_i32, %c0_i32_0 : i32, i32
  }
  func.func @transform_7(%arg0: i32) -> (i32, i32, i32) {
    %c0_i32 = arith.constant 0 : i32
    %c0_i32_0 = arith.constant 0 : i32
    %c0_i32_1 = arith.constant 0 : i32
    return %arg0, %c0_i32, %c0_i32_0 : i32, i32, i32
  }
}

</mosaic_0001>

<bundles_post_ra>
// kernel: qualitynet_forward.1
= control target key start
LH: loop header
LB: loop body
LE: loop exit
PB: predicated region body
PF: predicated region fallthrough
CT: control target
= control target key end

     0   :  { %s8047_s0 = inlined_call_operand.vmem [shape: f32[2,2048,196], index: 0, kind: input, shape index: {}]   ;;  %s8048_s1 = inlined_call_operand.vmem [shape: f32[128,4096], index: 1, kind: input, shape index: {}]   ;;  %s8049_s2 = inlined_call_operand.vmem [shape: f32[128,1], index: 2, kind: input, shape index: {}]   ;;  %s8050_s3 = inlined_call_operand.vmem [shape: f32[128,128], index: 3, kind: input, shape index: {}]   ;;  %s8051_s4 = inlined_call_operand.vmem [shape: f32[128,1], index: 4, kind: input, shape index: {}]   ;;  %s8052_s5 = inlined_call_operand.vmem [shape: f32[1,128], index: 5, kind: input, shape index: {}]   ;;  %s8053_s6 = inlined_call_operand.<no memory space> [shape: f32[1,1], index: 6, kind: input, shape index: {}]   ;;  %s8054_s7 = inlined_call_operand.hbm [shape: f32[1,1,2], index: 7, kind: output, shape index: {}]  }
   0x1   :  { %v12_v0 = vstv %s8053_s6 }
   0x2   :  { %13 = vst [vmem:[#allocation3] sm:$0x1] %v12_v0 }
   0x3   :  { %14 = vsyncpa [#allocation5], 0  ;;  %v4813_v1 = vmov 0.0   ;;  %v4815_v2 = vmov 0.0   ;;  %s4817_s26 = smov 0  }
   0x4 LB: > { %s4427_s6 = sshll.u32 %s4746_s26, 7  ;;  %vm128_vm0 = vcmask 556032   ;;  %s34_s26 = sadd.s32 1, %s4746_s26   ;;  %s4746_s26 = sphi %s4817_s26, %s34_s26   ;;  %v4742_v2 = vphi %v4815_v2, %v8056_v2   ;;  %v4738_v1 = vphi %v4813_v1, %v8055_v1  }
   0x5   : > { %s38_s27 = sshra.s32 %s4427_s6, 3  ;;  %p31_p0 = scmp.ge.s32.totalorder %s34_s26, 16  }
   0x6   : > { %s4537_s28 = sshll.u32 %s38_s27, 4  ;;  %s4895_s9 = smov (%p31_p0), 0  }
   0x7   : > { %s4832_s8 = scalar_lea.vmem %s8047_s0, %s4537_s28 }
   0x8   : > { %v43_v3 = vld [vmem:[%s4832_s8] sm:$0xff]  ;;  %v44_v4 = vld [vmem:[%s4832_s8 + $0x8] sm:$0xff]  ;;  %v45_v5 = vld [vmem:[%s4832_s8 + $0x10] sm:$0xff] }
   0x9   : > { %v46_v6 = vld [vmem:[%s4832_s8 + $0x18] sm:$0xff]  ;;  %v47_v7 = vld [vmem:[%s4832_s8 + $0x20] sm:$0xff]  ;;  %v75_v8 = vmul.f32 %v43_v3, %v43_v3  ;;  %v76_v9 = vmul.f32 %v44_v4, %v44_v4  ;;  %v77_v10 = vmul.f32 %v45_v5, %v45_v5  ;;  %v49_v11 = vld [vmem:[%s4832_s8 + $0x30] sm:$0xff] }
   0xa   : > { %v51_v12 = vld [vmem:[%s4832_s8 + $0x40] sm:$0xff]  ;;  %v78_v13 = vmul.f32 %v46_v6, %v46_v6  ;;  %v79_v14 = vmul.f32 %v47_v7, %v47_v7  ;;  %v48_v15 = vld [vmem:[%s4832_s8 + $0x28] sm:$0xff]  ;;  %v81_v16 = vmul.f32 %v49_v11, %v49_v11  ;;  %v53_v18 = vld [vmem:[%s4832_s8 + $0x50] sm:$0xff] }
   0xb   : > { %v107_v17 = vadd.f32 %v77_v10, %v75_v8  ;;  %v50_v19 = vld [vmem:[%s4832_s8 + $0x38] sm:$0xff]  ;;  %v52_v20 = vld [vmem:[%s4832_s8 + $0x48] sm:$0xff]  ;;  %v83_v21 = vmul.f32 %v51_v12, %v51_v12  ;;  %v129_v23 = vsel %vm128_vm0, %v76_v9, 0.0  ;;  %v55_v24 = vld [vmem:[%s4832_s8 + $0x60] sm:$0xff]  ;;  %v80_v25 = vmul.f32 %v48_v15, %v48_v15 }
   0xc   : > { %v130_v26 = vsel %vm128_vm0, %v78_v13, 0.0  ;;  %v54_v27 = vld [vmem:[%s4832_s8 + $0x58] sm:$0xff]  ;;  %v85_v28 = vmul.f32 %v53_v18, %v53_v18  ;;  %v57_v30 = vld [vmem:[%s4832_s8 + $0x70] sm:$0xff]  ;;  %v82_v31 = vmul.f32 %v50_v19, %v50_v19  ;;  %v84_v32 = vmul.f32 %v52_v20, %v52_v20  ;;  %v56_v34 = vld [vmem:[%s4832_s8 + $0x68] sm:$0xff] }
   0xd   : > { %v108_v22 = vadd.f32 %v107_v17, %v79_v14  ;;  %v131_v33 = vadd.f32 %v130_v26, %v129_v23  ;;  %v87_v35 = vmul.f32 %v55_v24, %v55_v24  ;;  %v59_v37 = vld [vmem:[%s4832_s8 + $0x80] sm:$0xff]  ;;  %v86_v38 = vmul.f32 %v54_v27, %v54_v27  ;;  %v58_v40 = vld [vmem:[%s4832_s8 + $0x78] sm:$0xff]  ;;  %v61_v44 = vld [vmem:[%s4832_s8 + $0x90] sm:$0xff] }
   0xe   : > { %v132_v39 = vsel %vm128_vm0, %v80_v25, 0.0  ;;  %v89_v41 = vmul.f32 %v57_v30, %v57_v30  ;;  %v88_v45 = vmul.f32 %v56_v34, %v56_v34  ;;  %v134_v46 = vsel %vm128_vm0, %v82_v31, 0.0  ;;  %v60_v48 = vld [vmem:[%s4832_s8 + $0x88] sm:$0xff]  ;;  %v63_v52 = vld [vmem:[%s4832_s8 + $0xa0] sm:$0xff]  ;;  %v62_v55 = vld [vmem:[%s4832_s8 + $0x98] sm:$0xff] }
   0xf   : > { %v109_v29 = vadd.f32 %v108_v22, %v81_v16  ;;  %v133_v43 = vadd.f32 %v132_v39, %v131_v33  ;;  %v136_v47 = vsel %vm128_vm0, %v84_v32, 0.0  ;;  %v91_v49 = vmul.f32 %v59_v37, %v59_v37  ;;  %v65_v59 = vld [vmem:[%s4832_s8 + $0xb0] sm:$0xff]  ;;  %v64_v62 = vld [vmem:[%s4832_s8 + $0xa8] sm:$0xff]  ;;  %v67_v4 = vld [vmem:[%s4832_s8 + $0xc0] sm:$0xff] }
  0x10   : > { %v90_v53 = vmul.f32 %v58_v40, %v58_v40  ;;  %v138_v54 = vsel %vm128_vm0, %v86_v38, 0.0  ;;  %v93_v56 = vmul.f32 %v61_v44, %v61_v44  ;;  %v92_v60 = vmul.f32 %v60_v48, %v60_v48  ;;  %v66_v7 = vld [vmem:[%s4832_s8 + $0xb8] sm:$0xff]  ;;  %v69_v11 = vld [vmem:[%s4832_s8 + $0xd0] sm:$0xff]  ;;  %v68_v14 = vld [vmem:[%s4832_s8 + $0xc8] sm:$0xff] }
  0x11   : > { %v110_v36 = vadd.f32 %v109_v29, %v83_v21  ;;  %v135_v51 = vadd.f32 %v134_v46, %v133_v43  ;;  %v140_v61 = vsel %vm128_vm0, %v88_v45, 0.0  ;;  %v95_v63 = vmul.f32 %v63_v52, %v63_v52  ;;  %v71_v18 = vld [vmem:[%s4832_s8 + $0xe0] sm:$0xff]  ;;  %v70_v21 = vld [vmem:[%s4832_s8 + $0xd8] sm:$0xff]  ;;  %v73_v25 = vld [vmem:[%s4832_s8 + $0xf0] sm:$0xff] }
  0x12   : > { %v94_v5 = vmul.f32 %v62_v55, %v62_v55  ;;  %v142_v6 = vsel %vm128_vm0, %v90_v53, 0.0  ;;  %v97_v8 = vmul.f32 %v65_v59, %v65_v59  ;;  %v96_v12 = vmul.f32 %v64_v62, %v64_v62  ;;  %v74_v34 = vld [vmem:[%s4832_s8 + $0xf8] sm:$0xff] }
  0x13   : > { %v111_v42 = vadd.f32 %v110_v36, %v85_v28  ;;  %v137_v58 = vadd.f32 %v136_v47, %v135_v51  ;;  %v144_v13 = vsel %vm128_vm0, %v92_v60, 0.0  ;;  %v99_v15 = vmul.f32 %v67_v4, %v67_v4  ;;  %v72_v28 = vld [vmem:[%s4832_s8 + $0xe8] sm:$0xff] }
  0x14   : > { %v98_v19 = vmul.f32 %v66_v7, %v66_v7  ;;  %v146_v20 = vsel %vm128_vm0, %v94_v5, 0.0  ;;  %v101_v22 = vmul.f32 %v69_v11, %v69_v11  ;;  %v100_v26 = vmul.f32 %v68_v14, %v68_v14 }
  0x15   : > { %v112_v50 = vadd.f32 %v111_v42, %v87_v35  ;;  %v139_v3 = vadd.f32 %v138_v54, %v137_v58  ;;  %v148_v27 = vsel %vm128_vm0, %v96_v12, 0.0  ;;  %v103_v29 = vmul.f32 %v71_v18, %v71_v18 }
  0x16   : > { %v102_v32 = vmul.f32 %v70_v21, %v70_v21  ;;  %v150_v33 = vsel %vm128_vm0, %v98_v19, 0.0  ;;  %v105_v35 = vmul.f32 %v73_v25, %v73_v25  ;;  %v104_v38 = vmul.f32 %v72_v28, %v72_v28 }
  0x17   : > { %v113_v57 = vadd.f32 %v112_v50, %v89_v41  ;;  %v141_v10 = vadd.f32 %v140_v61, %v139_v3  ;;  %v152_v39 = vsel %vm128_vm0, %v100_v26, 0.0  ;;  %v106_v42 = vmul.f32 %v74_v34, %v74_v34 }
  0x18   : > { %v154_v43 = vsel %vm128_vm0, %v102_v32, 0.0  ;;  %v156_v46 = vsel %vm128_vm0, %v104_v38, 0.0 }
  0x19   : > { %v114_v0 = vadd.f32 %v113_v57, %v91_v49  ;;  %v143_v17 = vadd.f32 %v142_v6, %v141_v10  ;;  %v158_v49 = vsel %vm128_vm0, %v106_v42, 0.0 }
  0x1b   : > { %v115_v9 = vadd.f32 %v114_v0, %v93_v56  ;;  %v145_v24 = vadd.f32 %v144_v13, %v143_v17 }
  0x1d   : > { %v116_v16 = vadd.f32 %v115_v9, %v95_v63  ;;  %v147_v31 = vadd.f32 %v146_v20, %v145_v24 }
  0x1f   : > { %v117_v23 = vadd.f32 %v116_v16, %v97_v8  ;;  %v149_v37 = vadd.f32 %v148_v27, %v147_v31 }
  0x21   : > { %v118_v30 = vadd.f32 %v117_v23, %v99_v15  ;;  %v151_v41 = vadd.f32 %v150_v33, %v149_v37 }
  0x23   : > { %v119_v36 = vadd.f32 %v118_v30, %v101_v22  ;;  %v153_v45 = vadd.f32 %v152_v39, %v151_v41 }
  0x25   : > { %v120_v40 = vadd.f32 %v119_v36, %v103_v29  ;;  %v155_v48 = vadd.f32 %v154_v43, %v153_v45 }
  0x27   : > { %v121_v44 = vadd.f32 %v120_v40, %v105_v35  ;;  %v157_v51 = vadd.f32 %v156_v46, %v155_v48 }
  0x29   : > { %v122_v47 = vrot.slane %v121_v44, 4  ;;  %v159_v53 = vadd.f32 %v158_v49, %v157_v51 }
  0x2b   : > { %v123_v50 = vadd.f32 %v122_v47, %v121_v44  ;;  %v160_v55 = vrot.slane %v159_v53, 4 }
  0x2d   : > { %v124_v52 = vrot.slane %v123_v50, 2  ;;  %v161_v57 = vadd.f32 %v160_v55, %v159_v53 }
  0x2f   : > { %v125_v54 = vadd.f32 %v124_v52, %v123_v50  ;;  %v162_v59 = vrot.slane %v161_v57, 2 }
  0x31   : > { %v126_v56 = vrot.slane %v125_v54, 1  ;;  %v163_v60 = vadd.f32 %v162_v59, %v161_v57 }
  0x33   : > { %v127_v58 = vadd.f32 %v126_v56, %v125_v54  ;;  %v164_v62 = vrot.slane %v163_v60, 1 }
  0x35   : > { %v166_v61 = vadd.f32 %v4742_v2, %v127_v58   ;;  %v165_v63 = vadd.f32 %v164_v62, %v163_v60  ;;  %33 = sbr.rel (!%p31_p0) target bundleno = 4 (0x4), region = 84 }
  0x37   : > { %v167_v0 = vadd.f32 %v4738_v1, %v165_v63   ;;  %v8056_v2 = vmov %v166_v61  ;;  %4655 = vrsqrt.f32 (%p31_p0), %v166_v61  ;;  %vm175_vm1 = vcmp.eq.f32.partialorder (%p31_p0), %v166_v61, inf }
  0x38   :  { %v178_v13 = vand.u32 (%p31_p0), 2147483648, %v166_v61  ;;  %vm177_vm2 = vcmp.eq.f32.partialorder (%p31_p0), %v166_v61, 0.0 }
  0x39   : > { %v8055_v1 = vmov %v167_v0  ;;  %4657 = vrsqrt.f32 (%p31_p0), %v167_v0  ;;  %vm187_vm3 = vcmp.eq.f32.partialorder (%p31_p0), %v167_v0, inf  ;;  %v190_v16 = vand.u32 (%p31_p0), 2147483648, %v167_v0 }
  0x3a   :  { %vm189_vm4 = vcmp.eq.f32.partialorder %v167_v0, 0.0 }
  0x3d   :  { %v4656_v3 = vpop.eup %4655 }
  0x3e   :  { %v169_v5 = vmul.f32 %v4656_v3, %v166_v61 }
  0x3f   :  { %v4658_v4 = vpop.eup %4657 }
  0x40   :  { %v181_v2 = vmul.f32 %v4658_v4, %v167_v0  ;;  %v170_v6 = vmul.f32 %v4656_v3, %v169_v5 }
  0x42   :  { %v182_v7 = vmul.f32 %v4658_v4, %v181_v2  ;;  %v171_v8 = vmul.f32 0.5, %v170_v6 }
  0x44   :  { %v183_v9 = vmul.f32 0.5, %v182_v7  ;;  %v172_v10 = vsub.f32 1.5, %v171_v8 }
  0x46   :  { %v184_v11 = vsub.f32 1.5, %v183_v9  ;;  %v173_v12 = vmul.f32 %v4656_v3, %v172_v10 }
  0x48   :  { %v185_v14 = vmul.f32 %v4658_v4, %v184_v11  ;;  %v174_v15 = vmul.f32 %v173_v12, %v166_v61 }
  0x4a   :  { %v186_v1 = vmul.f32 %v185_v14, %v167_v0  ;;  %v176_v17 = vsel %vm175_vm1, %v166_v61, %v174_v15 }
  0x4b   :  { %v179_v18 = vsel %vm177_vm2, %v178_v13, %v176_v17 }
  0x4c   :  { %v188_v19 = vsel %vm187_vm3, %v167_v0, %v186_v1  ;;  %v192_v21 = vadd.f32 1e-08, %v179_v18 }
  0x4d   :  { %v191_v20 = vsel %vm189_vm4, %v190_v16, %v188_v19 }
  0x4e   :  { %v193_v22 = vadd.f32 1e-08, %v191_v20  ;;  %4659 = vrcp.f32 %v192_v21  ;;  %vm199_vm5 = vweird.f32 %v192_v21  ;;  %v205_v26 = vand.u32 2147483648, %v192_v21 }
  0x4f   :  { %v203_v29 = vand.u32 2147483647, %v192_v21 }
  0x50   :  { %4661 = vrcp.f32 %v193_v22  ;;  %v219_v30 = vand.u32 2147483648, %v193_v22  ;;  %vm213_vm7 = vweird.f32 %v193_v22  ;;  %v217_v32 = vand.u32 2147483647, %v193_v22 }
  0x51   :  { %v206_v34 = vor.u32 1.1754944e-38, %v205_v26  ;;  %vm204_vm10 = vcmp.eq.f32.partialorder %v203_v29, 8.507059e+37 }
  0x52   :  { %v220_v37 = vor.u32 1.1754944e-38, %v219_v30  ;;  %vm218_vm12 = vcmp.eq.f32.partialorder %v217_v32, 8.507059e+37 }
  0x54   :  { %v4660_v23 = vpop.eup %4659 }
  0x55   :  { %v195_v25 = vmul.f32 %v4660_v23, %v192_v21  ;;  %vm200_vm6 = vweird.f32 %v4660_v23 }
  0x56   :  { %v4662_v24 = vpop.eup %4661  ;;  %vm201_vm9 = vmor %vm199_vm5, %vm200_vm6 }
  0x57   :  { %v209_v27 = vmul.f32 %v4662_v24, %v193_v22  ;;  %v196_v28 = vsub.f32 1.0, %v195_v25  ;;  %vm214_vm8 = vweird.f32 %v4662_v24 }
  0x58   :  { %vm215_vm11 = vmor %vm213_vm7, %vm214_vm8 }
  0x59   :  { %v210_v31 = vsub.f32 1.0, %v209_v27  ;;  %v197_v33 = vmul.f32 %v4660_v23, %v196_v28 }
  0x5b   :  { %v211_v35 = vmul.f32 %v4662_v24, %v210_v31  ;;  %v198_v36 = vadd.f32 %v4660_v23, %v197_v33 }
  0x5d   :  { %v212_v38 = vadd.f32 %v4662_v24, %v211_v35  ;;  %v202_v39 = vsel %vm201_vm9, %v4660_v23, %v198_v36 }
  0x5e   :  { %v4891_v40 = vsel %vm204_vm10, %v206_v34, %v202_v39 }
  0x5f   :  { %v216_v41 = vsel %vm215_vm11, %v4662_v24, %v212_v38 }
  0x60   :  { %v4893_v42 = vsel %vm218_vm12, %v220_v37, %v216_v41 }
  0x61 LB: > { %s4430_s10 = sshll.u32 %s4750_s9, 7  ;;  %vm364_vm13 = vcmask 7168   ;;  %s227_s9 = sadd.s32 1, %s4750_s9   ;;  %s4750_s9 = sphi %s4895_s9, %s227_s9  }
  0x62   : > { %s229_s11 = sshra.s32 %s4430_s10, 3  ;;  %s5110_s16 = scalar_lea.vmem [#allocation2], %s4430_s10 }
  0x63   : > { %s4538_s12 = sshll.u32 %s229_s11, 4  ;;  %p224_p1 = scmp.ge.s32.totalorder %s227_s9, 16  }
  0x64   : > { %s4906_s15 = scalar_lea.vmem %s8047_s0, %s4538_s12  ;;  %s5183_s17 = smov (%p224_p1), 0  }
  0x65   : > { %v238_v43 = vld [vmem:[%s4906_s15 + $0x20] sm:$0xff]  ;;  %v239_v44 = vld [vmem:[%s4906_s15 + $0x28] sm:$0xff]  ;;  %v241_v55 = vld [vmem:[%s4906_s15 + $0x38] sm:$0xff] }
  0x66   : > { %v234_v45 = vld [vmem:[%s4906_s15] sm:$0xff]  ;;  %v4912_v46 = vmul.f32 %v238_v43, %v4891_v40  ;;  %v4915_v47 = vmul.f32 %v239_v44, %v4893_v42  ;;  %v235_v48 = vld [vmem:[%s4906_s15 + $0x8] sm:$0xff]  ;;  %v240_v57 = vld [vmem:[%s4906_s15 + $0x30] sm:$0xff]  ;;  %v4937_v58 = vmul.f32 %v241_v55, %v4893_v42 }
  0x67   : > { %v4919_v49 = vmul.f32 %v234_v45, %v4891_v40  ;;  %v242_v50 = vld [vmem:[%s4906_s15 + $0x40] sm:$0xff]  ;;  %v243_v51 = vld [vmem:[%s4906_s15 + $0x48] sm:$0xff]  ;;  %v4924_v52 = vmul.f32 %v235_v48, %v4893_v42  ;;  %v237_v59 = vld [vmem:[%s4906_s15 + $0x18] sm:$0xff]  ;;  %v4954_v6 = vmul.f32 %v240_v57, %v4891_v40 }
  0x68   : > { %v4927_v53 = vmul.f32 %v242_v50, %v4891_v40  ;;  %v4930_v54 = vmul.f32 %v243_v51, %v4893_v42  ;;  %v307_v56 = vsel %vm128_vm0, %v4915_v47, -inf  ;;  %v245_v60 = vld [vmem:[%s4906_s15 + $0x58] sm:$0xff]  ;;  %v236_v0 = vld [vmem:[%s4906_s15 + $0x10] sm:$0xff]  ;;  %v4948_v3 = vmul.f32 %v237_v59, %v4893_v42  ;;  %v247_v14 = vld [vmem:[%s4906_s15 + $0x68] sm:$0xff] }
  0x69   : > { %v308_v61 = vmax.f32 %v4912_v46, %v307_v56  ;;  %v299_v62 = vsel %vm128_vm0, %v4924_v52, -inf  ;;  %v244_v4 = vld [vmem:[%s4906_s15 + $0x50] sm:$0xff]  ;;  %v4957_v7 = vmul.f32 %v245_v60, %v4893_v42  ;;  %v311_v8 = vsel %vm128_vm0, %v4937_v58, -inf  ;;  %v249_v13 = vld [vmem:[%s4906_s15 + $0x78] sm:$0xff]  ;;  %v251_v15 = vld [vmem:[%s4906_s15 + $0x88] sm:$0xff] }
  0x6a   : > { %v315_v63 = vsel %vm128_vm0, %v4930_v54, -inf  ;;  %v300_v5 = vmax.f32 %v4919_v49, %v299_v62  ;;  %v4962_v9 = vmul.f32 %v236_v0, %v4891_v40  ;;  %v4965_v10 = vmul.f32 %v244_v4, %v4891_v40  ;;  %v248_v18 = vld [vmem:[%s4906_s15 + $0x70] sm:$0xff]  ;;  %v246_v20 = vld [vmem:[%s4906_s15 + $0x60] sm:$0xff]  ;;  %v255_v30 = vld [vmem:[%s4906_s15 + $0xa8] sm:$0xff] }
  0x6b   : > { %v316_v2 = vmax.f32 %v4927_v53, %v315_v63  ;;  %309 = vmax.xlane.f32.xlu1 %v308_v61  ;;  %v303_v11 = vsel %vm128_vm0, %v4948_v3, -inf  ;;  %v319_v12 = vsel %vm128_vm0, %v4957_v7, -inf  ;;  %v312_v16 = vmax.f32 %v4954_v6, %v311_v8  ;;  %v250_v22 = vld [vmem:[%s4906_s15 + $0x80] sm:$0xff]  ;;  %v253_v31 = vld [vmem:[%s4906_s15 + $0x98] sm:$0xff]  ;;  %v252_v38 = vld [vmem:[%s4906_s15 + $0x90] sm:$0xff] }
  0x6c   : > { %301 = vmax.xlane.f32.xlu0 %v300_v5  ;;  %v304_v1 = vmax.f32 %v4962_v9, %v303_v11  ;;  %v320_v17 = vmax.f32 %v4965_v10, %v319_v12  ;;  %v4979_v19 = vmul.f32 %v249_v13, %v4893_v42  ;;  %v4983_v21 = vmul.f32 %v247_v14, %v4893_v42  ;;  %v257_v32 = vld [vmem:[%s4906_s15 + $0xb8] sm:$0xff]  ;;  %v254_v36 = vld [vmem:[%s4906_s15 + $0xa0] sm:$0xff]  ;;  %v256_v41 = vld [vmem:[%s4906_s15 + $0xb0] sm:$0xff] }
  0x6d   : > { %317 = vmax.xlane.f32.xlu2 %v316_v2  ;;  %v4987_v23 = vmul.f32 %v251_v15, %v4893_v42  ;;  %v4990_v24 = vmul.f32 %v248_v18, %v4891_v40  ;;  %v4995_v26 = vmul.f32 %v246_v20, %v4891_v40  ;;  %v4998_v27 = vmul.f32 %v250_v22, %v4891_v40  ;;  %v261_v56 = vld [vmem:[%s4906_s15 + $0xd8] sm:$0xff]  ;;  %v259_v57 = vld [vmem:[%s4906_s15 + $0xc8] sm:$0xff]  ;;  %v260_v63 = vld [vmem:[%s4906_s15 + $0xd0] sm:$0xff] }
  0x6e   : > { %v327_v25 = vsel %vm128_vm0, %v4979_v19, -inf  ;;  %v323_v28 = vsel %vm128_vm0, %v4983_v21, -inf  ;;  %v5012_v37 = vmul.f32 %v255_v30, %v4893_v42  ;;  %v5016_v39 = vmul.f32 %v253_v31, %v4893_v42  ;;  %v263_v59 = vld [vmem:[%s4906_s15 + $0xe8] sm:$0xff]  ;;  %v258_v4 = vld [vmem:[%s4906_s15 + $0xc0] sm:$0xff]  ;;  %v264_v22 = vld [vmem:[%s4906_s15 + $0xf0] sm:$0xff] }
  0x6f   : > { %v331_v29 = vsel %vm128_vm0, %v4987_v23, -inf  ;;  %v328_v33 = vmax.f32 %v4990_v24, %v327_v25  ;;  %v324_v34 = vmax.f32 %v4995_v26, %v323_v28  ;;  %v5020_v43 = vmul.f32 %v257_v32, %v4893_v42  ;;  %v262_v2 = vld [vmem:[%s4906_s15 + $0xe0] sm:$0xff] }
  0x70   : > { %v332_v35 = vmax.f32 %v4998_v27, %v331_v29  ;;  %v5023_v44 = vmul.f32 %v254_v36, %v4891_v40  ;;  %v339_v45 = vsel %vm128_vm0, %v5012_v37, -inf  ;;  %v5028_v48 = vmul.f32 %v252_v38, %v4891_v40 }
  0x71   : > { %v5031_v50 = vmul.f32 %v256_v41, %v4891_v40  ;;  %v335_v51 = vsel %vm128_vm0, %v5016_v39, -inf  ;;  %v343_v55 = vsel %vm128_vm0, %v5020_v43, -inf  ;;  %v293_v0 = vmul.f32 %v261_v56, %v4893_v42 }
  0x72   : > { %v340_v60 = vmax.f32 %v5023_v44, %v339_v45  ;;  %v336_v61 = vmax.f32 %v5028_v48, %v335_v51  ;;  %v291_v5 = vmul.f32 %v259_v57, %v4893_v42  ;;  %v5049_v8 = vmul.f32 %v263_v59, %v4893_v42 }
  0x73   : > { %313 = vmax.xlane.f32.xlu1 %v312_v16  ;;  %v344_v62 = vmax.f32 %v5031_v50, %v343_v55  ;;  %v292_v11 = vmul.f32 %v260_v63, %v4891_v40  ;;  %v351_v12 = vsel %vm128_vm0, %v293_v0, -inf  ;;  %v290_v13 = vmul.f32 %v258_v4, %v4891_v40 }
  0x74   : > { %305 = vmax.xlane.f32.xlu0 %v304_v1  ;;  %v5055_v14 = vmul.f32 %v262_v2, %v4891_v40  ;;  %v347_v15 = vsel %vm128_vm0, %v291_v5, -inf  ;;  %v355_v16 = vsel %vm128_vm0, %v5049_v8, -inf  ;;  %v265_v1 = vld [vmem:[%s4906_s15 + $0xf8] sm:$0xff]  ;;  %v381_v28 = vsel %vm128_vm0, %v4924_v52, inf }
  0x75   : > { %321 = vmax.xlane.f32.xlu2 %v320_v17  ;;  %v352_v17 = vmax.f32 %v292_v11, %v351_v12  ;;  %v348_v18 = vmax.f32 %v290_v13, %v347_v15  ;;  %v297_v25 = vmul.f32 %v265_v1, %v4893_v42  ;;  %v296_v29 = vmul.f32 %v264_v22, %v4891_v40 }
  0x76   : > { %v356_v20 = vmax.f32 %v5055_v14, %v355_v16  ;;  %v385_v31 = vsel %vm128_vm0, %v4948_v3, inf  ;;  %v382_v32 = vmin.f32 %v4919_v49, %v381_v28  ;;  %v389_v52 = vsel %vm128_vm0, %v4915_v47, inf }
  0x77   : > { %v359_v30 = vsel %vm128_vm0, %v297_v25, -inf  ;;  %v397_v36 = vsel %vm128_vm0, %v4930_v54, inf  ;;  %v390_v3 = vmin.f32 %v4912_v46, %v389_v52  ;;  %v409_v47 = vsel %vm128_vm0, %v4979_v19, inf }
  0x78   : > { %v398_v49 = vmin.f32 %v4927_v53, %v397_v36  ;;  %v410_v46 = vmin.f32 %v4990_v24, %v409_v47  ;;  %v417_v53 = vsel %vm128_vm0, %v5016_v39, inf  ;;  %v429_v24 = vsel %vm128_vm0, %v291_v5, inf }
  0x79   : > { %v418_v19 = vmin.f32 %v5028_v48, %v417_v53  ;;  %v425_v39 = vsel %vm128_vm0, %v5020_v43, inf  ;;  %v430_v41 = vmin.f32 %v290_v13, %v429_v24 }
  0x7b   : > { %329 = vmax.xlane.f32.xlu1 %v328_v33  ;;  %v360_v33 = vmax.f32 %v296_v29, %v359_v30 }
  0x7c   : > { %325 = vmax.xlane.f32.xlu0 %v324_v34  ;;  %v386_v34 = vmin.f32 %v4962_v9, %v385_v31  ;;  %v405_v9 = vsel %vm128_vm0, %v4983_v21, inf  ;;  %v413_v21 = vsel %vm128_vm0, %v4987_v23, inf  ;;  %v433_v23 = vsel %vm128_vm0, %v293_v0, inf }
  0x7d   : > { %333 = vmax.xlane.f32.xlu2 %v332_v35  ;;  %v393_v35 = vsel %vm128_vm0, %v4937_v58, inf  ;;  %v401_v58 = vsel %vm128_vm0, %v4957_v7, inf  ;;  %v406_v54 = vmin.f32 %v4995_v26, %v405_v9  ;;  %v421_v7 = vsel %vm128_vm0, %v5012_v37, inf }
  0x7e   : > { %v394_v38 = vmin.f32 %v4954_v6, %v393_v35  ;;  %v402_v6 = vmin.f32 %v4965_v10, %v401_v58  ;;  %v414_v26 = vmin.f32 %v4998_v27, %v413_v21  ;;  %v422_v10 = vmin.f32 %v5023_v44, %v421_v7 }
  0x7f   : > { %v426_v37 = vmin.f32 %v5031_v50, %v425_v39  ;;  %v434_v45 = vmin.f32 %v292_v11, %v433_v23  ;;  %v441_v27 = vsel %vm128_vm0, %v297_v25, inf  ;;  %v437_v44 = vsel %vm128_vm0, %v5049_v8, inf }
  0x80   : > { %v442_v48 = vmin.f32 %v296_v29, %v441_v27  ;;  %v438_v51 = vmin.f32 %v5055_v14, %v437_v44 }
  0x83   : > { %341 = vmax.xlane.f32.xlu1 %v340_v60 }
  0x84   : > { %337 = vmax.xlane.f32.xlu0 %v336_v61 }
  0x85   : > { %345 = vmax.xlane.f32.xlu2 %v344_v62 }
  0x8b   : > { %353 = vmax.xlane.f32.xlu1 %v352_v17 }
  0x8c   : > { %349 = vmax.xlane.f32.xlu0 %v348_v18 }
  0x8d   : > { %357 = vmax.xlane.f32.xlu2 %v356_v20 }
  0x93   : > { %383 = vmin.xlane.f32.xlu1 %v382_v32 }
  0x94   : > { %361 = vmax.xlane.f32.xlu0 %v360_v33  ;;  %v5179_v33 = vmov (%p224_p1), 0.0  }
  0x95   : > { %387 = vmin.xlane.f32.xlu2 %v386_v34  ;;  %v5181_v34 = vmov (%p224_p1), 0.0  }
  0x9b   : > { %395 = vmin.xlane.f32.xlu1 %v394_v38 }
  0x9c   : > { %391 = vmin.xlane.f32.xlu0 %v390_v3 }
  0x9d   : > { %399 = vmin.xlane.f32.xlu2 %v398_v49 }
  0xa3   : > { %407 = vmin.xlane.f32.xlu1 %v406_v54 }
  0xa4   : > { %403 = vmin.xlane.f32.xlu0 %v402_v6 }
  0xa5   : > { %411 = vmin.xlane.f32.xlu2 %v410_v46 }
  0xab   : > { %419 = vmin.xlane.f32.xlu1 %v418_v19 }
  0xac   : > { %415 = vmin.xlane.f32.xlu0 %v414_v26 }
  0xad   : > { %423 = vmin.xlane.f32.xlu2 %v422_v10 }
  0xb3   : > { %431 = vmin.xlane.f32.xlu1 %v430_v41 }
  0xb4   : > { %427 = vmin.xlane.f32.xlu0 %v426_v37 }
  0xb5   : > { %435 = vmin.xlane.f32.xlu2 %v434_v45 }
  0xbb   : > { %443 = vmin.xlane.f32.xlu1 %v442_v48 }
  0xbc   : > { %439 = vmin.xlane.f32.xlu0 %v438_v51 }
  0xde   : > { %v310_v43 = vpop.xlane.xlu1 %309 }
  0xdf   : > { %367 = vst.msk [vmem:[%s5110_s16 + $0x10] sm:$0xff] %vm364_vm13, %v310_v43  ;;  %v302_v50 = vpop.xlane.xlu0 %301 }
  0xe0   : > { %v318_v55 = vpop.xlane.xlu2 %317  ;;  %365 = vst.msk [vmem:[%s5110_s16] sm:$0xff] %vm364_vm13, %v302_v50 }
  0xe1   : > { %369 = vst.msk [vmem:[%s5110_s16 + $0x20] sm:$0xff] %vm364_vm13, %v318_v55 }
  0xe6   : > { %v314_v56 = vpop.xlane.xlu1 %313 }
  0xe7   : > { %368 = vst.msk [vmem:[%s5110_s16 + $0x18] sm:$0xff] %vm364_vm13, %v314_v56  ;;  %v306_v57 = vpop.xlane.xlu0 %305 }
  0xe8   : > { %v322_v59 = vpop.xlane.xlu2 %321  ;;  %366 = vst.msk [vmem:[%s5110_s16 + $0x8] sm:$0xff] %vm364_vm13, %v306_v57 }
  0xe9   : > { %370 = vst.msk [vmem:[%s5110_s16 + $0x28] sm:$0xff] %vm364_vm13, %v322_v59 }
  0xee   : > { %v330_v60 = vpop.xlane.xlu1 %329 }
  0xef   : > { %372 = vst.msk [vmem:[%s5110_s16 + $0x38] sm:$0xff] %vm364_vm13, %v330_v60  ;;  %v326_v61 = vpop.xlane.xlu0 %325 }
  0xf0   : > { %v334_v62 = vpop.xlane.xlu2 %333  ;;  %371 = vst.msk [vmem:[%s5110_s16 + $0x30] sm:$0xff] %vm364_vm13, %v326_v61 }
  0xf1   : > { %373 = vst.msk [vmem:[%s5110_s16 + $0x40] sm:$0xff] %vm364_vm13, %v334_v62 }
  0xf6   : > { %v342_v63 = vpop.xlane.xlu1 %341 }
  0xf7   : > { %375 = vst.msk [vmem:[%s5110_s16 + $0x50] sm:$0xff] %vm364_vm13, %v342_v63  ;;  %v338_v0 = vpop.xlane.xlu0 %337 }
  0xf8   : > { %v346_v4 = vpop.xlane.xlu2 %345  ;;  %374 = vst.msk [vmem:[%s5110_s16 + $0x48] sm:$0xff] %vm364_vm13, %v338_v0 }
  0xf9   : > { %376 = vst.msk [vmem:[%s5110_s16 + $0x58] sm:$0xff] %vm364_vm13, %v346_v4 }
  0xfe   : > { %v354_v5 = vpop.xlane.xlu1 %353 }
  0xff   : > { %378 = vst.msk [vmem:[%s5110_s16 + $0x68] sm:$0xff] %vm364_vm13, %v354_v5  ;;  %v350_v2 = vpop.xlane.xlu0 %349 }
 0x100   : > { %v358_v8 = vpop.xlane.xlu2 %357  ;;  %377 = vst.msk [vmem:[%s5110_s16 + $0x60] sm:$0xff] %vm364_vm13, %v350_v2 }
 0x101   : > { %379 = vst.msk [vmem:[%s5110_s16 + $0x70] sm:$0xff] %vm364_vm13, %v358_v8 }
 0x106   : > { %v384_v11 = vpop.xlane.xlu1 %383 }
 0x107   : > { %4434 = vst.msk [vmem:[%s5110_s16 + $0x800] sm:$0xff] %vm364_vm13, %v384_v11  ;;  %v362_v12 = vpop.xlane.xlu0 %361 }
 0x108   : > { %v388_v13 = vpop.xlane.xlu2 %387  ;;  %380 = vst.msk [vmem:[%s5110_s16 + $0x78] sm:$0xff] %vm364_vm13, %v362_v12 }
 0x109   : > { %4435 = vst.msk [vmem:[%s5110_s16 + $0x808] sm:$0xff] %vm364_vm13, %v388_v13 }
 0x10e   : > { %v396_v14 = vpop.xlane.xlu1 %395 }
 0x10f   : > { %4437 = vst.msk [vmem:[%s5110_s16 + $0x818] sm:$0xff] %vm364_vm13, %v396_v14  ;;  %v392_v15 = vpop.xlane.xlu0 %391 }
 0x110   : > { %v400_v16 = vpop.xlane.xlu2 %399  ;;  %4436 = vst.msk [vmem:[%s5110_s16 + $0x810] sm:$0xff] %vm364_vm13, %v392_v15 }
 0x111   : > { %4438 = vst.msk [vmem:[%s5110_s16 + $0x820] sm:$0xff] %vm364_vm13, %v400_v16 }
 0x116   : > { %v408_v1 = vpop.xlane.xlu1 %407 }
 0x117   : > { %4440 = vst.msk [vmem:[%s5110_s16 + $0x830] sm:$0xff] %vm364_vm13, %v408_v1  ;;  %v404_v17 = vpop.xlane.xlu0 %403 }
 0x118   : > { %v412_v18 = vpop.xlane.xlu2 %411  ;;  %4439 = vst.msk [vmem:[%s5110_s16 + $0x828] sm:$0xff] %vm364_vm13, %v404_v17 }
 0x119   : > { %4441 = vst.msk [vmem:[%s5110_s16 + $0x838] sm:$0xff] %vm364_vm13, %v412_v18 }
 0x11e   : > { %v420_v20 = vpop.xlane.xlu1 %419 }
 0x11f   : > { %4443 = vst.msk [vmem:[%s5110_s16 + $0x848] sm:$0xff] %vm364_vm13, %v420_v20  ;;  %v416_v22 = vpop.xlane.xlu0 %415 }
 0x120   : > { %v424_v25 = vpop.xlane.xlu2 %423  ;;  %4442 = vst.msk [vmem:[%s5110_s16 + $0x840] sm:$0xff] %vm364_vm13, %v416_v22 }
 0x121   : > { %4444 = vst.msk [vmem:[%s5110_s16 + $0x850] sm:$0xff] %vm364_vm13, %v424_v25 }
 0x126   : > { %v432_v28 = vpop.xlane.xlu1 %431 }
 0x127   : > { %4446 = vst.msk [vmem:[%s5110_s16 + $0x860] sm:$0xff] %vm364_vm13, %v432_v28  ;;  %v428_v29 = vpop.xlane.xlu0 %427 }
 0x128   : > { %v436_v30 = vpop.xlane.xlu2 %435  ;;  %4445 = vst.msk [vmem:[%s5110_s16 + $0x858] sm:$0xff] %vm364_vm13, %v428_v29 }
 0x129   : > { %4447 = vst.msk [vmem:[%s5110_s16 + $0x868] sm:$0xff] %vm364_vm13, %v436_v30 }
 0x12c   :  { %226 = sbr.rel (!%p224_p1) target bundleno = 97 (0x61), region = 95 }
 0x12e   : > { %v444_v31 = vpop.xlane.xlu1 %443 }
 0x12f   : > { %4449 = vst.msk [vmem:[%s5110_s16 + $0x878] sm:$0xff] %vm364_vm13, %v444_v31  ;;  %v440_v32 = vpop.xlane.xlu0 %439 }
 0x130   : > { %4448 = vst.msk [vmem:[%s5110_s16 + $0x870] sm:$0xff] %vm364_vm13, %v440_v32 }
 0x131 LB: > { %s4450_s18 = sshll.u32 %s4762_s17, 7  ;;  %s468_s17 = sadd.s32 1, %s4762_s17   ;;  %s4762_s17 = sphi %s5183_s17, %s468_s17   ;;  %v4758_v34 = vphi %v5181_v34, %v8058_v34   ;;  %v4754_v33 = vphi %v5179_v33, %v8057_v33  }
 0x132   : > { %s472_s19 = sshra.s32 %s4450_s18, 3  ;;  %p465_p2 = scmp.ge.s32.totalorder %s468_s17, 16  }
 0x133   : > { %s4539_s20 = sshll.u32 %s472_s19, 4  ;;  %s5261_s24 = smov (%p465_p2), 0  }
 0x134   : > { %s5198_s23 = scalar_lea.vmem %s8047_s0, %s4539_s20 }
 0x135   : > { %v4453_v40 = vld [vmem:[%s5198_s23 + $0x1000] sm:$0xff]  ;;  %v4454_v42 = vld [vmem:[%s5198_s23 + $0x1008] sm:$0xff]  ;;  %v4455_v35 = vld [vmem:[%s5198_s23 + $0x1010] sm:$0xff] }
 0x136   : > { %v4456_v52 = vld [vmem:[%s5198_s23 + $0x1018] sm:$0xff]  ;;  %v4457_v36 = vld [vmem:[%s5198_s23 + $0x1020] sm:$0xff]  ;;  %v510_v38 = vmul.f32 %v4453_v40, %v4453_v40  ;;  %v511_v3 = vmul.f32 %v4454_v42, %v4454_v42  ;;  %v512_v49 = vmul.f32 %v4455_v35, %v4455_v35  ;;  %v4459_v9 = vld [vmem:[%s5198_s23 + $0x1030] sm:$0xff] }
 0x137   : > { %v4461_v58 = vld [vmem:[%s5198_s23 + $0x1040] sm:$0xff]  ;;  %v513_v47 = vmul.f32 %v4456_v52, %v4456_v52  ;;  %v514_v54 = vmul.f32 %v4457_v36, %v4457_v36  ;;  %v4458_v6 = vld [vmem:[%s5198_s23 + $0x1028] sm:$0xff]  ;;  %v516_v46 = vmul.f32 %v4459_v9, %v4459_v9  ;;  %v4463_v21 = vld [vmem:[%s5198_s23 + $0x1050] sm:$0xff] }
 0x138   : > { %v542_v53 = vadd.f32 %v512_v49, %v510_v38  ;;  %v4460_v7 = vld [vmem:[%s5198_s23 + $0x1038] sm:$0xff]  ;;  %v4462_v19 = vld [vmem:[%s5198_s23 + $0x1048] sm:$0xff]  ;;  %v518_v26 = vmul.f32 %v4461_v58, %v4461_v58  ;;  %v564_v24 = vsel %vm128_vm0, %v511_v3, 0.0  ;;  %v4465_v39 = vld [vmem:[%s5198_s23 + $0x1060] sm:$0xff]  ;;  %v515_v23 = vmul.f32 %v4458_v6, %v4458_v6 }
 0x139   : > { %v565_v41 = vsel %vm128_vm0, %v513_v47, 0.0  ;;  %v4464_v37 = vld [vmem:[%s5198_s23 + $0x1058] sm:$0xff]  ;;  %v520_v45 = vmul.f32 %v4463_v21, %v4463_v21  ;;  %v4467_v44 = vld [vmem:[%s5198_s23 + $0x1070] sm:$0xff]  ;;  %v517_v48 = vmul.f32 %v4460_v7, %v4460_v7  ;;  %v519_v51 = vmul.f32 %v4462_v19, %v4462_v19  ;;  %v4466_v50 = vld [vmem:[%s5198_s23 + $0x1068] sm:$0xff] }
 0x13a   : > { %v543_v10 = vadd.f32 %v542_v53, %v514_v54  ;;  %v566_v43 = vadd.f32 %v565_v41, %v564_v24  ;;  %v522_v55 = vmul.f32 %v4465_v39, %v4465_v39  ;;  %v4469_v57 = vld [vmem:[%s5198_s23 + $0x1080] sm:$0xff]  ;;  %v521_v59 = vmul.f32 %v4464_v37, %v4464_v37  ;;  %v4468_v61 = vld [vmem:[%s5198_s23 + $0x1078] sm:$0xff]  ;;  %v4471_v4 = vld [vmem:[%s5198_s23 + $0x1090] sm:$0xff] }
 0x13b   : > { %v567_v60 = vsel %vm128_vm0, %v515_v23, 0.0  ;;  %v524_v62 = vmul.f32 %v4467_v44, %v4467_v44  ;;  %v523_v5 = vmul.f32 %v4466_v50, %v4466_v50  ;;  %v569_v2 = vsel %vm128_vm0, %v517_v48, 0.0  ;;  %v4470_v11 = vld [vmem:[%s5198_s23 + $0x1088] sm:$0xff]  ;;  %v4473_v15 = vld [vmem:[%s5198_s23 + $0x10a0] sm:$0xff]  ;;  %v4472_v17 = vld [vmem:[%s5198_s23 + $0x1098] sm:$0xff] }
 0x13c   : > { %v544_v27 = vadd.f32 %v543_v10, %v516_v46  ;;  %v568_v0 = vadd.f32 %v567_v60, %v566_v43  ;;  %v571_v8 = vsel %vm128_vm0, %v519_v51, 0.0  ;;  %v526_v12 = vmul.f32 %v4469_v57, %v4469_v57  ;;  %v4475_v25 = vld [vmem:[%s5198_s23 + $0x10b0] sm:$0xff]  ;;  %v4474_v30 = vld [vmem:[%s5198_s23 + $0x10a8] sm:$0xff]  ;;  %v4477_v42 = vld [vmem:[%s5198_s23 + $0x10c0] sm:$0xff] }
 0x13d   : > { %v525_v16 = vmul.f32 %v4468_v61, %v4468_v61  ;;  %v573_v1 = vsel %vm128_vm0, %v521_v59, 0.0  ;;  %v528_v18 = vmul.f32 %v4471_v4, %v4471_v4  ;;  %v527_v28 = vmul.f32 %v4470_v11, %v4470_v11  ;;  %v4476_v36 = vld [vmem:[%s5198_s23 + $0x10b8] sm:$0xff]  ;;  %v4479_v9 = vld [vmem:[%s5198_s23 + $0x10d0] sm:$0xff]  ;;  %v4478_v54 = vld [vmem:[%s5198_s23 + $0x10c8] sm:$0xff] }
 0x13e   : > { %v545_v56 = vadd.f32 %v544_v27, %v518_v26  ;;  %v570_v14 = vadd.f32 %v569_v2, %v568_v0  ;;  %v575_v29 = vsel %vm128_vm0, %v523_v5, 0.0  ;;  %v530_v31 = vmul.f32 %v4473_v15, %v4473_v15  ;;  %v4481_v21 = vld [vmem:[%s5198_s23 + $0x10e0] sm:$0xff]  ;;  %v4480_v26 = vld [vmem:[%s5198_s23 + $0x10d8] sm:$0xff]  ;;  %v4483_v23 = vld [vmem:[%s5198_s23 + $0x10f0] sm:$0xff] }
 0x13f   : > { %v529_v35 = vmul.f32 %v4472_v17, %v4472_v17  ;;  %v577_v52 = vsel %vm128_vm0, %v525_v16, 0.0  ;;  %v532_v38 = vmul.f32 %v4475_v25, %v4475_v25  ;;  %v531_v58 = vmul.f32 %v4474_v30, %v4474_v30  ;;  %v4484_v50 = vld [vmem:[%s5198_s23 + $0x10f8] sm:$0xff] }
 0x140   : > { %v546_v63 = vadd.f32 %v545_v56, %v520_v45  ;;  %v572_v22 = vadd.f32 %v571_v8, %v570_v14  ;;  %v579_v47 = vsel %vm128_vm0, %v527_v28, 0.0  ;;  %v534_v6 = vmul.f32 %v4477_v42, %v4477_v42  ;;  %v4482_v45 = vld [vmem:[%s5198_s23 + $0x10e8] sm:$0xff] }
 0x141   : > { %v533_v7 = vmul.f32 %v4476_v36, %v4476_v36  ;;  %v581_v19 = vsel %vm128_vm0, %v529_v35, 0.0  ;;  %v536_v10 = vmul.f32 %v4479_v9, %v4479_v9  ;;  %v535_v41 = vmul.f32 %v4478_v54, %v4478_v54 }
 0x142   : > { %v547_v13 = vadd.f32 %v546_v63, %v522_v55  ;;  %v574_v40 = vadd.f32 %v573_v1, %v572_v22  ;;  %v583_v37 = vsel %vm128_vm0, %v531_v58, 0.0  ;;  %v538_v27 = vmul.f32 %v4481_v21, %v4481_v21 }
 0x143   : > { %v537_v51 = vmul.f32 %v4480_v26, %v4480_v26  ;;  %v585_v43 = vsel %vm128_vm0, %v533_v7, 0.0  ;;  %v540_v55 = vmul.f32 %v4483_v23, %v4483_v23  ;;  %v539_v59 = vmul.f32 %v4482_v45, %v4482_v45 }
 0x144   : > { %v548_v20 = vadd.f32 %v547_v13, %v524_v62  ;;  %v576_v49 = vadd.f32 %v575_v29, %v574_v40  ;;  %v587_v60 = vsel %vm128_vm0, %v535_v41, 0.0  ;;  %v541_v63 = vmul.f32 %v4484_v50, %v4484_v50 }
 0x145   : > { %v589_v0 = vsel %vm128_vm0, %v537_v51, 0.0  ;;  %v591_v2 = vsel %vm128_vm0, %v539_v59, 0.0 }
 0x146   : > { %v549_v32 = vadd.f32 %v548_v20, %v526_v12  ;;  %v578_v53 = vadd.f32 %v577_v52, %v576_v49  ;;  %v593_v12 = vsel %vm128_vm0, %v541_v63, 0.0 }
 0x148   : > { %v550_v3 = vadd.f32 %v549_v32, %v528_v18  ;;  %v580_v39 = vadd.f32 %v579_v47, %v578_v53 }
 0x14a   : > { %v551_v46 = vadd.f32 %v550_v3, %v530_v31  ;;  %v582_v48 = vadd.f32 %v581_v19, %v580_v39 }
 0x14c   : > { %v552_v24 = vadd.f32 %v551_v46, %v532_v38  ;;  %v584_v57 = vadd.f32 %v583_v37, %v582_v48 }
 0x14e   : > { %v553_v44 = vadd.f32 %v552_v24, %v534_v6  ;;  %v586_v62 = vadd.f32 %v585_v43, %v584_v57 }
 0x150   : > { %v554_v56 = vadd.f32 %v553_v44, %v536_v10  ;;  %v588_v5 = vadd.f32 %v587_v60, %v586_v62 }
 0x152   : > { %v555_v61 = vadd.f32 %v554_v56, %v538_v27  ;;  %v590_v11 = vadd.f32 %v589_v0, %v588_v5 }
 0x154   : > { %v556_v4 = vadd.f32 %v555_v61, %v540_v55  ;;  %v592_v14 = vadd.f32 %v591_v2, %v590_v11 }
 0x156   : > { %v557_v8 = vrot.slane %v556_v4, 4  ;;  %v594_v16 = vadd.f32 %v593_v12, %v592_v14 }
 0x158   : > { %v558_v13 = vadd.f32 %v557_v8, %v556_v4  ;;  %v595_v17 = vrot.slane %v594_v16, 4 }
 0x15a   : > { %v559_v15 = vrot.slane %v558_v13, 2  ;;  %v596_v20 = vadd.f32 %v595_v17, %v594_v16 }
 0x15c   : > { %v560_v1 = vadd.f32 %v559_v15, %v558_v13  ;;  %v597_v25 = vrot.slane %v596_v20, 2 }
 0x15e   : > { %v561_v18 = vrot.slane %v560_v1, 1  ;;  %v598_v28 = vadd.f32 %v597_v25, %v596_v20 }
 0x160   : > { %v562_v22 = vadd.f32 %v561_v18, %v560_v1  ;;  %v599_v30 = vrot.slane %v598_v28, 1 }
 0x162   : > { %v601_v29 = vadd.f32 %v4758_v34, %v562_v22   ;;  %v600_v31 = vadd.f32 %v599_v30, %v598_v28  ;;  %467 = sbr.rel (!%p465_p2) target bundleno = 305 (0x131), region = 106 }
 0x164   : > { %v602_v32 = vadd.f32 %v4754_v33, %v600_v31   ;;  %v8058_v34 = vmov %v601_v29  ;;  %4663 = vrsqrt.f32 (%p465_p2), %v601_v29  ;;  %vm610_vm14 = vcmp.eq.f32.partialorder (%p465_p2), %v601_v29, inf }
 0x165   :  { %v613_v47 = vand.u32 (%p465_p2), 2147483648, %v601_v29  ;;  %vm612_vm15 = vcmp.eq.f32.partialorder (%p465_p2), %v601_v29, 0.0 }
 0x166   : > { %v8057_v33 = vmov %v602_v32  ;;  %4665 = vrsqrt.f32 (%p465_p2), %v602_v32  ;;  %vm622_vm1 = vcmp.eq.f32.partialorder (%p465_p2), %v602_v32, inf  ;;  %v625_v46 = vand.u32 (%p465_p2), 2147483648, %v602_v32 }
 0x167   :  { %vm624_vm2 = vcmp.eq.f32.partialorder %v602_v32, 0.0 }
 0x16a   :  { %v4664_v40 = vpop.eup %4663 }
 0x16b   :  { %v604_v35 = vmul.f32 %v4664_v40, %v601_v29 }
 0x16c   :  { %v4666_v42 = vpop.eup %4665 }
 0x16d   :  { %v616_v34 = vmul.f32 %v4666_v42, %v602_v32  ;;  %v605_v52 = vmul.f32 %v4664_v40, %v604_v35 }
 0x16f   :  { %v617_v36 = vmul.f32 %v4666_v42, %v616_v34  ;;  %v606_v38 = vmul.f32 0.5, %v605_v52 }
 0x171   :  { %v618_v3 = vmul.f32 0.5, %v617_v36  ;;  %v607_v49 = vsub.f32 1.5, %v606_v38 }
 0x173   :  { %v619_v9 = vsub.f32 1.5, %v618_v3  ;;  %v608_v58 = vmul.f32 %v4664_v40, %v607_v49 }
 0x175   :  { %v620_v54 = vmul.f32 %v4666_v42, %v619_v9  ;;  %v609_v6 = vmul.f32 %v608_v58, %v601_v29 }
 0x177   :  { %v621_v33 = vmul.f32 %v620_v54, %v602_v32  ;;  %v611_v53 = vsel %vm610_vm14, %v601_v29, %v609_v6 }
 0x178   :  { %v614_v21 = vsel %vm612_vm15, %v613_v47, %v611_v53 }
 0x179   :  { %v623_v7 = vsel %vm622_vm1, %v602_v32, %v621_v33  ;;  %v627_v26 = vadd.f32 1e-08, %v614_v21 }
 0x17a   :  { %v626_v19 = vsel %vm624_vm2, %v625_v46, %v623_v7 }
 0x17b   :  { %v628_v10 = vadd.f32 1e-08, %v626_v19  ;;  %4667 = vrcp.f32 %v627_v26  ;;  %vm634_vm3 = vweird.f32 %v627_v26  ;;  %v640_v41 = vand.u32 2147483648, %v627_v26 }
 0x17c   :  { %v638_v27 = vand.u32 2147483647, %v627_v26 }
 0x17d   :  { %4669 = vrcp.f32 %v628_v10  ;;  %v654_v44 = vand.u32 2147483648, %v628_v10  ;;  %vm648_vm5 = vweird.f32 %v628_v10  ;;  %v652_v51 = vand.u32 2147483647, %v628_v10 }
 0x17e   :  { %v641_v50 = vor.u32 1.1754944e-38, %v640_v41  ;;  %vm639_vm8 = vcmp.eq.f32.partialorder %v638_v27, 8.507059e+37 }
 0x17f   :  { %v655_v57 = vor.u32 1.1754944e-38, %v654_v44  ;;  %vm653_vm10 = vcmp.eq.f32.partialorder %v652_v51, 8.507059e+37 }
 0x181   :  { %v4668_v24 = vpop.eup %4667 }
 0x182   :  { %v630_v23 = vmul.f32 %v4668_v24, %v627_v26  ;;  %vm635_vm4 = vweird.f32 %v4668_v24 }
 0x183   :  { %v4670_v39 = vpop.eup %4669  ;;  %vm636_vm7 = vmor %vm634_vm3, %vm635_vm4 }
 0x184   :  { %v644_v37 = vmul.f32 %v4670_v39, %v628_v10  ;;  %v631_v45 = vsub.f32 1.0, %v630_v23  ;;  %vm649_vm6 = vweird.f32 %v4670_v39 }
 0x185   :  { %vm650_vm9 = vmor %vm648_vm5, %vm649_vm6 }
 0x186   :  { %v645_v48 = vsub.f32 1.0, %v644_v37  ;;  %v632_v43 = vmul.f32 %v4668_v24, %v631_v45 }
 0x188   :  { %v646_v55 = vmul.f32 %v4670_v39, %v645_v48  ;;  %v633_v56 = vadd.f32 %v4668_v24, %v632_v43 }
 0x18a   :  { %v647_v59 = vadd.f32 %v4670_v39, %v646_v55  ;;  %v637_v60 = vsel %vm636_vm7, %v4668_v24, %v633_v56 }
 0x18b   :  { %v5257_v61 = vsel %vm639_vm8, %v641_v50, %v637_v60 }
 0x18c   :  { %v651_v62 = vsel %vm650_vm9, %v4670_v39, %v647_v59 }
 0x18d   :  { %v5259_v63 = vsel %vm653_vm10, %v655_v57, %v651_v62 }
 0x18e LB: > { %s4485_s25 = sshll.u32 %s4766_s24, 7  ;;  %vm800_vm11 = vcmask 15368   ;;  %s662_s24 = sadd.s32 1, %s4766_s24   ;;  %s4766_s24 = sphi %s5261_s24, %s662_s24  }
 0x18f   : > { %s664_s26 = sshra.s32 %s4485_s25, 3  ;;  %s5476_s30 = scalar_lea.vmem [#allocation2], %s4485_s25 }
 0x190   : > { %s4540_s6 = sshll.u32 %s664_s26, 4  ;;  %p659_p3 = scmp.ge.s32.totalorder %s662_s24, 16  }
 0x191   : > { %s5272_s29 = scalar_lea.vmem %s8047_s0, %s4540_s6  ;;  %s4364_s11 = sshll.u32 (%p659_p3), %s8054_s7, 4  ;;  %vm4355_vm14 = vcmask (%p659_p3), 8192   ;;  %s4365_s11 = int_to_ptr.hbm [resolvable:$true] %s4364_s11 }
 0x192   : > { %v4492_v0 = vld [vmem:[%s5272_s29 + $0x1020] sm:$0xff]  ;;  %v4493_v4 = vld [vmem:[%s5272_s29 + $0x1028] sm:$0xff]  ;;  %v4495_v17 = vld [vmem:[%s5272_s29 + $0x1038] sm:$0xff] }
 0x193   : > { %v4488_v5 = vld [vmem:[%s5272_s29 + $0x1000] sm:$0xff]  ;;  %v5278_v2 = vmul.f32 %v4492_v0, %v5257_v61  ;;  %v5281_v8 = vmul.f32 %v4493_v4, %v5259_v63  ;;  %v4489_v11 = vld [vmem:[%s5272_s29 + $0x1008] sm:$0xff]  ;;  %v4494_v20 = vld [vmem:[%s5272_s29 + $0x1030] sm:$0xff]  ;;  %v5303_v22 = vmul.f32 %v4495_v17, %v5259_v63 }
 0x194   : > { %v5285_v12 = vmul.f32 %v4488_v5, %v5257_v61  ;;  %v4496_v13 = vld [vmem:[%s5272_s29 + $0x1040] sm:$0xff]  ;;  %v4497_v14 = vld [vmem:[%s5272_s29 + $0x1048] sm:$0xff]  ;;  %v5290_v15 = vmul.f32 %v4489_v11, %v5259_v63  ;;  %v4491_v25 = vld [vmem:[%s5272_s29 + $0x1018] sm:$0xff]  ;;  %v5320_v52 = vmul.f32 %v4494_v20, %v5257_v61 }
 0x195   : > { %v5293_v16 = vmul.f32 %v4496_v13, %v5257_v61  ;;  %v5296_v1 = vmul.f32 %v4497_v14, %v5259_v63  ;;  %v743_v18 = vsel %vm128_vm0, %v5281_v8, -inf  ;;  %v4499_v28 = vld [vmem:[%s5272_s29 + $0x1058] sm:$0xff]  ;;  %v4490_v32 = vld [vmem:[%s5272_s29 + $0x1010] sm:$0xff]  ;;  %v5314_v40 = vmul.f32 %v4491_v25, %v5259_v63  ;;  %v4501_v54 = vld [vmem:[%s5272_s29 + $0x1068] sm:$0xff] }
 0x196   : > { %v744_v29 = vmax.f32 %v5278_v2, %v743_v18  ;;  %v735_v30 = vsel %vm128_vm0, %v5290_v15, -inf  ;;  %v4498_v42 = vld [vmem:[%s5272_s29 + $0x1050] sm:$0xff]  ;;  %v5323_v36 = vmul.f32 %v4499_v28, %v5259_v63  ;;  %v747_v38 = vsel %vm128_vm0, %v5303_v22, -inf  ;;  %v4503_v47 = vld [vmem:[%s5272_s29 + $0x1078] sm:$0xff]  ;;  %v4505_v6 = vld [vmem:[%s5272_s29 + $0x1088] sm:$0xff] }
 0x197   : > { %v751_v31 = vsel %vm128_vm0, %v5296_v1, -inf  ;;  %v736_v35 = vmax.f32 %v5285_v12, %v735_v30  ;;  %v5328_v3 = vmul.f32 %v4490_v32, %v5257_v61  ;;  %v5331_v49 = vmul.f32 %v4498_v42, %v5257_v61  ;;  %v4502_v21 = vld [vmem:[%s5272_s29 + $0x1070] sm:$0xff]  ;;  %v4500_v19 = vld [vmem:[%s5272_s29 + $0x1060] sm:$0xff]  ;;  %v4509_v44 = vld [vmem:[%s5272_s29 + $0x10a8] sm:$0xff] }
 0x198   : > { %v752_v34 = vmax.f32 %v5293_v16, %v751_v31  ;;  %745 = vmax.xlane.f32.xlu1 %v744_v29  ;;  %v739_v9 = vsel %vm128_vm0, %v5314_v40, -inf  ;;  %v755_v58 = vsel %vm128_vm0, %v5323_v36, -inf  ;;  %v748_v46 = vmax.f32 %v5320_v52, %v747_v38  ;;  %v4504_v10 = vld [vmem:[%s5272_s29 + $0x1080] sm:$0xff]  ;;  %v4507_v48 = vld [vmem:[%s5272_s29 + $0x1098] sm:$0xff]  ;;  %v4506_v59 = vld [vmem:[%s5272_s29 + $0x1090] sm:$0xff] }
 0x199   : > { %737 = vmax.xlane.f32.xlu0 %v736_v35  ;;  %v740_v33 = vmax.f32 %v5328_v3, %v739_v9  ;;  %v756_v53 = vmax.f32 %v5331_v49, %v755_v58  ;;  %v5345_v7 = vmul.f32 %v4503_v47, %v5259_v63  ;;  %v5349_v26 = vmul.f32 %v4501_v54, %v5259_v63  ;;  %v4511_v51 = vld [vmem:[%s5272_s29 + $0x10b8] sm:$0xff]  ;;  %v4508_v56 = vld [vmem:[%s5272_s29 + $0x10a0] sm:$0xff]  ;;  %v4510_v62 = vld [vmem:[%s5272_s29 + $0x10b0] sm:$0xff] }
 0x19a   : > { %753 = vmax.xlane.f32.xlu2 %v752_v34  ;;  %v5353_v24 = vmul.f32 %v4505_v6, %v5259_v63  ;;  %v5356_v39 = vmul.f32 %v4502_v21, %v5257_v61  ;;  %v5361_v41 = vmul.f32 %v4500_v19, %v5257_v61  ;;  %v5364_v37 = vmul.f32 %v4504_v10, %v5257_v61  ;;  %v4515_v18 = vld [vmem:[%s5272_s29 + $0x10d8] sm:$0xff]  ;;  %v4513_v20 = vld [vmem:[%s5272_s29 + $0x10c8] sm:$0xff]  ;;  %v4514_v31 = vld [vmem:[%s5272_s29 + $0x10d0] sm:$0xff] }
 0x19b   : > { %v763_v23 = vsel %vm128_vm0, %v5345_v7, -inf  ;;  %v759_v45 = vsel %vm128_vm0, %v5349_v26, -inf  ;;  %v5378_v57 = vmul.f32 %v4509_v44, %v5259_v63  ;;  %v5382_v60 = vmul.f32 %v4507_v48, %v5259_v63  ;;  %v4517_v25 = vld [vmem:[%s5272_s29 + $0x10e8] sm:$0xff]  ;;  %v4512_v42 = vld [vmem:[%s5272_s29 + $0x10c0] sm:$0xff]  ;;  %v4518_v10 = vld [vmem:[%s5272_s29 + $0x10f0] sm:$0xff] }
 0x19c   : > { %v767_v27 = vsel %vm128_vm0, %v5353_v24, -inf  ;;  %v764_v43 = vmax.f32 %v5356_v39, %v763_v23  ;;  %v760_v50 = vmax.f32 %v5361_v41, %v759_v45  ;;  %v5386_v0 = vmul.f32 %v4511_v51, %v5259_v63  ;;  %v4516_v34 = vld [vmem:[%s5272_s29 + $0x10e0] sm:$0xff] }
 0x19d   : > { %v768_v55 = vmax.f32 %v5364_v37, %v767_v27  ;;  %v5389_v4 = vmul.f32 %v4508_v56, %v5257_v61  ;;  %v775_v5 = vsel %vm128_vm0, %v5378_v57, -inf  ;;  %v5394_v11 = vmul.f32 %v4506_v59, %v5257_v61 }
 0x19e   : > { %v5397_v13 = vmul.f32 %v4510_v62, %v5257_v61  ;;  %v771_v14 = vsel %vm128_vm0, %v5382_v60, -inf  ;;  %v779_v17 = vsel %vm128_vm0, %v5386_v0, -inf  ;;  %v729_v32 = vmul.f32 %v4515_v18, %v5259_v63 }
 0x19f   : > { %v776_v28 = vmax.f32 %v5389_v4, %v775_v5  ;;  %v772_v29 = vmax.f32 %v5394_v11, %v771_v14  ;;  %v727_v35 = vmul.f32 %v4513_v20, %v5259_v63  ;;  %v5415_v38 = vmul.f32 %v4517_v25, %v5259_v63 }
 0x1a0   : > { %749 = vmax.xlane.f32.xlu1 %v748_v46  ;;  %v780_v30 = vmax.f32 %v5397_v13, %v779_v17  ;;  %v728_v9 = vmul.f32 %v4514_v31, %v5257_v61  ;;  %v787_v58 = vsel %vm128_vm0, %v729_v32, -inf  ;;  %v726_v47 = vmul.f32 %v4512_v42, %v5257_v61 }
 0x1a1   : > { %741 = vmax.xlane.f32.xlu0 %v740_v33  ;;  %v5421_v54 = vmul.f32 %v4516_v34, %v5257_v61  ;;  %v783_v6 = vsel %vm128_vm0, %v727_v35, -inf  ;;  %v791_v46 = vsel %vm128_vm0, %v5415_v38, -inf  ;;  %v4519_v33 = vld [vmem:[%s5272_s29 + $0x10f8] sm:$0xff]  ;;  %v817_v45 = vsel %vm128_vm0, %v5290_v15, inf }
 0x1a2   : > { %757 = vmax.xlane.f32.xlu2 %v756_v53  ;;  %v788_v53 = vmax.f32 %v728_v9, %v787_v58  ;;  %v784_v21 = vmax.f32 %v726_v47, %v783_v6  ;;  %v733_v23 = vmul.f32 %v4519_v33, %v5259_v63  ;;  %v732_v27 = vmul.f32 %v4518_v10, %v5257_v61 }
 0x1a3   : > { %v792_v19 = vmax.f32 %v5421_v54, %v791_v46  ;;  %v821_v48 = vsel %vm128_vm0, %v5314_v40, inf  ;;  %v818_v51 = vmin.f32 %v5285_v12, %v817_v45  ;;  %v825_v15 = vsel %vm128_vm0, %v5281_v8, inf }
 0x1a4   : > { %v795_v44 = vsel %vm128_vm0, %v733_v23, -inf  ;;  %v833_v56 = vsel %vm128_vm0, %v5296_v1, inf  ;;  %v826_v40 = vmin.f32 %v5278_v2, %v825_v15  ;;  %v845_v8 = vsel %vm128_vm0, %v5345_v7, inf }
 0x1a5   : > { %v834_v12 = vmin.f32 %v5293_v16, %v833_v56  ;;  %v846_v2 = vmin.f32 %v5356_v39, %v845_v8  ;;  %v853_v16 = vsel %vm128_vm0, %v5382_v60, inf  ;;  %v865_v39 = vsel %vm128_vm0, %v727_v35, inf }
 0x1a6   : > { %v854_v7 = vmin.f32 %v5394_v11, %v853_v16  ;;  %v861_v60 = vsel %vm128_vm0, %v5386_v0, inf  ;;  %v866_v62 = vmin.f32 %v726_v47, %v865_v39  ;;  %v1635_v16 = vld [vmem:[%s8048_s1 + $0x700] sm:$0xff] (%p659_p3)  ;;  %v4768_v39 = vmov (%p659_p3), 0  }
 0x1a7   :  { %4672 = vset.pattern.permute.xlu1 (%p659_p3), %v4768_v39  ;;  %4671 = vset.pattern.permute.xlu0 (%p659_p3), %v4768_v39 }
 0x1a8   : > { %765 = vmax.xlane.f32.xlu1 %v764_v43  ;;  %v796_v43 = vmax.f32 %v732_v27, %v795_v44  ;;  %4673 = vset.pattern.permute.xlu2 (%p659_p3), %v4768_v39 }
 0x1a9   : > { %761 = vmax.xlane.f32.xlu0 %v760_v50  ;;  %v822_v50 = vmin.f32 %v5328_v3, %v821_v48  ;;  %v841_v3 = vsel %vm128_vm0, %v5349_v26, inf  ;;  %v849_v26 = vsel %vm128_vm0, %v5353_v24, inf  ;;  %v869_v24 = vsel %vm128_vm0, %v729_v32, inf }
 0x1aa   : > { %769 = vmax.xlane.f32.xlu2 %v768_v55  ;;  %v829_v55 = vsel %vm128_vm0, %v5303_v22, inf  ;;  %v837_v22 = vsel %vm128_vm0, %v5323_v36, inf  ;;  %v842_v1 = vmin.f32 %v5361_v41, %v841_v3  ;;  %v857_v36 = vsel %vm128_vm0, %v5378_v57, inf }
 0x1ab   : > { %v830_v59 = vmin.f32 %v5320_v52, %v829_v55  ;;  %v838_v52 = vmin.f32 %v5331_v49, %v837_v22  ;;  %v850_v41 = vmin.f32 %v5364_v37, %v849_v26  ;;  %v858_v49 = vmin.f32 %v5389_v4, %v857_v36 }
 0x1ac   : > { %v862_v57 = vmin.f32 %v5397_v13, %v861_v60  ;;  %v870_v5 = vmin.f32 %v728_v9, %v869_v24  ;;  %v877_v37 = vsel %vm128_vm0, %v733_v23, inf  ;;  %v873_v4 = vsel %vm128_vm0, %v5415_v38, inf  ;;  %v1411_v60 = vld [vmem:[%s8048_s1] sm:$0xff] (%p659_p3) }
 0x1ad   : > { %v878_v11 = vmin.f32 %v732_v27, %v877_v37  ;;  %v874_v14 = vmin.f32 %v5421_v54, %v873_v4  ;;  %v1795_v24 = vld [vmem:[%s8048_s1 + $0xc00] sm:$0xff] (%p659_p3) }
 0x1ae   :  { %v1667_v4 = vld [vmem:[%s8048_s1 + $0x800] sm:$0xff] (%p659_p3) }
 0x1b0   : > { %777 = vmax.xlane.f32.xlu1 %v776_v28 }
 0x1b1   : > { %773 = vmax.xlane.f32.xlu0 %v772_v29 }
 0x1b2   : > { %781 = vmax.xlane.f32.xlu2 %v780_v30 }
 0x1b8   : > { %789 = vmax.xlane.f32.xlu1 %v788_v53 }
 0x1b9   : > { %785 = vmax.xlane.f32.xlu0 %v784_v21 }
 0x1ba   : > { %793 = vmax.xlane.f32.xlu2 %v792_v19 }
 0x1c0   : > { %819 = vmin.xlane.f32.xlu1 %v818_v51 }
 0x1c1   : > { %797 = vmax.xlane.f32.xlu0 %v796_v43 }
 0x1c2   : > { %823 = vmin.xlane.f32.xlu2 %v822_v50 }
 0x1c8   : > { %831 = vmin.xlane.f32.xlu1 %v830_v59 }
 0x1c9   : > { %827 = vmin.xlane.f32.xlu0 %v826_v40 }
 0x1ca   : > { %835 = vmin.xlane.f32.xlu2 %v834_v12 }
 0x1d0   : > { %843 = vmin.xlane.f32.xlu1 %v842_v1 }
 0x1d1   : > { %839 = vmin.xlane.f32.xlu0 %v838_v52 }
 0x1d2   : > { %847 = vmin.xlane.f32.xlu2 %v846_v2 }
 0x1d8   : > { %855 = vmin.xlane.f32.xlu1 %v854_v7  ;;  %v1936_v7 = vld [vmem:[%s8049_s2 + $0x68] sm:$0xff] (%p659_p3) }
 0x1d9   : > { %851 = vmin.xlane.f32.xlu0 %v850_v41 }
 0x1da   : > { %859 = vmin.xlane.f32.xlu2 %v858_v49 }
 0x1e0   : > { %867 = vmin.xlane.f32.xlu1 %v866_v62 }
 0x1e1   : > { %863 = vmin.xlane.f32.xlu0 %v862_v57 }
 0x1e2   : > { %871 = vmin.xlane.f32.xlu2 %v870_v5 }
 0x1e8   : > { %879 = vmin.xlane.f32.xlu1 %v878_v11 }
 0x1e9   : > { %875 = vmin.xlane.f32.xlu0 %v874_v14  ;;  %v1938_v14 = vld [vmem:[%s8049_s2 + $0x78] sm:$0xff] (%p659_p3) }
 0x1fd   :  { %2016 = vperm.xlu0 (%p659_p3), %4671, %v1938_v14  }
 0x201   :  { %2006 = vperm.xlu1 (%p659_p3), %4672, %v1936_v7   ;;  %v1763_v7 = vld [vmem:[%s8048_s1 + $0xb00] sm:$0xff] (%p659_p3) }
 0x20b   : > { %v746_v0 = vpop.xlane.xlu1 %745 }
 0x20c   : > { %803 = vst.msk [vmem:[%s5476_s30 + $0x10] sm:$0xff] %vm800_vm11, %v746_v0  ;;  %v738_v13 = vpop.xlane.xlu0 %737 }
 0x20d   : > { %v754_v17 = vpop.xlane.xlu2 %753  ;;  %801 = vst.msk [vmem:[%s5476_s30] sm:$0xff] %vm800_vm11, %v738_v13 }
 0x20e   : > { %805 = vst.msk [vmem:[%s5476_s30 + $0x20] sm:$0xff] %vm800_vm11, %v754_v17 }
 0x213   : > { %v750_v18 = vpop.xlane.xlu1 %749 }
 0x214   : > { %804 = vst.msk [vmem:[%s5476_s30 + $0x18] sm:$0xff] %vm800_vm11, %v750_v18  ;;  %v742_v20 = vpop.xlane.xlu0 %741  ;;  %v1571_v18 = vld [vmem:[%s8048_s1 + $0x500] sm:$0xff] (%p659_p3) }
 0x215   : > { %v758_v25 = vpop.xlane.xlu2 %757  ;;  %802 = vst.msk [vmem:[%s5476_s30 + $0x8] sm:$0xff] %vm800_vm11, %v742_v20 }
 0x216   : > { %806 = vst.msk [vmem:[%s5476_s30 + $0x28] sm:$0xff] %vm800_vm11, %v758_v25 }
 0x21b   : > { %v766_v28 = vpop.xlane.xlu1 %765 }
 0x21c   : > { %808 = vst.msk [vmem:[%s5476_s30 + $0x38] sm:$0xff] %vm800_vm11, %v766_v28  ;;  %v762_v29 = vpop.xlane.xlu0 %761  ;;  %v1935_v28 = vld [vmem:[%s8049_s2 + $0x60] sm:$0xff] (%p659_p3) }
 0x21d   : > { %v770_v30 = vpop.xlane.xlu2 %769  ;;  %807 = vst.msk [vmem:[%s5476_s30 + $0x30] sm:$0xff] %vm800_vm11, %v762_v29  ;;  %2001 = vperm.xlu1 (%p659_p3), %4672, %v1935_v28   ;;  %v1413_v28 = vld [vmem:[%s8048_s1 + $0x10] sm:$0xff] (%p659_p3) }
 0x21e   : > { %809 = vst.msk [vmem:[%s5476_s30 + $0x40] sm:$0xff] %vm800_vm11, %v770_v30 }
 0x223   : > { %v778_v31 = vpop.xlane.xlu1 %777 }
 0x224   : > { %811 = vst.msk [vmem:[%s5476_s30 + $0x50] sm:$0xff] %vm800_vm11, %v778_v31  ;;  %v774_v32 = vpop.xlane.xlu0 %773 }
 0x225   : > { %v782_v42 = vpop.xlane.xlu2 %781  ;;  %810 = vst.msk [vmem:[%s5476_s30 + $0x48] sm:$0xff] %vm800_vm11, %v774_v32  ;;  %v1443_v32 = vld [vmem:[%s8048_s1 + $0x100] sm:$0xff] (%p659_p3) }
 0x226   : > { %812 = vst.msk [vmem:[%s5476_s30 + $0x58] sm:$0xff] %vm800_vm11, %v782_v42  ;;  %v1827_v42 = vld [vmem:[%s8048_s1 + $0xd00] sm:$0xff] (%p659_p3) }
 0x22b   : > { %v790_v35 = vpop.xlane.xlu1 %789 }
 0x22c   : > { %814 = vst.msk [vmem:[%s5476_s30 + $0x68] sm:$0xff] %vm800_vm11, %v790_v35  ;;  %v786_v34 = vpop.xlane.xlu0 %785 }
 0x22d   : > { %v794_v38 = vpop.xlane.xlu2 %793  ;;  %813 = vst.msk [vmem:[%s5476_s30 + $0x60] sm:$0xff] %vm800_vm11, %v786_v34  ;;  %v1699_v34 = vld [vmem:[%s8048_s1 + $0x900] sm:$0xff] (%p659_p3) }
 0x22e   : > { %815 = vst.msk [vmem:[%s5476_s30 + $0x70] sm:$0xff] %vm800_vm11, %v794_v38 }
 0x233   : > { %v820_v9 = vpop.xlane.xlu1 %819 }
 0x234   : > { %4521 = vst.msk [vmem:[%s5476_s30 + $0x800] sm:$0xff] %vm800_vm11, %v820_v9  ;;  %v798_v58 = vpop.xlane.xlu0 %797 }
 0x235   : > { %v824_v47 = vpop.xlane.xlu2 %823  ;;  %816 = vst.msk [vmem:[%s5476_s30 + $0x78] sm:$0xff] %vm800_vm11, %v798_v58 }
 0x236   : > { %4522 = vst.msk [vmem:[%s5476_s30 + $0x808] sm:$0xff] %vm800_vm11, %v824_v47 }
 0x23b   : > { %v832_v54 = vpop.xlane.xlu1 %831 }
 0x23c   : > { %4524 = vst.msk [vmem:[%s5476_s30 + $0x818] sm:$0xff] %vm800_vm11, %v832_v54  ;;  %v828_v6 = vpop.xlane.xlu0 %827  ;;  %v1937_v54 = vld [vmem:[%s8049_s2 + $0x70] sm:$0xff] (%p659_p3) }
 0x23d   : > { %v836_v46 = vpop.xlane.xlu2 %835  ;;  %4523 = vst.msk [vmem:[%s5476_s30 + $0x810] sm:$0xff] %vm800_vm11, %v828_v6  ;;  %2011 = vperm.xlu0 (%p659_p3), %4671, %v1937_v54   ;;  %v1445_v54 = vld [vmem:[%s8048_s1 + $0x110] sm:$0xff] (%p659_p3) }
 0x23e   : > { %4525 = vst.msk [vmem:[%s5476_s30 + $0x820] sm:$0xff] %vm800_vm11, %v836_v46 }
 0x243   : > { %v844_v33 = vpop.xlane.xlu1 %843 }
 0x244   : > { %4527 = vst.msk [vmem:[%s5476_s30 + $0x830] sm:$0xff] %vm800_vm11, %v844_v33  ;;  %v840_v53 = vpop.xlane.xlu0 %839 }
 0x245   : > { %v848_v21 = vpop.xlane.xlu2 %847  ;;  %4526 = vst.msk [vmem:[%s5476_s30 + $0x828] sm:$0xff] %vm800_vm11, %v840_v53 }
 0x246   : > { %4528 = vst.msk [vmem:[%s5476_s30 + $0x838] sm:$0xff] %vm800_vm11, %v848_v21  ;;  %v1603_v21 = vld [vmem:[%s8048_s1 + $0x600] sm:$0xff] (%p659_p3) }
 0x24b   : > { %v856_v19 = vpop.xlane.xlu1 %855 }
 0x24c   : > { %4530 = vst.msk [vmem:[%s5476_s30 + $0x848] sm:$0xff] %vm800_vm11, %v856_v19  ;;  %v852_v10 = vpop.xlane.xlu0 %851 }
 0x24d   : > { %v860_v23 = vpop.xlane.xlu2 %859  ;;  %4529 = vst.msk [vmem:[%s5476_s30 + $0x840] sm:$0xff] %vm800_vm11, %v852_v10 }
 0x24e   : > { %4531 = vst.msk [vmem:[%s5476_s30 + $0x850] sm:$0xff] %vm800_vm11, %v860_v23 }
 0x253   : > { %v868_v45 = vpop.xlane.xlu1 %867 }
 0x254   : > { %4533 = vst.msk [vmem:[%s5476_s30 + $0x860] sm:$0xff] %vm800_vm11, %v868_v45  ;;  %v864_v27 = vpop.xlane.xlu0 %863 }
 0x255   : > { %v872_v44 = vpop.xlane.xlu2 %871  ;;  %4532 = vst.msk [vmem:[%s5476_s30 + $0x858] sm:$0xff] %vm800_vm11, %v864_v27  ;;  %v1731_v27 = vld [vmem:[%s8048_s1 + $0xa00] sm:$0xff] (%p659_p3) }
 0x256   : > { %4534 = vst.msk [vmem:[%s5476_s30 + $0x868] sm:$0xff] %vm800_vm11, %v872_v44 }
 0x259   :  { %661 = sbr.rel (!%p659_p3) target bundleno = 398 (0x18e), region = 117 }
 0x25b   : > { %v880_v48 = vpop.xlane.xlu1 %879 }
 0x25c   : > { %4536 = vst.msk [vmem:[%s5476_s30 + $0x878] sm:$0xff] %vm800_vm11, %v880_v48  ;;  %v876_v51 = vpop.xlane.xlu0 %875  ;;  %v1934_v48 = vld [vmem:[%s8049_s2 + $0x58] sm:$0xff] (%p659_p3) }
 0x25d   : > { %4535 = vst.msk [vmem:[%s5476_s30 + $0x870] sm:$0xff] %vm800_vm11, %v876_v51  ;;  %v1931_v51 = vld [vmem:[%s8049_s2 + $0x40] sm:$0xff] (%p659_p3)  ;;  %1996 = vperm.xlu2 (%p659_p3), %4673, %v1934_v48   ;;  %v1509_v48 = vld [vmem:[%s8048_s1 + $0x310] sm:$0xff] (%p659_p3) }
 0x25e   :  { %1981 = vperm.xlu1 %4672, %v1931_v51   ;;  %v1510_v51 = vld [vmem:[%s8048_s1 + $0x318] sm:$0xff] }
 0x264   :  { %v914_v43 = vld [vmem:[#allocation2 + $0x78] sm:$0xff]  ;;  %v913_v50 = vld [vmem:[#allocation2 + $0x70] sm:$0xff]  ;;  %v912_v55 = vld [vmem:[#allocation2 + $0x68] sm:$0xff] }
 0x265   :  { %4541 = vmatpush.msra.mxu1 %v914_v43  ;;  %4542 = vmatpush.msra.mxu2 %v914_v43  ;;  %v911_v15 = vld [vmem:[#allocation2 + $0x60] sm:$0xff]  ;;  %v910_v56 = vld [vmem:[#allocation2 + $0x58] sm:$0xff]  ;;  %v909_v59 = vld [vmem:[#allocation2 + $0x50] sm:$0xff] }
 0x266   :  { %2019 = vmatpush.msra.mxu0 %v914_v43  ;;  %4543 = vmatpush.msra.mxu3 %v914_v43  ;;  %v908_v61 = vld [vmem:[#allocation2 + $0x48] sm:$0xff]  ;;  %v907_v63 = vld [vmem:[#allocation2 + $0x40] sm:$0xff]  ;;  %v906_v40 = vld [vmem:[#allocation2 + $0x38] sm:$0xff] }
 0x267   :  { %4544 = vmatpush.msra.mxu1 %v913_v50  ;;  %4545 = vmatpush.msra.mxu2 %v913_v50  ;;  %v905_v12 = vld [vmem:[#allocation2 + $0x30] sm:$0xff]  ;;  %v904_v3 = vld [vmem:[#allocation2 + $0x28] sm:$0xff]  ;;  %v903_v22 = vld [vmem:[#allocation2 + $0x20] sm:$0xff] }
 0x268   :  { %2020 = vmatpush.msra.mxu0 %v913_v50  ;;  %4546 = vmatpush.msra.mxu3 %v913_v50  ;;  %v902_v8 = vld [vmem:[#allocation2 + $0x18] sm:$0xff]  ;;  %v901_v1 = vld [vmem:[#allocation2 + $0x10] sm:$0xff]  ;;  %v900_v52 = vld [vmem:[#allocation2 + $0x8] sm:$0xff] }
 0x269   :  { %4547 = vmatpush.msra.mxu1 %v912_v55  ;;  %4548 = vmatpush.msra.mxu2 %v912_v55  ;;  %v899_v2 = vld [vmem:[#allocation2] sm:$0xff]  ;;  %v930_v26 = vld [vmem:[#allocation2 + $0xf8] sm:$0xff]  ;;  %v929_v36 = vld [vmem:[#allocation2 + $0xf0] sm:$0xff] }
 0x26a   :  { %2021 = vmatpush.msra.mxu0 %v912_v55  ;;  %4549 = vmatpush.msra.mxu3 %v912_v55  ;;  %v946_v41 = vld [vmem:[#allocation2 + $0x178] sm:$0xff]  ;;  %v928_v49 = vld [vmem:[#allocation2 + $0xe8] sm:$0xff]  ;;  %v945_v62 = vld [vmem:[#allocation2 + $0x170] sm:$0xff] }
 0x26b   :  { %4550 = vmatpush.msra.mxu1 %v911_v15  ;;  %4551 = vmatpush.msra.mxu2 %v911_v15  ;;  %v927_v57 = vld [vmem:[#allocation2 + $0xe0] sm:$0xff]  ;;  %v962_v5 = vld [vmem:[#allocation2 + $0x1f8] sm:$0xff]  ;;  %v944_v37 = vld [vmem:[#allocation2 + $0x168] sm:$0xff] }
 0x26c   :  { %2022 = vmatpush.msra.mxu0 %v911_v15  ;;  %4552 = vmatpush.msra.mxu3 %v911_v15  ;;  %v926_v11 = vld [vmem:[#allocation2 + $0xd8] sm:$0xff]  ;;  %v961_v0 = vld [vmem:[#allocation2 + $0x1f0] sm:$0xff]  ;;  %v943_v17 = vld [vmem:[#allocation2 + $0x160] sm:$0xff] }
 0x26d   :  { %4553 = vmatpush.msra.mxu1 %v910_v56  ;;  %4554 = vmatpush.msra.mxu2 %v910_v56  ;;  %v925_v13 = vld [vmem:[#allocation2 + $0xd0] sm:$0xff]  ;;  %v960_v20 = vld [vmem:[#allocation2 + $0x1e8] sm:$0xff]  ;;  %v942_v29 = vld [vmem:[#allocation2 + $0x158] sm:$0xff] }
 0x26e   :  { %2023 = vmatpush.msra.mxu0 %v910_v56  ;;  %4555 = vmatpush.msra.mxu3 %v910_v56  ;;  %v924_v25 = vld [vmem:[#allocation2 + $0xc8] sm:$0xff]  ;;  %v959_v30 = vld [vmem:[#allocation2 + $0x1e0] sm:$0xff]  ;;  %v941_v35 = vld [vmem:[#allocation2 + $0x150] sm:$0xff] }
 0x26f   :  { %4556 = vmatpush.msra.mxu1 %v909_v59  ;;  %4557 = vmatpush.msra.mxu2 %v909_v59  ;;  %v923_v31 = vld [vmem:[#allocation2 + $0xc0] sm:$0xff]  ;;  %v922_v38 = vld [vmem:[#allocation2 + $0xb8] sm:$0xff]  ;;  %v921_v47 = vld [vmem:[#allocation2 + $0xb0] sm:$0xff] }
 0x270   :  { %2024 = vmatpush.msra.mxu0 %v909_v59  ;;  %4558 = vmatpush.msra.mxu3 %v909_v59  ;;  %v958_v9 = vld [vmem:[#allocation2 + $0x1d8] sm:$0xff]  ;;  %v940_v6 = vld [vmem:[#allocation2 + $0x148] sm:$0xff]  ;;  %v957_v46 = vld [vmem:[#allocation2 + $0x1d0] sm:$0xff] }
 0x271   :  { %4559 = vmatpush.msra.mxu1 %v908_v61  ;;  %4560 = vmatpush.msra.mxu2 %v908_v61  ;;  %v978_v58 = vld [vmem:[#allocation2 + $0x278] sm:$0xff]  ;;  %v920_v33 = vld [vmem:[#allocation2 + $0xa8] sm:$0xff]  ;;  %v977_v53 = vld [vmem:[#allocation2 + $0x270] sm:$0xff] }
 0x272   :  { %2025 = vmatpush.msra.mxu0 %v908_v61  ;;  %4561 = vmatpush.msra.mxu3 %v908_v61  ;;  %v939_v19 = vld [vmem:[#allocation2 + $0x140] sm:$0xff]  ;;  %v956_v23 = vld [vmem:[#allocation2 + $0x1c8] sm:$0xff]  ;;  %v918_v44 = vld [vmem:[#allocation2 + $0x98] sm:$0xff] }
 0x273   :  { %4562 = vmatpush.msra.mxu1 %v907_v63  ;;  %4563 = vmatpush.msra.mxu2 %v907_v63  ;;  %v919_v10 = vld [vmem:[#allocation2 + $0xa0] sm:$0xff]  ;;  %v976_v45 = vld [vmem:[#allocation2 + $0x268] sm:$0xff]  ;;  %v938_v43 = vld [vmem:[#allocation2 + $0x138] sm:$0xff] }
 0x274   :  { %2026 = vmatpush.msra.mxu0 %v907_v63  ;;  %4564 = vmatpush.msra.mxu3 %v907_v63  ;;  %v955_v50 = vld [vmem:[#allocation2 + $0x1c0] sm:$0xff]  ;;  %v917_v59 = vld [vmem:[#allocation2 + $0x90] sm:$0xff]  ;;  %v954_v63 = vld [vmem:[#allocation2 + $0x1b8] sm:$0xff] }
 0x275   :  { %4565 = vmatpush.msra.mxu1 %v906_v40  ;;  %4566 = vmatpush.msra.mxu2 %v906_v40  ;;  %v975_v55 = vld [vmem:[#allocation2 + $0x260] sm:$0xff]  ;;  %v937_v61 = vld [vmem:[#allocation2 + $0x130] sm:$0xff] }
 0x276   :  { %2027 = vmatpush.msra.mxu0 %v906_v40  ;;  %4567 = vmatpush.msra.mxu3 %v906_v40  ;;  %v1859_v15 = vld [vmem:[%s8048_s1 + $0xe00] sm:$0xff]  ;;  %v974_v40 = vld [vmem:[#allocation2 + $0x258] sm:$0xff]  ;;  %v949_v14 = vld [vmem:[#allocation2 + $0x190] sm:$0xff] }
 0x277   :  { %4568 = vmatpush.msra.mxu1 %v905_v12  ;;  %4569 = vmatpush.msra.mxu2 %v905_v12  ;;  %v1475_v56 = vld [vmem:[%s8048_s1 + $0x200] sm:$0xff] }
 0x278   :  { %2028 = vmatpush.msra.mxu0 %v905_v12  ;;  %4570 = vmatpush.msra.mxu3 %v905_v12  ;;  %v916_v12 = vld [vmem:[#allocation2 + $0x88] sm:$0xff]  ;;  %v951_v39 = vld [vmem:[#allocation2 + $0x1a0] sm:$0xff] }
 0x279   :  { %4571 = vmatpush.msra.mxu1 %v904_v3  ;;  %4572 = vmatpush.msra.mxu2 %v904_v3 }
 0x27a   :  { %2029 = vmatpush.msra.mxu0 %v904_v3  ;;  %4573 = vmatpush.msra.mxu3 %v904_v3  ;;  %v1932_v3 = vld [vmem:[%s8049_s2 + $0x48] sm:$0xff] }
 0x27b   :  { %4574 = vmatpush.msra.mxu1 %v903_v22  ;;  %4575 = vmatpush.msra.mxu2 %v903_v22 }
 0x27c   :  { %2030 = vmatpush.msra.mxu0 %v903_v22  ;;  %4576 = vmatpush.msra.mxu3 %v903_v22  ;;  %v936_v22 = vld [vmem:[#allocation2 + $0x128] sm:$0xff] }
 0x27d   :  { %4577 = vmatpush.msra.mxu1 %v902_v8  ;;  %4578 = vmatpush.msra.mxu2 %v902_v8 }
 0x27e   :  { %2031 = vmatpush.msra.mxu0 %v902_v8  ;;  %4579 = vmatpush.msra.mxu3 %v902_v8  ;;  %v953_v8 = vld [vmem:[#allocation2 + $0x1b0] sm:$0xff] }
 0x27f   :  { %4580 = vmatpush.msra.mxu1 %v901_v1  ;;  %4581 = vmatpush.msra.mxu2 %v901_v1 }
 0x280   :  { %2032 = vmatpush.msra.mxu0 %v901_v1  ;;  %4582 = vmatpush.msra.mxu3 %v901_v1  ;;  %v973_v1 = vld [vmem:[#allocation2 + $0x250] sm:$0xff] }
 0x281   :  { %4583 = vmatpush.msra.mxu1 %v900_v52  ;;  %4584 = vmatpush.msra.mxu2 %v900_v52 }
 0x282   :  { %2033 = vmatpush.msra.mxu0 %v900_v52  ;;  %4585 = vmatpush.msra.mxu3 %v900_v52  ;;  %v915_v52 = vld [vmem:[#allocation2 + $0x80] sm:$0xff] }
 0x283   :  { %4586 = vmatpush.msra.mxu1 %v899_v2  ;;  %4587 = vmatpush.msra.mxu2 %v899_v2 }
 0x284   :  { %2056 = vmatmul.f32.vlgmr.msra.gmra.mxu2 %v1635_v16  ;;  %2034 = vmatpush.msra.mxu0 %v899_v2  ;;  %v1412_v16 = vld [vmem:[%s8048_s1 + $0x8] sm:$0xff] }
 0x285   :  { %2084 = vmatpush.msrb.mxu1 %v930_v26  ;;  %4588 = vmatpush.msra.mxu3 %v899_v2  ;;  %v935_v2 = vld [vmem:[#allocation2 + $0x120] sm:$0xff]  ;;  %v952_v26 = vld [vmem:[#allocation2 + $0x1a8] sm:$0xff] }
 0x286   :  { %2149 = vmatpush.msrb.mxu2 %v946_v41  ;;  %2035 = vmatmul.f32.vlgmr.msra.gmra.mxu0 %v1411_v60  ;;  %v1933_v41 = vld [vmem:[%s8049_s2 + $0x50] sm:$0xff]  ;;  %v971_v60 = vld [vmem:[#allocation2 + $0x240] sm:$0xff] }
 0x287   :  { %2085 = vmatpush.msrb.mxu1 %v929_v36  ;;  %2071 = vmatmul.f32.vlgmr.msra.gmra.mxu3 %v1795_v24  ;;  %v972_v36 = vld [vmem:[#allocation2 + $0x248] sm:$0xff]  ;;  %v1507_v24 = vld [vmem:[%s8048_s1 + $0x300] sm:$0xff] }
 0x288   :  { %2150 = vmatpush.msrb.mxu2 %v945_v62  ;;  %2214 = vmatpush.msrb.mxu3 %v962_v5  ;;  %v1891_v62 = vld [vmem:[%s8048_s1 + $0xf00] sm:$0xff]  ;;  %v950_v5 = vld [vmem:[#allocation2 + $0x198] sm:$0xff] }
 0x289   :  { %2086 = vmatpush.msrb.mxu1 %v928_v49  ;;  %2279 = vmatpush.msrb.mxu0 %v978_v58  ;;  %v934_v49 = vld [vmem:[#allocation2 + $0x118] sm:$0xff]  ;;  %v1476_v58 = vld [vmem:[%s8048_s1 + $0x208] sm:$0xff] }
 0x28a   :  { %2151 = vmatpush.msrb.mxu2 %v944_v37  ;;  %2215 = vmatpush.msrb.mxu3 %v961_v0  ;;  %v970_v37 = vld [vmem:[#allocation2 + $0x238] sm:$0xff]  ;;  %v969_v0 = vld [vmem:[#allocation2 + $0x230] sm:$0xff] }
 0x28b   :  { %2087 = vmatpush.msrb.mxu1 %v927_v57  ;;  %2280 = vmatpush.msrb.mxu0 %v977_v53  ;;  %v933_v57 = vld [vmem:[#allocation2 + $0x110] sm:$0xff]  ;;  %v1415_v53 = vld [vmem:[%s8048_s1 + $0x20] sm:$0xff] }
 0x28c   :  { %2059 = vmatmul.f32.gmra.mxu2 %v1667_v4  ;;  %2050 = vmatmul.f32.vlgmr.msra.gmra.mxu1 %v1571_v18  ;;  %v1929_v4 = vld [vmem:[%s8049_s2 + $0x30] sm:$0xff]  ;;  %v931_v18 = vld [vmem:[#allocation2 + $0x100] sm:$0xff] }
 0x28d   :  { %2088 = vmatpush.msrb.mxu1 %v926_v11  ;;  %2152 = vmatpush.msrb.mxu2 %v943_v17  ;;  %v932_v11 = vld [vmem:[#allocation2 + $0x108] sm:$0xff] }
 0x28e   :  { %2216 = vmatpush.msrb.mxu3 %v960_v20  ;;  %2038 = vmatmul.f32.gmra.mxu0 %v1443_v32  ;;  %v1444_v17 = vld [vmem:[%s8048_s1 + $0x108] sm:$0xff]  ;;  %v1539_v32 = vld [vmem:[%s8048_s1 + $0x400] sm:$0xff] }
 0x28f   :  { %2089 = vmatpush.msrb.mxu1 %v925_v13  ;;  %2153 = vmatpush.msrb.mxu2 %v942_v29  ;;  %v1928_v13 = vld [vmem:[%s8049_s2 + $0x28] sm:$0xff]  ;;  %v1930_v29 = vld [vmem:[%s8049_s2 + $0x38] sm:$0xff] }
 0x290   :  { %2217 = vmatpush.msrb.mxu3 %v959_v30  ;;  %2281 = vmatpush.msrb.mxu0 %v976_v45  ;;  %v948_v20 = vld [vmem:[#allocation2 + $0x188] sm:$0xff]  ;;  %v947_v30 = vld [vmem:[#allocation2 + $0x180] sm:$0xff]  ;;  %v1478_v45 = vld [vmem:[%s8048_s1 + $0x218] sm:$0xff] }
 0x291   :  { %2090 = vmatpush.msrb.mxu1 %v924_v25  ;;  %2074 = vmatmul.f32.gmra.mxu3 %v1827_v42  ;;  %v968_v25 = vld [vmem:[#allocation2 + $0x228] sm:$0xff]  ;;  %v1414_v42 = vld [vmem:[%s8048_s1 + $0x18] sm:$0xff] }
 0x292   :  { %2154 = vmatpush.msrb.mxu2 %v941_v35  ;;  %2218 = vmatpush.msrb.mxu3 %v958_v9  ;;  %v966_v35 = vld [vmem:[#allocation2 + $0x218] sm:$0xff]  ;;  %v1925_v9 = vld [vmem:[%s8049_s2 + $0x10] sm:$0xff] }
 0x293   :  { %2091 = vmatpush.msrb.mxu1 %v923_v31  ;;  %2282 = vmatpush.msrb.mxu0 %v975_v55  ;;  %v967_v31 = vld [vmem:[#allocation2 + $0x220] sm:$0xff]  ;;  %v1541_v55 = vld [vmem:[%s8048_s1 + $0x410] sm:$0xff] }
 0x294   :  { %2062 = vmatmul.f32.gmra.mxu2 %v1699_v34  ;;  %2219 = vmatpush.msrb.mxu3 %v957_v46  ;;  %v1926_v34 = vld [vmem:[%s8049_s2 + $0x18] sm:$0xff]  ;;  %v963_v46 = vld [vmem:[#allocation2 + $0x200] sm:$0xff] }
 0x295   :  { %2092 = vmatpush.msrb.mxu1 %v922_v38  ;;  %2155 = vmatpush.msrb.mxu2 %v940_v6  ;;  %v965_v38 = vld [vmem:[#allocation2 + $0x210] sm:$0xff]  ;;  %v1927_v6 = vld [vmem:[%s8049_s2 + $0x20] sm:$0xff] }
 0x296   :  { %2053 = vmatmul.f32.gmra.mxu1 %v1603_v21  ;;  %2220 = vmatpush.msrb.mxu3 %v956_v23  ;;  %v1923_v21 = vld [vmem:[%s8049_s2] sm:$0xff]  ;;  %v1924_v23 = vld [vmem:[%s8049_s2 + $0x8] sm:$0xff] }
 0x297   :  { %2093 = vmatpush.msrb.mxu1 %v921_v47  ;;  %2156 = vmatpush.msrb.mxu2 %v939_v19  ;;  %v964_v47 = vld [vmem:[#allocation2 + $0x208] sm:$0xff] }
 0x298   :  { %2221 = vmatpush.msrb.mxu3 %v955_v50  ;;  %2041 = vmatmul.f32.gmra.mxu0 %v1475_v56  ;;  %v1508_v19 = vld [vmem:[%s8048_s1 + $0x308] sm:$0xff]  ;;  %v1511_v56 = vld [vmem:[%s8048_s1 + $0x320] sm:$0xff] }
 0x299   :  { %2094 = vmatpush.msrb.mxu1 %v920_v33  ;;  %2157 = vmatpush.msrb.mxu2 %v938_v43  ;;  %v1446_v33 = vld [vmem:[%s8048_s1 + $0x118] sm:$0xff]  ;;  %v1479_v43 = vld [vmem:[%s8048_s1 + $0x220] sm:$0xff]  ;;  %v1572_v50 = vld [vmem:[%s8048_s1 + $0x508] sm:$0xff] }
 0x29a   :  { %2077 = vmatmul.f32.gmra.mxu3 %v1859_v15  ;;  %2283 = vmatpush.msrb.mxu0 %v974_v40  ;;  %v1542_v15 = vld [vmem:[%s8048_s1 + $0x418] sm:$0xff]  ;;  %v1543_v40 = vld [vmem:[%s8048_s1 + $0x420] sm:$0xff] }
 0x29b   :  { %2095 = vmatpush.msrb.mxu1 %v919_v10  ;;  %2158 = vmatpush.msrb.mxu2 %v937_v61  ;;  %v1477_v10 = vld [vmem:[%s8048_s1 + $0x210] sm:$0xff] }
 0x29c   :  { %2065 = vmatmul.f32.gmra.mxu2 %v1731_v27  ;;  %2222 = vmatpush.msrb.mxu3 %v954_v63  ;;  %v1447_v27 = vld [vmem:[%s8048_s1 + $0x120] sm:$0xff]  ;;  %v1573_v61 = vld [vmem:[%s8048_s1 + $0x510] sm:$0xff]  ;;  %v1574_v63 = vld [vmem:[%s8048_s1 + $0x518] sm:$0xff] }
 0x29d   :  { %2096 = vmatpush.msrb.mxu1 %v918_v44  ;;  %1986 = vperm.xlu0 %4671, %v1932_v3   ;;  %v1540_v44 = vld [vmem:[%s8048_s1 + $0x408] sm:$0xff]  ;;  %v1605_v3 = vld [vmem:[%s8048_s1 + $0x610] sm:$0xff] }
 0x29e   :  { %2159 = vmatpush.msrb.mxu2 %v936_v22  ;;  %2223 = vmatpush.msrb.mxu3 %v953_v8  ;;  %v1606_v22 = vld [vmem:[%s8048_s1 + $0x618] sm:$0xff]  ;;  %v1575_v8 = vld [vmem:[%s8048_s1 + $0x520] sm:$0xff] }
 0x29f   :  { %2097 = vmatpush.msrb.mxu1 %v917_v59  ;;  %2284 = vmatpush.msrb.mxu0 %v973_v1  ;;  %v1604_v59 = vld [vmem:[%s8048_s1 + $0x608] sm:$0xff] }
 0x2a0   :  { %2160 = vmatpush.msrb.mxu2 %v935_v2  ;;  %2224 = vmatpush.msrb.mxu3 %v952_v26  ;;  %v1668_v1 = vld [vmem:[%s8048_s1 + $0x808] sm:$0xff]  ;;  %v1638_v2 = vld [vmem:[%s8048_s1 + $0x718] sm:$0xff] }
 0x2a1   :  { %2098 = vmatpush.msrb.mxu1 %v916_v12  ;;  %2285 = vmatpush.msrb.mxu0 %v972_v36  ;;  %v1636_v12 = vld [vmem:[%s8048_s1 + $0x708] sm:$0xff]  ;;  %v994_v26 = vld [vmem:[#allocation2 + $0x2f8] sm:$0xff]  ;;  %v993_v36 = vld [vmem:[#allocation2 + $0x2f0] sm:$0xff] }
 0x2a2   :  { %1991 = vperm.xlu2 %4673, %v1933_v41   ;;  %2161 = vmatpush.msrb.mxu2 %v934_v49  ;;  %v992_v41 = vld [vmem:[#allocation2 + $0x2e8] sm:$0xff]  ;;  %v991_v49 = vld [vmem:[#allocation2 + $0x2e0] sm:$0xff] }
 0x2a3   :  { %2099 = vmatpush.msrb.mxu1 %v915_v52  ;;  %2225 = vmatpush.msrb.mxu3 %v951_v39  ;;  %v1637_v52 = vld [vmem:[%s8048_s1 + $0x710] sm:$0xff] }
 0x2a4   :  { %2100 = vmatmul.f32.vlgmr.msrb.gmra.mxu1 %v1412_v16  ;;  %2068 = vmatmul.f32.gmra.mxu2 %v1763_v7  ;;  %v1607_v16 = vld [vmem:[%s8048_s1 + $0x620] sm:$0xff]  ;;  %v1700_v7 = vld [vmem:[%s8048_s1 + $0x908] sm:$0xff]  ;;  %v1669_v39 = vld [vmem:[%s8048_s1 + $0x810] sm:$0xff] }
 0x2a5   :  { %2286 = vmatpush.msrb.mxu0 %v971_v60  ;;  %2080 = vmatmul.f32.gmra.mxu3 %v1891_v62  ;;  %v1670_v60 = vld [vmem:[%s8048_s1 + $0x818] sm:$0xff] }
 0x2a6   :  { %2044 = vmatmul.f32.gmra.mxu0 %v1507_v24  ;;  %2162 = vmatpush.msrb.mxu2 %v933_v57  ;;  %v1639_v24 = vld [vmem:[%s8048_s1 + $0x720] sm:$0xff]  ;;  %v990_v62 = vld [vmem:[#allocation2 + $0x2d8] sm:$0xff] }
 0x2a7   :  { %2226 = vmatpush.msrb.mxu3 %v950_v5  ;;  %2287 = vmatpush.msrb.mxu0 %v970_v37  ;;  %v1010_v57 = vld [vmem:[#allocation2 + $0x378] sm:$0xff]  ;;  %v989_v5 = vld [vmem:[#allocation2 + $0x2d0] sm:$0xff] }
 0x2a8   :  { %1971 = vperm.xlu0 %4671, %v1929_v4   ;;  %2163 = vmatpush.msrb.mxu2 %v932_v11  ;;  %v1009_v37 = vld [vmem:[#allocation2 + $0x370] sm:$0xff]  ;;  %v1026_v4 = vld [vmem:[#allocation2 + $0x3f8] sm:$0xff]  ;;  %v988_v11 = vld [vmem:[#allocation2 + $0x2c8] sm:$0xff] }
 0x2a9   :  { %2227 = vmatpush.msrb.mxu3 %v949_v14  ;;  %2288 = vmatpush.msrb.mxu0 %v969_v0  ;;  %v1732_v14 = vld [vmem:[%s8048_s1 + $0xa08] sm:$0xff] }
 0x2aa   :  { %1966 = vperm.xlu1 %4672, %v1928_v13   ;;  %2164 = vmatpush.msrb.mxu2 %v931_v18  ;;  %v1008_v0 = vld [vmem:[#allocation2 + $0x368] sm:$0xff]  ;;  %v1025_v13 = vld [vmem:[#allocation2 + $0x3f0] sm:$0xff] }
 0x2ab   :  { %2228 = vmatpush.msrb.mxu3 %v948_v20  ;;  %2289 = vmatpush.msrb.mxu0 %v968_v25  ;;  %v1701_v18 = vld [vmem:[%s8048_s1 + $0x910] sm:$0xff]  ;;  %v1007_v20 = vld [vmem:[#allocation2 + $0x360] sm:$0xff]  ;;  %v1024_v25 = vld [vmem:[#allocation2 + $0x3e8] sm:$0xff] }
 0x2ac   :  { %2103 = vmatmul.f32.gmra.mxu1 %v1444_v17  ;;  %2165 = vmatmul.f32.vlgmr.msrb.gmra.mxu2 %v1413_v28  ;;  %v987_v17 = vld [vmem:[#allocation2 + $0x2c0] sm:$0xff]  ;;  %v1702_v28 = vld [vmem:[%s8048_s1 + $0x918] sm:$0xff] }
 0x2ad   :  { %1976 = vperm.xlu2 %4673, %v1930_v29   ;;  %2229 = vmatpush.msrb.mxu3 %v947_v30  ;;  %v1671_v29 = vld [vmem:[%s8048_s1 + $0x820] sm:$0xff]  ;;  %v986_v30 = vld [vmem:[#allocation2 + $0x2b8] sm:$0xff] }
 0x2ae   :  { %2290 = vmatpush.msrb.mxu0 %v967_v31  ;;  %2230 = vmatmul.f32.vlgmr.msrb.gmra.mxu3 %v1414_v42  ;;  %v1006_v31 = vld [vmem:[#allocation2 + $0x358] sm:$0xff]  ;;  %v985_v42 = vld [vmem:[#allocation2 + $0x2b0] sm:$0xff] }
 0x2af   :  { %2047 = vmatmul.f32.gmra.mxu0 %v1539_v32  ;;  %2344 = vmatpush.msra.mxu1 %v994_v26  ;;  %v1023_v32 = vld [vmem:[#allocation2 + $0x3e0] sm:$0xff] }
 0x2b0   :  { %2291 = vmatpush.msrb.mxu0 %v966_v35  ;;  %1956 = vperm.xlu0 %4671, %v1926_v34   ;;  %v1005_v35 = vld [vmem:[#allocation2 + $0x350] sm:$0xff]  ;;  %v1022_v34 = vld [vmem:[#allocation2 + $0x3d8] sm:$0xff] }
 0x2b1   :  { %2345 = vmatpush.msra.mxu1 %v993_v36  ;;  %2409 = vmatpush.msra.mxu2 %v1010_v57  ;;  %v1036_v36 = vld [vmem:[#allocation2 + $0x448] sm:$0xff] }
 0x2b2   :  { %2292 = vmatpush.msrb.mxu0 %v965_v38  ;;  %1951 = vperm.xlu1 %4672, %v1925_v9   ;;  %v1042_v38 = vld [vmem:[#allocation2 + $0x478] sm:$0xff]  ;;  %v1764_v9 = vld [vmem:[%s8048_s1 + $0xb08] sm:$0xff] }
 0x2b3   :  { %2346 = vmatpush.msra.mxu1 %v992_v41  ;;  %2410 = vmatpush.msra.mxu2 %v1009_v37  ;;  %v1828_v41 = vld [vmem:[%s8048_s1 + $0xd08] sm:$0xff]  ;;  %v997_v37 = vld [vmem:[#allocation2 + $0x310] sm:$0xff] }
 0x2b4   :  { %2106 = vmatmul.f32.gmra.mxu1 %v1476_v58  ;;  %2293 = vmatpush.msrb.mxu0 %v964_v47  ;;  %v984_v58 = vld [vmem:[#allocation2 + $0x2a8] sm:$0xff] }
 0x2b5   :  { %2168 = vmatmul.f32.gmra.mxu2 %v1445_v54  ;;  %1961 = vperm.xlu2 %4673, %v1927_v6   ;;  %v1004_v47 = vld [vmem:[#allocation2 + $0x348] sm:$0xff]  ;;  %v1021_v54 = vld [vmem:[#allocation2 + $0x3d0] sm:$0xff] }
 0x2b6   :  { %2294 = vmatpush.msrb.mxu0 %v963_v46  ;;  %2233 = vmatmul.f32.gmra.mxu3 %v1446_v33  ;;  %v1041_v6 = vld [vmem:[#allocation2 + $0x470] sm:$0xff]  ;;  %v983_v33 = vld [vmem:[#allocation2 + $0x2a0] sm:$0xff] }
 0x2b7   :  { %2295 = vmatmul.f32.vlgmr.msrb.gmra.mxu0 %v1415_v53  ;;  %2347 = vmatpush.msra.mxu1 %v991_v49  ;;  %v1733_v46 = vld [vmem:[%s8048_s1 + $0xa10] sm:$0xff]  ;;  %v1003_v53 = vld [vmem:[#allocation2 + $0x340] sm:$0xff]  ;;  %v998_v49 = vld [vmem:[#allocation2 + $0x318] sm:$0xff] }
 0x2b8   :  { %1941 = vperm.xlu0 %4671, %v1923_v21   ;;  %2474 = vmatpush.msra.mxu3 %v1026_v4  ;;  %v1020_v21 = vld [vmem:[#allocation2 + $0x3c8] sm:$0xff]  ;;  %v1014_v4 = vld [vmem:[#allocation2 + $0x398] sm:$0xff] }
 0x2b9   :  { %2348 = vmatpush.msra.mxu1 %v990_v62  ;;  %2411 = vmatpush.msra.mxu2 %v1008_v0  ;;  %v1034_v0 = vld [vmem:[#allocation2 + $0x438] sm:$0xff] }
 0x2ba   :  { %2475 = vmatpush.msra.mxu3 %v1025_v13  ;;  %2539 = vmatpush.msra.mxu0 %v1042_v38  ;;  %v996_v13 = vld [vmem:[#allocation2 + $0x308] sm:$0xff] }
 0x2bb   :  { %2349 = vmatpush.msra.mxu1 %v989_v5  ;;  %2412 = vmatpush.msra.mxu2 %v1007_v20  ;;  %v1033_v20 = vld [vmem:[#allocation2 + $0x430] sm:$0xff] }
 0x2bc   :  { %2109 = vmatmul.f32.gmra.mxu1 %v1508_v19  ;;  %2476 = vmatpush.msra.mxu3 %v1024_v25  ;;  %v1734_v19 = vld [vmem:[%s8048_s1 + $0xa18] sm:$0xff]  ;;  %v995_v25 = vld [vmem:[#allocation2 + $0x300] sm:$0xff] }
 0x2bd   :  { %2171 = vmatmul.f32.gmra.mxu2 %v1477_v10  ;;  %1946 = vperm.xlu2 %4673, %v1924_v23   ;;  %v1703_v10 = vld [vmem:[%s8048_s1 + $0x920] sm:$0xff]  ;;  %v5776_v23 = vpop.permute.xlu0 %2016 }
 0x2be   :  { %2236 = vmatmul.f32.gmra.mxu3 %v1478_v45  ;;  %2350 = vmatpush.msra.mxu1 %v988_v11  ;;  %v1040_v45 = vld [vmem:[#allocation2 + $0x468] sm:$0xff]  ;;  %v1798_v11 = vld [vmem:[%s8048_s1 + $0xc18] sm:$0xff] }
 0x2bf   :  { %2298 = vmatmul.f32.gmra.mxu0 %v1447_v27  ;;  %2413 = vmatpush.msra.mxu2 %v1006_v31  ;;  %v982_v27 = vld [vmem:[#allocation2 + $0x298] sm:$0xff] }
 0x2c0   :  { %2351 = vmatpush.msra.mxu1 %v987_v17  ;;  %2477 = vmatpush.msra.mxu3 %v1023_v32  ;;  %v1013_v17 = vld [vmem:[#allocation2 + $0x390] sm:$0xff]  ;;  %v1032_v32 = vld [vmem:[#allocation2 + $0x428] sm:$0xff] }
 0x2c1   :  { %2414 = vmatpush.msra.mxu2 %v1005_v35  ;;  %2540 = vmatpush.msra.mxu0 %v1041_v6  ;;  %v1829_v35 = vld [vmem:[%s8048_s1 + $0xd10] sm:$0xff] }
 0x2c2   :  { %2352 = vmatpush.msra.mxu1 %v986_v30  ;;  %2478 = vmatpush.msra.mxu3 %v1022_v34  ;;  %v5821_v30 = vpop.permute.xlu1 %2006  ;;  %v1011_v34 = vld [vmem:[#allocation2 + $0x380] sm:$0xff] }
 0x2c3   :  { %2415 = vmatpush.msra.mxu2 %v1004_v47  ;;  %2541 = vmatpush.msra.mxu0 %v1040_v45  ;;  %v1799_v47 = vld [vmem:[%s8048_s1 + $0xc20] sm:$0xff]  ;;  %v1861_v45 = vld [vmem:[%s8048_s1 + $0xe10] sm:$0xff] }
 0x2c4   :  { %2112 = vmatmul.f32.gmra.mxu1 %v1540_v44  ;;  %2479 = vmatpush.msra.mxu3 %v1021_v54  ;;  %v1002_v44 = vld [vmem:[#allocation2 + $0x338] sm:$0xff] }
 0x2c5   :  { %2174 = vmatmul.f32.gmra.mxu2 %v1509_v48  ;;  %2353 = vmatpush.msra.mxu1 %v985_v42  ;;  %v1019_v48 = vld [vmem:[#allocation2 + $0x3c0] sm:$0xff]  ;;  %v5794_v26 = vpop.permute.xlu0 %2011 }
 0x2c6   :  { %2239 = vmatmul.f32.gmra.mxu3 %v1510_v51  ;;  %2416 = vmatpush.msra.mxu2 %v1003_v53  ;;  %v1039_v51 = vld [vmem:[#allocation2 + $0x460] sm:$0xff]  ;;  %v1892_v53 = vld [vmem:[%s8048_s1 + $0xf08] sm:$0xff] }
 0x2c7   :  { %2301 = vmatmul.f32.gmra.mxu0 %v1479_v43  ;;  %2354 = vmatpush.msra.mxu1 %v984_v58  ;;  %v981_v43 = vld [vmem:[#allocation2 + $0x290] sm:$0xff]  ;;  %v1830_v58 = vld [vmem:[%s8048_s1 + $0xd18] sm:$0xff] }
 0x2c8   :  { %2480 = vmatpush.msra.mxu3 %v1020_v21  ;;  %2417 = vmatpush.msra.mxu2 %v1002_v44  ;;  %v1027_v44 = vld [vmem:[#allocation2 + $0x400] sm:$0xff] }
 0x2c9   :  { %2355 = vmatpush.msra.mxu1 %v983_v33  ;;  %2542 = vmatpush.msra.mxu0 %v1039_v51  ;;  %v1029_v33 = vld [vmem:[#allocation2 + $0x410] sm:$0xff]  ;;  %v1862_v51 = vld [vmem:[%s8048_s1 + $0xe18] sm:$0xff] }
 0x2ca   :  { %2481 = vmatpush.msra.mxu3 %v1019_v48 }
 0x2cb   :  { %2356 = vmatpush.msra.mxu1 %v982_v27  ;;  %v5852_v27 = vpop.permute.xlu1 %2001 }
 0x2cc   :  { %2115 = vmatmul.f32.gmra.mxu1 %v1572_v50  ;;  %v1796_v50 = vld [vmem:[%s8048_s1 + $0xc08] sm:$0xff] }
 0x2cd   :  { %2177 = vmatmul.f32.gmra.mxu2 %v1541_v55  ;;  %v1001_v55 = vld [vmem:[#allocation2 + $0x330] sm:$0xff]  ;;  %2357 = vmatpush.msra.mxu1 %v981_v43  ;;  %v1831_v43 = vld [vmem:[%s8048_s1 + $0xd20] sm:$0xff] }
 0x2ce   :  { %2242 = vmatmul.f32.gmra.mxu3 %v1542_v15  ;;  %v1018_v15 = vld [vmem:[#allocation2 + $0x3b8] sm:$0xff]  ;;  %2418 = vmatpush.msra.mxu2 %v1001_v55 }
 0x2cf   :  { %2304 = vmatmul.f32.gmra.mxu0 %v1511_v56  ;;  %v1038_v56 = vld [vmem:[#allocation2 + $0x458] sm:$0xff]  ;;  %2482 = vmatpush.msra.mxu3 %v1018_v15 }
 0x2d0   :  { %2543 = vmatpush.msra.mxu0 %v1038_v56  ;;  %v1416_v56 = vld [vmem:[%s8048_s1 + $0x28] sm:$0xff] }
 0x2d4   :  { %2118 = vmatmul.f32.gmra.mxu1 %v1604_v59  ;;  %v1765_v59 = vld [vmem:[%s8048_s1 + $0xb10] sm:$0xff] }
 0x2d5   :  { %2180 = vmatmul.f32.gmra.mxu2 %v1573_v61  ;;  %v980_v61 = vld [vmem:[#allocation2 + $0x288] sm:$0xff] }
 0x2d6   :  { %2245 = vmatmul.f32.gmra.mxu3 %v1574_v63  ;;  %2358 = vmatpush.msra.mxu1 %v980_v61  ;;  %v1893_v61 = vld [vmem:[%s8048_s1 + $0xf10] sm:$0xff] }
 0x2d7   :  { %2307 = vmatmul.f32.gmra.mxu0 %v1543_v40  ;;  %v1000_v40 = vld [vmem:[#allocation2 + $0x328] sm:$0xff] }
 0x2d8   :  { %2419 = vmatpush.msra.mxu2 %v1000_v40 }
 0x2dc   :  { %2121 = vmatmul.f32.gmra.mxu1 %v1636_v12  ;;  %v1017_v12 = vld [vmem:[#allocation2 + $0x3b0] sm:$0xff] }
 0x2dd   :  { %2183 = vmatmul.f32.gmra.mxu2 %v1605_v3  ;;  %v1766_v3 = vld [vmem:[%s8048_s1 + $0xb18] sm:$0xff]  ;;  %2483 = vmatpush.msra.mxu3 %v1017_v12 }
 0x2de   :  { %2248 = vmatmul.f32.gmra.mxu3 %v1606_v22  ;;  %v1735_v22 = vld [vmem:[%s8048_s1 + $0xa20] sm:$0xff]  ;;  %v1894_v12 = vld [vmem:[%s8048_s1 + $0xf18] sm:$0xff] }
 0x2df   :  { %2310 = vmatmul.f32.gmra.mxu0 %v1575_v8 }
 0x2e4   :  { %2124 = vmatmul.f32.gmra.mxu1 %v1668_v1  ;;  %v1037_v1 = vld [vmem:[#allocation2 + $0x450] sm:$0xff] }
 0x2e5   :  { %2186 = vmatmul.f32.gmra.mxu2 %v1637_v52  ;;  %v979_v52 = vld [vmem:[#allocation2 + $0x280] sm:$0xff]  ;;  %2544 = vmatpush.msra.mxu0 %v1037_v1  ;;  %v5882_v1 = vpop.permute.xlu1 %1981 }
 0x2e6   :  { %2251 = vmatmul.f32.gmra.mxu3 %v1638_v2  ;;  %v999_v2 = vld [vmem:[#allocation2 + $0x320] sm:$0xff]  ;;  %2359 = vmatpush.msra.mxu1 %v979_v52 }
 0x2e7   :  { %2313 = vmatmul.f32.gmra.mxu0 %v1607_v16  ;;  %v1016_v16 = vld [vmem:[#allocation2 + $0x3a8] sm:$0xff]  ;;  %2420 = vmatpush.msra.mxu2 %v999_v2 }
 0x2e8   :  { %2484 = vmatpush.msra.mxu3 %v1016_v16  ;;  %2545 = vmatpush.msra.mxu0 %v1036_v36  ;;  %v1448_v16 = vld [vmem:[%s8048_s1 + $0x128] sm:$0xff] }
 0x2e9   :  { %2421 = vmatpush.msra.mxu2 %v998_v49  ;;  %v1417_v49 = vld [vmem:[%s8048_s1 + $0x30] sm:$0xff] }
 0x2eb   :  { %2422 = vmatpush.msra.mxu2 %v997_v37  ;;  %v1418_v37 = vld [vmem:[%s8048_s1 + $0x38] sm:$0xff] }
 0x2ec   :  { %2127 = vmatmul.f32.gmra.mxu1 %v1700_v7  ;;  %v5796_v7 = vpop.permute.xlu2 %1996 }
 0x2ed   :  { %2189 = vmatmul.f32.gmra.mxu2 %v1669_v39  ;;  %v1015_v39 = vld [vmem:[#allocation2 + $0x3a0] sm:$0xff] }
 0x2ee   :  { %2254 = vmatmul.f32.gmra.mxu3 %v1670_v60  ;;  %v1035_v60 = vld [vmem:[#allocation2 + $0x440] sm:$0xff]  ;;  %2423 = vmatpush.msra.mxu2 %v996_v13 }
 0x2ef   :  { %2316 = vmatmul.f32.gmra.mxu0 %v1639_v24  ;;  %v1797_v24 = vld [vmem:[%s8048_s1 + $0xc10] sm:$0xff]  ;;  %2485 = vmatpush.msra.mxu3 %v1015_v39 }
 0x2f0   :  { %2546 = vmatpush.msra.mxu0 %v1035_v60  ;;  %2424 = vmatpush.msra.mxu2 %v995_v25 }
 0x2f1   :  { %2486 = vmatpush.msra.mxu3 %v1014_v4 }
 0x2f2   :  { %2547 = vmatpush.msra.mxu0 %v1034_v0 }
 0x2f3   :  { %2487 = vmatpush.msra.mxu3 %v1013_v17 }
 0x2f4   :  { %2130 = vmatmul.f32.gmra.mxu1 %v1732_v14  ;;  %v1767_v14 = vld [vmem:[%s8048_s1 + $0xb20] sm:$0xff]  ;;  %2548 = vmatpush.msra.mxu0 %v1033_v20 }
 0x2f5   :  { %2192 = vmatmul.f32.gmra.mxu2 %v1701_v18 }
 0x2f6   :  { %2257 = vmatmul.f32.gmra.mxu3 %v1702_v28  ;;  %v1860_v28 = vld [vmem:[%s8048_s1 + $0xe08] sm:$0xff]  ;;  %2549 = vmatpush.msra.mxu0 %v1032_v32 }
 0x2f7   :  { %2319 = vmatmul.f32.gmra.mxu0 %v1671_v29  ;;  %v1012_v29 = vld [vmem:[#allocation2 + $0x388] sm:$0xff] }
 0x2f8   :  { %2488 = vmatpush.msra.mxu3 %v1012_v29 }
 0x2fa   :  { %2489 = vmatpush.msra.mxu3 %v1011_v34  ;;  %v1419_v34 = vld [vmem:[%s8048_s1 + $0x40] sm:$0xff] }
 0x2fc   :  { %2133 = vmatmul.f32.gmra.mxu1 %v1764_v9  ;;  %v5825_v42 = vpop.permute.xlu2 %1991  ;;  %v1031_v9 = vld [vmem:[#allocation2 + $0x420] sm:$0xff] }
 0x2fd   :  { %2195 = vmatmul.f32.gmra.mxu2 %v1733_v46  ;;  %v1030_v46 = vld [vmem:[#allocation2 + $0x418] sm:$0xff]  ;;  %2550 = vmatpush.msra.mxu0 %v1031_v9 }
 0x2fe   :  { %2260 = vmatmul.f32.gmra.mxu3 %v1734_v19  ;;  %v1028_v19 = vld [vmem:[#allocation2 + $0x408] sm:$0xff] }
 0x2ff   :  { %2322 = vmatmul.f32.gmra.mxu0 %v1703_v10 }
 0x300   :  { %2551 = vmatpush.msra.mxu0 %v1030_v46  ;;  %v1512_v46 = vld [vmem:[%s8048_s1 + $0x328] sm:$0xff] }
 0x302   :  { %2552 = vmatpush.msra.mxu0 %v1029_v33 }
 0x303   :  { %v5792_v8 = vpop.f32.mrf.mxu0 }
 0x304   :  { %2136 = vmatmul.f32.gmra.mxu1 %v1796_v50  ;;  %2553 = vmatpush.msra.mxu0 %v1028_v19 }
 0x305   :  { %2198 = vmatmul.f32.gmra.mxu2 %v1765_v59 }
 0x306   :  { %2263 = vmatmul.f32.gmra.mxu3 %v1766_v3  ;;  %2554 = vmatpush.msra.mxu0 %v1027_v44  ;;  %v1863_v3 = vld [vmem:[%s8048_s1 + $0xe20] sm:$0xff] }
 0x307   :  { %v5784_v63 = vpop.f32.mrf.mxu2  ;;  %2325 = vmatmul.f32.gmra.mxu0 %v1735_v22  ;;  %v5854_v48 = vpop.permute.xlu2 %1976 }
 0x309   :  { %v5804_v62 = vpop.f32.mrf.mxu1 }
 0x30a   :  { %v5808_v5 = vpop.f32.mrf.mxu3 }
 0x30b   :  { %v5816_v18 = vpop.f32.mrf.mxu0 }
 0x30c   :  { %2139 = vmatmul.f32.gmra.mxu1 %v1828_v41 }
 0x30d   :  { %2201 = vmatmul.f32.gmra.mxu2 %v1797_v24  ;;  %v1895_v24 = vld [vmem:[%s8048_s1 + $0xf20] sm:$0xff] }
 0x30e   :  { %2266 = vmatmul.f32.gmra.mxu3 %v1798_v11 }
 0x30f   :  { %v5806_v57 = vpop.f32.mrf.mxu2  ;;  %2328 = vmatmul.f32.gmra.mxu0 %v1767_v14  ;;  %v5823_v31 = vpop.permute.xlu0 %1986 }
 0x310   :  { %v5880_v22 = vpop.permute.xlu2 %1961 }
 0x313   :  { %v5838_v54 = vpop.f32.mrf.mxu1 }
 0x314   :  { %2142 = vmatmul.f32.gmra.mxu1 %v1860_v28  ;;  %v5840_v6 = vpop.f32.mrf.mxu3  ;;  %v1449_v28 = vld [vmem:[%s8048_s1 + $0x130] sm:$0xff] }
 0x315   :  { %2204 = vmatmul.f32.gmra.mxu2 %v1829_v35  ;;  %v5845_v21 = vpop.f32.mrf.mxu0  ;;  %v1450_v35 = vld [vmem:[%s8048_s1 + $0x138] sm:$0xff] }
 0x316   :  { %2269 = vmatmul.f32.gmra.mxu3 %v1830_v58 }
 0x317   :  { %v5830_v38 = vpop.f32.mrf.mxu2  ;;  %2331 = vmatmul.f32.gmra.mxu0 %v1799_v47 }
 0x318   :  { %v1947_v14 = vpop.permute.xlu2 %1946 }
 0x319   :  { %v2040_v20 = vadd.f32 %v5816_v18, %v1947_v14  ;;  %v1576_v14 = vld [vmem:[%s8048_s1 + $0x528] sm:$0xff] }
 0x31a   :  { %v5847_v10 = vpop.permute.xlu0 %1971 }
 0x31c   :  { %2145 = vmatmul.f32.gmra.mxu1 %v1892_v53  ;;  %v5901_v11 = vpop.permute.xlu1 %1966 }
 0x31d   :  { %2207 = vmatmul.f32.gmra.mxu2 %v1861_v45  ;;  %v5864_v15 = vpop.f32.mrf.mxu3  ;;  %v1481_v45 = vld [vmem:[%s8048_s1 + $0x230] sm:$0xff] }
 0x31e   :  { %2272 = vmatmul.f32.gmra.mxu3 %v1862_v51 }
 0x31f   :  { %v5862_v50 = vpop.f32.mrf.mxu2  ;;  %2334 = vmatmul.f32.gmra.mxu0 %v1831_v43  ;;  %v1482_v43 = vld [vmem:[%s8048_s1 + $0x238] sm:$0xff] }
 0x321   :  { %v2101_v55 = vpop.f32.mrf.mxu1 }
 0x322   :  { %v5869_v59 = vpop.permute.xlu0 %1956 }
 0x323   :  { %v2045_v40 = vpop.f32.mrf.mxu0 }
 0x324   :  { %2360 = vmatmul.f32.vlgmr.msra.gmra.mxu1 %v1416_v56  ;;  %v1952_v18 = vpop.permute.xlu1 %1951 }
 0x325   :  { %2210 = vmatmul.f32.gmra.mxu2 %v1893_v61  ;;  %v2043_v53 = vadd.f32 %v5845_v21, %v1952_v18 }
 0x326   :  { %2275 = vmatmul.f32.gmra.mxu3 %v1894_v12  ;;  %v1544_v12 = vld [vmem:[%s8048_s1 + $0x428] sm:$0xff] }
 0x327   :  { %v5884_v52 = vpop.f32.mrf.mxu2  ;;  %2337 = vmatmul.f32.gmra.mxu0 %v1863_v3  ;;  %v2046_v3 = vadd.f32 %v2045_v40, %v5869_v59 }
 0x328   :  { %v5889_v36 = vpop.f32.mrf.mxu3 }
 0x329   :  { %v2104_v2 = vpop.f32.mrf.mxu1 }
 0x32a   :  { %v1942_v41 = vpop.permute.xlu0 %1941  ;;  %v2105_v9 = vadd.f32 %v2104_v2, %v2040_v20 }
 0x32b   :  { %v2037_v39 = vadd.f32 %v5792_v8, %v1942_v41  ;;  %v1480_v8 = vld [vmem:[%s8048_s1 + $0x228] sm:$0xff]  ;;  %v1513_v41 = vld [vmem:[%s8048_s1 + $0x330] sm:$0xff] }
 0x32c   :  { %2363 = vmatmul.f32.gmra.mxu1 %v1448_v16  ;;  %v2048_v60 = vpop.f32.mrf.mxu0 }
 0x32d   :  { %v2102_v4 = vadd.f32 %v2101_v55, %v2037_v39  ;;  %2425 = vmatmul.f32.vlgmr.msra.gmra.mxu2 %v1417_v49  ;;  %v1451_v55 = vld [vmem:[%s8048_s1 + $0x140] sm:$0xff] }
 0x32e   :  { %2490 = vmatmul.f32.vlgmr.msra.gmra.mxu3 %v1418_v37  ;;  %v1483_v37 = vld [vmem:[%s8048_s1 + $0x240] sm:$0xff] }
 0x32f   :  { %2340 = vmatmul.f32.gmra.mxu0 %v1895_v24  ;;  %v2166_v0 = vpop.f32.mrf.mxu2  ;;  %v1514_v24 = vld [vmem:[%s8048_s1 + $0x338] sm:$0xff] }
 0x330   :  { %v2167_v17 = vadd.f32 %v2166_v0, %v2102_v4  ;;  %v2049_v0 = vadd.f32 %v2048_v60, %v5880_v22 }
 0x331   :  { %v2107_v13 = vpop.f32.mrf.mxu1  ;;  %v2231_v25 = vpop.f32.mrf.mxu3 }
 0x332   :  { %v5910_v29 = vadd.f32 %v2231_v25, %v2167_v17  ;;  %v2108_v56 = vadd.f32 %v2107_v13, %v2043_v53  ;;  %v1545_v17 = vld [vmem:[%s8048_s1 + $0x430] sm:$0xff]  ;;  %v1578_v53 = vld [vmem:[%s8048_s1 + $0x538] sm:$0xff] }
 0x334   :  { %2366 = vmatmul.f32.gmra.mxu1 %v1480_v8  ;;  %v5912_v32 = vpop.f32.mrf.mxu0 }
 0x335   :  { %2428 = vmatmul.f32.gmra.mxu2 %v1449_v28  ;;  %v1546_v28 = vld [vmem:[%s8048_s1 + $0x438] sm:$0xff] }
 0x336   :  { %2493 = vmatmul.f32.gmra.mxu3 %v1450_v35  ;;  %v1515_v35 = vld [vmem:[%s8048_s1 + $0x340] sm:$0xff] }
 0x337   :  { %2555 = vmatmul.f32.vlgmr.msra.gmra.mxu0 %v1419_v34 }
 0x338   :  { %v2169_v58 = vpop.f32.mrf.mxu2 }
 0x339   :  { %v2110_v47 = vpop.f32.mrf.mxu1  ;;  %v2170_v33 = vadd.f32 %v2169_v58, %v2105_v9  ;;  %v2234_v19 = vpop.f32.mrf.mxu3  ;;  %v1608_v9 = vld [vmem:[%s8048_s1 + $0x628] sm:$0xff] }
 0x33a   :  { %v2111_v59 = vadd.f32 %v2110_v47, %v2046_v3  ;;  %v1577_v47 = vld [vmem:[%s8048_s1 + $0x530] sm:$0xff] }
 0x33b   :  { %v5927_v44 = vadd.f32 %v2234_v19, %v2170_v33  ;;  %v1547_v19 = vld [vmem:[%s8048_s1 + $0x440] sm:$0xff]  ;;  %v1609_v3 = vld [vmem:[%s8048_s1 + $0x630] sm:$0xff] }
 0x33c   :  { %2369 = vmatmul.f32.gmra.mxu1 %v1512_v46  ;;  %v5929_v51 = vpop.f32.mrf.mxu0 }
 0x33d   :  { %2431 = vmatmul.f32.gmra.mxu2 %v1481_v45  ;;  %v2052_v45 = vadd.f32 %v5804_v62, %v5901_v11  ;;  %v1610_v11 = vld [vmem:[%s8048_s1 + $0x638] sm:$0xff] }
 0x33e   :  { %2496 = vmatmul.f32.gmra.mxu3 %v1482_v43 }
 0x33f   :  { %2558 = vmatmul.f32.gmra.mxu0 %v1451_v55 }
 0x340   :  { %v2172_v21 = vpop.f32.mrf.mxu2 }
 0x341   :  { %v2113_v61 = vpop.f32.mrf.mxu1  ;;  %v2173_v2 = vadd.f32 %v2172_v21, %v2108_v56  ;;  %v2237_v16 = vpop.f32.mrf.mxu3  ;;  %v1640_v21 = vld [vmem:[%s8048_s1 + $0x728] sm:$0xff] }
 0x342   :  { %v2114_v22 = vadd.f32 %v2113_v61, %v2049_v0  ;;  %v1641_v0 = vld [vmem:[%s8048_s1 + $0x730] sm:$0xff] }
 0x343   :  { %v5944_v49 = vadd.f32 %v2237_v16, %v2173_v2  ;;  %v1579_v16 = vld [vmem:[%s8048_s1 + $0x540] sm:$0xff] }
 0x344   :  { %2372 = vmatmul.f32.gmra.mxu1 %v1544_v12  ;;  %v5946_v39 = vpop.f32.mrf.mxu0 }
 0x345   :  { %2434 = vmatmul.f32.gmra.mxu2 %v1513_v41  ;;  %v2055_v41 = vadd.f32 %v5838_v54, %v5847_v10  ;;  %v1642_v10 = vld [vmem:[%s8048_s1 + $0x738] sm:$0xff] }
 0x346   :  { %2499 = vmatmul.f32.gmra.mxu3 %v1514_v24 }
 0x347   :  { %2561 = vmatmul.f32.gmra.mxu0 %v1483_v37 }
 0x348   :  { %v2175_v40 = vpop.f32.mrf.mxu2 }
 0x349   :  { %v2116_v4 = vpop.f32.mrf.mxu1  ;;  %v2176_v13 = vadd.f32 %v2175_v40, %v2111_v59  ;;  %v2240_v8 = vpop.f32.mrf.mxu3  ;;  %v1672_v40 = vld [vmem:[%s8048_s1 + $0x828] sm:$0xff] }
 0x34a   :  { %v2117_v43 = vadd.f32 %v2116_v4, %v2052_v45  ;;  %v1674_v45 = vld [vmem:[%s8048_s1 + $0x838] sm:$0xff] }
 0x34b   :  { %v5961_v20 = vadd.f32 %v2240_v8, %v2176_v13  ;;  %v1611_v8 = vld [vmem:[%s8048_s1 + $0x640] sm:$0xff] }
 0x34c   :  { %2375 = vmatmul.f32.gmra.mxu1 %v1576_v14  ;;  %v5963_v25 = vpop.f32.mrf.mxu0 }
 0x34d   :  { %2437 = vmatmul.f32.gmra.mxu2 %v1545_v17  ;;  %v1058_v17 = vld [vmem:[#allocation2 + $0x4f8] sm:$0xff] }
 0x34e   :  { %2502 = vmatmul.f32.gmra.mxu3 %v1546_v28  ;;  %v2058_v28 = vadd.f32 %v5784_v63, %v5854_v48  ;;  %2604 = vmatpush.msrb.mxu1 %v1058_v17  ;;  %v1673_v63 = vld [vmem:[%s8048_s1 + $0x830] sm:$0xff]  ;;  %v1055_v48 = vld [vmem:[#allocation2 + $0x4e0] sm:$0xff] }
 0x34f   :  { %2564 = vmatmul.f32.gmra.mxu0 %v1515_v35  ;;  %v1057_v35 = vld [vmem:[#allocation2 + $0x4f0] sm:$0xff] }
 0x350   :  { %v2178_v60 = vpop.f32.mrf.mxu2  ;;  %2605 = vmatpush.msrb.mxu1 %v1057_v35  ;;  %v1675_v35 = vld [vmem:[%s8048_s1 + $0x840] sm:$0xff] }
 0x351   :  { %v2119_v34 = vpop.f32.mrf.mxu1  ;;  %v2179_v18 = vadd.f32 %v2178_v60, %v2114_v22  ;;  %v2243_v58 = vpop.f32.mrf.mxu3 }
 0x352   :  { %v2120_v24 = vadd.f32 %v2119_v34, %v2055_v41 }
 0x353   :  { %v5977_v46 = vadd.f32 %v2243_v58, %v2179_v18  ;;  %v1056_v18 = vld [vmem:[#allocation2 + $0x4e8] sm:$0xff] }
 0x354   :  { %2378 = vmatmul.f32.gmra.mxu1 %v1608_v9  ;;  %v5979_v33 = vpop.f32.mrf.mxu0  ;;  %v1704_v9 = vld [vmem:[%s8048_s1 + $0x928] sm:$0xff] }
 0x355   :  { %2440 = vmatmul.f32.gmra.mxu2 %v1577_v47  ;;  %2606 = vmatpush.msrb.mxu1 %v1056_v18  ;;  %v1087_v18 = vld [vmem:[#allocation2 + $0x5e0] sm:$0xff] }
 0x356   :  { %2505 = vmatmul.f32.gmra.mxu3 %v1578_v53 }
 0x357   :  { %2567 = vmatmul.f32.gmra.mxu0 %v1547_v19  ;;  %2607 = vmatpush.msrb.mxu1 %v1055_v48  ;;  %v1086_v48 = vld [vmem:[#allocation2 + $0x5d8] sm:$0xff] }
 0x358   :  { %v2181_v55 = vpop.f32.mrf.mxu2 }
 0x359   :  { %v2122_v56 = vpop.f32.mrf.mxu1  ;;  %v2182_v61 = vadd.f32 %v2181_v55, %v2117_v43  ;;  %v2246_v12 = vpop.f32.mrf.mxu3  ;;  %v1643_v43 = vld [vmem:[%s8048_s1 + $0x740] sm:$0xff]  ;;  %v1054_v55 = vld [vmem:[#allocation2 + $0x4d8] sm:$0xff] }
 0x35a   :  { %v2123_v22 = vadd.f32 %v2122_v56, %v2058_v28  ;;  %v2061_v56 = vadd.f32 %v5806_v57, %v5882_v1  ;;  %2608 = vmatpush.msrb.mxu1 %v1054_v55  ;;  %v1052_v57 = vld [vmem:[#allocation2 + $0x4c8] sm:$0xff]  ;;  %v1706_v28 = vld [vmem:[%s8048_s1 + $0x938] sm:$0xff] }
 0x35b   :  { %v5995_v2 = vadd.f32 %v2246_v12, %v2182_v61  ;;  %v1053_v61 = vld [vmem:[#allocation2 + $0x4d0] sm:$0xff] }
 0x35c   :  { %2381 = vmatmul.f32.gmra.mxu1 %v1640_v21  ;;  %v5997_v62 = vpop.f32.mrf.mxu0  ;;  %v1074_v21 = vld [vmem:[#allocation2 + $0x578] sm:$0xff] }
 0x35d   :  { %2443 = vmatmul.f32.gmra.mxu2 %v1609_v3  ;;  %v1073_v3 = vld [vmem:[#allocation2 + $0x570] sm:$0xff]  ;;  %2609 = vmatpush.msrb.mxu1 %v1053_v61 }
 0x35e   :  { %2508 = vmatmul.f32.gmra.mxu3 %v1610_v11  ;;  %2669 = vmatpush.msrb.mxu2 %v1074_v21  ;;  %v1090_v11 = vld [vmem:[#allocation2 + $0x5f8] sm:$0xff]  ;;  %v1068_v21 = vld [vmem:[#allocation2 + $0x548] sm:$0xff]  ;;  %v1105_v61 = vld [vmem:[#allocation2 + $0x670] sm:$0xff] }
 0x35f   :  { %2570 = vmatmul.f32.gmra.mxu0 %v1579_v16  ;;  %2734 = vmatpush.msrb.mxu3 %v1090_v11  ;;  %v1047_v11 = vld [vmem:[#allocation2 + $0x4a0] sm:$0xff] }
 0x360   :  { %v2184_v37 = vpop.f32.mrf.mxu2  ;;  %2670 = vmatpush.msrb.mxu2 %v1073_v3  ;;  %2610 = vmatpush.msrb.mxu1 %v1052_v57  ;;  %v1737_v3 = vld [vmem:[%s8048_s1 + $0xa30] sm:$0xff]  ;;  %v1084_v57 = vld [vmem:[#allocation2 + $0x5c8] sm:$0xff] }
 0x361   :  { %v2125_v59 = vpop.f32.mrf.mxu1  ;;  %v2185_v4 = vadd.f32 %v2184_v37, %v2120_v24  ;;  %v2249_v14 = vpop.f32.mrf.mxu3  ;;  %v1736_v24 = vld [vmem:[%s8048_s1 + $0xa28] sm:$0xff] }
 0x362   :  { %v2126_v12 = vadd.f32 %v2125_v59, %v2061_v56  ;;  %v1072_v37 = vld [vmem:[#allocation2 + $0x568] sm:$0xff]  ;;  %v1705_v59 = vld [vmem:[%s8048_s1 + $0x930] sm:$0xff] }
 0x363   :  { %v6013_v13 = vadd.f32 %v2249_v14, %v2185_v4  ;;  %2671 = vmatpush.msrb.mxu2 %v1072_v37  ;;  %v1051_v14 = vld [vmem:[#allocation2 + $0x4c0] sm:$0xff]  ;;  %v1738_v37 = vld [vmem:[%s8048_s1 + $0xa38] sm:$0xff] }
 0x364   :  { %2384 = vmatmul.f32.gmra.mxu1 %v1672_v40  ;;  %v6015_v54 = vpop.f32.mrf.mxu0  ;;  %v1089_v40 = vld [vmem:[#allocation2 + $0x5f0] sm:$0xff] }
 0x365   :  { %2446 = vmatmul.f32.gmra.mxu2 %v1641_v0  ;;  %2735 = vmatpush.msrb.mxu3 %v1089_v40  ;;  %v1707_v40 = vld [vmem:[%s8048_s1 + $0x940] sm:$0xff] }
 0x366   :  { %2511 = vmatmul.f32.gmra.mxu3 %v1642_v10  ;;  %v1071_v10 = vld [vmem:[#allocation2 + $0x560] sm:$0xff]  ;;  %2611 = vmatpush.msrb.mxu1 %v1051_v14  ;;  %v1046_v14 = vld [vmem:[#allocation2 + $0x498] sm:$0xff] }
 0x367   :  { %2573 = vmatmul.f32.gmra.mxu0 %v1611_v8  ;;  %v1088_v8 = vld [vmem:[#allocation2 + $0x5e8] sm:$0xff]  ;;  %2672 = vmatpush.msrb.mxu2 %v1071_v10  ;;  %v1066_v10 = vld [vmem:[#allocation2 + $0x538] sm:$0xff] }
 0x368   :  { %v2187_v60 = vpop.f32.mrf.mxu2  ;;  %2736 = vmatpush.msrb.mxu3 %v1088_v8  ;;  %v1083_v8 = vld [vmem:[#allocation2 + $0x5c0] sm:$0xff] }
 0x369   :  { %v2128_v34 = vpop.f32.mrf.mxu1  ;;  %v2188_v58 = vadd.f32 %v2187_v60, %v2123_v22  ;;  %v2252_v47 = vpop.f32.mrf.mxu3  ;;  %v1050_v22 = vld [vmem:[#allocation2 + $0x4b8] sm:$0xff]  ;;  %v2064_v60 = vadd.f32 %v5830_v38, %v5823_v31  ;;  %v1768_v31 = vld [vmem:[%s8048_s1 + $0xb28] sm:$0xff] }
 0x36a   :  { %2612 = vmatpush.msrb.mxu1 %v1050_v22  ;;  %2737 = vmatpush.msrb.mxu3 %v1087_v18  ;;  %v1048_v38 = vld [vmem:[#allocation2 + $0x4a8] sm:$0xff]  ;;  %v1045_v22 = vld [vmem:[#allocation2 + $0x490] sm:$0xff] }
 0x36b   :  { %v6031_v53 = vadd.f32 %v2252_v47, %v2188_v58  ;;  %v1049_v58 = vld [vmem:[#allocation2 + $0x4b0] sm:$0xff]  ;;  %v2129_v47 = vadd.f32 %v2128_v34, %v2064_v60 }
 0x36c   :  { %2387 = vmatmul.f32.gmra.mxu1 %v1704_v9  ;;  %v6033_v19 = vpop.f32.mrf.mxu0  ;;  %v1070_v9 = vld [vmem:[#allocation2 + $0x558] sm:$0xff]  ;;  %v1085_v34 = vld [vmem:[#allocation2 + $0x5d0] sm:$0xff]  ;;  %2738 = vmatpush.msrb.mxu3 %v1086_v48  ;;  %v1044_v48 = vld [vmem:[#allocation2 + $0x488] sm:$0xff] }
 0x36d   :  { %2449 = vmatmul.f32.gmra.mxu2 %v1673_v63  ;;  %v1069_v63 = vld [vmem:[#allocation2 + $0x550] sm:$0xff]  ;;  %2613 = vmatpush.msrb.mxu1 %v1049_v58  ;;  %v1082_v58 = vld [vmem:[#allocation2 + $0x5b8] sm:$0xff] }
 0x36e   :  { %2514 = vmatmul.f32.gmra.mxu3 %v1674_v45  ;;  %2673 = vmatpush.msrb.mxu2 %v1070_v9  ;;  %v1106_v45 = vld [vmem:[#allocation2 + $0x678] sm:$0xff] }
 0x36f   :  { %2576 = vmatmul.f32.gmra.mxu0 %v1643_v43  ;;  %2614 = vmatpush.msrb.mxu1 %v1048_v38 }
 0x370   :  { %v2190_v16 = vpop.f32.mrf.mxu2  ;;  %2674 = vmatpush.msrb.mxu2 %v1069_v63  ;;  %2799 = vmatpush.msrb.mxu0 %v1106_v45  ;;  %v1769_v63 = vld [vmem:[%s8048_s1 + $0xb30] sm:$0xff] }
 0x371   :  { %v6043_v41 = vpop.f32.mrf.mxu1  ;;  %v2191_v1 = vadd.f32 %v2190_v16, %v2126_v12  ;;  %v2255_v4 = vpop.f32.mrf.mxu3  ;;  %2739 = vmatpush.msrb.mxu3 %v1085_v34  ;;  %2615 = vmatpush.msrb.mxu1 %v1047_v11  ;;  %v2070_v34 = vadd.f32 %v5884_v52, %v5796_v7  ;;  %v1080_v11 = vld [vmem:[#allocation2 + $0x5a8] sm:$0xff]  ;;  %v1062_v7 = vld [vmem:[#allocation2 + $0x518] sm:$0xff] }
 0x372   :  { %2675 = vmatpush.msrb.mxu2 %v1068_v21  ;;  %2800 = vmatpush.msrb.mxu0 %v1105_v61  ;;  %v1739_v21 = vld [vmem:[%s8048_s1 + $0xa40] sm:$0xff]  ;;  %v1101_v61 = vld [vmem:[#allocation2 + $0x650] sm:$0xff] }
 0x373   :  { %v6051_v0 = vadd.f32 %v2255_v4, %v2191_v1  ;;  %v2067_v4 = vadd.f32 %v5862_v50, %v5825_v42  ;;  %2740 = vmatpush.msrb.mxu3 %v1084_v57  ;;  %v1800_v42 = vld [vmem:[%s8048_s1 + $0xc28] sm:$0xff]  ;;  %2616 = vmatpush.msrb.mxu1 %v1046_v14  ;;  %v1065_v50 = vld [vmem:[#allocation2 + $0x530] sm:$0xff]  ;;  %v1099_v14 = vld [vmem:[#allocation2 + $0x640] sm:$0xff] }
 0x374   :  { %2390 = vmatmul.f32.gmra.mxu1 %v1736_v24  ;;  %v6053_v17 = vpop.f32.mrf.mxu0  ;;  %v1067_v24 = vld [vmem:[#allocation2 + $0x540] sm:$0xff]  ;;  %v1100_v57 = vld [vmem:[#allocation2 + $0x648] sm:$0xff] }
 0x375   :  { %2452 = vmatmul.f32.gmra.mxu2 %v1705_v59  ;;  %v1104_v59 = vld [vmem:[#allocation2 + $0x668] sm:$0xff]  ;;  %2741 = vmatpush.msrb.mxu3 %v1083_v8 }
 0x376   :  { %2517 = vmatmul.f32.gmra.mxu3 %v1706_v28  ;;  %2676 = vmatpush.msrb.mxu2 %v1067_v24  ;;  %v2132_v28 = vadd.f32 %v6043_v41, %v2067_v4  ;;  %v1832_v4 = vld [vmem:[%s8048_s1 + $0xd28] sm:$0xff] }
 0x377   :  { %2579 = vmatmul.f32.gmra.mxu0 %v1675_v35  ;;  %v1103_v35 = vld [vmem:[#allocation2 + $0x660] sm:$0xff]  ;;  %2617 = vmatpush.msrb.mxu1 %v1045_v22 }
 0x378   :  { %v2193_v43 = vpop.f32.mrf.mxu2  ;;  %2801 = vmatpush.msrb.mxu0 %v1104_v59  ;;  %2677 = vmatpush.msrb.mxu2 %v1066_v10  ;;  %v1079_v59 = vld [vmem:[#allocation2 + $0x5a0] sm:$0xff] }
 0x379   :  { %v6063_v55 = vpop.f32.mrf.mxu1  ;;  %v2194_v56 = vadd.f32 %v2193_v43, %v2129_v47  ;;  %v2258_v12 = vpop.f32.mrf.mxu3  ;;  %v1102_v47 = vld [vmem:[#allocation2 + $0x658] sm:$0xff]  ;;  %v1064_v43 = vld [vmem:[#allocation2 + $0x528] sm:$0xff]  ;;  %2742 = vmatpush.msrb.mxu3 %v1082_v58  ;;  %2618 = vmatpush.msrb.mxu1 %v1044_v48  ;;  %v1059_v48 = vld [vmem:[#allocation2 + $0x500] sm:$0xff] }
 0x37a   :  { %2802 = vmatpush.msrb.mxu0 %v1103_v35  ;;  %2678 = vmatpush.msrb.mxu2 %v1065_v50  ;;  %v2135_v24 = vadd.f32 %v6063_v55, %v2070_v34  ;;  %v1801_v55 = vld [vmem:[%s8048_s1 + $0xc30] sm:$0xff]  ;;  %v1078_v35 = vld [vmem:[#allocation2 + $0x598] sm:$0xff]  ;;  %v2073_v50 = vadd.f32 %v5808_v5, %v5852_v27  ;;  %v1060_v58 = vld [vmem:[#allocation2 + $0x508] sm:$0xff] }
 0x37b   :  { %v6071_v16 = vadd.f32 %v2258_v12, %v2194_v56  ;;  %v1770_v56 = vld [vmem:[%s8048_s1 + $0xb38] sm:$0xff]  ;;  %v1043_v12 = vld [vmem:[#allocation2 + $0x480] sm:$0xff]  ;;  %v1076_v5 = vld [vmem:[#allocation2 + $0x588] sm:$0xff] }
 0x37c   :  { %2393 = vmatmul.f32.gmra.mxu1 %v1768_v31  ;;  %v6073_v1 = vpop.f32.mrf.mxu0  ;;  %v1081_v31 = vld [vmem:[#allocation2 + $0x5b0] sm:$0xff]  ;;  %2803 = vmatpush.msrb.mxu0 %v1102_v47 }
 0x37d   :  { %2455 = vmatmul.f32.gmra.mxu2 %v1737_v3  ;;  %2743 = vmatpush.msrb.mxu3 %v1081_v31  ;;  %v1063_v3 = vld [vmem:[#allocation2 + $0x520] sm:$0xff]  ;;  %v1077_v47 = vld [vmem:[#allocation2 + $0x590] sm:$0xff] }
 0x37e   :  { %2520 = vmatmul.f32.gmra.mxu3 %v1738_v37  ;;  %2679 = vmatpush.msrb.mxu2 %v1064_v43 }
 0x37f   :  { %2582 = vmatmul.f32.gmra.mxu0 %v1707_v40  ;;  %2619 = vmatpush.msrb.mxu1 %v1043_v12 }
 0x380   :  { %v2196_v60 = vpop.f32.mrf.mxu2  ;;  %2804 = vmatpush.msrb.mxu0 %v1101_v61  ;;  %2680 = vmatpush.msrb.mxu2 %v1063_v3  ;;  %v1075_v61 = vld [vmem:[#allocation2 + $0x580] sm:$0xff] }
 0x381   :  { %v6084_v9 = vpop.f32.mrf.mxu1  ;;  %v2197_v18 = vadd.f32 %v2196_v60, %v2132_v28  ;;  %v2261_v41 = vpop.f32.mrf.mxu3  ;;  %2744 = vmatpush.msrb.mxu3 %v1080_v11  ;;  %v1061_v28 = vld [vmem:[#allocation2 + $0x510] sm:$0xff]  ;;  %v1802_v60 = vld [vmem:[%s8048_s1 + $0xc38] sm:$0xff]  ;;  %v1095_v3 = vld [vmem:[#allocation2 + $0x620] sm:$0xff] }
 0x382   :  { %2805 = vmatpush.msrb.mxu0 %v1100_v57  ;;  %2681 = vmatpush.msrb.mxu2 %v1062_v7  ;;  %v1803_v57 = vld [vmem:[%s8048_s1 + $0xc40] sm:$0xff] }
 0x383   :  { %v6092_v45 = vadd.f32 %v2261_v41, %v2197_v18  ;;  %2745 = vmatpush.msrb.mxu3 %v1079_v59  ;;  %v1098_v18 = vld [vmem:[#allocation2 + $0x638] sm:$0xff]  ;;  %v2138_v41 = vadd.f32 %v6084_v9, %v2073_v50  ;;  %v1833_v9 = vld [vmem:[%s8048_s1 + $0xd30] sm:$0xff]  ;;  %v1835_v50 = vld [vmem:[%s8048_s1 + $0xd40] sm:$0xff] }
 0x384   :  { %2396 = vmatmul.f32.gmra.mxu1 %v1800_v42  ;;  %v6094_v38 = vpop.f32.mrf.mxu0  ;;  %v1771_v42 = vld [vmem:[%s8048_s1 + $0xb40] sm:$0xff]  ;;  %2806 = vmatpush.msrb.mxu0 %v1099_v14 }
 0x385   :  { %2458 = vmatmul.f32.gmra.mxu2 %v1769_v63  ;;  %2746 = vmatpush.msrb.mxu3 %v1078_v35  ;;  %v1097_v63 = vld [vmem:[#allocation2 + $0x630] sm:$0xff] }
 0x386   :  { %2523 = vmatmul.f32.gmra.mxu3 %v1770_v56  ;;  %2682 = vmatpush.msrb.mxu2 %v1061_v28  ;;  %v1864_v56 = vld [vmem:[%s8048_s1 + $0xe28] sm:$0xff] }
 0x387   :  { %2585 = vmatmul.f32.gmra.mxu0 %v1739_v21  ;;  %2747 = vmatpush.msrb.mxu3 %v1077_v47  ;;  %v1096_v21 = vld [vmem:[#allocation2 + $0x628] sm:$0xff] }
 0x388   :  { %v2199_v37 = vpop.f32.mrf.mxu2  ;;  %2807 = vmatpush.msrb.mxu0 %v1098_v18  ;;  %2683 = vmatpush.msrb.mxu2 %v1060_v58  ;;  %v1092_v28 = vld [vmem:[#allocation2 + $0x608] sm:$0xff]  ;;  %v2079_v18 = vadd.f32 %v5864_v15, %v5794_v26  ;;  %v1898_v15 = vld [vmem:[%s8048_s1 + $0xf38] sm:$0xff] }
 0x389   :  { %v2140_v40 = vpop.f32.mrf.mxu1  ;;  %v2200_v52 = vadd.f32 %v2199_v37, %v2135_v24  ;;  %v2264_v10 = vpop.f32.mrf.mxu3  ;;  %2748 = vmatpush.msrb.mxu3 %v1076_v5  ;;  %v1834_v24 = vld [vmem:[%s8048_s1 + $0xd38] sm:$0xff]  ;;  %v2076_v37 = vadd.f32 %v5840_v6, %v5821_v30  ;;  %v1865_v30 = vld [vmem:[%s8048_s1 + $0xe30] sm:$0xff] }
 0x38a   :  { %2808 = vmatpush.msrb.mxu0 %v1097_v63  ;;  %2684 = vmatpush.msrb.mxu2 %v1059_v48  ;;  %v1420_v63 = vld [vmem:[%s8048_s1 + $0x48] sm:$0xff] }
 0x38b   :  { %v6111_v8 = vadd.f32 %v2264_v10, %v2200_v52  ;;  %2749 = vmatpush.msrb.mxu3 %v1075_v61  ;;  %v2141_v7 = vadd.f32 %v2140_v40, %v2076_v37  ;;  %v1093_v52 = vld [vmem:[#allocation2 + $0x610] sm:$0xff]  ;;  %v1896_v10 = vld [vmem:[%s8048_s1 + $0xf28] sm:$0xff]  ;;  %v1091_v40 = vld [vmem:[#allocation2 + $0x600] sm:$0xff] }
 0x38c   :  { %2399 = vmatmul.f32.gmra.mxu1 %v1832_v4  ;;  %v6113_v22 = vpop.f32.mrf.mxu0  ;;  %2809 = vmatpush.msrb.mxu0 %v1096_v21  ;;  %v1094_v4 = vld [vmem:[#allocation2 + $0x618] sm:$0xff]  ;;  %v1452_v61 = vld [vmem:[%s8048_s1 + $0x148] sm:$0xff] }
 0x38d   :  { %2461 = vmatmul.f32.gmra.mxu2 %v1801_v55 }
 0x38e   :  { %2526 = vmatmul.f32.gmra.mxu3 %v1802_v60  ;;  %2810 = vmatpush.msrb.mxu0 %v1095_v3 }
 0x38f   :  { %2588 = vmatmul.f32.gmra.mxu0 %v1771_v42  ;;  %v1866_v42 = vld [vmem:[%s8048_s1 + $0xe38] sm:$0xff] }
 0x390   :  { %v2202_v43 = vpop.f32.mrf.mxu2  ;;  %2811 = vmatpush.msrb.mxu0 %v1094_v4  ;;  %v1422_v4 = vld [vmem:[%s8048_s1 + $0x58] sm:$0xff] }
 0x391   :  { %v2143_v31 = vpop.f32.mrf.mxu1  ;;  %v2203_v27 = vadd.f32 %v2202_v43, %v2138_v41  ;;  %v2267_v34 = vpop.f32.mrf.mxu3 }
 0x392   :  { %2812 = vmatpush.msrb.mxu0 %v1093_v52  ;;  %v2144_v58 = vadd.f32 %v2143_v31, %v2079_v18  ;;  %v1867_v31 = vld [vmem:[%s8048_s1 + $0xe40] sm:$0xff] }
 0x393   :  { %v6130_v12 = vadd.f32 %v2267_v34, %v2203_v27  ;;  %v2082_v27 = vadd.f32 %v5889_v36, %v5776_v23  ;;  %v1899_v36 = vld [vmem:[%s8048_s1 + $0xf40] sm:$0xff] }
 0x394   :  { %2402 = vmatmul.f32.gmra.mxu1 %v1864_v56  ;;  %v6132_v11 = vpop.f32.mrf.mxu0  ;;  %2813 = vmatpush.msrb.mxu0 %v1092_v28  ;;  %v1897_v56 = vld [vmem:[%s8048_s1 + $0xf30] sm:$0xff] }
 0x395   :  { %2464 = vmatmul.f32.gmra.mxu2 %v1833_v9 }
 0x396   :  { %2529 = vmatmul.f32.gmra.mxu3 %v1834_v24  ;;  %2814 = vmatpush.msrb.mxu0 %v1091_v40  ;;  %v1423_v40 = vld [vmem:[%s8048_s1 + $0x60] sm:$0xff] }
 0x397   :  { %2591 = vmatmul.f32.gmra.mxu0 %v1803_v57  ;;  %v1421_v57 = vld [vmem:[%s8048_s1 + $0x50] sm:$0xff] }
 0x398   :  { %v2205_v59 = vpop.f32.mrf.mxu2 }
 0x399   :  { %v2146_v14 = vpop.f32.mrf.mxu1  ;;  %v2206_v55 = vadd.f32 %v2205_v59, %v2141_v7  ;;  %v2270_v35 = vpop.f32.mrf.mxu3  ;;  %v2297_v7 = vadd.f32 %v5912_v32, %v5910_v29  ;;  %v1454_v32 = vld [vmem:[%s8048_s1 + $0x158] sm:$0xff] }
 0x39a   :  { %v2147_v21 = vadd.f32 %v2146_v14, %v2082_v27 }
 0x39b   :  { %v6148_v6 = vadd.f32 %v2270_v35, %v2206_v55  ;;  %v1453_v35 = vld [vmem:[%s8048_s1 + $0x150] sm:$0xff] }
 0x39c   :  { %2405 = vmatmul.f32.gmra.mxu1 %v1896_v10  ;;  %v6150_v60 = vpop.f32.mrf.mxu0  ;;  %v1484_v10 = vld [vmem:[%s8048_s1 + $0x248] sm:$0xff] }
 0x39d   :  { %2467 = vmatmul.f32.gmra.mxu2 %v1865_v30 }
 0x39e   :  { %2532 = vmatmul.f32.gmra.mxu3 %v1866_v42  ;;  %v2300_v42 = vadd.f32 %v5929_v51, %v5927_v44  ;;  %v1486_v51 = vld [vmem:[%s8048_s1 + $0x258] sm:$0xff] }
 0x39f   :  { %2594 = vmatmul.f32.gmra.mxu0 %v1835_v50 }
 0x3a0   :  { %v2208_v47 = vpop.f32.mrf.mxu2 }
 0x3a1   :  { %v2361_v41 = vpop.f32.mrf.mxu1  ;;  %v2209_v48 = vadd.f32 %v2208_v47, %v2144_v58  ;;  %v2273_v43 = vpop.f32.mrf.mxu3  ;;  %v1516_v47 = vld [vmem:[%s8048_s1 + $0x348] sm:$0xff] }
 0x3a2   :  { %v2362_v52 = vadd.f32 %v2361_v41, %v2297_v7 }
 0x3a3   :  { %v6166_v5 = vadd.f32 %v2273_v43, %v2209_v48  ;;  %v1485_v48 = vld [vmem:[%s8048_s1 + $0x250] sm:$0xff] }
 0x3a4   :  { %2620 = vmatmul.f32.vlgmr.msrb.gmra.mxu1 %v1420_v63  ;;  %v6168_v26 = vpop.f32.mrf.mxu0 }
 0x3a5   :  { %2470 = vmatmul.f32.gmra.mxu2 %v1897_v56  ;;  %v1455_v56 = vld [vmem:[%s8048_s1 + $0x160] sm:$0xff] }
 0x3a6   :  { %2535 = vmatmul.f32.gmra.mxu3 %v1898_v15  ;;  %v2303_v15 = vadd.f32 %v5946_v39, %v5944_v49  ;;  %v1518_v39 = vld [vmem:[%s8048_s1 + $0x358] sm:$0xff] }
 0x3a7   :  { %2597 = vmatmul.f32.gmra.mxu0 %v1867_v31 }
 0x3a8   :  { %v2211_v34 = vpop.f32.mrf.mxu2 }
 0x3a9   :  { %v2364_v9 = vpop.f32.mrf.mxu1  ;;  %v2212_v3 = vadd.f32 %v2211_v34, %v2147_v21  ;;  %v2276_v24 = vpop.f32.mrf.mxu3  ;;  %v1548_v34 = vld [vmem:[%s8048_s1 + $0x448] sm:$0xff] }
 0x3aa   :  { %v2365_v50 = vadd.f32 %v2364_v9, %v2300_v42 }
 0x3ab   :  { %v6184_v37 = vadd.f32 %v2276_v24, %v2212_v3  ;;  %v1517_v3 = vld [vmem:[%s8048_s1 + $0x350] sm:$0xff] }
 0x3ac   :  { %2623 = vmatmul.f32.gmra.mxu1 %v1452_v61  ;;  %v6186_v23 = vpop.f32.mrf.mxu0 }
 0x3ad   :  { %2685 = vmatmul.f32.vlgmr.msrb.gmra.mxu2 %v1421_v57  ;;  %v1487_v57 = vld [vmem:[%s8048_s1 + $0x260] sm:$0xff] }
 0x3ae   :  { %2750 = vmatmul.f32.vlgmr.msrb.gmra.mxu3 %v1422_v4 }
 0x3af   :  { %2600 = vmatmul.f32.gmra.mxu0 %v1899_v36  ;;  %v2306_v36 = vadd.f32 %v5963_v25, %v5961_v20  ;;  %v1550_v25 = vld [vmem:[%s8048_s1 + $0x458] sm:$0xff] }
 0x3b0   :  { %v2426_v59 = vpop.f32.mrf.mxu2 }
 0x3b1   :  { %v2367_v14 = vpop.f32.mrf.mxu1  ;;  %v2427_v55 = vadd.f32 %v2426_v59, %v2362_v52  ;;  %v2491_v28 = vpop.f32.mrf.mxu3  ;;  %v1580_v59 = vld [vmem:[%s8048_s1 + $0x548] sm:$0xff] }
 0x3b2   :  { %v2368_v31 = vadd.f32 %v2367_v14, %v2303_v15 }
 0x3b3   :  { %v6202_v30 = vadd.f32 %v2491_v28, %v2427_v55  ;;  %v1549_v55 = vld [vmem:[%s8048_s1 + $0x450] sm:$0xff] }
 0x3b4   :  { %2626 = vmatmul.f32.gmra.mxu1 %v1484_v10  ;;  %v6204_v29 = vpop.f32.mrf.mxu0 }
 0x3b5   :  { %2688 = vmatmul.f32.gmra.mxu2 %v1453_v35  ;;  %v1519_v35 = vld [vmem:[%s8048_s1 + $0x360] sm:$0xff] }
 0x3b6   :  { %2753 = vmatmul.f32.gmra.mxu3 %v1454_v32  ;;  %v2309_v32 = vadd.f32 %v5979_v33, %v5977_v46  ;;  %v1582_v33 = vld [vmem:[%s8048_s1 + $0x558] sm:$0xff] }
 0x3b7   :  { %2815 = vmatmul.f32.vlgmr.msrb.gmra.mxu0 %v1423_v40 }
 0x3b8   :  { %v2429_v18 = vpop.f32.mrf.mxu2 }
 0x3b9   :  { %v2370_v58 = vpop.f32.mrf.mxu1  ;;  %v2430_v41 = vadd.f32 %v2429_v18, %v2365_v50  ;;  %v2494_v63 = vpop.f32.mrf.mxu3  ;;  %v1612_v18 = vld [vmem:[%s8048_s1 + $0x648] sm:$0xff] }
 0x3ba   :  { %v2371_v4 = vadd.f32 %v2370_v58, %v2306_v36 }
 0x3bb   :  { %v6220_v43 = vadd.f32 %v2494_v63, %v2430_v41  ;;  %v1581_v41 = vld [vmem:[%s8048_s1 + $0x550] sm:$0xff] }
 0x3bc   :  { %2629 = vmatmul.f32.gmra.mxu1 %v1516_v47  ;;  %v6222_v44 = vpop.f32.mrf.mxu0 }
 0x3bd   :  { %2691 = vmatmul.f32.gmra.mxu2 %v1485_v48  ;;  %v1551_v48 = vld [vmem:[%s8048_s1 + $0x460] sm:$0xff] }
 0x3be   :  { %2756 = vmatmul.f32.gmra.mxu3 %v1486_v51  ;;  %v2312_v51 = vadd.f32 %v5997_v62, %v5995_v2  ;;  %v1614_v62 = vld [vmem:[%s8048_s1 + $0x658] sm:$0xff] }
 0x3bf   :  { %2818 = vmatmul.f32.gmra.mxu0 %v1455_v56 }
 0x3c0   :  { %v2432_v27 = vpop.f32.mrf.mxu2 }
 0x3c1   :  { %v2373_v21 = vpop.f32.mrf.mxu1  ;;  %v2433_v9 = vadd.f32 %v2432_v27, %v2368_v31  ;;  %v2497_v61 = vpop.f32.mrf.mxu3  ;;  %v1644_v27 = vld [vmem:[%s8048_s1 + $0x748] sm:$0xff] }
 0x3c2   :  { %v2374_v40 = vadd.f32 %v2373_v21, %v2309_v32  ;;  %v1121_v32 = vld [vmem:[#allocation2 + $0x6f0] sm:$0xff] }
 0x3c3   :  { %v6238_v24 = vadd.f32 %v2497_v61, %v2433_v9  ;;  %v1613_v9 = vld [vmem:[%s8048_s1 + $0x650] sm:$0xff] }
 0x3c4   :  { %2632 = vmatmul.f32.gmra.mxu1 %v1548_v34  ;;  %v6240_v49 = vpop.f32.mrf.mxu0 }
 0x3c5   :  { %2694 = vmatmul.f32.gmra.mxu2 %v1517_v3  ;;  %v1583_v3 = vld [vmem:[%s8048_s1 + $0x560] sm:$0xff] }
 0x3c6   :  { %2759 = vmatmul.f32.gmra.mxu3 %v1518_v39  ;;  %v2315_v39 = vadd.f32 %v6015_v54, %v6013_v13  ;;  %v1646_v54 = vld [vmem:[%s8048_s1 + $0x758] sm:$0xff] }
 0x3c7   :  { %2821 = vmatmul.f32.gmra.mxu0 %v1487_v57 }
 0x3c8   :  { %v2435_v7 = vpop.f32.mrf.mxu2 }
 0x3c9   :  { %v2376_v52 = vpop.f32.mrf.mxu1  ;;  %v2436_v14 = vadd.f32 %v2435_v7, %v2371_v4  ;;  %v2500_v10 = vpop.f32.mrf.mxu3  ;;  %v1676_v7 = vld [vmem:[%s8048_s1 + $0x848] sm:$0xff] }
 0x3ca   :  { %v2377_v56 = vadd.f32 %v2376_v52, %v2312_v51  ;;  %v1678_v51 = vld [vmem:[%s8048_s1 + $0x858] sm:$0xff] }
 0x3cb   :  { %v6256_v28 = vadd.f32 %v2500_v10, %v2436_v14  ;;  %v1645_v14 = vld [vmem:[%s8048_s1 + $0x750] sm:$0xff] }
 0x3cc   :  { %2635 = vmatmul.f32.gmra.mxu1 %v1580_v59  ;;  %v6258_v20 = vpop.f32.mrf.mxu0 }
 0x3cd   :  { %2697 = vmatmul.f32.gmra.mxu2 %v1549_v55  ;;  %v1615_v55 = vld [vmem:[%s8048_s1 + $0x660] sm:$0xff] }
 0x3ce   :  { %2762 = vmatmul.f32.gmra.mxu3 %v1550_v25  ;;  %v1122_v25 = vld [vmem:[#allocation2 + $0x6f8] sm:$0xff] }
 0x3cf   :  { %2824 = vmatmul.f32.gmra.mxu0 %v1519_v35  ;;  %v2318_v35 = vadd.f32 %v6033_v19, %v6031_v53  ;;  %2864 = vmatpush.msra.mxu1 %v1122_v25  ;;  %v1677_v53 = vld [vmem:[%s8048_s1 + $0x850] sm:$0xff]  ;;  %v1119_v19 = vld [vmem:[#allocation2 + $0x6e0] sm:$0xff] }
 0x3d0   :  { %v2438_v42 = vpop.f32.mrf.mxu2 }
 0x3d1   :  { %v2379_v50 = vpop.f32.mrf.mxu1  ;;  %v2439_v58 = vadd.f32 %v2438_v42, %v2374_v40  ;;  %v2503_v47 = vpop.f32.mrf.mxu3  ;;  %2865 = vmatpush.msra.mxu1 %v1121_v32  ;;  %v1679_v32 = vld [vmem:[%s8048_s1 + $0x860] sm:$0xff] }
 0x3d2   :  { %v2380_v57 = vadd.f32 %v2379_v50, %v2315_v39 }
 0x3d3   :  { %v6274_v63 = vadd.f32 %v2503_v47, %v2439_v58  ;;  %v1120_v58 = vld [vmem:[#allocation2 + $0x6e8] sm:$0xff] }
 0x3d4   :  { %2638 = vmatmul.f32.gmra.mxu1 %v1612_v18  ;;  %v6276_v46 = vpop.f32.mrf.mxu0  ;;  %v1708_v18 = vld [vmem:[%s8048_s1 + $0x948] sm:$0xff] }
 0x3d5   :  { %2700 = vmatmul.f32.gmra.mxu2 %v1581_v41  ;;  %2866 = vmatpush.msra.mxu1 %v1120_v58  ;;  %v1151_v58 = vld [vmem:[#allocation2 + $0x7e0] sm:$0xff] }
 0x3d6   :  { %2765 = vmatmul.f32.gmra.mxu3 %v1582_v33 }
 0x3d7   :  { %2827 = vmatmul.f32.gmra.mxu0 %v1551_v48  ;;  %2867 = vmatpush.msra.mxu1 %v1119_v19  ;;  %v1150_v19 = vld [vmem:[#allocation2 + $0x7d8] sm:$0xff] }
 0x3d8   :  { %v2441_v15 = vpop.f32.mrf.mxu2 }
 0x3d9   :  { %v2382_v31 = vpop.f32.mrf.mxu1  ;;  %v2442_v21 = vadd.f32 %v2441_v15, %v2377_v56  ;;  %v2506_v34 = vpop.f32.mrf.mxu3  ;;  %v1647_v56 = vld [vmem:[%s8048_s1 + $0x760] sm:$0xff]  ;;  %v1118_v15 = vld [vmem:[#allocation2 + $0x6d8] sm:$0xff] }
 0x3da   :  { %v2383_v40 = vadd.f32 %v2382_v31, %v2318_v35  ;;  %v2321_v31 = vadd.f32 %v6053_v17, %v6051_v0  ;;  %2868 = vmatpush.msra.mxu1 %v1118_v15  ;;  %v1116_v0 = vld [vmem:[#allocation2 + $0x6c8] sm:$0xff]  ;;  %v1710_v35 = vld [vmem:[%s8048_s1 + $0x958] sm:$0xff] }
 0x3db   :  { %v6292_v61 = vadd.f32 %v2506_v34, %v2442_v21  ;;  %v1117_v21 = vld [vmem:[#allocation2 + $0x6d0] sm:$0xff] }
 0x3dc   :  { %2641 = vmatmul.f32.gmra.mxu1 %v1644_v27  ;;  %v6294_v2 = vpop.f32.mrf.mxu0  ;;  %v1138_v27 = vld [vmem:[#allocation2 + $0x778] sm:$0xff] }
 0x3dd   :  { %2703 = vmatmul.f32.gmra.mxu2 %v1613_v9  ;;  %v1137_v9 = vld [vmem:[#allocation2 + $0x770] sm:$0xff]  ;;  %2869 = vmatpush.msra.mxu1 %v1117_v21 }
 0x3de   :  { %2768 = vmatmul.f32.gmra.mxu3 %v1614_v62  ;;  %2929 = vmatpush.msra.mxu2 %v1138_v27  ;;  %v1154_v62 = vld [vmem:[#allocation2 + $0x7f8] sm:$0xff]  ;;  %v1132_v27 = vld [vmem:[#allocation2 + $0x748] sm:$0xff]  ;;  %v1169_v21 = vld [vmem:[#allocation2 + $0x870] sm:$0xff] }
 0x3df   :  { %2830 = vmatmul.f32.gmra.mxu0 %v1583_v3  ;;  %2994 = vmatpush.msra.mxu3 %v1154_v62  ;;  %v1111_v62 = vld [vmem:[#allocation2 + $0x6a0] sm:$0xff] }
 0x3e0   :  { %v2444_v36 = vpop.f32.mrf.mxu2  ;;  %2930 = vmatpush.msra.mxu2 %v1137_v9  ;;  %2870 = vmatpush.msra.mxu1 %v1116_v0  ;;  %v1741_v9 = vld [vmem:[%s8048_s1 + $0xa50] sm:$0xff]  ;;  %v1148_v0 = vld [vmem:[#allocation2 + $0x7c8] sm:$0xff] }
 0x3e1   :  { %v2385_v4 = vpop.f32.mrf.mxu1  ;;  %v2445_v52 = vadd.f32 %v2444_v36, %v2380_v57  ;;  %v2509_v59 = vpop.f32.mrf.mxu3  ;;  %v1740_v57 = vld [vmem:[%s8048_s1 + $0xa48] sm:$0xff] }
 0x3e2   :  { %v2386_v34 = vadd.f32 %v2385_v4, %v2321_v31  ;;  %v1136_v36 = vld [vmem:[#allocation2 + $0x768] sm:$0xff]  ;;  %v1709_v4 = vld [vmem:[%s8048_s1 + $0x950] sm:$0xff] }
 0x3e3   :  { %v6310_v10 = vadd.f32 %v2509_v59, %v2445_v52  ;;  %2931 = vmatpush.msra.mxu2 %v1136_v36  ;;  %v1115_v59 = vld [vmem:[#allocation2 + $0x6c0] sm:$0xff]  ;;  %v1742_v36 = vld [vmem:[%s8048_s1 + $0xa58] sm:$0xff] }
 0x3e4   :  { %2644 = vmatmul.f32.gmra.mxu1 %v1676_v7  ;;  %v6312_v13 = vpop.f32.mrf.mxu0  ;;  %v1153_v7 = vld [vmem:[#allocation2 + $0x7f0] sm:$0xff] }
 0x3e5   :  { %2706 = vmatmul.f32.gmra.mxu2 %v1645_v14  ;;  %2995 = vmatpush.msra.mxu3 %v1153_v7  ;;  %v1711_v7 = vld [vmem:[%s8048_s1 + $0x960] sm:$0xff] }
 0x3e6   :  { %2771 = vmatmul.f32.gmra.mxu3 %v1646_v54  ;;  %v1135_v54 = vld [vmem:[#allocation2 + $0x760] sm:$0xff]  ;;  %2871 = vmatpush.msra.mxu1 %v1115_v59  ;;  %v1110_v59 = vld [vmem:[#allocation2 + $0x698] sm:$0xff] }
 0x3e7   :  { %2833 = vmatmul.f32.gmra.mxu0 %v1615_v55  ;;  %v1152_v55 = vld [vmem:[#allocation2 + $0x7e8] sm:$0xff]  ;;  %2932 = vmatpush.msra.mxu2 %v1135_v54  ;;  %v1130_v54 = vld [vmem:[#allocation2 + $0x738] sm:$0xff] }
 0x3e8   :  { %v2447_v42 = vpop.f32.mrf.mxu2  ;;  %2996 = vmatpush.msra.mxu3 %v1152_v55  ;;  %v1147_v55 = vld [vmem:[#allocation2 + $0x7c0] sm:$0xff] }
 0x3e9   :  { %v2388_v50 = vpop.f32.mrf.mxu1  ;;  %v2448_v47 = vadd.f32 %v2447_v42, %v2383_v40  ;;  %v2512_v41 = vpop.f32.mrf.mxu3  ;;  %v1114_v40 = vld [vmem:[#allocation2 + $0x6b8] sm:$0xff]  ;;  %v2324_v42 = vadd.f32 %v6073_v1, %v6071_v16  ;;  %v1772_v16 = vld [vmem:[%s8048_s1 + $0xb48] sm:$0xff] }
 0x3ea   :  { %2872 = vmatpush.msra.mxu1 %v1114_v40  ;;  %2997 = vmatpush.msra.mxu3 %v1151_v58  ;;  %v1112_v1 = vld [vmem:[#allocation2 + $0x6a8] sm:$0xff]  ;;  %v1109_v40 = vld [vmem:[#allocation2 + $0x690] sm:$0xff] }
 0x3eb   :  { %v6328_v33 = vadd.f32 %v2512_v41, %v2448_v47  ;;  %v1113_v47 = vld [vmem:[#allocation2 + $0x6b0] sm:$0xff]  ;;  %v2389_v41 = vadd.f32 %v2388_v50, %v2324_v42 }
 0x3ec   :  { %2647 = vmatmul.f32.gmra.mxu1 %v1708_v18  ;;  %v6330_v48 = vpop.f32.mrf.mxu0  ;;  %v1134_v18 = vld [vmem:[#allocation2 + $0x758] sm:$0xff]  ;;  %v1149_v50 = vld [vmem:[#allocation2 + $0x7d0] sm:$0xff]  ;;  %2998 = vmatpush.msra.mxu3 %v1150_v19  ;;  %v1108_v19 = vld [vmem:[#allocation2 + $0x688] sm:$0xff] }
 0x3ed   :  { %2709 = vmatmul.f32.gmra.mxu2 %v1677_v53  ;;  %v1133_v53 = vld [vmem:[#allocation2 + $0x750] sm:$0xff]  ;;  %2873 = vmatpush.msra.mxu1 %v1113_v47  ;;  %v1146_v47 = vld [vmem:[#allocation2 + $0x7b8] sm:$0xff] }
 0x3ee   :  { %2774 = vmatmul.f32.gmra.mxu3 %v1678_v51  ;;  %2933 = vmatpush.msra.mxu2 %v1134_v18  ;;  %v1170_v51 = vld [vmem:[#allocation2 + $0x878] sm:$0xff] }
 0x3ef   :  { %2836 = vmatmul.f32.gmra.mxu0 %v1647_v56  ;;  %2874 = vmatpush.msra.mxu1 %v1112_v1 }
 0x3f0   :  { %v2450_v3 = vpop.f32.mrf.mxu2  ;;  %2934 = vmatpush.msra.mxu2 %v1133_v53  ;;  %3059 = vmatpush.msra.mxu0 %v1170_v51  ;;  %v1773_v53 = vld [vmem:[%s8048_s1 + $0xb50] sm:$0xff] }
 0x3f1   :  { %v6340_v39 = vpop.f32.mrf.mxu1  ;;  %v2451_v17 = vadd.f32 %v2450_v3, %v2386_v34  ;;  %v2515_v52 = vpop.f32.mrf.mxu3  ;;  %2999 = vmatpush.msra.mxu3 %v1149_v50  ;;  %2875 = vmatpush.msra.mxu1 %v1111_v62  ;;  %v2330_v50 = vadd.f32 %v6113_v22, %v6111_v8  ;;  %v1144_v62 = vld [vmem:[#allocation2 + $0x7a8] sm:$0xff]  ;;  %v1126_v8 = vld [vmem:[#allocation2 + $0x718] sm:$0xff] }
 0x3f2   :  { %2935 = vmatpush.msra.mxu2 %v1132_v27  ;;  %3060 = vmatpush.msra.mxu0 %v1169_v21  ;;  %v1743_v27 = vld [vmem:[%s8048_s1 + $0xa60] sm:$0xff]  ;;  %v1165_v21 = vld [vmem:[#allocation2 + $0x850] sm:$0xff] }
 0x3f3   :  { %v6348_v14 = vadd.f32 %v2515_v52, %v2451_v17  ;;  %v2327_v52 = vadd.f32 %v6094_v38, %v6092_v45  ;;  %3000 = vmatpush.msra.mxu3 %v1148_v0  ;;  %v1804_v45 = vld [vmem:[%s8048_s1 + $0xc48] sm:$0xff]  ;;  %2876 = vmatpush.msra.mxu1 %v1110_v59  ;;  %v1129_v38 = vld [vmem:[#allocation2 + $0x730] sm:$0xff]  ;;  %v1163_v59 = vld [vmem:[#allocation2 + $0x840] sm:$0xff] }
 0x3f4   :  { %2650 = vmatmul.f32.gmra.mxu1 %v1740_v57  ;;  %v6350_v25 = vpop.f32.mrf.mxu0  ;;  %v1131_v57 = vld [vmem:[#allocation2 + $0x740] sm:$0xff]  ;;  %v1164_v0 = vld [vmem:[#allocation2 + $0x848] sm:$0xff] }
 0x3f5   :  { %2712 = vmatmul.f32.gmra.mxu2 %v1709_v4  ;;  %v1168_v4 = vld [vmem:[#allocation2 + $0x868] sm:$0xff]  ;;  %3001 = vmatpush.msra.mxu3 %v1147_v55 }
 0x3f6   :  { %2777 = vmatmul.f32.gmra.mxu3 %v1710_v35  ;;  %2936 = vmatpush.msra.mxu2 %v1131_v57  ;;  %v2392_v35 = vadd.f32 %v6340_v39, %v2327_v52  ;;  %v1836_v52 = vld [vmem:[%s8048_s1 + $0xd48] sm:$0xff] }
 0x3f7   :  { %2839 = vmatmul.f32.gmra.mxu0 %v1679_v32  ;;  %v1167_v32 = vld [vmem:[#allocation2 + $0x860] sm:$0xff]  ;;  %2877 = vmatpush.msra.mxu1 %v1109_v40 }
 0x3f8   :  { %v2453_v56 = vpop.f32.mrf.mxu2  ;;  %3061 = vmatpush.msra.mxu0 %v1168_v4  ;;  %2937 = vmatpush.msra.mxu2 %v1130_v54  ;;  %v1143_v4 = vld [vmem:[#allocation2 + $0x7a0] sm:$0xff] }
 0x3f9   :  { %v6360_v15 = vpop.f32.mrf.mxu1  ;;  %v2454_v31 = vadd.f32 %v2453_v56, %v2389_v41  ;;  %v2518_v34 = vpop.f32.mrf.mxu3  ;;  %v1166_v41 = vld [vmem:[#allocation2 + $0x858] sm:$0xff]  ;;  %v1128_v56 = vld [vmem:[#allocation2 + $0x728] sm:$0xff]  ;;  %3002 = vmatpush.msra.mxu3 %v1146_v47  ;;  %2878 = vmatpush.msra.mxu1 %v1108_v19  ;;  %v1123_v19 = vld [vmem:[#allocation2 + $0x700] sm:$0xff] }
 0x3fa   :  { %3062 = vmatpush.msra.mxu0 %v1167_v32  ;;  %2938 = vmatpush.msra.mxu2 %v1129_v38  ;;  %v2395_v57 = vadd.f32 %v6360_v15, %v2330_v50  ;;  %v1805_v15 = vld [vmem:[%s8048_s1 + $0xc50] sm:$0xff]  ;;  %v1142_v32 = vld [vmem:[#allocation2 + $0x798] sm:$0xff]  ;;  %v2333_v38 = vadd.f32 %v6132_v11, %v6130_v12  ;;  %v1124_v47 = vld [vmem:[#allocation2 + $0x708] sm:$0xff] }
 0x3fb   :  { %v6368_v3 = vadd.f32 %v2518_v34, %v2454_v31  ;;  %v1774_v31 = vld [vmem:[%s8048_s1 + $0xb58] sm:$0xff]  ;;  %v1107_v34 = vld [vmem:[#allocation2 + $0x680] sm:$0xff]  ;;  %v1140_v12 = vld [vmem:[#allocation2 + $0x788] sm:$0xff] }
 0x3fc   :  { %2653 = vmatmul.f32.gmra.mxu1 %v1772_v16  ;;  %v6370_v17 = vpop.f32.mrf.mxu0  ;;  %v1145_v16 = vld [vmem:[#allocation2 + $0x7b0] sm:$0xff]  ;;  %3063 = vmatpush.msra.mxu0 %v1166_v41 }
 0x3fd   :  { %2715 = vmatmul.f32.gmra.mxu2 %v1741_v9  ;;  %3003 = vmatpush.msra.mxu3 %v1145_v16  ;;  %v1127_v9 = vld [vmem:[#allocation2 + $0x720] sm:$0xff]  ;;  %v1141_v41 = vld [vmem:[#allocation2 + $0x790] sm:$0xff] }
 0x3fe   :  { %2780 = vmatmul.f32.gmra.mxu3 %v1742_v36  ;;  %2939 = vmatpush.msra.mxu2 %v1128_v56 }
 0x3ff   :  { %2842 = vmatmul.f32.gmra.mxu0 %v1711_v7  ;;  %2879 = vmatpush.msra.mxu1 %v1107_v34 }
 0x400   :  { %v2456_v42 = vpop.f32.mrf.mxu2  ;;  %3064 = vmatpush.msra.mxu0 %v1165_v21  ;;  %2940 = vmatpush.msra.mxu2 %v1127_v9  ;;  %v1139_v21 = vld [vmem:[#allocation2 + $0x780] sm:$0xff] }
 0x401   :  { %v6381_v18 = vpop.f32.mrf.mxu1  ;;  %v2457_v58 = vadd.f32 %v2456_v42, %v2392_v35  ;;  %v2521_v39 = vpop.f32.mrf.mxu3  ;;  %3004 = vmatpush.msra.mxu3 %v1144_v62  ;;  %v1125_v35 = vld [vmem:[#allocation2 + $0x710] sm:$0xff]  ;;  %v1806_v42 = vld [vmem:[%s8048_s1 + $0xc58] sm:$0xff]  ;;  %v1159_v9 = vld [vmem:[#allocation2 + $0x820] sm:$0xff] }
 0x402   :  { %3065 = vmatpush.msra.mxu0 %v1164_v0  ;;  %2941 = vmatpush.msra.mxu2 %v1126_v8  ;;  %v1807_v0 = vld [vmem:[%s8048_s1 + $0xc60] sm:$0xff] }
 0x403   :  { %v6389_v51 = vadd.f32 %v2521_v39, %v2457_v58  ;;  %3005 = vmatpush.msra.mxu3 %v1143_v4  ;;  %v1162_v58 = vld [vmem:[#allocation2 + $0x838] sm:$0xff]  ;;  %v2398_v39 = vadd.f32 %v6381_v18, %v2333_v38  ;;  %v1837_v18 = vld [vmem:[%s8048_s1 + $0xd50] sm:$0xff]  ;;  %v1839_v38 = vld [vmem:[%s8048_s1 + $0xd60] sm:$0xff] }
 0x404   :  { %2656 = vmatmul.f32.gmra.mxu1 %v1804_v45  ;;  %v6391_v1 = vpop.f32.mrf.mxu0  ;;  %v1775_v45 = vld [vmem:[%s8048_s1 + $0xb60] sm:$0xff]  ;;  %3066 = vmatpush.msra.mxu0 %v1163_v59 }
 0x405   :  { %2718 = vmatmul.f32.gmra.mxu2 %v1773_v53  ;;  %3006 = vmatpush.msra.mxu3 %v1142_v32  ;;  %v1161_v53 = vld [vmem:[#allocation2 + $0x830] sm:$0xff] }
 0x406   :  { %2783 = vmatmul.f32.gmra.mxu3 %v1774_v31  ;;  %2942 = vmatpush.msra.mxu2 %v1125_v35  ;;  %v1868_v31 = vld [vmem:[%s8048_s1 + $0xe48] sm:$0xff] }
 0x407   :  { %2845 = vmatmul.f32.gmra.mxu0 %v1743_v27  ;;  %3007 = vmatpush.msra.mxu3 %v1141_v41  ;;  %v1160_v27 = vld [vmem:[#allocation2 + $0x828] sm:$0xff] }
 0x408   :  { %v2459_v36 = vpop.f32.mrf.mxu2  ;;  %3067 = vmatpush.msra.mxu0 %v1162_v58  ;;  %2943 = vmatpush.msra.mxu2 %v1124_v47  ;;  %v1156_v35 = vld [vmem:[#allocation2 + $0x808] sm:$0xff]  ;;  %v2339_v58 = vadd.f32 %v6168_v26, %v6166_v5  ;;  %v1902_v26 = vld [vmem:[%s8048_s1 + $0xf58] sm:$0xff] }
 0x409   :  { %v2400_v7 = vpop.f32.mrf.mxu1  ;;  %v2460_v22 = vadd.f32 %v2459_v36, %v2395_v57  ;;  %v2524_v54 = vpop.f32.mrf.mxu3  ;;  %3008 = vmatpush.msra.mxu3 %v1140_v12  ;;  %v1838_v57 = vld [vmem:[%s8048_s1 + $0xd58] sm:$0xff]  ;;  %v2336_v36 = vadd.f32 %v6150_v60, %v6148_v6  ;;  %v1869_v6 = vld [vmem:[%s8048_s1 + $0xe50] sm:$0xff] }
 0x40a   :  { %3068 = vmatpush.msra.mxu0 %v1161_v53  ;;  %2944 = vmatpush.msra.mxu2 %v1123_v19  ;;  %v1424_v53 = vld [vmem:[%s8048_s1 + $0x68] sm:$0xff] }
 0x40b   :  { %v6408_v55 = vadd.f32 %v2524_v54, %v2460_v22  ;;  %3009 = vmatpush.msra.mxu3 %v1139_v21  ;;  %v2401_v8 = vadd.f32 %v2400_v7, %v2336_v36  ;;  %v1157_v22 = vld [vmem:[#allocation2 + $0x810] sm:$0xff]  ;;  %v1900_v54 = vld [vmem:[%s8048_s1 + $0xf48] sm:$0xff]  ;;  %v1155_v7 = vld [vmem:[#allocation2 + $0x800] sm:$0xff] }
 0x40c   :  { %2659 = vmatmul.f32.gmra.mxu1 %v1836_v52  ;;  %v6410_v40 = vpop.f32.mrf.mxu0  ;;  %3069 = vmatpush.msra.mxu0 %v1160_v27  ;;  %v1158_v52 = vld [vmem:[#allocation2 + $0x818] sm:$0xff]  ;;  %v1456_v21 = vld [vmem:[%s8048_s1 + $0x168] sm:$0xff] }
 0x40d   :  { %2721 = vmatmul.f32.gmra.mxu2 %v1805_v15 }
 0x40e   :  { %2786 = vmatmul.f32.gmra.mxu3 %v1806_v42  ;;  %3070 = vmatpush.msra.mxu0 %v1159_v9 }
 0x40f   :  { %2848 = vmatmul.f32.gmra.mxu0 %v1775_v45  ;;  %v1870_v45 = vld [vmem:[%s8048_s1 + $0xe58] sm:$0xff] }
 0x410   :  { %v2462_v56 = vpop.f32.mrf.mxu2  ;;  %3071 = vmatpush.msra.mxu0 %v1158_v52  ;;  %v1426_v52 = vld [vmem:[%s8048_s1 + $0x78] sm:$0xff] }
 0x411   :  { %v2403_v16 = vpop.f32.mrf.mxu1  ;;  %v2463_v11 = vadd.f32 %v2462_v56, %v2398_v39  ;;  %v2527_v50 = vpop.f32.mrf.mxu3 }
 0x412   :  { %3072 = vmatpush.msra.mxu0 %v1157_v22  ;;  %v2404_v47 = vadd.f32 %v2403_v16, %v2339_v58  ;;  %v1871_v16 = vld [vmem:[%s8048_s1 + $0xe60] sm:$0xff] }
 0x413   :  { %v6427_v34 = vadd.f32 %v2527_v50, %v2463_v11  ;;  %v2342_v11 = vadd.f32 %v6186_v23, %v6184_v37  ;;  %v1903_v23 = vld [vmem:[%s8048_s1 + $0xf60] sm:$0xff] }
 0x414   :  { %2662 = vmatmul.f32.gmra.mxu1 %v1868_v31  ;;  %v6429_v62 = vpop.f32.mrf.mxu0  ;;  %3073 = vmatpush.msra.mxu0 %v1156_v35  ;;  %v1901_v31 = vld [vmem:[%s8048_s1 + $0xf50] sm:$0xff] }
 0x415   :  { %2724 = vmatmul.f32.gmra.mxu2 %v1837_v18 }
 0x416   :  { %2789 = vmatmul.f32.gmra.mxu3 %v1838_v57  ;;  %3074 = vmatpush.msra.mxu0 %v1155_v7  ;;  %v1427_v7 = vld [vmem:[%s8048_s1 + $0x80] sm:$0xff] }
 0x417   :  { %2851 = vmatmul.f32.gmra.mxu0 %v1807_v0  ;;  %v1425_v0 = vld [vmem:[%s8048_s1 + $0x70] sm:$0xff] }
 0x418   :  { %v2465_v4 = vpop.f32.mrf.mxu2 }
 0x419   :  { %v2406_v59 = vpop.f32.mrf.mxu1  ;;  %v2466_v15 = vadd.f32 %v2465_v4, %v2401_v8  ;;  %v2530_v32 = vpop.f32.mrf.mxu3  ;;  %v2557_v8 = vadd.f32 %v6204_v29, %v6202_v30  ;;  %v1458_v29 = vld [vmem:[%s8048_s1 + $0x178] sm:$0xff] }
 0x41a   :  { %v2407_v27 = vadd.f32 %v2406_v59, %v2342_v11 }
 0x41b   :  { %v6445_v60 = vadd.f32 %v2530_v32, %v2466_v15  ;;  %v1457_v32 = vld [vmem:[%s8048_s1 + $0x170] sm:$0xff] }
 0x41c   :  { %2665 = vmatmul.f32.gmra.mxu1 %v1900_v54  ;;  %v6447_v42 = vpop.f32.mrf.mxu0  ;;  %v1488_v54 = vld [vmem:[%s8048_s1 + $0x268] sm:$0xff] }
 0x41d   :  { %2727 = vmatmul.f32.gmra.mxu2 %v1869_v6 }
 0x41e   :  { %2792 = vmatmul.f32.gmra.mxu3 %v1870_v45  ;;  %v2560_v45 = vadd.f32 %v6222_v44, %v6220_v43  ;;  %v1490_v44 = vld [vmem:[%s8048_s1 + $0x278] sm:$0xff] }
 0x41f   :  { %2854 = vmatmul.f32.gmra.mxu0 %v1839_v38 }
 0x420   :  { %v2468_v41 = vpop.f32.mrf.mxu2 }
 0x421   :  { %v2621_v39 = vpop.f32.mrf.mxu1  ;;  %v2469_v19 = vadd.f32 %v2468_v41, %v2404_v47  ;;  %v2533_v56 = vpop.f32.mrf.mxu3  ;;  %v1520_v41 = vld [vmem:[%s8048_s1 + $0x368] sm:$0xff] }
 0x422   :  { %v2622_v22 = vadd.f32 %v2621_v39, %v2557_v8 }
 0x423   :  { %v6463_v12 = vadd.f32 %v2533_v56, %v2469_v19  ;;  %v1489_v19 = vld [vmem:[%s8048_s1 + $0x270] sm:$0xff] }
 0x424   :  { %2880 = vmatmul.f32.vlgmr.msra.gmra.mxu1 %v1424_v53  ;;  %v6465_v5 = vpop.f32.mrf.mxu0 }
 0x425   :  { %2730 = vmatmul.f32.gmra.mxu2 %v1901_v31  ;;  %v1459_v31 = vld [vmem:[%s8048_s1 + $0x180] sm:$0xff] }
 0x426   :  { %2795 = vmatmul.f32.gmra.mxu3 %v1902_v26  ;;  %v2563_v26 = vadd.f32 %v6240_v49, %v6238_v24  ;;  %v1522_v49 = vld [vmem:[%s8048_s1 + $0x378] sm:$0xff] }
 0x427   :  { %2857 = vmatmul.f32.gmra.mxu0 %v1871_v16 }
 0x428   :  { %v2471_v50 = vpop.f32.mrf.mxu2 }
 0x429   :  { %v2624_v18 = vpop.f32.mrf.mxu1  ;;  %v2472_v9 = vadd.f32 %v2471_v50, %v2407_v27  ;;  %v2536_v57 = vpop.f32.mrf.mxu3  ;;  %v1552_v50 = vld [vmem:[%s8048_s1 + $0x468] sm:$0xff] }
 0x42a   :  { %v2625_v38 = vadd.f32 %v2624_v18, %v2560_v45 }
 0x42b   :  { %v6481_v36 = vadd.f32 %v2536_v57, %v2472_v9  ;;  %v1521_v9 = vld [vmem:[%s8048_s1 + $0x370] sm:$0xff] }
 0x42c   :  { %2883 = vmatmul.f32.gmra.mxu1 %v1456_v21  ;;  %v6483_v37 = vpop.f32.mrf.mxu0 }
 0x42d   :  { %2945 = vmatmul.f32.vlgmr.msra.gmra.mxu2 %v1425_v0  ;;  %v1491_v0 = vld [vmem:[%s8048_s1 + $0x280] sm:$0xff] }
 0x42e   :  { %3010 = vmatmul.f32.vlgmr.msra.gmra.mxu3 %v1426_v52 }
 0x42f   :  { %2860 = vmatmul.f32.gmra.mxu0 %v1903_v23  ;;  %v2566_v23 = vadd.f32 %v6258_v20, %v6256_v28  ;;  %v1554_v20 = vld [vmem:[%s8048_s1 + $0x478] sm:$0xff] }
 0x430   :  { %v2686_v4 = vpop.f32.mrf.mxu2 }
 0x431   :  { %v2627_v59 = vpop.f32.mrf.mxu1  ;;  %v2687_v15 = vadd.f32 %v2686_v4, %v2622_v22  ;;  %v2751_v35 = vpop.f32.mrf.mxu3  ;;  %v1584_v4 = vld [vmem:[%s8048_s1 + $0x568] sm:$0xff] }
 0x432   :  { %v2628_v16 = vadd.f32 %v2627_v59, %v2563_v26 }
 0x433   :  { %v6499_v6 = vadd.f32 %v2751_v35, %v2687_v15  ;;  %v1553_v15 = vld [vmem:[%s8048_s1 + $0x470] sm:$0xff] }
 0x434   :  { %2886 = vmatmul.f32.gmra.mxu1 %v1488_v54  ;;  %v6501_v30 = vpop.f32.mrf.mxu0 }
 0x435   :  { %2948 = vmatmul.f32.gmra.mxu2 %v1457_v32  ;;  %v1523_v32 = vld [vmem:[%s8048_s1 + $0x380] sm:$0xff] }
 0x436   :  { %3013 = vmatmul.f32.gmra.mxu3 %v1458_v29  ;;  %v2569_v29 = vadd.f32 %v6276_v46, %v6274_v63  ;;  %v1586_v46 = vld [vmem:[%s8048_s1 + $0x578] sm:$0xff] }
 0x437   :  { %3075 = vmatmul.f32.vlgmr.msra.gmra.mxu0 %v1427_v7 }
 0x438   :  { %v2689_v58 = vpop.f32.mrf.mxu2 }
 0x439   :  { %v2630_v47 = vpop.f32.mrf.mxu1  ;;  %v2690_v39 = vadd.f32 %v2689_v58, %v2625_v38  ;;  %v2754_v53 = vpop.f32.mrf.mxu3  ;;  %v1616_v58 = vld [vmem:[%s8048_s1 + $0x668] sm:$0xff] }
 0x43a   :  { %v2631_v52 = vadd.f32 %v2630_v47, %v2566_v23 }
 0x43b   :  { %v6517_v56 = vadd.f32 %v2754_v53, %v2690_v39  ;;  %v1585_v39 = vld [vmem:[%s8048_s1 + $0x570] sm:$0xff] }
 0x43c   :  { %2889 = vmatmul.f32.gmra.mxu1 %v1520_v41  ;;  %v6519_v43 = vpop.f32.mrf.mxu0 }
 0x43d   :  { %2951 = vmatmul.f32.gmra.mxu2 %v1489_v19  ;;  %v1555_v19 = vld [vmem:[%s8048_s1 + $0x480] sm:$0xff] }
 0x43e   :  { %3016 = vmatmul.f32.gmra.mxu3 %v1490_v44  ;;  %v2572_v44 = vadd.f32 %v6294_v2, %v6292_v61  ;;  %v1618_v2 = vld [vmem:[%s8048_s1 + $0x678] sm:$0xff] }
 0x43f   :  { %3078 = vmatmul.f32.gmra.mxu0 %v1459_v31 }
 0x440   :  { %v2692_v11 = vpop.f32.mrf.mxu2 }
 0x441   :  { %v2633_v27 = vpop.f32.mrf.mxu1  ;;  %v2693_v18 = vadd.f32 %v2692_v11, %v2628_v16  ;;  %v2757_v21 = vpop.f32.mrf.mxu3  ;;  %v1648_v11 = vld [vmem:[%s8048_s1 + $0x768] sm:$0xff] }
 0x442   :  { %v2634_v7 = vadd.f32 %v2633_v27, %v2569_v29  ;;  %v1185_v29 = vld [vmem:[#allocation2 + $0x8f0] sm:$0xff] }
 0x443   :  { %v6535_v57 = vadd.f32 %v2757_v21, %v2693_v18  ;;  %v1617_v18 = vld [vmem:[%s8048_s1 + $0x670] sm:$0xff] }
 0x444   :  { %2892 = vmatmul.f32.gmra.mxu1 %v1552_v50  ;;  %v6537_v24 = vpop.f32.mrf.mxu0 }
 0x445   :  { %2954 = vmatmul.f32.gmra.mxu2 %v1521_v9  ;;  %v1587_v9 = vld [vmem:[%s8048_s1 + $0x580] sm:$0xff] }
 0x446   :  { %3019 = vmatmul.f32.gmra.mxu3 %v1522_v49  ;;  %v2575_v49 = vadd.f32 %v6312_v13, %v6310_v10  ;;  %v1650_v13 = vld [vmem:[%s8048_s1 + $0x778] sm:$0xff] }
 0x447   :  { %3081 = vmatmul.f32.gmra.mxu0 %v1491_v0 }
 0x448   :  { %v2695_v8 = vpop.f32.mrf.mxu2 }
 0x449   :  { %v2636_v22 = vpop.f32.mrf.mxu1  ;;  %v2696_v59 = vadd.f32 %v2695_v8, %v2631_v52  ;;  %v2760_v54 = vpop.f32.mrf.mxu3  ;;  %v1680_v8 = vld [vmem:[%s8048_s1 + $0x868] sm:$0xff] }
 0x44a   :  { %v2637_v31 = vadd.f32 %v2636_v22, %v2572_v44  ;;  %v1682_v44 = vld [vmem:[%s8048_s1 + $0x878] sm:$0xff] }
 0x44b   :  { %v6553_v35 = vadd.f32 %v2760_v54, %v2696_v59  ;;  %v1649_v59 = vld [vmem:[%s8048_s1 + $0x770] sm:$0xff] }
 0x44c   :  { %2895 = vmatmul.f32.gmra.mxu1 %v1584_v4  ;;  %v6555_v28 = vpop.f32.mrf.mxu0 }
 0x44d   :  { %2957 = vmatmul.f32.gmra.mxu2 %v1553_v15  ;;  %v1619_v15 = vld [vmem:[%s8048_s1 + $0x680] sm:$0xff] }
 0x44e   :  { %3022 = vmatmul.f32.gmra.mxu3 %v1554_v20  ;;  %v1186_v20 = vld [vmem:[#allocation2 + $0x8f8] sm:$0xff] }
 0x44f   :  { %3084 = vmatmul.f32.gmra.mxu0 %v1523_v32  ;;  %v2578_v32 = vadd.f32 %v6330_v48, %v6328_v33  ;;  %3124 = vmatpush.msrb.mxu1 %v1186_v20  ;;  %v1681_v33 = vld [vmem:[%s8048_s1 + $0x870] sm:$0xff]  ;;  %v1183_v48 = vld [vmem:[#allocation2 + $0x8e0] sm:$0xff] }
 0x450   :  { %v2698_v45 = vpop.f32.mrf.mxu2 }
 0x451   :  { %v2639_v38 = vpop.f32.mrf.mxu1  ;;  %v2699_v47 = vadd.f32 %v2698_v45, %v2634_v7  ;;  %v2763_v41 = vpop.f32.mrf.mxu3  ;;  %3125 = vmatpush.msrb.mxu1 %v1185_v29  ;;  %v1683_v29 = vld [vmem:[%s8048_s1 + $0x880] sm:$0xff] }
 0x452   :  { %v2640_v0 = vadd.f32 %v2639_v38, %v2575_v49 }
 0x453   :  { %v6571_v53 = vadd.f32 %v2763_v41, %v2699_v47  ;;  %v1184_v47 = vld [vmem:[#allocation2 + $0x8e8] sm:$0xff] }
 0x454   :  { %2898 = vmatmul.f32.gmra.mxu1 %v1616_v58  ;;  %v6573_v63 = vpop.f32.mrf.mxu0  ;;  %v1712_v58 = vld [vmem:[%s8048_s1 + $0x968] sm:$0xff] }
 0x455   :  { %2960 = vmatmul.f32.gmra.mxu2 %v1585_v39  ;;  %3126 = vmatpush.msrb.mxu1 %v1184_v47  ;;  %v1215_v47 = vld [vmem:[#allocation2 + $0x9e0] sm:$0xff] }
 0x456   :  { %3025 = vmatmul.f32.gmra.mxu3 %v1586_v46 }
 0x457   :  { %3087 = vmatmul.f32.gmra.mxu0 %v1555_v19  ;;  %3127 = vmatpush.msrb.mxu1 %v1183_v48  ;;  %v1214_v48 = vld [vmem:[#allocation2 + $0x9d8] sm:$0xff] }
 0x458   :  { %v2701_v26 = vpop.f32.mrf.mxu2 }
 0x459   :  { %v2642_v16 = vpop.f32.mrf.mxu1  ;;  %v2702_v27 = vadd.f32 %v2701_v26, %v2637_v31  ;;  %v2766_v50 = vpop.f32.mrf.mxu3  ;;  %v1651_v31 = vld [vmem:[%s8048_s1 + $0x780] sm:$0xff]  ;;  %v1182_v26 = vld [vmem:[#allocation2 + $0x8d8] sm:$0xff] }
 0x45a   :  { %v2643_v7 = vadd.f32 %v2642_v16, %v2578_v32  ;;  %v2581_v16 = vadd.f32 %v6350_v25, %v6348_v14  ;;  %3128 = vmatpush.msrb.mxu1 %v1182_v26  ;;  %v1180_v14 = vld [vmem:[#allocation2 + $0x8c8] sm:$0xff]  ;;  %v1714_v32 = vld [vmem:[%s8048_s1 + $0x978] sm:$0xff] }
 0x45b   :  { %v6589_v21 = vadd.f32 %v2766_v50, %v2702_v27  ;;  %v1181_v27 = vld [vmem:[#allocation2 + $0x8d0] sm:$0xff] }
 0x45c   :  { %2901 = vmatmul.f32.gmra.mxu1 %v1648_v11  ;;  %v6591_v61 = vpop.f32.mrf.mxu0  ;;  %v1202_v11 = vld [vmem:[#allocation2 + $0x978] sm:$0xff] }
 0x45d   :  { %2963 = vmatmul.f32.gmra.mxu2 %v1617_v18  ;;  %v1201_v18 = vld [vmem:[#allocation2 + $0x970] sm:$0xff]  ;;  %3129 = vmatpush.msrb.mxu1 %v1181_v27 }
 0x45e   :  { %3028 = vmatmul.f32.gmra.mxu3 %v1618_v2  ;;  %3189 = vmatpush.msrb.mxu2 %v1202_v11  ;;  %v1218_v2 = vld [vmem:[#allocation2 + $0x9f8] sm:$0xff]  ;;  %v1196_v11 = vld [vmem:[#allocation2 + $0x948] sm:$0xff]  ;;  %v1233_v27 = vld [vmem:[#allocation2 + $0xa70] sm:$0xff] }
 0x45f   :  { %3090 = vmatmul.f32.gmra.mxu0 %v1587_v9  ;;  %3254 = vmatpush.msrb.mxu3 %v1218_v2  ;;  %v1175_v2 = vld [vmem:[#allocation2 + $0x8a0] sm:$0xff] }
 0x460   :  { %v2704_v23 = vpop.f32.mrf.mxu2  ;;  %3190 = vmatpush.msrb.mxu2 %v1201_v18  ;;  %3130 = vmatpush.msrb.mxu1 %v1180_v14  ;;  %v1745_v18 = vld [vmem:[%s8048_s1 + $0xa70] sm:$0xff]  ;;  %v1212_v14 = vld [vmem:[#allocation2 + $0x9c8] sm:$0xff] }
 0x461   :  { %v2645_v52 = vpop.f32.mrf.mxu1  ;;  %v2705_v22 = vadd.f32 %v2704_v23, %v2640_v0  ;;  %v2769_v4 = vpop.f32.mrf.mxu3  ;;  %v1744_v0 = vld [vmem:[%s8048_s1 + $0xa68] sm:$0xff] }
 0x462   :  { %v2646_v50 = vadd.f32 %v2645_v52, %v2581_v16  ;;  %v1200_v23 = vld [vmem:[#allocation2 + $0x968] sm:$0xff]  ;;  %v1713_v52 = vld [vmem:[%s8048_s1 + $0x970] sm:$0xff] }
 0x463   :  { %v6607_v54 = vadd.f32 %v2769_v4, %v2705_v22  ;;  %3191 = vmatpush.msrb.mxu2 %v1200_v23  ;;  %v1179_v4 = vld [vmem:[#allocation2 + $0x8c0] sm:$0xff]  ;;  %v1746_v23 = vld [vmem:[%s8048_s1 + $0xa78] sm:$0xff] }
 0x464   :  { %2904 = vmatmul.f32.gmra.mxu1 %v1680_v8  ;;  %v6609_v10 = vpop.f32.mrf.mxu0  ;;  %v1217_v8 = vld [vmem:[#allocation2 + $0x9f0] sm:$0xff] }
 0x465   :  { %2966 = vmatmul.f32.gmra.mxu2 %v1649_v59  ;;  %3255 = vmatpush.msrb.mxu3 %v1217_v8  ;;  %v1715_v8 = vld [vmem:[%s8048_s1 + $0x980] sm:$0xff] }
 0x466   :  { %3031 = vmatmul.f32.gmra.mxu3 %v1650_v13  ;;  %v1199_v13 = vld [vmem:[#allocation2 + $0x960] sm:$0xff]  ;;  %3131 = vmatpush.msrb.mxu1 %v1179_v4  ;;  %v1174_v4 = vld [vmem:[#allocation2 + $0x898] sm:$0xff] }
 0x467   :  { %3093 = vmatmul.f32.gmra.mxu0 %v1619_v15  ;;  %v1216_v15 = vld [vmem:[#allocation2 + $0x9e8] sm:$0xff]  ;;  %3192 = vmatpush.msrb.mxu2 %v1199_v13  ;;  %v1194_v13 = vld [vmem:[#allocation2 + $0x938] sm:$0xff] }
 0x468   :  { %v2707_v45 = vpop.f32.mrf.mxu2  ;;  %3256 = vmatpush.msrb.mxu3 %v1216_v15  ;;  %v1211_v15 = vld [vmem:[#allocation2 + $0x9c0] sm:$0xff] }
 0x469   :  { %v2648_v38 = vpop.f32.mrf.mxu1  ;;  %v2708_v41 = vadd.f32 %v2707_v45, %v2643_v7  ;;  %v2772_v39 = vpop.f32.mrf.mxu3  ;;  %v1178_v7 = vld [vmem:[#allocation2 + $0x8b8] sm:$0xff]  ;;  %v2584_v45 = vadd.f32 %v6370_v17, %v6368_v3  ;;  %v1776_v3 = vld [vmem:[%s8048_s1 + $0xb68] sm:$0xff] }
 0x46a   :  { %3132 = vmatpush.msrb.mxu1 %v1178_v7  ;;  %3257 = vmatpush.msrb.mxu3 %v1215_v47  ;;  %v1176_v17 = vld [vmem:[#allocation2 + $0x8a8] sm:$0xff]  ;;  %v1173_v7 = vld [vmem:[#allocation2 + $0x890] sm:$0xff] }
 0x46b   :  { %v6625_v46 = vadd.f32 %v2772_v39, %v2708_v41  ;;  %v1177_v41 = vld [vmem:[#allocation2 + $0x8b0] sm:$0xff]  ;;  %v2649_v39 = vadd.f32 %v2648_v38, %v2584_v45 }
 0x46c   :  { %2907 = vmatmul.f32.gmra.mxu1 %v1712_v58  ;;  %v6627_v19 = vpop.f32.mrf.mxu0  ;;  %v1198_v58 = vld [vmem:[#allocation2 + $0x958] sm:$0xff]  ;;  %v1213_v38 = vld [vmem:[#allocation2 + $0x9d0] sm:$0xff]  ;;  %3258 = vmatpush.msrb.mxu3 %v1214_v48  ;;  %v1172_v48 = vld [vmem:[#allocation2 + $0x888] sm:$0xff] }
 0x46d   :  { %2969 = vmatmul.f32.gmra.mxu2 %v1681_v33  ;;  %v1197_v33 = vld [vmem:[#allocation2 + $0x950] sm:$0xff]  ;;  %3133 = vmatpush.msrb.mxu1 %v1177_v41  ;;  %v1210_v41 = vld [vmem:[#allocation2 + $0x9b8] sm:$0xff] }
 0x46e   :  { %3034 = vmatmul.f32.gmra.mxu3 %v1682_v44  ;;  %3193 = vmatpush.msrb.mxu2 %v1198_v58  ;;  %v1234_v44 = vld [vmem:[#allocation2 + $0xa78] sm:$0xff] }
 0x46f   :  { %3096 = vmatmul.f32.gmra.mxu0 %v1651_v31  ;;  %3134 = vmatpush.msrb.mxu1 %v1176_v17 }
 0x470   :  { %v2710_v9 = vpop.f32.mrf.mxu2  ;;  %3194 = vmatpush.msrb.mxu2 %v1197_v33  ;;  %3319 = vmatpush.msrb.mxu0 %v1234_v44  ;;  %v1777_v33 = vld [vmem:[%s8048_s1 + $0xb70] sm:$0xff] }
 0x471   :  { %v6637_v49 = vpop.f32.mrf.mxu1  ;;  %v2711_v25 = vadd.f32 %v2710_v9, %v2646_v50  ;;  %v2775_v22 = vpop.f32.mrf.mxu3  ;;  %3259 = vmatpush.msrb.mxu3 %v1213_v38  ;;  %3135 = vmatpush.msrb.mxu1 %v1175_v2  ;;  %v2590_v38 = vadd.f32 %v6410_v40, %v6408_v55  ;;  %v1208_v2 = vld [vmem:[#allocation2 + $0x9a8] sm:$0xff]  ;;  %v1190_v55 = vld [vmem:[#allocation2 + $0x918] sm:$0xff] }
 0x472   :  { %3195 = vmatpush.msrb.mxu2 %v1196_v11  ;;  %3320 = vmatpush.msrb.mxu0 %v1233_v27  ;;  %v1747_v11 = vld [vmem:[%s8048_s1 + $0xa80] sm:$0xff]  ;;  %v1229_v27 = vld [vmem:[#allocation2 + $0xa50] sm:$0xff] }
 0x473   :  { %v6645_v59 = vadd.f32 %v2775_v22, %v2711_v25  ;;  %v2587_v22 = vadd.f32 %v6391_v1, %v6389_v51  ;;  %3260 = vmatpush.msrb.mxu3 %v1212_v14  ;;  %v1808_v51 = vld [vmem:[%s8048_s1 + $0xc68] sm:$0xff]  ;;  %3136 = vmatpush.msrb.mxu1 %v1174_v4  ;;  %v1193_v1 = vld [vmem:[#allocation2 + $0x930] sm:$0xff]  ;;  %v1227_v4 = vld [vmem:[#allocation2 + $0xa40] sm:$0xff] }
 0x474   :  { %2910 = vmatmul.f32.gmra.mxu1 %v1744_v0  ;;  %v6647_v20 = vpop.f32.mrf.mxu0  ;;  %v1195_v0 = vld [vmem:[#allocation2 + $0x940] sm:$0xff]  ;;  %v1228_v14 = vld [vmem:[#allocation2 + $0xa48] sm:$0xff] }
 0x475   :  { %2972 = vmatmul.f32.gmra.mxu2 %v1713_v52  ;;  %v1232_v52 = vld [vmem:[#allocation2 + $0xa68] sm:$0xff]  ;;  %3261 = vmatpush.msrb.mxu3 %v1211_v15 }
 0x476   :  { %3037 = vmatmul.f32.gmra.mxu3 %v1714_v32  ;;  %3196 = vmatpush.msrb.mxu2 %v1195_v0  ;;  %v2652_v32 = vadd.f32 %v6637_v49, %v2587_v22  ;;  %v1840_v22 = vld [vmem:[%s8048_s1 + $0xd68] sm:$0xff] }
 0x477   :  { %3099 = vmatmul.f32.gmra.mxu0 %v1683_v29  ;;  %v1231_v29 = vld [vmem:[#allocation2 + $0xa60] sm:$0xff]  ;;  %3137 = vmatpush.msrb.mxu1 %v1173_v7 }
 0x478   :  { %v2713_v31 = vpop.f32.mrf.mxu2  ;;  %3321 = vmatpush.msrb.mxu0 %v1232_v52  ;;  %3197 = vmatpush.msrb.mxu2 %v1194_v13  ;;  %v1207_v52 = vld [vmem:[#allocation2 + $0x9a0] sm:$0xff] }
 0x479   :  { %v6657_v26 = vpop.f32.mrf.mxu1  ;;  %v2714_v16 = vadd.f32 %v2713_v31, %v2649_v39  ;;  %v2778_v50 = vpop.f32.mrf.mxu3  ;;  %v1230_v39 = vld [vmem:[#allocation2 + $0xa58] sm:$0xff]  ;;  %v1192_v31 = vld [vmem:[#allocation2 + $0x928] sm:$0xff]  ;;  %3262 = vmatpush.msrb.mxu3 %v1210_v41  ;;  %3138 = vmatpush.msrb.mxu1 %v1172_v48  ;;  %v1187_v48 = vld [vmem:[#allocation2 + $0x900] sm:$0xff] }
 0x47a   :  { %3322 = vmatpush.msrb.mxu0 %v1231_v29  ;;  %3198 = vmatpush.msrb.mxu2 %v1193_v1  ;;  %v2655_v0 = vadd.f32 %v6657_v26, %v2590_v38  ;;  %v1809_v26 = vld [vmem:[%s8048_s1 + $0xc70] sm:$0xff]  ;;  %v1206_v29 = vld [vmem:[#allocation2 + $0x998] sm:$0xff]  ;;  %v2593_v1 = vadd.f32 %v6429_v62, %v6427_v34  ;;  %v1188_v41 = vld [vmem:[#allocation2 + $0x908] sm:$0xff] }
 0x47b   :  { %v6665_v9 = vadd.f32 %v2778_v50, %v2714_v16  ;;  %v1778_v16 = vld [vmem:[%s8048_s1 + $0xb78] sm:$0xff]  ;;  %v1171_v50 = vld [vmem:[#allocation2 + $0x880] sm:$0xff]  ;;  %v1204_v34 = vld [vmem:[#allocation2 + $0x988] sm:$0xff] }
 0x47c   :  { %2913 = vmatmul.f32.gmra.mxu1 %v1776_v3  ;;  %v6667_v25 = vpop.f32.mrf.mxu0  ;;  %v1209_v3 = vld [vmem:[#allocation2 + $0x9b0] sm:$0xff]  ;;  %3323 = vmatpush.msrb.mxu0 %v1230_v39 }
 0x47d   :  { %2975 = vmatmul.f32.gmra.mxu2 %v1745_v18  ;;  %3263 = vmatpush.msrb.mxu3 %v1209_v3  ;;  %v1191_v18 = vld [vmem:[#allocation2 + $0x920] sm:$0xff]  ;;  %v1205_v39 = vld [vmem:[#allocation2 + $0x990] sm:$0xff] }
 0x47e   :  { %3040 = vmatmul.f32.gmra.mxu3 %v1746_v23  ;;  %3199 = vmatpush.msrb.mxu2 %v1192_v31 }
 0x47f   :  { %3102 = vmatmul.f32.gmra.mxu0 %v1715_v8  ;;  %3139 = vmatpush.msrb.mxu1 %v1171_v50 }
 0x480   :  { %v2716_v45 = vpop.f32.mrf.mxu2  ;;  %3324 = vmatpush.msrb.mxu0 %v1229_v27  ;;  %3200 = vmatpush.msrb.mxu2 %v1191_v18  ;;  %v1203_v27 = vld [vmem:[#allocation2 + $0x980] sm:$0xff] }
 0x481   :  { %v6678_v58 = vpop.f32.mrf.mxu1  ;;  %v2717_v47 = vadd.f32 %v2716_v45, %v2652_v32  ;;  %v2781_v49 = vpop.f32.mrf.mxu3  ;;  %3264 = vmatpush.msrb.mxu3 %v1208_v2  ;;  %v1189_v32 = vld [vmem:[#allocation2 + $0x910] sm:$0xff]  ;;  %v1810_v45 = vld [vmem:[%s8048_s1 + $0xc78] sm:$0xff]  ;;  %v1223_v18 = vld [vmem:[#allocation2 + $0xa20] sm:$0xff] }
 0x482   :  { %3325 = vmatpush.msrb.mxu0 %v1228_v14  ;;  %3201 = vmatpush.msrb.mxu2 %v1190_v55  ;;  %v1811_v14 = vld [vmem:[%s8048_s1 + $0xc80] sm:$0xff] }
 0x483   :  { %v6686_v44 = vadd.f32 %v2781_v49, %v2717_v47  ;;  %3265 = vmatpush.msrb.mxu3 %v1207_v52  ;;  %v1226_v47 = vld [vmem:[#allocation2 + $0xa38] sm:$0xff]  ;;  %v2658_v49 = vadd.f32 %v6678_v58, %v2593_v1  ;;  %v1841_v58 = vld [vmem:[%s8048_s1 + $0xd70] sm:$0xff]  ;;  %v1843_v1 = vld [vmem:[%s8048_s1 + $0xd80] sm:$0xff] }
 0x484   :  { %2916 = vmatmul.f32.gmra.mxu1 %v1808_v51  ;;  %v6688_v17 = vpop.f32.mrf.mxu0  ;;  %v1779_v51 = vld [vmem:[%s8048_s1 + $0xb80] sm:$0xff]  ;;  %3326 = vmatpush.msrb.mxu0 %v1227_v4 }
 0x485   :  { %2978 = vmatmul.f32.gmra.mxu2 %v1777_v33  ;;  %3266 = vmatpush.msrb.mxu3 %v1206_v29  ;;  %v1225_v33 = vld [vmem:[#allocation2 + $0xa30] sm:$0xff] }
 0x486   :  { %3043 = vmatmul.f32.gmra.mxu3 %v1778_v16  ;;  %3202 = vmatpush.msrb.mxu2 %v1189_v32  ;;  %v1872_v16 = vld [vmem:[%s8048_s1 + $0xe68] sm:$0xff] }
 0x487   :  { %3105 = vmatmul.f32.gmra.mxu0 %v1747_v11  ;;  %3267 = vmatpush.msrb.mxu3 %v1205_v39  ;;  %v1224_v11 = vld [vmem:[#allocation2 + $0xa28] sm:$0xff] }
 0x488   :  { %v2719_v23 = vpop.f32.mrf.mxu2  ;;  %3327 = vmatpush.msrb.mxu0 %v1226_v47  ;;  %3203 = vmatpush.msrb.mxu2 %v1188_v41  ;;  %v1220_v32 = vld [vmem:[#allocation2 + $0xa08] sm:$0xff]  ;;  %v2599_v47 = vadd.f32 %v6465_v5, %v6463_v12  ;;  %v1906_v5 = vld [vmem:[%s8048_s1 + $0xf78] sm:$0xff] }
 0x489   :  { %v2660_v8 = vpop.f32.mrf.mxu1  ;;  %v2720_v40 = vadd.f32 %v2719_v23, %v2655_v0  ;;  %v2784_v13 = vpop.f32.mrf.mxu3  ;;  %3268 = vmatpush.msrb.mxu3 %v1204_v34  ;;  %v1842_v0 = vld [vmem:[%s8048_s1 + $0xd78] sm:$0xff]  ;;  %v2596_v23 = vadd.f32 %v6447_v42, %v6445_v60  ;;  %v1873_v60 = vld [vmem:[%s8048_s1 + $0xe70] sm:$0xff] }
 0x48a   :  { %3328 = vmatpush.msrb.mxu0 %v1225_v33  ;;  %3204 = vmatpush.msrb.mxu2 %v1187_v48  ;;  %v1428_v33 = vld [vmem:[%s8048_s1 + $0x88] sm:$0xff] }
 0x48b   :  { %v6705_v15 = vadd.f32 %v2784_v13, %v2720_v40  ;;  %3269 = vmatpush.msrb.mxu3 %v1203_v27  ;;  %v2661_v55 = vadd.f32 %v2660_v8, %v2596_v23  ;;  %v1221_v40 = vld [vmem:[#allocation2 + $0xa10] sm:$0xff]  ;;  %v1904_v13 = vld [vmem:[%s8048_s1 + $0xf68] sm:$0xff]  ;;  %v1219_v8 = vld [vmem:[#allocation2 + $0xa00] sm:$0xff] }
 0x48c   :  { %2919 = vmatmul.f32.gmra.mxu1 %v1840_v22  ;;  %v6707_v7 = vpop.f32.mrf.mxu0  ;;  %3329 = vmatpush.msrb.mxu0 %v1224_v11  ;;  %v1222_v22 = vld [vmem:[#allocation2 + $0xa18] sm:$0xff]  ;;  %v1460_v27 = vld [vmem:[%s8048_s1 + $0x188] sm:$0xff] }
 0x48d   :  { %2981 = vmatmul.f32.gmra.mxu2 %v1809_v26 }
 0x48e   :  { %3046 = vmatmul.f32.gmra.mxu3 %v1810_v45  ;;  %3330 = vmatpush.msrb.mxu0 %v1223_v18 }
 0x48f   :  { %3108 = vmatmul.f32.gmra.mxu0 %v1779_v51  ;;  %v1874_v51 = vld [vmem:[%s8048_s1 + $0xe78] sm:$0xff] }
 0x490   :  { %v2722_v31 = vpop.f32.mrf.mxu2  ;;  %3331 = vmatpush.msrb.mxu0 %v1222_v22  ;;  %v1430_v22 = vld [vmem:[%s8048_s1 + $0x98] sm:$0xff] }
 0x491   :  { %v2663_v3 = vpop.f32.mrf.mxu1  ;;  %v2723_v62 = vadd.f32 %v2722_v31, %v2658_v49  ;;  %v2787_v38 = vpop.f32.mrf.mxu3 }
 0x492   :  { %3332 = vmatpush.msrb.mxu0 %v1221_v40  ;;  %v2664_v41 = vadd.f32 %v2663_v3, %v2599_v47  ;;  %v1875_v3 = vld [vmem:[%s8048_s1 + $0xe80] sm:$0xff] }
 0x493   :  { %v6724_v50 = vadd.f32 %v2787_v38, %v2723_v62  ;;  %v2602_v62 = vadd.f32 %v6483_v37, %v6481_v36  ;;  %v1907_v37 = vld [vmem:[%s8048_s1 + $0xf80] sm:$0xff] }
 0x494   :  { %2922 = vmatmul.f32.gmra.mxu1 %v1872_v16  ;;  %v6726_v2 = vpop.f32.mrf.mxu0  ;;  %3333 = vmatpush.msrb.mxu0 %v1220_v32  ;;  %v1905_v16 = vld [vmem:[%s8048_s1 + $0xf70] sm:$0xff] }
 0x495   :  { %2984 = vmatmul.f32.gmra.mxu2 %v1841_v58 }
 0x496   :  { %3049 = vmatmul.f32.gmra.mxu3 %v1842_v0  ;;  %3334 = vmatpush.msrb.mxu0 %v1219_v8  ;;  %v1431_v8 = vld [vmem:[%s8048_s1 + $0xa0] sm:$0xff] }
 0x497   :  { %3111 = vmatmul.f32.gmra.mxu0 %v1811_v14  ;;  %v1429_v14 = vld [vmem:[%s8048_s1 + $0x90] sm:$0xff] }
 0x498   :  { %v2725_v52 = vpop.f32.mrf.mxu2 }
 0x499   :  { %v2666_v4 = vpop.f32.mrf.mxu1  ;;  %v2726_v26 = vadd.f32 %v2725_v52, %v2661_v55  ;;  %v2790_v29 = vpop.f32.mrf.mxu3  ;;  %v2817_v55 = vadd.f32 %v6501_v30, %v6499_v6  ;;  %v1462_v30 = vld [vmem:[%s8048_s1 + $0x198] sm:$0xff] }
 0x49a   :  { %v2667_v11 = vadd.f32 %v2666_v4, %v2602_v62 }
 0x49b   :  { %v6742_v42 = vadd.f32 %v2790_v29, %v2726_v26  ;;  %v1461_v29 = vld [vmem:[%s8048_s1 + $0x190] sm:$0xff] }
 0x49c   :  { %2925 = vmatmul.f32.gmra.mxu1 %v1904_v13  ;;  %v6744_v45 = vpop.f32.mrf.mxu0  ;;  %v1492_v13 = vld [vmem:[%s8048_s1 + $0x288] sm:$0xff] }
 0x49d   :  { %2987 = vmatmul.f32.gmra.mxu2 %v1873_v60 }
 0x49e   :  { %3052 = vmatmul.f32.gmra.mxu3 %v1874_v51  ;;  %v2820_v51 = vadd.f32 %v6519_v43, %v6517_v56  ;;  %v1494_v43 = vld [vmem:[%s8048_s1 + $0x298] sm:$0xff] }
 0x49f   :  { %3114 = vmatmul.f32.gmra.mxu0 %v1843_v1 }
 0x4a0   :  { %v2728_v39 = vpop.f32.mrf.mxu2 }
 0x4a1   :  { %v2881_v49 = vpop.f32.mrf.mxu1  ;;  %v2729_v48 = vadd.f32 %v2728_v39, %v2664_v41  ;;  %v2793_v31 = vpop.f32.mrf.mxu3  ;;  %v1524_v39 = vld [vmem:[%s8048_s1 + $0x388] sm:$0xff] }
 0x4a2   :  { %v2882_v40 = vadd.f32 %v2881_v49, %v2817_v55 }
 0x4a3   :  { %v6760_v34 = vadd.f32 %v2793_v31, %v2729_v48  ;;  %v1493_v48 = vld [vmem:[%s8048_s1 + $0x290] sm:$0xff] }
 0x4a4   :  { %3140 = vmatmul.f32.vlgmr.msrb.gmra.mxu1 %v1428_v33  ;;  %v6762_v12 = vpop.f32.mrf.mxu0 }
 0x4a5   :  { %2990 = vmatmul.f32.gmra.mxu2 %v1905_v16  ;;  %v1463_v16 = vld [vmem:[%s8048_s1 + $0x1a0] sm:$0xff] }
 0x4a6   :  { %3055 = vmatmul.f32.gmra.mxu3 %v1906_v5  ;;  %v2823_v5 = vadd.f32 %v6537_v24, %v6535_v57  ;;  %v1526_v24 = vld [vmem:[%s8048_s1 + $0x398] sm:$0xff] }
 0x4a7   :  { %3117 = vmatmul.f32.gmra.mxu0 %v1875_v3 }
 0x4a8   :  { %v2731_v38 = vpop.f32.mrf.mxu2 }
 0x4a9   :  { %v2884_v58 = vpop.f32.mrf.mxu1  ;;  %v2732_v18 = vadd.f32 %v2731_v38, %v2667_v11  ;;  %v2796_v0 = vpop.f32.mrf.mxu3  ;;  %v1556_v38 = vld [vmem:[%s8048_s1 + $0x488] sm:$0xff] }
 0x4aa   :  { %v2885_v1 = vadd.f32 %v2884_v58, %v2820_v51 }
 0x4ab   :  { %v6778_v23 = vadd.f32 %v2796_v0, %v2732_v18  ;;  %v1525_v18 = vld [vmem:[%s8048_s1 + $0x390] sm:$0xff] }
 0x4ac   :  { %3143 = vmatmul.f32.gmra.mxu1 %v1460_v27  ;;  %v6780_v36 = vpop.f32.mrf.mxu0 }
 0x4ad   :  { %3205 = vmatmul.f32.vlgmr.msrb.gmra.mxu2 %v1429_v14  ;;  %v1495_v14 = vld [vmem:[%s8048_s1 + $0x2a0] sm:$0xff] }
 0x4ae   :  { %3270 = vmatmul.f32.vlgmr.msrb.gmra.mxu3 %v1430_v22 }
 0x4af   :  { %3120 = vmatmul.f32.gmra.mxu0 %v1907_v37  ;;  %v2826_v37 = vadd.f32 %v6555_v28, %v6553_v35  ;;  %v1558_v28 = vld [vmem:[%s8048_s1 + $0x498] sm:$0xff] }
 0x4b0   :  { %v2946_v52 = vpop.f32.mrf.mxu2 }
 0x4b1   :  { %v2887_v4 = vpop.f32.mrf.mxu1  ;;  %v2947_v26 = vadd.f32 %v2946_v52, %v2882_v40  ;;  %v3011_v32 = vpop.f32.mrf.mxu3  ;;  %v1588_v52 = vld [vmem:[%s8048_s1 + $0x588] sm:$0xff] }
 0x4b2   :  { %v2888_v3 = vadd.f32 %v2887_v4, %v2823_v5 }
 0x4b3   :  { %v6796_v60 = vadd.f32 %v3011_v32, %v2947_v26  ;;  %v1557_v26 = vld [vmem:[%s8048_s1 + $0x490] sm:$0xff] }
 0x4b4   :  { %3146 = vmatmul.f32.gmra.mxu1 %v1492_v13  ;;  %v6798_v6 = vpop.f32.mrf.mxu0 }
 0x4b5   :  { %3208 = vmatmul.f32.gmra.mxu2 %v1461_v29  ;;  %v1527_v29 = vld [vmem:[%s8048_s1 + $0x3a0] sm:$0xff] }
 0x4b6   :  { %3273 = vmatmul.f32.gmra.mxu3 %v1462_v30  ;;  %v2829_v30 = vadd.f32 %v6573_v63, %v6571_v53  ;;  %v1590_v63 = vld [vmem:[%s8048_s1 + $0x598] sm:$0xff] }
 0x4b7   :  { %3335 = vmatmul.f32.vlgmr.msrb.gmra.mxu0 %v1431_v8 }
 0x4b8   :  { %v2949_v47 = vpop.f32.mrf.mxu2 }
 0x4b9   :  { %v2890_v41 = vpop.f32.mrf.mxu1  ;;  %v2950_v49 = vadd.f32 %v2949_v47, %v2885_v1  ;;  %v3014_v33 = vpop.f32.mrf.mxu3  ;;  %v1620_v47 = vld [vmem:[%s8048_s1 + $0x688] sm:$0xff] }
 0x4ba   :  { %v2891_v22 = vadd.f32 %v2890_v41, %v2826_v37 }
 0x4bb   :  { %v6814_v31 = vadd.f32 %v3014_v33, %v2950_v49  ;;  %v1589_v49 = vld [vmem:[%s8048_s1 + $0x590] sm:$0xff] }
 0x4bc   :  { %3149 = vmatmul.f32.gmra.mxu1 %v1524_v39  ;;  %v6816_v56 = vpop.f32.mrf.mxu0 }
 0x4bd   :  { %3211 = vmatmul.f32.gmra.mxu2 %v1493_v48  ;;  %v1559_v48 = vld [vmem:[%s8048_s1 + $0x4a0] sm:$0xff] }
 0x4be   :  { %3276 = vmatmul.f32.gmra.mxu3 %v1494_v43  ;;  %v2832_v43 = vadd.f32 %v6591_v61, %v6589_v21  ;;  %v1622_v61 = vld [vmem:[%s8048_s1 + $0x698] sm:$0xff] }
 0x4bf   :  { %3338 = vmatmul.f32.gmra.mxu0 %v1463_v16 }
 0x4c0   :  { %v2952_v62 = vpop.f32.mrf.mxu2 }
 0x4c1   :  { %v2893_v11 = vpop.f32.mrf.mxu1  ;;  %v2953_v58 = vadd.f32 %v2952_v62, %v2888_v3  ;;  %v3017_v27 = vpop.f32.mrf.mxu3  ;;  %v1652_v62 = vld [vmem:[%s8048_s1 + $0x788] sm:$0xff] }
 0x4c2   :  { %v2894_v8 = vadd.f32 %v2893_v11, %v2829_v30  ;;  %v1249_v30 = vld [vmem:[#allocation2 + $0xaf0] sm:$0xff] }
 0x4c3   :  { %v6832_v0 = vadd.f32 %v3017_v27, %v2953_v58  ;;  %v1621_v58 = vld [vmem:[%s8048_s1 + $0x690] sm:$0xff] }
 0x4c4   :  { %3152 = vmatmul.f32.gmra.mxu1 %v1556_v38  ;;  %v6834_v57 = vpop.f32.mrf.mxu0 }
 0x4c5   :  { %3214 = vmatmul.f32.gmra.mxu2 %v1525_v18  ;;  %v1591_v18 = vld [vmem:[%s8048_s1 + $0x5a0] sm:$0xff] }
 0x4c6   :  { %3279 = vmatmul.f32.gmra.mxu3 %v1526_v24  ;;  %v2835_v24 = vadd.f32 %v6609_v10, %v6607_v54  ;;  %v1654_v10 = vld [vmem:[%s8048_s1 + $0x798] sm:$0xff] }
 0x4c7   :  { %3341 = vmatmul.f32.gmra.mxu0 %v1495_v14 }
 0x4c8   :  { %v2955_v55 = vpop.f32.mrf.mxu2 }
 0x4c9   :  { %v2896_v40 = vpop.f32.mrf.mxu1  ;;  %v2956_v4 = vadd.f32 %v2955_v55, %v2891_v22  ;;  %v3020_v13 = vpop.f32.mrf.mxu3  ;;  %v1684_v55 = vld [vmem:[%s8048_s1 + $0x888] sm:$0xff] }
 0x4ca   :  { %v2897_v16 = vadd.f32 %v2896_v40, %v2832_v43  ;;  %v1686_v43 = vld [vmem:[%s8048_s1 + $0x898] sm:$0xff] }
 0x4cb   :  { %v6850_v32 = vadd.f32 %v3020_v13, %v2956_v4  ;;  %v1653_v4 = vld [vmem:[%s8048_s1 + $0x790] sm:$0xff] }
 0x4cc   :  { %3155 = vmatmul.f32.gmra.mxu1 %v1588_v52  ;;  %v6852_v35 = vpop.f32.mrf.mxu0 }
 0x4cd   :  { %3217 = vmatmul.f32.gmra.mxu2 %v1557_v26  ;;  %v1623_v26 = vld [vmem:[%s8048_s1 + $0x6a0] sm:$0xff] }
 0x4ce   :  { %3282 = vmatmul.f32.gmra.mxu3 %v1558_v28  ;;  %v1250_v28 = vld [vmem:[#allocation2 + $0xaf8] sm:$0xff] }
 0x4cf   :  { %3344 = vmatmul.f32.gmra.mxu0 %v1527_v29  ;;  %v2838_v29 = vadd.f32 %v6627_v19, %v6625_v46  ;;  %3384 = vmatpush.msra.mxu1 %v1250_v28  ;;  %v1685_v46 = vld [vmem:[%s8048_s1 + $0x890] sm:$0xff]  ;;  %v1247_v19 = vld [vmem:[#allocation2 + $0xae0] sm:$0xff] }
 0x4d0   :  { %v2958_v51 = vpop.f32.mrf.mxu2 }
 0x4d1   :  { %v2899_v1 = vpop.f32.mrf.mxu1  ;;  %v2959_v41 = vadd.f32 %v2958_v51, %v2894_v8  ;;  %v3023_v39 = vpop.f32.mrf.mxu3  ;;  %3385 = vmatpush.msra.mxu1 %v1249_v30  ;;  %v1687_v30 = vld [vmem:[%s8048_s1 + $0x8a0] sm:$0xff] }
 0x4d2   :  { %v2900_v14 = vadd.f32 %v2899_v1, %v2835_v24 }
 0x4d3   :  { %v6868_v33 = vadd.f32 %v3023_v39, %v2959_v41  ;;  %v1248_v41 = vld [vmem:[#allocation2 + $0xae8] sm:$0xff] }
 0x4d4   :  { %3158 = vmatmul.f32.gmra.mxu1 %v1620_v47  ;;  %v6870_v53 = vpop.f32.mrf.mxu0  ;;  %v1716_v47 = vld [vmem:[%s8048_s1 + $0x988] sm:$0xff] }
 0x4d5   :  { %3220 = vmatmul.f32.gmra.mxu2 %v1589_v49  ;;  %3386 = vmatpush.msra.mxu1 %v1248_v41  ;;  %v1279_v41 = vld [vmem:[#allocation2 + $0xbe0] sm:$0xff] }
 0x4d6   :  { %3285 = vmatmul.f32.gmra.mxu3 %v1590_v63 }
 0x4d7   :  { %3347 = vmatmul.f32.gmra.mxu0 %v1559_v48  ;;  %3387 = vmatpush.msra.mxu1 %v1247_v19  ;;  %v1278_v19 = vld [vmem:[#allocation2 + $0xbd8] sm:$0xff] }
 0x4d8   :  { %v2961_v5 = vpop.f32.mrf.mxu2 }
 0x4d9   :  { %v2902_v3 = vpop.f32.mrf.mxu1  ;;  %v2962_v11 = vadd.f32 %v2961_v5, %v2897_v16  ;;  %v3026_v38 = vpop.f32.mrf.mxu3  ;;  %v1655_v16 = vld [vmem:[%s8048_s1 + $0x7a0] sm:$0xff]  ;;  %v1246_v5 = vld [vmem:[#allocation2 + $0xad8] sm:$0xff] }
 0x4da   :  { %v2903_v8 = vadd.f32 %v2902_v3, %v2838_v29  ;;  %v2841_v3 = vadd.f32 %v6647_v20, %v6645_v59  ;;  %3388 = vmatpush.msra.mxu1 %v1246_v5  ;;  %v1244_v59 = vld [vmem:[#allocation2 + $0xac8] sm:$0xff]  ;;  %v1718_v29 = vld [vmem:[%s8048_s1 + $0x998] sm:$0xff] }
 0x4db   :  { %v6886_v27 = vadd.f32 %v3026_v38, %v2962_v11  ;;  %v1245_v11 = vld [vmem:[#allocation2 + $0xad0] sm:$0xff] }
 0x4dc   :  { %3161 = vmatmul.f32.gmra.mxu1 %v1652_v62  ;;  %v6888_v21 = vpop.f32.mrf.mxu0  ;;  %v1266_v62 = vld [vmem:[#allocation2 + $0xb78] sm:$0xff] }
 0x4dd   :  { %3223 = vmatmul.f32.gmra.mxu2 %v1621_v58  ;;  %v1265_v58 = vld [vmem:[#allocation2 + $0xb70] sm:$0xff]  ;;  %3389 = vmatpush.msra.mxu1 %v1245_v11 }
 0x4de   :  { %3288 = vmatmul.f32.gmra.mxu3 %v1622_v61  ;;  %3449 = vmatpush.msra.mxu2 %v1266_v62  ;;  %v1282_v61 = vld [vmem:[#allocation2 + $0xbf8] sm:$0xff]  ;;  %v1260_v62 = vld [vmem:[#allocation2 + $0xb48] sm:$0xff]  ;;  %v1297_v11 = vld [vmem:[#allocation2 + $0xc70] sm:$0xff] }
 0x4df   :  { %3350 = vmatmul.f32.gmra.mxu0 %v1591_v18  ;;  %3514 = vmatpush.msra.mxu3 %v1282_v61  ;;  %v1239_v61 = vld [vmem:[#allocation2 + $0xaa0] sm:$0xff] }
 0x4e0   :  { %v2964_v37 = vpop.f32.mrf.mxu2  ;;  %3450 = vmatpush.msra.mxu2 %v1265_v58  ;;  %3390 = vmatpush.msra.mxu1 %v1244_v59  ;;  %v1749_v58 = vld [vmem:[%s8048_s1 + $0xa90] sm:$0xff]  ;;  %v1276_v59 = vld [vmem:[#allocation2 + $0xbc8] sm:$0xff] }
 0x4e1   :  { %v2905_v22 = vpop.f32.mrf.mxu1  ;;  %v2965_v40 = vadd.f32 %v2964_v37, %v2900_v14  ;;  %v3029_v52 = vpop.f32.mrf.mxu3  ;;  %v1748_v14 = vld [vmem:[%s8048_s1 + $0xa88] sm:$0xff] }
 0x4e2   :  { %v2906_v38 = vadd.f32 %v2905_v22, %v2841_v3  ;;  %v1264_v37 = vld [vmem:[#allocation2 + $0xb68] sm:$0xff]  ;;  %v1717_v22 = vld [vmem:[%s8048_s1 + $0x990] sm:$0xff] }
 0x4e3   :  { %v6904_v13 = vadd.f32 %v3029_v52, %v2965_v40  ;;  %3451 = vmatpush.msra.mxu2 %v1264_v37  ;;  %v1243_v52 = vld [vmem:[#allocation2 + $0xac0] sm:$0xff]  ;;  %v1750_v37 = vld [vmem:[%s8048_s1 + $0xa98] sm:$0xff] }
 0x4e4   :  { %3164 = vmatmul.f32.gmra.mxu1 %v1684_v55  ;;  %v6906_v54 = vpop.f32.mrf.mxu0  ;;  %v1281_v55 = vld [vmem:[#allocation2 + $0xbf0] sm:$0xff] }
 0x4e5   :  { %3226 = vmatmul.f32.gmra.mxu2 %v1653_v4  ;;  %3515 = vmatpush.msra.mxu3 %v1281_v55  ;;  %v1719_v55 = vld [vmem:[%s8048_s1 + $0x9a0] sm:$0xff] }
 0x4e6   :  { %3291 = vmatmul.f32.gmra.mxu3 %v1654_v10  ;;  %v1263_v10 = vld [vmem:[#allocation2 + $0xb60] sm:$0xff]  ;;  %3391 = vmatpush.msra.mxu1 %v1243_v52  ;;  %v1238_v52 = vld [vmem:[#allocation2 + $0xa98] sm:$0xff] }
 0x4e7   :  { %3353 = vmatmul.f32.gmra.mxu0 %v1623_v26  ;;  %v1280_v26 = vld [vmem:[#allocation2 + $0xbe8] sm:$0xff]  ;;  %3452 = vmatpush.msra.mxu2 %v1263_v10  ;;  %v1258_v10 = vld [vmem:[#allocation2 + $0xb38] sm:$0xff] }
 0x4e8   :  { %v2967_v51 = vpop.f32.mrf.mxu2  ;;  %3516 = vmatpush.msra.mxu3 %v1280_v26  ;;  %v1275_v26 = vld [vmem:[#allocation2 + $0xbc0] sm:$0xff] }
 0x4e9   :  { %v2908_v1 = vpop.f32.mrf.mxu1  ;;  %v2968_v39 = vadd.f32 %v2967_v51, %v2903_v8  ;;  %v3032_v49 = vpop.f32.mrf.mxu3  ;;  %v1242_v8 = vld [vmem:[#allocation2 + $0xab8] sm:$0xff]  ;;  %v2844_v51 = vadd.f32 %v6667_v25, %v6665_v9  ;;  %v1780_v9 = vld [vmem:[%s8048_s1 + $0xb88] sm:$0xff] }
 0x4ea   :  { %3392 = vmatpush.msra.mxu1 %v1242_v8  ;;  %3517 = vmatpush.msra.mxu3 %v1279_v41  ;;  %v1240_v25 = vld [vmem:[#allocation2 + $0xaa8] sm:$0xff]  ;;  %v1237_v8 = vld [vmem:[#allocation2 + $0xa90] sm:$0xff] }
 0x4eb   :  { %v6922_v63 = vadd.f32 %v3032_v49, %v2968_v39  ;;  %v1241_v39 = vld [vmem:[#allocation2 + $0xab0] sm:$0xff]  ;;  %v2909_v49 = vadd.f32 %v2908_v1, %v2844_v51 }
 0x4ec   :  { %3167 = vmatmul.f32.gmra.mxu1 %v1716_v47  ;;  %v6924_v48 = vpop.f32.mrf.mxu0  ;;  %v1262_v47 = vld [vmem:[#allocation2 + $0xb58] sm:$0xff]  ;;  %v1277_v1 = vld [vmem:[#allocation2 + $0xbd0] sm:$0xff]  ;;  %3518 = vmatpush.msra.mxu3 %v1278_v19  ;;  %v1236_v19 = vld [vmem:[#allocation2 + $0xa88] sm:$0xff] }
 0x4ed   :  { %3229 = vmatmul.f32.gmra.mxu2 %v1685_v46  ;;  %v1261_v46 = vld [vmem:[#allocation2 + $0xb50] sm:$0xff]  ;;  %3393 = vmatpush.msra.mxu1 %v1241_v39  ;;  %v1274_v39 = vld [vmem:[#allocation2 + $0xbb8] sm:$0xff] }
 0x4ee   :  { %3294 = vmatmul.f32.gmra.mxu3 %v1686_v43  ;;  %3453 = vmatpush.msra.mxu2 %v1262_v47  ;;  %v1298_v43 = vld [vmem:[#allocation2 + $0xc78] sm:$0xff] }
 0x4ef   :  { %3356 = vmatmul.f32.gmra.mxu0 %v1655_v16  ;;  %3394 = vmatpush.msra.mxu1 %v1240_v25 }
 0x4f0   :  { %v2970_v18 = vpop.f32.mrf.mxu2  ;;  %3454 = vmatpush.msra.mxu2 %v1261_v46  ;;  %3579 = vmatpush.msra.mxu0 %v1298_v43  ;;  %v1781_v46 = vld [vmem:[%s8048_s1 + $0xb90] sm:$0xff] }
 0x4f1   :  { %v6934_v24 = vpop.f32.mrf.mxu1  ;;  %v2971_v20 = vadd.f32 %v2970_v18, %v2906_v38  ;;  %v3035_v40 = vpop.f32.mrf.mxu3  ;;  %3519 = vmatpush.msra.mxu3 %v1277_v1  ;;  %3395 = vmatpush.msra.mxu1 %v1239_v61  ;;  %v2850_v1 = vadd.f32 %v6707_v7, %v6705_v15  ;;  %v1272_v61 = vld [vmem:[#allocation2 + $0xba8] sm:$0xff]  ;;  %v1254_v15 = vld [vmem:[#allocation2 + $0xb18] sm:$0xff] }
 0x4f2   :  { %3455 = vmatpush.msra.mxu2 %v1260_v62  ;;  %3580 = vmatpush.msra.mxu0 %v1297_v11  ;;  %v1751_v62 = vld [vmem:[%s8048_s1 + $0xaa0] sm:$0xff]  ;;  %v1293_v11 = vld [vmem:[#allocation2 + $0xc50] sm:$0xff] }
 0x4f3   :  { %v6942_v4 = vadd.f32 %v3035_v40, %v2971_v20  ;;  %v2847_v40 = vadd.f32 %v6688_v17, %v6686_v44  ;;  %3520 = vmatpush.msra.mxu3 %v1276_v59  ;;  %v1812_v44 = vld [vmem:[%s8048_s1 + $0xc88] sm:$0xff]  ;;  %3396 = vmatpush.msra.mxu1 %v1238_v52  ;;  %v1257_v17 = vld [vmem:[#allocation2 + $0xb30] sm:$0xff]  ;;  %v1291_v52 = vld [vmem:[#allocation2 + $0xc40] sm:$0xff] }
 0x4f4   :  { %3170 = vmatmul.f32.gmra.mxu1 %v1748_v14  ;;  %v6944_v28 = vpop.f32.mrf.mxu0  ;;  %v1259_v14 = vld [vmem:[#allocation2 + $0xb40] sm:$0xff]  ;;  %v1292_v59 = vld [vmem:[#allocation2 + $0xc48] sm:$0xff] }
 0x4f5   :  { %3232 = vmatmul.f32.gmra.mxu2 %v1717_v22  ;;  %v1296_v22 = vld [vmem:[#allocation2 + $0xc68] sm:$0xff]  ;;  %3521 = vmatpush.msra.mxu3 %v1275_v26 }
 0x4f6   :  { %3297 = vmatmul.f32.gmra.mxu3 %v1718_v29  ;;  %3456 = vmatpush.msra.mxu2 %v1259_v14  ;;  %v2912_v29 = vadd.f32 %v6934_v24, %v2847_v40  ;;  %v1844_v40 = vld [vmem:[%s8048_s1 + $0xd88] sm:$0xff] }
 0x4f7   :  { %3359 = vmatmul.f32.gmra.mxu0 %v1687_v30  ;;  %v1295_v30 = vld [vmem:[#allocation2 + $0xc60] sm:$0xff]  ;;  %3397 = vmatpush.msra.mxu1 %v1237_v8 }
 0x4f8   :  { %v2973_v16 = vpop.f32.mrf.mxu2  ;;  %3581 = vmatpush.msra.mxu0 %v1296_v22  ;;  %3457 = vmatpush.msra.mxu2 %v1258_v10  ;;  %v1271_v22 = vld [vmem:[#allocation2 + $0xba0] sm:$0xff] }
 0x4f9   :  { %v6954_v5 = vpop.f32.mrf.mxu1  ;;  %v2974_v3 = vadd.f32 %v2973_v16, %v2909_v49  ;;  %v3038_v38 = vpop.f32.mrf.mxu3  ;;  %v1294_v49 = vld [vmem:[#allocation2 + $0xc58] sm:$0xff]  ;;  %v1256_v16 = vld [vmem:[#allocation2 + $0xb28] sm:$0xff]  ;;  %3522 = vmatpush.msra.mxu3 %v1274_v39  ;;  %3398 = vmatpush.msra.mxu1 %v1236_v19  ;;  %v1251_v19 = vld [vmem:[#allocation2 + $0xb00] sm:$0xff] }
 0x4fa   :  { %3582 = vmatpush.msra.mxu0 %v1295_v30  ;;  %3458 = vmatpush.msra.mxu2 %v1257_v17  ;;  %v2915_v14 = vadd.f32 %v6954_v5, %v2850_v1  ;;  %v1813_v5 = vld [vmem:[%s8048_s1 + $0xc90] sm:$0xff]  ;;  %v1270_v30 = vld [vmem:[#allocation2 + $0xb98] sm:$0xff]  ;;  %v2853_v17 = vadd.f32 %v6726_v2, %v6724_v50  ;;  %v1252_v39 = vld [vmem:[#allocation2 + $0xb08] sm:$0xff] }
 0x4fb   :  { %v6962_v18 = vadd.f32 %v3038_v38, %v2974_v3  ;;  %v1782_v3 = vld [vmem:[%s8048_s1 + $0xb98] sm:$0xff]  ;;  %v1235_v38 = vld [vmem:[#allocation2 + $0xa80] sm:$0xff]  ;;  %v1268_v50 = vld [vmem:[#allocation2 + $0xb88] sm:$0xff] }
 0x4fc   :  { %3173 = vmatmul.f32.gmra.mxu1 %v1780_v9  ;;  %v6964_v20 = vpop.f32.mrf.mxu0  ;;  %v1273_v9 = vld [vmem:[#allocation2 + $0xbb0] sm:$0xff]  ;;  %3583 = vmatpush.msra.mxu0 %v1294_v49 }
 0x4fd   :  { %3235 = vmatmul.f32.gmra.mxu2 %v1749_v58  ;;  %3523 = vmatpush.msra.mxu3 %v1273_v9  ;;  %v1255_v58 = vld [vmem:[#allocation2 + $0xb20] sm:$0xff]  ;;  %v1269_v49 = vld [vmem:[#allocation2 + $0xb90] sm:$0xff] }
 0x4fe   :  { %3300 = vmatmul.f32.gmra.mxu3 %v1750_v37  ;;  %3459 = vmatpush.msra.mxu2 %v1256_v16 }
 0x4ff   :  { %3362 = vmatmul.f32.gmra.mxu0 %v1719_v55  ;;  %3399 = vmatpush.msra.mxu1 %v1235_v38 }
 0x500   :  { %v2976_v51 = vpop.f32.mrf.mxu2  ;;  %3584 = vmatpush.msra.mxu0 %v1293_v11  ;;  %3460 = vmatpush.msra.mxu2 %v1255_v58  ;;  %v1267_v11 = vld [vmem:[#allocation2 + $0xb80] sm:$0xff] }
 0x501   :  { %v6975_v47 = vpop.f32.mrf.mxu1  ;;  %v2977_v41 = vadd.f32 %v2976_v51, %v2912_v29  ;;  %v3041_v24 = vpop.f32.mrf.mxu3  ;;  %3524 = vmatpush.msra.mxu3 %v1272_v61  ;;  %v1253_v29 = vld [vmem:[#allocation2 + $0xb10] sm:$0xff]  ;;  %v1814_v51 = vld [vmem:[%s8048_s1 + $0xc98] sm:$0xff]  ;;  %v1287_v58 = vld [vmem:[#allocation2 + $0xc20] sm:$0xff] }
 0x502   :  { %3585 = vmatpush.msra.mxu0 %v1292_v59  ;;  %3461 = vmatpush.msra.mxu2 %v1254_v15  ;;  %v1815_v59 = vld [vmem:[%s8048_s1 + $0xca0] sm:$0xff] }
 0x503   :  { %v6983_v43 = vadd.f32 %v3041_v24, %v2977_v41  ;;  %3525 = vmatpush.msra.mxu3 %v1271_v22  ;;  %v1290_v41 = vld [vmem:[#allocation2 + $0xc38] sm:$0xff]  ;;  %v2918_v24 = vadd.f32 %v6975_v47, %v2853_v17  ;;  %v1845_v47 = vld [vmem:[%s8048_s1 + $0xd90] sm:$0xff]  ;;  %v1847_v17 = vld [vmem:[%s8048_s1 + $0xda0] sm:$0xff] }
 0x504   :  { %3176 = vmatmul.f32.gmra.mxu1 %v1812_v44  ;;  %v6985_v25 = vpop.f32.mrf.mxu0  ;;  %v1783_v44 = vld [vmem:[%s8048_s1 + $0xba0] sm:$0xff]  ;;  %3586 = vmatpush.msra.mxu0 %v1291_v52 }
 0x505   :  { %3238 = vmatmul.f32.gmra.mxu2 %v1781_v46  ;;  %3526 = vmatpush.msra.mxu3 %v1270_v30  ;;  %v1289_v46 = vld [vmem:[#allocation2 + $0xc30] sm:$0xff] }
 0x506   :  { %3303 = vmatmul.f32.gmra.mxu3 %v1782_v3  ;;  %3462 = vmatpush.msra.mxu2 %v1253_v29  ;;  %v1876_v3 = vld [vmem:[%s8048_s1 + $0xe88] sm:$0xff] }
 0x507   :  { %3365 = vmatmul.f32.gmra.mxu0 %v1751_v62  ;;  %3527 = vmatpush.msra.mxu3 %v1269_v49  ;;  %v1288_v62 = vld [vmem:[#allocation2 + $0xc28] sm:$0xff] }
 0x508   :  { %v2979_v37 = vpop.f32.mrf.mxu2  ;;  %3587 = vmatpush.msra.mxu0 %v1290_v41  ;;  %3463 = vmatpush.msra.mxu2 %v1252_v39  ;;  %v1284_v29 = vld [vmem:[#allocation2 + $0xc08] sm:$0xff]  ;;  %v2859_v41 = vadd.f32 %v6762_v12, %v6760_v34  ;;  %v1910_v12 = vld [vmem:[%s8048_s1 + $0xf98] sm:$0xff] }
 0x509   :  { %v2920_v55 = vpop.f32.mrf.mxu1  ;;  %v2980_v7 = vadd.f32 %v2979_v37, %v2915_v14  ;;  %v3044_v10 = vpop.f32.mrf.mxu3  ;;  %3528 = vmatpush.msra.mxu3 %v1268_v50  ;;  %v1846_v14 = vld [vmem:[%s8048_s1 + $0xd98] sm:$0xff]  ;;  %v2856_v37 = vadd.f32 %v6744_v45, %v6742_v42  ;;  %v1877_v42 = vld [vmem:[%s8048_s1 + $0xe90] sm:$0xff] }
 0x50a   :  { %3588 = vmatpush.msra.mxu0 %v1289_v46  ;;  %3464 = vmatpush.msra.mxu2 %v1251_v19  ;;  %v1432_v46 = vld [vmem:[%s8048_s1 + $0xa8] sm:$0xff] }
 0x50b   :  { %v7002_v26 = vadd.f32 %v3044_v10, %v2980_v7  ;;  %3529 = vmatpush.msra.mxu3 %v1267_v11  ;;  %v2921_v15 = vadd.f32 %v2920_v55, %v2856_v37  ;;  %v1285_v7 = vld [vmem:[#allocation2 + $0xc10] sm:$0xff]  ;;  %v1908_v10 = vld [vmem:[%s8048_s1 + $0xf88] sm:$0xff]  ;;  %v1283_v55 = vld [vmem:[#allocation2 + $0xc00] sm:$0xff] }
 0x50c   :  { %3179 = vmatmul.f32.gmra.mxu1 %v1844_v40  ;;  %v7004_v8 = vpop.f32.mrf.mxu0  ;;  %3589 = vmatpush.msra.mxu0 %v1288_v62  ;;  %v1286_v40 = vld [vmem:[#allocation2 + $0xc18] sm:$0xff]  ;;  %v1464_v11 = vld [vmem:[%s8048_s1 + $0x1a8] sm:$0xff] }
 0x50d   :  { %3241 = vmatmul.f32.gmra.mxu2 %v1813_v5 }
 0x50e   :  { %3306 = vmatmul.f32.gmra.mxu3 %v1814_v51  ;;  %3590 = vmatpush.msra.mxu0 %v1287_v58 }
 0x50f   :  { %3368 = vmatmul.f32.gmra.mxu0 %v1783_v44  ;;  %v1878_v44 = vld [vmem:[%s8048_s1 + $0xe98] sm:$0xff] }
 0x510   :  { %v2982_v16 = vpop.f32.mrf.mxu2  ;;  %3591 = vmatpush.msra.mxu0 %v1286_v40  ;;  %v1434_v40 = vld [vmem:[%s8048_s1 + $0xb8] sm:$0xff] }
 0x511   :  { %v2923_v9 = vpop.f32.mrf.mxu1  ;;  %v2983_v2 = vadd.f32 %v2982_v16, %v2918_v24  ;;  %v3047_v1 = vpop.f32.mrf.mxu3 }
 0x512   :  { %3592 = vmatpush.msra.mxu0 %v1285_v7  ;;  %v2924_v39 = vadd.f32 %v2923_v9, %v2859_v41  ;;  %v1879_v9 = vld [vmem:[%s8048_s1 + $0xea0] sm:$0xff] }
 0x513   :  { %v7021_v38 = vadd.f32 %v3047_v1, %v2983_v2  ;;  %v2862_v2 = vadd.f32 %v6780_v36, %v6778_v23  ;;  %v1911_v36 = vld [vmem:[%s8048_s1 + $0xfa0] sm:$0xff] }
 0x514   :  { %3182 = vmatmul.f32.gmra.mxu1 %v1876_v3  ;;  %v7023_v61 = vpop.f32.mrf.mxu0  ;;  %3593 = vmatpush.msra.mxu0 %v1284_v29  ;;  %v1909_v3 = vld [vmem:[%s8048_s1 + $0xf90] sm:$0xff] }
 0x515   :  { %3244 = vmatmul.f32.gmra.mxu2 %v1845_v47 }
 0x516   :  { %3309 = vmatmul.f32.gmra.mxu3 %v1846_v14  ;;  %3594 = vmatpush.msra.mxu0 %v1283_v55  ;;  %v1435_v55 = vld [vmem:[%s8048_s1 + $0xc0] sm:$0xff] }
 0x517   :  { %3371 = vmatmul.f32.gmra.mxu0 %v1815_v59  ;;  %v1433_v59 = vld [vmem:[%s8048_s1 + $0xb0] sm:$0xff] }
 0x518   :  { %v2985_v22 = vpop.f32.mrf.mxu2 }
 0x519   :  { %v2926_v52 = vpop.f32.mrf.mxu1  ;;  %v2986_v5 = vadd.f32 %v2985_v22, %v2921_v15  ;;  %v3050_v30 = vpop.f32.mrf.mxu3  ;;  %v3077_v15 = vadd.f32 %v6798_v6, %v6796_v60  ;;  %v1466_v6 = vld [vmem:[%s8048_s1 + $0x1b8] sm:$0xff] }
 0x51a   :  { %v2927_v62 = vadd.f32 %v2926_v52, %v2862_v2 }
 0x51b   :  { %v7039_v45 = vadd.f32 %v3050_v30, %v2986_v5  ;;  %v1465_v30 = vld [vmem:[%s8048_s1 + $0x1b0] sm:$0xff] }
 0x51c   :  { %3185 = vmatmul.f32.gmra.mxu1 %v1908_v10  ;;  %v7041_v51 = vpop.f32.mrf.mxu0  ;;  %v1496_v10 = vld [vmem:[%s8048_s1 + $0x2a8] sm:$0xff] }
 0x51d   :  { %3247 = vmatmul.f32.gmra.mxu2 %v1877_v42 }
 0x51e   :  { %3312 = vmatmul.f32.gmra.mxu3 %v1878_v44  ;;  %v3080_v44 = vadd.f32 %v6816_v56, %v6814_v31  ;;  %v1498_v56 = vld [vmem:[%s8048_s1 + $0x2b8] sm:$0xff] }
 0x51f   :  { %3374 = vmatmul.f32.gmra.mxu0 %v1847_v17 }
 0x520   :  { %v2988_v49 = vpop.f32.mrf.mxu2 }
 0x521   :  { %v3141_v24 = vpop.f32.mrf.mxu1  ;;  %v2989_v19 = vadd.f32 %v2988_v49, %v2924_v39  ;;  %v3053_v16 = vpop.f32.mrf.mxu3  ;;  %v1528_v49 = vld [vmem:[%s8048_s1 + $0x3a8] sm:$0xff] }
 0x522   :  { %v3142_v7 = vadd.f32 %v3141_v24, %v3077_v15 }
 0x523   :  { %v7057_v50 = vadd.f32 %v3053_v16, %v2989_v19  ;;  %v1497_v19 = vld [vmem:[%s8048_s1 + $0x2b0] sm:$0xff] }
 0x524   :  { %3400 = vmatmul.f32.vlgmr.msra.gmra.mxu1 %v1432_v46  ;;  %v7059_v34 = vpop.f32.mrf.mxu0 }
 0x525   :  { %3250 = vmatmul.f32.gmra.mxu2 %v1909_v3  ;;  %v1467_v3 = vld [vmem:[%s8048_s1 + $0x1c0] sm:$0xff] }
 0x526   :  { %3315 = vmatmul.f32.gmra.mxu3 %v1910_v12  ;;  %v3083_v12 = vadd.f32 %v6834_v57, %v6832_v0  ;;  %v1530_v57 = vld [vmem:[%s8048_s1 + $0x3b8] sm:$0xff] }
 0x527   :  { %3377 = vmatmul.f32.gmra.mxu0 %v1879_v9 }
 0x528   :  { %v2991_v1 = vpop.f32.mrf.mxu2 }
 0x529   :  { %v3144_v47 = vpop.f32.mrf.mxu1  ;;  %v2992_v58 = vadd.f32 %v2991_v1, %v2927_v62  ;;  %v3056_v14 = vpop.f32.mrf.mxu3  ;;  %v1560_v1 = vld [vmem:[%s8048_s1 + $0x4a8] sm:$0xff] }
 0x52a   :  { %v3145_v17 = vadd.f32 %v3144_v47, %v3080_v44 }
 0x52b   :  { %v7075_v37 = vadd.f32 %v3056_v14, %v2992_v58  ;;  %v1529_v58 = vld [vmem:[%s8048_s1 + $0x3b0] sm:$0xff] }
 0x52c   :  { %3403 = vmatmul.f32.gmra.mxu1 %v1464_v11  ;;  %v7077_v23 = vpop.f32.mrf.mxu0 }
 0x52d   :  { %3465 = vmatmul.f32.vlgmr.msra.gmra.mxu2 %v1433_v59  ;;  %v1499_v59 = vld [vmem:[%s8048_s1 + $0x2c0] sm:$0xff] }
 0x52e   :  { %3530 = vmatmul.f32.vlgmr.msra.gmra.mxu3 %v1434_v40 }
 0x52f   :  { %3380 = vmatmul.f32.gmra.mxu0 %v1911_v36  ;;  %v3086_v36 = vadd.f32 %v6852_v35, %v6850_v32  ;;  %v1562_v35 = vld [vmem:[%s8048_s1 + $0x4b8] sm:$0xff] }
 0x530   :  { %v3206_v22 = vpop.f32.mrf.mxu2 }
 0x531   :  { %v3147_v52 = vpop.f32.mrf.mxu1  ;;  %v3207_v5 = vadd.f32 %v3206_v22, %v3142_v7  ;;  %v3271_v29 = vpop.f32.mrf.mxu3  ;;  %v1592_v22 = vld [vmem:[%s8048_s1 + $0x5a8] sm:$0xff] }
 0x532   :  { %v3148_v9 = vadd.f32 %v3147_v52, %v3083_v12 }
 0x533   :  { %v7093_v42 = vadd.f32 %v3271_v29, %v3207_v5  ;;  %v1561_v5 = vld [vmem:[%s8048_s1 + $0x4b0] sm:$0xff] }
 0x534   :  { %3406 = vmatmul.f32.gmra.mxu1 %v1496_v10  ;;  %v7095_v60 = vpop.f32.mrf.mxu0 }
 0x535   :  { %3468 = vmatmul.f32.gmra.mxu2 %v1465_v30  ;;  %v1531_v30 = vld [vmem:[%s8048_s1 + $0x3c0] sm:$0xff] }
 0x536   :  { %3533 = vmatmul.f32.gmra.mxu3 %v1466_v6  ;;  %v3089_v6 = vadd.f32 %v6870_v53, %v6868_v33  ;;  %v1594_v53 = vld [vmem:[%s8048_s1 + $0x5b8] sm:$0xff] }
 0x537   :  { %3595 = vmatmul.f32.vlgmr.msra.gmra.mxu0 %v1435_v55 }
 0x538   :  { %v3209_v41 = vpop.f32.mrf.mxu2 }
 0x539   :  { %v3150_v39 = vpop.f32.mrf.mxu1  ;;  %v3210_v24 = vadd.f32 %v3209_v41, %v3145_v17  ;;  %v3274_v46 = vpop.f32.mrf.mxu3  ;;  %v1624_v41 = vld [vmem:[%s8048_s1 + $0x6a8] sm:$0xff] }
 0x53a   :  { %v3151_v40 = vadd.f32 %v3150_v39, %v3086_v36 }
 0x53b   :  { %v7111_v16 = vadd.f32 %v3274_v46, %v3210_v24  ;;  %v1593_v24 = vld [vmem:[%s8048_s1 + $0x5b0] sm:$0xff] }
 0x53c   :  { %3409 = vmatmul.f32.gmra.mxu1 %v1528_v49  ;;  %v7113_v31 = vpop.f32.mrf.mxu0 }
 0x53d   :  { %3471 = vmatmul.f32.gmra.mxu2 %v1497_v19  ;;  %v1563_v19 = vld [vmem:[%s8048_s1 + $0x4c0] sm:$0xff] }
 0x53e   :  { %3536 = vmatmul.f32.gmra.mxu3 %v1498_v56  ;;  %v3092_v56 = vadd.f32 %v6888_v21, %v6886_v27  ;;  %v1626_v21 = vld [vmem:[%s8048_s1 + $0x6b8] sm:$0xff] }
 0x53f   :  { %3598 = vmatmul.f32.gmra.mxu0 %v1467_v3 }
 0x540   :  { %v3212_v2 = vpop.f32.mrf.mxu2 }
 0x541   :  { %v3153_v62 = vpop.f32.mrf.mxu1  ;;  %v3213_v47 = vadd.f32 %v3212_v2, %v3148_v9  ;;  %v3277_v11 = vpop.f32.mrf.mxu3  ;;  %v1656_v2 = vld [vmem:[%s8048_s1 + $0x7a8] sm:$0xff] }
 0x542   :  { %v3154_v55 = vadd.f32 %v3153_v62, %v3089_v6  ;;  %v1313_v6 = vld [vmem:[#allocation2 + $0xcf0] sm:$0xff] }
 0x543   :  { %v7129_v14 = vadd.f32 %v3277_v11, %v3213_v47  ;;  %v1625_v47 = vld [vmem:[%s8048_s1 + $0x6b0] sm:$0xff] }
 0x544   :  { %3412 = vmatmul.f32.gmra.mxu1 %v1560_v1  ;;  %v7131_v0 = vpop.f32.mrf.mxu0 }
 0x545   :  { %3474 = vmatmul.f32.gmra.mxu2 %v1529_v58  ;;  %v1595_v58 = vld [vmem:[%s8048_s1 + $0x5c0] sm:$0xff] }
 0x546   :  { %3539 = vmatmul.f32.gmra.mxu3 %v1530_v57  ;;  %v3095_v57 = vadd.f32 %v6906_v54, %v6904_v13  ;;  %v1658_v54 = vld [vmem:[%s8048_s1 + $0x7b8] sm:$0xff] }
 0x547   :  { %3601 = vmatmul.f32.gmra.mxu0 %v1499_v59 }
 0x548   :  { %v3215_v15 = vpop.f32.mrf.mxu2 }
 0x549   :  { %v3156_v7 = vpop.f32.mrf.mxu1  ;;  %v3216_v52 = vadd.f32 %v3215_v15, %v3151_v40  ;;  %v3280_v10 = vpop.f32.mrf.mxu3  ;;  %v1688_v15 = vld [vmem:[%s8048_s1 + $0x8a8] sm:$0xff] }
 0x54a   :  { %v3157_v3 = vadd.f32 %v3156_v7, %v3092_v56  ;;  %v1690_v56 = vld [vmem:[%s8048_s1 + $0x8b8] sm:$0xff] }
 0x54b   :  { %v7147_v29 = vadd.f32 %v3280_v10, %v3216_v52  ;;  %v1657_v52 = vld [vmem:[%s8048_s1 + $0x7b0] sm:$0xff] }
 0x54c   :  { %3415 = vmatmul.f32.gmra.mxu1 %v1592_v22  ;;  %v7149_v32 = vpop.f32.mrf.mxu0 }
 0x54d   :  { %3477 = vmatmul.f32.gmra.mxu2 %v1561_v5  ;;  %v1627_v5 = vld [vmem:[%s8048_s1 + $0x6c0] sm:$0xff] }
 0x54e   :  { %3542 = vmatmul.f32.gmra.mxu3 %v1562_v35  ;;  %v1314_v35 = vld [vmem:[#allocation2 + $0xcf8] sm:$0xff] }
 0x54f   :  { %3604 = vmatmul.f32.gmra.mxu0 %v1531_v30  ;;  %v3098_v30 = vadd.f32 %v6924_v48, %v6922_v63  ;;  %3644 = vmatpush.msrb.mxu1 %v1314_v35  ;;  %v1689_v63 = vld [vmem:[%s8048_s1 + $0x8b0] sm:$0xff]  ;;  %v1311_v48 = vld [vmem:[#allocation2 + $0xce0] sm:$0xff] }
 0x550   :  { %v3218_v44 = vpop.f32.mrf.mxu2 }
 0x551   :  { %v3159_v17 = vpop.f32.mrf.mxu1  ;;  %v3219_v39 = vadd.f32 %v3218_v44, %v3154_v55  ;;  %v3283_v49 = vpop.f32.mrf.mxu3  ;;  %3645 = vmatpush.msrb.mxu1 %v1313_v6  ;;  %v1691_v6 = vld [vmem:[%s8048_s1 + $0x8c0] sm:$0xff] }
 0x552   :  { %v3160_v59 = vadd.f32 %v3159_v17, %v3095_v57 }
 0x553   :  { %v7165_v46 = vadd.f32 %v3283_v49, %v3219_v39  ;;  %v1312_v39 = vld [vmem:[#allocation2 + $0xce8] sm:$0xff] }
 0x554   :  { %3418 = vmatmul.f32.gmra.mxu1 %v1624_v41  ;;  %v7167_v33 = vpop.f32.mrf.mxu0  ;;  %v1720_v41 = vld [vmem:[%s8048_s1 + $0x9a8] sm:$0xff] }
 0x555   :  { %3480 = vmatmul.f32.gmra.mxu2 %v1593_v24  ;;  %3646 = vmatpush.msrb.mxu1 %v1312_v39  ;;  %v1343_v39 = vld [vmem:[#allocation2 + $0xde0] sm:$0xff] }
 0x556   :  { %3545 = vmatmul.f32.gmra.mxu3 %v1594_v53 }
 0x557   :  { %3607 = vmatmul.f32.gmra.mxu0 %v1563_v19  ;;  %3647 = vmatpush.msrb.mxu1 %v1311_v48  ;;  %v1342_v48 = vld [vmem:[#allocation2 + $0xdd8] sm:$0xff] }
 0x558   :  { %v3221_v12 = vpop.f32.mrf.mxu2 }
 0x559   :  { %v3162_v9 = vpop.f32.mrf.mxu1  ;;  %v3222_v62 = vadd.f32 %v3221_v12, %v3157_v3  ;;  %v3286_v1 = vpop.f32.mrf.mxu3  ;;  %v1659_v3 = vld [vmem:[%s8048_s1 + $0x7c0] sm:$0xff]  ;;  %v1310_v12 = vld [vmem:[#allocation2 + $0xcd8] sm:$0xff] }
 0x55a   :  { %v3163_v55 = vadd.f32 %v3162_v9, %v3098_v30  ;;  %v3101_v9 = vadd.f32 %v6944_v28, %v6942_v4  ;;  %3648 = vmatpush.msrb.mxu1 %v1310_v12  ;;  %v1308_v4 = vld [vmem:[#allocation2 + $0xcc8] sm:$0xff]  ;;  %v1722_v30 = vld [vmem:[%s8048_s1 + $0x9b8] sm:$0xff] }
 0x55b   :  { %v7183_v11 = vadd.f32 %v3286_v1, %v3222_v62  ;;  %v1309_v62 = vld [vmem:[#allocation2 + $0xcd0] sm:$0xff] }
 0x55c   :  { %3421 = vmatmul.f32.gmra.mxu1 %v1656_v2  ;;  %v7185_v27 = vpop.f32.mrf.mxu0  ;;  %v1330_v2 = vld [vmem:[#allocation2 + $0xd78] sm:$0xff] }
 0x55d   :  { %3483 = vmatmul.f32.gmra.mxu2 %v1625_v47  ;;  %v1329_v47 = vld [vmem:[#allocation2 + $0xd70] sm:$0xff]  ;;  %3649 = vmatpush.msrb.mxu1 %v1309_v62 }
 0x55e   :  { %3548 = vmatmul.f32.gmra.mxu3 %v1626_v21  ;;  %3709 = vmatpush.msrb.mxu2 %v1330_v2  ;;  %v1346_v21 = vld [vmem:[#allocation2 + $0xdf8] sm:$0xff]  ;;  %v1324_v2 = vld [vmem:[#allocation2 + $0xd48] sm:$0xff]  ;;  %v1361_v62 = vld [vmem:[#allocation2 + $0xe70] sm:$0xff] }
 0x55f   :  { %3610 = vmatmul.f32.gmra.mxu0 %v1595_v58  ;;  %3774 = vmatpush.msrb.mxu3 %v1346_v21  ;;  %v1303_v21 = vld [vmem:[#allocation2 + $0xca0] sm:$0xff] }
 0x560   :  { %v3224_v36 = vpop.f32.mrf.mxu2  ;;  %3710 = vmatpush.msrb.mxu2 %v1329_v47  ;;  %3650 = vmatpush.msrb.mxu1 %v1308_v4  ;;  %v1753_v47 = vld [vmem:[%s8048_s1 + $0xab0] sm:$0xff]  ;;  %v1340_v4 = vld [vmem:[#allocation2 + $0xdc8] sm:$0xff] }
 0x561   :  { %v3165_v40 = vpop.f32.mrf.mxu1  ;;  %v3225_v7 = vadd.f32 %v3224_v36, %v3160_v59  ;;  %v3289_v22 = vpop.f32.mrf.mxu3  ;;  %v1752_v59 = vld [vmem:[%s8048_s1 + $0xaa8] sm:$0xff] }
 0x562   :  { %v3166_v1 = vadd.f32 %v3165_v40, %v3101_v9  ;;  %v1328_v36 = vld [vmem:[#allocation2 + $0xd68] sm:$0xff]  ;;  %v1721_v40 = vld [vmem:[%s8048_s1 + $0x9b0] sm:$0xff] }
 0x563   :  { %v7201_v10 = vadd.f32 %v3289_v22, %v3225_v7  ;;  %3711 = vmatpush.msrb.mxu2 %v1328_v36  ;;  %v1307_v22 = vld [vmem:[#allocation2 + $0xcc0] sm:$0xff]  ;;  %v1754_v36 = vld [vmem:[%s8048_s1 + $0xab8] sm:$0xff] }
 0x564   :  { %3424 = vmatmul.f32.gmra.mxu1 %v1688_v15  ;;  %v7203_v13 = vpop.f32.mrf.mxu0  ;;  %v1345_v15 = vld [vmem:[#allocation2 + $0xdf0] sm:$0xff] }
 0x565   :  { %3486 = vmatmul.f32.gmra.mxu2 %v1657_v52  ;;  %3775 = vmatpush.msrb.mxu3 %v1345_v15  ;;  %v1723_v15 = vld [vmem:[%s8048_s1 + $0x9c0] sm:$0xff] }
 0x566   :  { %3551 = vmatmul.f32.gmra.mxu3 %v1658_v54  ;;  %v1327_v54 = vld [vmem:[#allocation2 + $0xd60] sm:$0xff]  ;;  %3651 = vmatpush.msrb.mxu1 %v1307_v22  ;;  %v1302_v22 = vld [vmem:[#allocation2 + $0xc98] sm:$0xff] }
 0x567   :  { %3613 = vmatmul.f32.gmra.mxu0 %v1627_v5  ;;  %v1344_v5 = vld [vmem:[#allocation2 + $0xde8] sm:$0xff]  ;;  %3712 = vmatpush.msrb.mxu2 %v1327_v54  ;;  %v1322_v54 = vld [vmem:[#allocation2 + $0xd38] sm:$0xff] }
 0x568   :  { %v3227_v44 = vpop.f32.mrf.mxu2  ;;  %3776 = vmatpush.msrb.mxu3 %v1344_v5  ;;  %v1339_v5 = vld [vmem:[#allocation2 + $0xdc0] sm:$0xff] }
 0x569   :  { %v3168_v17 = vpop.f32.mrf.mxu1  ;;  %v3228_v49 = vadd.f32 %v3227_v44, %v3163_v55  ;;  %v3292_v24 = vpop.f32.mrf.mxu3  ;;  %v1306_v55 = vld [vmem:[#allocation2 + $0xcb8] sm:$0xff]  ;;  %v3104_v44 = vadd.f32 %v6964_v20, %v6962_v18  ;;  %v1784_v18 = vld [vmem:[%s8048_s1 + $0xba8] sm:$0xff] }
 0x56a   :  { %3652 = vmatpush.msrb.mxu1 %v1306_v55  ;;  %3777 = vmatpush.msrb.mxu3 %v1343_v39  ;;  %v1304_v20 = vld [vmem:[#allocation2 + $0xca8] sm:$0xff]  ;;  %v1301_v55 = vld [vmem:[#allocation2 + $0xc90] sm:$0xff] }
 0x56b   :  { %v7219_v53 = vadd.f32 %v3292_v24, %v3228_v49  ;;  %v1305_v49 = vld [vmem:[#allocation2 + $0xcb0] sm:$0xff]  ;;  %v3169_v24 = vadd.f32 %v3168_v17, %v3104_v44 }
 0x56c   :  { %3427 = vmatmul.f32.gmra.mxu1 %v1720_v41  ;;  %v7221_v19 = vpop.f32.mrf.mxu0  ;;  %v1326_v41 = vld [vmem:[#allocation2 + $0xd58] sm:$0xff]  ;;  %v1341_v17 = vld [vmem:[#allocation2 + $0xdd0] sm:$0xff]  ;;  %3778 = vmatpush.msrb.mxu3 %v1342_v48  ;;  %v1300_v48 = vld [vmem:[#allocation2 + $0xc88] sm:$0xff] }
 0x56d   :  { %3489 = vmatmul.f32.gmra.mxu2 %v1689_v63  ;;  %v1325_v63 = vld [vmem:[#allocation2 + $0xd50] sm:$0xff]  ;;  %3653 = vmatpush.msrb.mxu1 %v1305_v49  ;;  %v1338_v49 = vld [vmem:[#allocation2 + $0xdb8] sm:$0xff] }
 0x56e   :  { %3554 = vmatmul.f32.gmra.mxu3 %v1690_v56  ;;  %3713 = vmatpush.msrb.mxu2 %v1326_v41  ;;  %v1362_v56 = vld [vmem:[#allocation2 + $0xe78] sm:$0xff] }
 0x56f   :  { %3616 = vmatmul.f32.gmra.mxu0 %v1659_v3  ;;  %3654 = vmatpush.msrb.mxu1 %v1304_v20 }
 0x570   :  { %v3230_v58 = vpop.f32.mrf.mxu2  ;;  %3714 = vmatpush.msrb.mxu2 %v1325_v63  ;;  %3839 = vmatpush.msrb.mxu0 %v1362_v56  ;;  %v1785_v63 = vld [vmem:[%s8048_s1 + $0xbb0] sm:$0xff] }
 0x571   :  { %v7231_v57 = vpop.f32.mrf.mxu1  ;;  %v3231_v28 = vadd.f32 %v3230_v58, %v3166_v1  ;;  %v3295_v7 = vpop.f32.mrf.mxu3  ;;  %3779 = vmatpush.msrb.mxu3 %v1341_v17  ;;  %3655 = vmatpush.msrb.mxu1 %v1303_v21  ;;  %v3110_v17 = vadd.f32 %v7004_v8, %v7002_v26  ;;  %v1336_v21 = vld [vmem:[#allocation2 + $0xda8] sm:$0xff]  ;;  %v1318_v26 = vld [vmem:[#allocation2 + $0xd18] sm:$0xff] }
 0x572   :  { %3715 = vmatpush.msrb.mxu2 %v1324_v2  ;;  %3840 = vmatpush.msrb.mxu0 %v1361_v62  ;;  %v1755_v2 = vld [vmem:[%s8048_s1 + $0xac0] sm:$0xff]  ;;  %v1357_v62 = vld [vmem:[#allocation2 + $0xe50] sm:$0xff] }
 0x573   :  { %v7239_v52 = vadd.f32 %v3295_v7, %v3231_v28  ;;  %v3107_v7 = vadd.f32 %v6985_v25, %v6983_v43  ;;  %3780 = vmatpush.msrb.mxu3 %v1340_v4  ;;  %v1816_v43 = vld [vmem:[%s8048_s1 + $0xca8] sm:$0xff]  ;;  %3656 = vmatpush.msrb.mxu1 %v1302_v22  ;;  %v1321_v25 = vld [vmem:[#allocation2 + $0xd30] sm:$0xff]  ;;  %v1355_v22 = vld [vmem:[#allocation2 + $0xe40] sm:$0xff] }
 0x574   :  { %3430 = vmatmul.f32.gmra.mxu1 %v1752_v59  ;;  %v7241_v35 = vpop.f32.mrf.mxu0  ;;  %v1323_v59 = vld [vmem:[#allocation2 + $0xd40] sm:$0xff]  ;;  %v1356_v4 = vld [vmem:[#allocation2 + $0xe48] sm:$0xff] }
 0x575   :  { %3492 = vmatmul.f32.gmra.mxu2 %v1721_v40  ;;  %v1360_v40 = vld [vmem:[#allocation2 + $0xe68] sm:$0xff]  ;;  %3781 = vmatpush.msrb.mxu3 %v1339_v5 }
 0x576   :  { %3557 = vmatmul.f32.gmra.mxu3 %v1722_v30  ;;  %3716 = vmatpush.msrb.mxu2 %v1323_v59  ;;  %v3172_v30 = vadd.f32 %v7231_v57, %v3107_v7  ;;  %v1848_v7 = vld [vmem:[%s8048_s1 + $0xda8] sm:$0xff] }
 0x577   :  { %3619 = vmatmul.f32.gmra.mxu0 %v1691_v6  ;;  %v1359_v6 = vld [vmem:[#allocation2 + $0xe60] sm:$0xff]  ;;  %3657 = vmatpush.msrb.mxu1 %v1301_v55 }
 0x578   :  { %v3233_v3 = vpop.f32.mrf.mxu2  ;;  %3841 = vmatpush.msrb.mxu0 %v1360_v40  ;;  %3717 = vmatpush.msrb.mxu2 %v1322_v54  ;;  %v1335_v40 = vld [vmem:[#allocation2 + $0xda0] sm:$0xff] }
 0x579   :  { %v7251_v12 = vpop.f32.mrf.mxu1  ;;  %v3234_v9 = vadd.f32 %v3233_v3, %v3169_v24  ;;  %v3298_v1 = vpop.f32.mrf.mxu3  ;;  %v1358_v24 = vld [vmem:[#allocation2 + $0xe58] sm:$0xff]  ;;  %v1320_v3 = vld [vmem:[#allocation2 + $0xd28] sm:$0xff]  ;;  %3782 = vmatpush.msrb.mxu3 %v1338_v49  ;;  %3658 = vmatpush.msrb.mxu1 %v1300_v48  ;;  %v1315_v48 = vld [vmem:[#allocation2 + $0xd00] sm:$0xff] }
 0x57a   :  { %3842 = vmatpush.msrb.mxu0 %v1359_v6  ;;  %3718 = vmatpush.msrb.mxu2 %v1321_v25  ;;  %v3175_v59 = vadd.f32 %v7251_v12, %v3110_v17  ;;  %v1817_v12 = vld [vmem:[%s8048_s1 + $0xcb0] sm:$0xff]  ;;  %v1334_v6 = vld [vmem:[#allocation2 + $0xd98] sm:$0xff]  ;;  %v3113_v25 = vadd.f32 %v7023_v61, %v7021_v38  ;;  %v1316_v49 = vld [vmem:[#allocation2 + $0xd08] sm:$0xff] }
 0x57b   :  { %v7259_v58 = vadd.f32 %v3298_v1, %v3234_v9  ;;  %v1786_v9 = vld [vmem:[%s8048_s1 + $0xbb8] sm:$0xff]  ;;  %v1299_v1 = vld [vmem:[#allocation2 + $0xc80] sm:$0xff]  ;;  %v1332_v38 = vld [vmem:[#allocation2 + $0xd88] sm:$0xff] }
 0x57c   :  { %3433 = vmatmul.f32.gmra.mxu1 %v1784_v18  ;;  %v7261_v28 = vpop.f32.mrf.mxu0  ;;  %v1337_v18 = vld [vmem:[#allocation2 + $0xdb0] sm:$0xff]  ;;  %3843 = vmatpush.msrb.mxu0 %v1358_v24 }
 0x57d   :  { %3495 = vmatmul.f32.gmra.mxu2 %v1753_v47  ;;  %3783 = vmatpush.msrb.mxu3 %v1337_v18  ;;  %v1319_v47 = vld [vmem:[#allocation2 + $0xd20] sm:$0xff]  ;;  %v1333_v24 = vld [vmem:[#allocation2 + $0xd90] sm:$0xff] }
 0x57e   :  { %3560 = vmatmul.f32.gmra.mxu3 %v1754_v36  ;;  %3719 = vmatpush.msrb.mxu2 %v1320_v3 }
 0x57f   :  { %3622 = vmatmul.f32.gmra.mxu0 %v1723_v15  ;;  %3659 = vmatpush.msrb.mxu1 %v1299_v1 }
 0x580   :  { %v3236_v44 = vpop.f32.mrf.mxu2  ;;  %3844 = vmatpush.msrb.mxu0 %v1357_v62  ;;  %3720 = vmatpush.msrb.mxu2 %v1319_v47  ;;  %v1331_v62 = vld [vmem:[#allocation2 + $0xd80] sm:$0xff] }
 0x581   :  { %v7272_v41 = vpop.f32.mrf.mxu1  ;;  %v3237_v39 = vadd.f32 %v3236_v44, %v3172_v30  ;;  %v3301_v57 = vpop.f32.mrf.mxu3  ;;  %3784 = vmatpush.msrb.mxu3 %v1336_v21  ;;  %v1317_v30 = vld [vmem:[#allocation2 + $0xd10] sm:$0xff]  ;;  %v1818_v44 = vld [vmem:[%s8048_s1 + $0xcb8] sm:$0xff]  ;;  %v1351_v47 = vld [vmem:[#allocation2 + $0xe20] sm:$0xff] }
 0x582   :  { %3845 = vmatpush.msrb.mxu0 %v1356_v4  ;;  %3721 = vmatpush.msrb.mxu2 %v1318_v26  ;;  %v1819_v4 = vld [vmem:[%s8048_s1 + $0xcc0] sm:$0xff] }
 0x583   :  { %v7280_v56 = vadd.f32 %v3301_v57, %v3237_v39  ;;  %3785 = vmatpush.msrb.mxu3 %v1335_v40  ;;  %v1354_v39 = vld [vmem:[#allocation2 + $0xe38] sm:$0xff]  ;;  %v3178_v57 = vadd.f32 %v7272_v41, %v3113_v25  ;;  %v1849_v41 = vld [vmem:[%s8048_s1 + $0xdb0] sm:$0xff]  ;;  %v1851_v25 = vld [vmem:[%s8048_s1 + $0xdc0] sm:$0xff] }
 0x584   :  { %3436 = vmatmul.f32.gmra.mxu1 %v1816_v43  ;;  %v7282_v20 = vpop.f32.mrf.mxu0  ;;  %v1787_v43 = vld [vmem:[%s8048_s1 + $0xbc0] sm:$0xff]  ;;  %3846 = vmatpush.msrb.mxu0 %v1355_v22 }
 0x585   :  { %3498 = vmatmul.f32.gmra.mxu2 %v1785_v63  ;;  %3786 = vmatpush.msrb.mxu3 %v1334_v6  ;;  %v1353_v63 = vld [vmem:[#allocation2 + $0xe30] sm:$0xff] }
 0x586   :  { %3563 = vmatmul.f32.gmra.mxu3 %v1786_v9  ;;  %3722 = vmatpush.msrb.mxu2 %v1317_v30  ;;  %v1880_v9 = vld [vmem:[%s8048_s1 + $0xea8] sm:$0xff] }
 0x587   :  { %3625 = vmatmul.f32.gmra.mxu0 %v1755_v2  ;;  %3787 = vmatpush.msrb.mxu3 %v1333_v24  ;;  %v1352_v2 = vld [vmem:[#allocation2 + $0xe28] sm:$0xff] }
 0x588   :  { %v3239_v36 = vpop.f32.mrf.mxu2  ;;  %3847 = vmatpush.msrb.mxu0 %v1354_v39  ;;  %3723 = vmatpush.msrb.mxu2 %v1316_v49  ;;  %v1348_v30 = vld [vmem:[#allocation2 + $0xe08] sm:$0xff]  ;;  %v3119_v39 = vadd.f32 %v7059_v34, %v7057_v50  ;;  %v1914_v34 = vld [vmem:[%s8048_s1 + $0xfb8] sm:$0xff] }
 0x589   :  { %v3180_v15 = vpop.f32.mrf.mxu1  ;;  %v3240_v8 = vadd.f32 %v3239_v36, %v3175_v59  ;;  %v3304_v54 = vpop.f32.mrf.mxu3  ;;  %3788 = vmatpush.msrb.mxu3 %v1332_v38  ;;  %v1850_v59 = vld [vmem:[%s8048_s1 + $0xdb8] sm:$0xff]  ;;  %v3116_v36 = vadd.f32 %v7041_v51, %v7039_v45  ;;  %v1881_v45 = vld [vmem:[%s8048_s1 + $0xeb0] sm:$0xff] }
 0x58a   :  { %3848 = vmatpush.msrb.mxu0 %v1353_v63  ;;  %3724 = vmatpush.msrb.mxu2 %v1315_v48  ;;  %v1436_v63 = vld [vmem:[%s8048_s1 + $0xc8] sm:$0xff] }
 0x58b   :  { %v7299_v5 = vadd.f32 %v3304_v54, %v3240_v8  ;;  %3789 = vmatpush.msrb.mxu3 %v1331_v62  ;;  %v3181_v26 = vadd.f32 %v3180_v15, %v3116_v36  ;;  %v1349_v8 = vld [vmem:[#allocation2 + $0xe10] sm:$0xff]  ;;  %v1912_v54 = vld [vmem:[%s8048_s1 + $0xfa8] sm:$0xff]  ;;  %v1347_v15 = vld [vmem:[#allocation2 + $0xe00] sm:$0xff] }
 0x58c   :  { %3439 = vmatmul.f32.gmra.mxu1 %v1848_v7  ;;  %v7301_v55 = vpop.f32.mrf.mxu0  ;;  %3849 = vmatpush.msrb.mxu0 %v1352_v2  ;;  %v1350_v7 = vld [vmem:[#allocation2 + $0xe18] sm:$0xff]  ;;  %v1468_v62 = vld [vmem:[%s8048_s1 + $0x1c8] sm:$0xff] }
 0x58d   :  { %3501 = vmatmul.f32.gmra.mxu2 %v1817_v12 }
 0x58e   :  { %3566 = vmatmul.f32.gmra.mxu3 %v1818_v44  ;;  %3850 = vmatpush.msrb.mxu0 %v1351_v47 }
 0x58f   :  { %3628 = vmatmul.f32.gmra.mxu0 %v1787_v43  ;;  %v1882_v43 = vld [vmem:[%s8048_s1 + $0xeb8] sm:$0xff] }
 0x590   :  { %v3242_v3 = vpop.f32.mrf.mxu2  ;;  %3851 = vmatpush.msrb.mxu0 %v1350_v7  ;;  %v1438_v7 = vld [vmem:[%s8048_s1 + $0xd8] sm:$0xff] }
 0x591   :  { %v3183_v18 = vpop.f32.mrf.mxu1  ;;  %v3243_v61 = vadd.f32 %v3242_v3, %v3178_v57  ;;  %v3307_v17 = vpop.f32.mrf.mxu3 }
 0x592   :  { %3852 = vmatpush.msrb.mxu0 %v1349_v8  ;;  %v3184_v49 = vadd.f32 %v3183_v18, %v3119_v39  ;;  %v1883_v18 = vld [vmem:[%s8048_s1 + $0xec0] sm:$0xff] }
 0x593   :  { %v7318_v1 = vadd.f32 %v3307_v17, %v3243_v61  ;;  %v3122_v61 = vadd.f32 %v7077_v23, %v7075_v37  ;;  %v1915_v23 = vld [vmem:[%s8048_s1 + $0xfc0] sm:$0xff] }
 0x594   :  { %3442 = vmatmul.f32.gmra.mxu1 %v1880_v9  ;;  %v7320_v21 = vpop.f32.mrf.mxu0  ;;  %3853 = vmatpush.msrb.mxu0 %v1348_v30  ;;  %v1913_v9 = vld [vmem:[%s8048_s1 + $0xfb0] sm:$0xff] }
 0x595   :  { %3504 = vmatmul.f32.gmra.mxu2 %v1849_v41 }
 0x596   :  { %3569 = vmatmul.f32.gmra.mxu3 %v1850_v59  ;;  %3854 = vmatpush.msrb.mxu0 %v1347_v15  ;;  %v1439_v15 = vld [vmem:[%s8048_s1 + $0xe0] sm:$0xff] }
 0x597   :  { %3631 = vmatmul.f32.gmra.mxu0 %v1819_v4  ;;  %v1437_v4 = vld [vmem:[%s8048_s1 + $0xd0] sm:$0xff] }
 0x598   :  { %v3245_v40 = vpop.f32.mrf.mxu2 }
 0x599   :  { %v3186_v22 = vpop.f32.mrf.mxu1  ;;  %v3246_v12 = vadd.f32 %v3245_v40, %v3181_v26  ;;  %v3310_v6 = vpop.f32.mrf.mxu3  ;;  %v3337_v26 = vadd.f32 %v7095_v60, %v7093_v42  ;;  %v1470_v60 = vld [vmem:[%s8048_s1 + $0x1d8] sm:$0xff] }
 0x59a   :  { %v3187_v2 = vadd.f32 %v3186_v22, %v3122_v61 }
 0x59b   :  { %v7336_v51 = vadd.f32 %v3310_v6, %v3246_v12  ;;  %v1469_v6 = vld [vmem:[%s8048_s1 + $0x1d0] sm:$0xff] }
 0x59c   :  { %3445 = vmatmul.f32.gmra.mxu1 %v1912_v54  ;;  %v7338_v44 = vpop.f32.mrf.mxu0  ;;  %v1500_v54 = vld [vmem:[%s8048_s1 + $0x2c8] sm:$0xff] }
 0x59d   :  { %3507 = vmatmul.f32.gmra.mxu2 %v1881_v45 }
 0x59e   :  { %3572 = vmatmul.f32.gmra.mxu3 %v1882_v43  ;;  %v3340_v43 = vadd.f32 %v7113_v31, %v7111_v16  ;;  %v1502_v31 = vld [vmem:[%s8048_s1 + $0x2d8] sm:$0xff] }
 0x59f   :  { %3634 = vmatmul.f32.gmra.mxu0 %v1851_v25 }
 0x5a0   :  { %v3248_v24 = vpop.f32.mrf.mxu2 }
 0x5a1   :  { %v3401_v57 = vpop.f32.mrf.mxu1  ;;  %v3249_v48 = vadd.f32 %v3248_v24, %v3184_v49  ;;  %v3313_v3 = vpop.f32.mrf.mxu3  ;;  %v1532_v24 = vld [vmem:[%s8048_s1 + $0x3c8] sm:$0xff] }
 0x5a2   :  { %v3402_v8 = vadd.f32 %v3401_v57, %v3337_v26 }
 0x5a3   :  { %v7354_v38 = vadd.f32 %v3313_v3, %v3249_v48  ;;  %v1501_v48 = vld [vmem:[%s8048_s1 + $0x2d0] sm:$0xff] }
 0x5a4   :  { %3660 = vmatmul.f32.vlgmr.msrb.gmra.mxu1 %v1436_v63  ;;  %v7356_v50 = vpop.f32.mrf.mxu0 }
 0x5a5   :  { %3510 = vmatmul.f32.gmra.mxu2 %v1913_v9  ;;  %v1471_v9 = vld [vmem:[%s8048_s1 + $0x1e0] sm:$0xff] }
 0x5a6   :  { %3575 = vmatmul.f32.gmra.mxu3 %v1914_v34  ;;  %v3343_v34 = vadd.f32 %v7131_v0, %v7129_v14  ;;  %v1534_v0 = vld [vmem:[%s8048_s1 + $0x3d8] sm:$0xff] }
 0x5a7   :  { %3637 = vmatmul.f32.gmra.mxu0 %v1883_v18 }
 0x5a8   :  { %v3251_v17 = vpop.f32.mrf.mxu2 }
 0x5a9   :  { %v3404_v41 = vpop.f32.mrf.mxu1  ;;  %v3252_v47 = vadd.f32 %v3251_v17, %v3187_v2  ;;  %v3316_v59 = vpop.f32.mrf.mxu3  ;;  %v1564_v17 = vld [vmem:[%s8048_s1 + $0x4c8] sm:$0xff] }
 0x5aa   :  { %v3405_v25 = vadd.f32 %v3404_v41, %v3340_v43 }
 0x5ab   :  { %v7372_v36 = vadd.f32 %v3316_v59, %v3252_v47  ;;  %v1533_v47 = vld [vmem:[%s8048_s1 + $0x3d0] sm:$0xff] }
 0x5ac   :  { %3663 = vmatmul.f32.gmra.mxu1 %v1468_v62  ;;  %v7374_v37 = vpop.f32.mrf.mxu0 }
 0x5ad   :  { %3725 = vmatmul.f32.vlgmr.msrb.gmra.mxu2 %v1437_v4  ;;  %v1503_v4 = vld [vmem:[%s8048_s1 + $0x2e0] sm:$0xff] }
 0x5ae   :  { %3790 = vmatmul.f32.vlgmr.msrb.gmra.mxu3 %v1438_v7 }
 0x5af   :  { %3640 = vmatmul.f32.gmra.mxu0 %v1915_v23  ;;  %v3346_v23 = vadd.f32 %v7149_v32, %v7147_v29  ;;  %v1566_v32 = vld [vmem:[%s8048_s1 + $0x4d8] sm:$0xff] }
 0x5b0   :  { %v3466_v40 = vpop.f32.mrf.mxu2 }
 0x5b1   :  { %v3407_v22 = vpop.f32.mrf.mxu1  ;;  %v3467_v12 = vadd.f32 %v3466_v40, %v3402_v8  ;;  %v3531_v30 = vpop.f32.mrf.mxu3  ;;  %v1596_v40 = vld [vmem:[%s8048_s1 + $0x5c8] sm:$0xff] }
 0x5b2   :  { %v3408_v18 = vadd.f32 %v3407_v22, %v3343_v34 }
 0x5b3   :  { %v7390_v45 = vadd.f32 %v3531_v30, %v3467_v12  ;;  %v1565_v12 = vld [vmem:[%s8048_s1 + $0x4d0] sm:$0xff] }
 0x5b4   :  { %3666 = vmatmul.f32.gmra.mxu1 %v1500_v54  ;;  %v7392_v42 = vpop.f32.mrf.mxu0 }
 0x5b5   :  { %3728 = vmatmul.f32.gmra.mxu2 %v1469_v6  ;;  %v1535_v6 = vld [vmem:[%s8048_s1 + $0x3e0] sm:$0xff] }
 0x5b6   :  { %3793 = vmatmul.f32.gmra.mxu3 %v1470_v60  ;;  %v3349_v60 = vadd.f32 %v7167_v33, %v7165_v46  ;;  %v1598_v33 = vld [vmem:[%s8048_s1 + $0x5d8] sm:$0xff] }
 0x5b7   :  { %3855 = vmatmul.f32.vlgmr.msrb.gmra.mxu0 %v1439_v15 }
 0x5b8   :  { %v3469_v39 = vpop.f32.mrf.mxu2 }
 0x5b9   :  { %v3410_v49 = vpop.f32.mrf.mxu1  ;;  %v3470_v57 = vadd.f32 %v3469_v39, %v3405_v25  ;;  %v3534_v63 = vpop.f32.mrf.mxu3  ;;  %v1628_v39 = vld [vmem:[%s8048_s1 + $0x6c8] sm:$0xff] }
 0x5ba   :  { %v3411_v7 = vadd.f32 %v3410_v49, %v3346_v23 }
 0x5bb   :  { %v7408_v3 = vadd.f32 %v3534_v63, %v3470_v57  ;;  %v1597_v57 = vld [vmem:[%s8048_s1 + $0x5d0] sm:$0xff] }
 0x5bc   :  { %3669 = vmatmul.f32.gmra.mxu1 %v1532_v24  ;;  %v7410_v16 = vpop.f32.mrf.mxu0 }
 0x5bd   :  { %3731 = vmatmul.f32.gmra.mxu2 %v1501_v48  ;;  %v1567_v48 = vld [vmem:[%s8048_s1 + $0x4e0] sm:$0xff] }
 0x5be   :  { %3796 = vmatmul.f32.gmra.mxu3 %v1502_v31  ;;  %v3352_v31 = vadd.f32 %v7185_v27, %v7183_v11  ;;  %v1630_v27 = vld [vmem:[%s8048_s1 + $0x6d8] sm:$0xff] }
 0x5bf   :  { %3858 = vmatmul.f32.gmra.mxu0 %v1471_v9 }
 0x5c0   :  { %v3472_v61 = vpop.f32.mrf.mxu2 }
 0x5c1   :  { %v3413_v2 = vpop.f32.mrf.mxu1  ;;  %v3473_v41 = vadd.f32 %v3472_v61, %v3408_v18  ;;  %v3537_v62 = vpop.f32.mrf.mxu3  ;;  %v1660_v61 = vld [vmem:[%s8048_s1 + $0x7c8] sm:$0xff] }
 0x5c2   :  { %v3414_v15 = vadd.f32 %v3413_v2, %v3349_v60  ;;  %v1377_v60 = vld [vmem:[#allocation2 + $0xef0] sm:$0xff] }
 0x5c3   :  { %v7426_v59 = vadd.f32 %v3537_v62, %v3473_v41  ;;  %v1629_v41 = vld [vmem:[%s8048_s1 + $0x6d0] sm:$0xff] }
 0x5c4   :  { %3672 = vmatmul.f32.gmra.mxu1 %v1564_v17  ;;  %v7428_v14 = vpop.f32.mrf.mxu0 }
 0x5c5   :  { %3734 = vmatmul.f32.gmra.mxu2 %v1533_v47  ;;  %v1599_v47 = vld [vmem:[%s8048_s1 + $0x5e0] sm:$0xff] }
 0x5c6   :  { %3799 = vmatmul.f32.gmra.mxu3 %v1534_v0  ;;  %v3355_v0 = vadd.f32 %v7203_v13, %v7201_v10  ;;  %v1662_v13 = vld [vmem:[%s8048_s1 + $0x7d8] sm:$0xff] }
 0x5c7   :  { %3861 = vmatmul.f32.gmra.mxu0 %v1503_v4 }
 0x5c8   :  { %v3475_v26 = vpop.f32.mrf.mxu2 }
 0x5c9   :  { %v3416_v8 = vpop.f32.mrf.mxu1  ;;  %v3476_v22 = vadd.f32 %v3475_v26, %v3411_v7  ;;  %v3540_v54 = vpop.f32.mrf.mxu3  ;;  %v1692_v26 = vld [vmem:[%s8048_s1 + $0x8c8] sm:$0xff] }
 0x5ca   :  { %v3417_v9 = vadd.f32 %v3416_v8, %v3352_v31  ;;  %v1694_v31 = vld [vmem:[%s8048_s1 + $0x8d8] sm:$0xff] }
 0x5cb   :  { %v7444_v30 = vadd.f32 %v3540_v54, %v3476_v22  ;;  %v1661_v22 = vld [vmem:[%s8048_s1 + $0x7d0] sm:$0xff] }
 0x5cc   :  { %3675 = vmatmul.f32.gmra.mxu1 %v1596_v40  ;;  %v7446_v29 = vpop.f32.mrf.mxu0 }
 0x5cd   :  { %3737 = vmatmul.f32.gmra.mxu2 %v1565_v12  ;;  %v1631_v12 = vld [vmem:[%s8048_s1 + $0x6e0] sm:$0xff] }
 0x5ce   :  { %3802 = vmatmul.f32.gmra.mxu3 %v1566_v32  ;;  %v1378_v32 = vld [vmem:[#allocation2 + $0xef8] sm:$0xff] }
 0x5cf   :  { %3864 = vmatmul.f32.gmra.mxu0 %v1535_v6  ;;  %v3358_v6 = vadd.f32 %v7221_v19, %v7219_v53  ;;  %3904 = vmatpush.msra.mxu1 %v1378_v32  ;;  %v1693_v53 = vld [vmem:[%s8048_s1 + $0x8d0] sm:$0xff]  ;;  %v1375_v19 = vld [vmem:[#allocation2 + $0xee0] sm:$0xff] }
 0x5d0   :  { %v3478_v43 = vpop.f32.mrf.mxu2 }
 0x5d1   :  { %v3419_v25 = vpop.f32.mrf.mxu1  ;;  %v3479_v49 = vadd.f32 %v3478_v43, %v3414_v15  ;;  %v3543_v24 = vpop.f32.mrf.mxu3  ;;  %3905 = vmatpush.msra.mxu1 %v1377_v60  ;;  %v1695_v60 = vld [vmem:[%s8048_s1 + $0x8e0] sm:$0xff] }
 0x5d2   :  { %v3420_v4 = vadd.f32 %v3419_v25, %v3355_v0 }
 0x5d3   :  { %v7462_v63 = vadd.f32 %v3543_v24, %v3479_v49  ;;  %v1376_v49 = vld [vmem:[#allocation2 + $0xee8] sm:$0xff] }
 0x5d4   :  { %3678 = vmatmul.f32.gmra.mxu1 %v1628_v39  ;;  %v7464_v46 = vpop.f32.mrf.mxu0  ;;  %v1724_v39 = vld [vmem:[%s8048_s1 + $0x9c8] sm:$0xff] }
 0x5d5   :  { %3740 = vmatmul.f32.gmra.mxu2 %v1597_v57  ;;  %3906 = vmatpush.msra.mxu1 %v1376_v49  ;;  %v1407_v49 = vld [vmem:[#allocation2 + $0xfe0] sm:$0xff] }
 0x5d6   :  { %3805 = vmatmul.f32.gmra.mxu3 %v1598_v33 }
 0x5d7   :  { %3867 = vmatmul.f32.gmra.mxu0 %v1567_v48  ;;  %3907 = vmatpush.msra.mxu1 %v1375_v19  ;;  %v1406_v19 = vld [vmem:[#allocation2 + $0xfd8] sm:$0xff] }
 0x5d8   :  { %v3481_v34 = vpop.f32.mrf.mxu2 }
 0x5d9   :  { %v3422_v18 = vpop.f32.mrf.mxu1  ;;  %v3482_v2 = vadd.f32 %v3481_v34, %v3417_v9  ;;  %v3546_v17 = vpop.f32.mrf.mxu3  ;;  %v1663_v9 = vld [vmem:[%s8048_s1 + $0x7e0] sm:$0xff]  ;;  %v1374_v34 = vld [vmem:[#allocation2 + $0xed8] sm:$0xff] }
 0x5da   :  { %v3423_v15 = vadd.f32 %v3422_v18, %v3358_v6  ;;  %v3361_v18 = vadd.f32 %v7241_v35, %v7239_v52  ;;  %3908 = vmatpush.msra.mxu1 %v1374_v34  ;;  %v1372_v52 = vld [vmem:[#allocation2 + $0xec8] sm:$0xff]  ;;  %v1726_v6 = vld [vmem:[%s8048_s1 + $0x9d8] sm:$0xff] }
 0x5db   :  { %v7480_v62 = vadd.f32 %v3546_v17, %v3482_v2  ;;  %v1373_v2 = vld [vmem:[#allocation2 + $0xed0] sm:$0xff]  ;;  %v1788_v34 = vld [vmem:[%s8048_s1 + $0xbc8] sm:$0xff] }
 0x5dc   :  { %3681 = vmatmul.f32.gmra.mxu1 %v1660_v61  ;;  %v7482_v11 = vpop.f32.mrf.mxu0  ;;  %v1394_v61 = vld [vmem:[#allocation2 + $0xf78] sm:$0xff] }
 0x5dd   :  { %3743 = vmatmul.f32.gmra.mxu2 %v1629_v41  ;;  %v1393_v41 = vld [vmem:[#allocation2 + $0xf70] sm:$0xff]  ;;  %3909 = vmatpush.msra.mxu1 %v1373_v2 }
 0x5de   :  { %3808 = vmatmul.f32.gmra.mxu3 %v1630_v27  ;;  %3969 = vmatpush.msra.mxu2 %v1394_v61  ;;  %v1410_v27 = vld [vmem:[#allocation2 + $0xff8] sm:$0xff]  ;;  %v1405_v61 = vld [vmem:[#allocation2 + $0xfd0] sm:$0xff] }
 0x5df   :  { %3870 = vmatmul.f32.gmra.mxu0 %v1599_v47  ;;  %4034 = vmatpush.msra.mxu3 %v1410_v27  ;;  %v1387_v27 = vld [vmem:[#allocation2 + $0xf40] sm:$0xff] }
 0x5e0   :  { %v3484_v23 = vpop.f32.mrf.mxu2  ;;  %3970 = vmatpush.msra.mxu2 %v1393_v41  ;;  %3910 = vmatpush.msra.mxu1 %v1372_v52  ;;  %v1758_v52 = vld [vmem:[%s8048_s1 + $0xad8] sm:$0xff] }
 0x5e1   :  { %v3425_v7 = vpop.f32.mrf.mxu1  ;;  %v3485_v8 = vadd.f32 %v3484_v23, %v3420_v4  ;;  %v3549_v40 = vpop.f32.mrf.mxu3  ;;  %v1756_v4 = vld [vmem:[%s8048_s1 + $0xac8] sm:$0xff] }
 0x5e2   :  { %v3426_v17 = vadd.f32 %v3425_v7, %v3361_v18  ;;  %v1392_v23 = vld [vmem:[#allocation2 + $0xf68] sm:$0xff]  ;;  %v1725_v7 = vld [vmem:[%s8048_s1 + $0x9d0] sm:$0xff] }
 0x5e3   :  { %v7498_v54 = vadd.f32 %v3549_v40, %v3485_v8  ;;  %3971 = vmatpush.msra.mxu2 %v1392_v23  ;;  %v1371_v40 = vld [vmem:[#allocation2 + $0xec0] sm:$0xff]  ;;  %v1388_v18 = vld [vmem:[#allocation2 + $0xf48] sm:$0xff]  ;;  %v3367_v23 = vadd.f32 %v7282_v20, %v7280_v56  ;;  %v1402_v56 = vld [vmem:[#allocation2 + $0xfb8] sm:$0xff] }
 0x5e4   :  { %3684 = vmatmul.f32.gmra.mxu1 %v1692_v26  ;;  %v7500_v10 = vpop.f32.mrf.mxu0  ;;  %v1409_v26 = vld [vmem:[#allocation2 + $0xff0] sm:$0xff] }
 0x5e5   :  { %3746 = vmatmul.f32.gmra.mxu2 %v1661_v22  ;;  %4035 = vmatpush.msra.mxu3 %v1409_v26  ;;  %v1366_v26 = vld [vmem:[#allocation2 + $0xe98] sm:$0xff] }
 0x5e6   :  { %3811 = vmatmul.f32.gmra.mxu3 %v1662_v13  ;;  %v1391_v13 = vld [vmem:[#allocation2 + $0xf60] sm:$0xff]  ;;  %3911 = vmatpush.msra.mxu1 %v1371_v40 }
 0x5e7   :  { %3873 = vmatmul.f32.gmra.mxu0 %v1631_v12  ;;  %v1408_v12 = vld [vmem:[#allocation2 + $0xfe8] sm:$0xff]  ;;  %3972 = vmatpush.msra.mxu2 %v1391_v13  ;;  %v1365_v13 = vld [vmem:[#allocation2 + $0xe90] sm:$0xff] }
 0x5e8   :  { %v3487_v43 = vpop.f32.mrf.mxu2  ;;  %4036 = vmatpush.msra.mxu3 %v1408_v12  ;;  %v1385_v12 = vld [vmem:[#allocation2 + $0xf30] sm:$0xff] }
 0x5e9   :  { %v3428_v25 = vpop.f32.mrf.mxu1  ;;  %v3488_v24 = vadd.f32 %v3487_v43, %v3423_v15  ;;  %v3552_v57 = vpop.f32.mrf.mxu3  ;;  %v1370_v15 = vld [vmem:[#allocation2 + $0xeb8] sm:$0xff]  ;;  %v3364_v43 = vadd.f32 %v7261_v28, %v7259_v58  ;;  %v1368_v58 = vld [vmem:[#allocation2 + $0xea8] sm:$0xff] }
 0x5ea   :  { %3912 = vmatpush.msra.mxu1 %v1370_v15  ;;  %4037 = vmatpush.msra.mxu3 %v1407_v49  ;;  %v1820_v15 = vld [vmem:[%s8048_s1 + $0xcc8] sm:$0xff] }
 0x5eb   :  { %v7516_v33 = vadd.f32 %v3552_v57, %v3488_v24  ;;  %v1369_v24 = vld [vmem:[#allocation2 + $0xeb0] sm:$0xff]  ;;  %v3429_v57 = vadd.f32 %v3428_v25, %v3364_v43  ;;  %v1364_v43 = vld [vmem:[#allocation2 + $0xe88] sm:$0xff] }
 0x5ec   :  { %3687 = vmatmul.f32.gmra.mxu1 %v1724_v39  ;;  %v7518_v48 = vpop.f32.mrf.mxu0  ;;  %v1390_v39 = vld [vmem:[#allocation2 + $0xf58] sm:$0xff]  ;;  %v1757_v25 = vld [vmem:[%s8048_s1 + $0xad0] sm:$0xff]  ;;  %4038 = vmatpush.msra.mxu3 %v1406_v19  ;;  %v1383_v19 = vld [vmem:[#allocation2 + $0xf20] sm:$0xff] }
 0x5ed   :  { %3749 = vmatmul.f32.gmra.mxu2 %v1693_v53  ;;  %v1389_v53 = vld [vmem:[#allocation2 + $0xf50] sm:$0xff]  ;;  %3913 = vmatpush.msra.mxu1 %v1369_v24 }
 0x5ee   :  { %3814 = vmatmul.f32.gmra.mxu3 %v1694_v31  ;;  %3973 = vmatpush.msra.mxu2 %v1390_v39  ;;  %v1384_v39 = vld [vmem:[#allocation2 + $0xf28] sm:$0xff]  ;;  %v1401_v24 = vld [vmem:[#allocation2 + $0xfb0] sm:$0xff] }
 0x5ef   :  { %3876 = vmatmul.f32.gmra.mxu0 %v1663_v9  ;;  %3914 = vmatpush.msra.mxu1 %v1368_v58  ;;  %v1759_v58 = vld [vmem:[%s8048_s1 + $0xae0] sm:$0xff] }
 0x5f0   :  { %v3490_v47 = vpop.f32.mrf.mxu2  ;;  %3974 = vmatpush.msra.mxu2 %v1389_v53  ;;  %4039 = vmatpush.msra.mxu3 %v1405_v61  ;;  %v1363_v53 = vld [vmem:[#allocation2 + $0xe80] sm:$0xff]  ;;  %v1382_v61 = vld [vmem:[#allocation2 + $0xf18] sm:$0xff] }
 0x5f1   :  { %v7528_v0 = vpop.f32.mrf.mxu1  ;;  %v3491_v35 = vadd.f32 %v3490_v47, %v3426_v17  ;;  %v3555_v8 = vpop.f32.mrf.mxu3  ;;  %v1367_v17 = vld [vmem:[#allocation2 + $0xea0] sm:$0xff]  ;;  %v1404_v47 = vld [vmem:[#allocation2 + $0xfc8] sm:$0xff] }
 0x5f2   :  { %3975 = vmatpush.msra.mxu2 %v1388_v18  ;;  %3915 = vmatpush.msra.mxu1 %v1367_v17  ;;  %v3432_v40 = vadd.f32 %v7528_v0, %v3367_v23  ;;  %v1789_v0 = vld [vmem:[%s8048_s1 + $0xbd0] sm:$0xff]  ;;  %v1400_v18 = vld [vmem:[#allocation2 + $0xfa8] sm:$0xff] }
 0x5f3   :  { %v7536_v22 = vadd.f32 %v3555_v8, %v3491_v35  ;;  %v1727_v35 = vld [vmem:[%s8048_s1 + $0x9e0] sm:$0xff]  ;;  %v1386_v8 = vld [vmem:[#allocation2 + $0xf38] sm:$0xff]  ;;  %4040 = vmatpush.msra.mxu3 %v1404_v47  ;;  %v1381_v17 = vld [vmem:[#allocation2 + $0xf10] sm:$0xff] }
 0x5f4   :  { %3690 = vmatmul.f32.gmra.mxu1 %v1756_v4  ;;  %v7538_v32 = vpop.f32.mrf.mxu0  ;;  %3976 = vmatpush.msra.mxu2 %v1387_v27 }
 0x5f5   :  { %3752 = vmatmul.f32.gmra.mxu2 %v1725_v7  ;;  %v1403_v7 = vld [vmem:[#allocation2 + $0xfc0] sm:$0xff]  ;;  %3916 = vmatpush.msra.mxu1 %v1366_v26 }
 0x5f6   :  { %3817 = vmatmul.f32.gmra.mxu3 %v1726_v6  ;;  %3977 = vmatpush.msra.mxu2 %v1386_v8  ;;  %v1397_v8 = vld [vmem:[#allocation2 + $0xf90] sm:$0xff] }
 0x5f7   :  { %3879 = vmatmul.f32.gmra.mxu0 %v1695_v60  ;;  %4041 = vmatpush.msra.mxu3 %v1403_v7  ;;  %v1379_v7 = vld [vmem:[#allocation2 + $0xf00] sm:$0xff] }
 0x5f8   :  { %v3493_v31 = vpop.f32.mrf.mxu2  ;;  %3917 = vmatpush.msra.mxu1 %v1365_v13  ;;  %3978 = vmatpush.msra.mxu2 %v1385_v12  ;;  %v1822_v13 = vld [vmem:[%s8048_s1 + $0xcd8] sm:$0xff]  ;;  %v1791_v12 = vld [vmem:[%s8048_s1 + $0xbe0] sm:$0xff] }
 0x5f9   :  { %v7548_v9 = vpop.f32.mrf.mxu1  ;;  %v3494_v28 = vadd.f32 %v3493_v31, %v3429_v57  ;;  %v3558_v2 = vpop.f32.mrf.mxu3  ;;  %4042 = vmatpush.msra.mxu3 %v1402_v56 }
 0x5fa   :  { %3918 = vmatpush.msra.mxu1 %v1364_v43  ;;  %3979 = vmatpush.msra.mxu2 %v1384_v39 }
 0x5fb   :  { %v7556_v41 = vadd.f32 %v3558_v2, %v3494_v28  ;;  %v3370_v28 = vadd.f32 %v7301_v55, %v7299_v5  ;;  %4043 = vmatpush.msra.mxu3 %v1401_v24  ;;  %v1398_v55 = vld [vmem:[#allocation2 + $0xf98] sm:$0xff] }
 0x5fc   :  { %3693 = vmatmul.f32.gmra.mxu1 %v1788_v34  ;;  %v7558_v4 = vpop.f32.mrf.mxu0  ;;  %v1790_v34 = vld [vmem:[%s8048_s1 + $0xbd8] sm:$0xff]  ;;  %3980 = vmatpush.msra.mxu2 %v1383_v19  ;;  %v1823_v19 = vld [vmem:[%s8048_s1 + $0xce0] sm:$0xff] }
 0x5fd   :  { %3755 = vmatmul.f32.gmra.mxu2 %v1757_v25  ;;  %3919 = vmatpush.msra.mxu1 %v1363_v53  ;;  %v3435_v2 = vadd.f32 %v7548_v9, %v3370_v28  ;;  %v1399_v25 = vld [vmem:[#allocation2 + $0xfa0] sm:$0xff]  ;;  %v1821_v9 = vld [vmem:[%s8048_s1 + $0xcd0] sm:$0xff]  ;;  %v1854_v53 = vld [vmem:[%s8048_s1 + $0xdd8] sm:$0xff] }
 0x5fe   :  { %3820 = vmatmul.f32.gmra.mxu3 %v1758_v52  ;;  %v1852_v52 = vld [vmem:[%s8048_s1 + $0xdc8] sm:$0xff]  ;;  %3981 = vmatpush.msra.mxu2 %v1382_v61 }
 0x5ff   :  { %3882 = vmatmul.f32.gmra.mxu0 %v1727_v35  ;;  %4044 = vmatpush.msra.mxu3 %v1400_v18  ;;  %v1380_v35 = vld [vmem:[#allocation2 + $0xf08] sm:$0xff] }
 0x600   :  { %v3496_v6 = vpop.f32.mrf.mxu2  ;;  %3982 = vmatpush.msra.mxu2 %v1381_v17  ;;  %v1916_v61 = vld [vmem:[%s8048_s1 + $0xfc8] sm:$0xff]  ;;  %v1885_v17 = vld [vmem:[%s8048_s1 + $0xed0] sm:$0xff] }
 0x601   :  { %v3437_v60 = vpop.f32.mrf.mxu1  ;;  %v3497_v20 = vadd.f32 %v3496_v6, %v3432_v40  ;;  %v3561_v49 = vpop.f32.mrf.mxu3  ;;  %4045 = vmatpush.msra.mxu3 %v1399_v25  ;;  %v3373_v6 = vadd.f32 %v7320_v21, %v7318_v1  ;;  %v1853_v1 = vld [vmem:[%s8048_s1 + $0xdd0] sm:$0xff] }
 0x602   :  { %3983 = vmatpush.msra.mxu2 %v1380_v35 }
 0x603   :  { %v7575_v57 = vadd.f32 %v3561_v49, %v3497_v20  ;;  %4046 = vmatpush.msra.mxu3 %v1398_v55  ;;  %v3438_v56 = vadd.f32 %v3437_v60, %v3373_v6  ;;  %v1395_v20 = vld [vmem:[#allocation2 + $0xf80] sm:$0xff]  ;;  %v1884_v49 = vld [vmem:[%s8048_s1 + $0xec8] sm:$0xff]  ;;  %v3382_v6 = vadd.f32 %v7374_v37, %v7372_v36  ;;  %v4146_v36 = vld [vmem:[%s8051_s4 + $0x78] sm:$0xff] }
 0x604   :  { %3696 = vmatmul.f32.gmra.mxu1 %v1820_v15  ;;  %v7577_v31 = vpop.f32.mrf.mxu0  ;;  %v1396_v15 = vld [vmem:[#allocation2 + $0xf88] sm:$0xff]  ;;  %3984 = vmatpush.msra.mxu2 %v1379_v7  ;;  %v1917_v7 = vld [vmem:[%s8048_s1 + $0xfd0] sm:$0xff] }
 0x605   :  { %3758 = vmatmul.f32.gmra.mxu2 %v1789_v0  ;;  %4047 = vmatpush.msra.mxu3 %v1397_v8 }
 0x606   :  { %3823 = vmatmul.f32.gmra.mxu3 %v1790_v34  ;;  %v3376_v34 = vadd.f32 %v7338_v44, %v7336_v51  ;;  %v1886_v44 = vld [vmem:[%s8048_s1 + $0xed8] sm:$0xff]  ;;  %4224 = vperm.xlu1 %4672, %v4146_v36  }
 0x607   :  { %3885 = vmatmul.f32.gmra.mxu0 %v1759_v58  ;;  %4048 = vmatpush.msra.mxu3 %v1396_v15 }
 0x608   :  { %v3499_v27 = vpop.f32.mrf.mxu2 }
 0x609   :  { %v3440_v47 = vpop.f32.mrf.mxu1  ;;  %v3500_v5 = vadd.f32 %v3499_v27, %v3435_v2  ;;  %v3564_v23 = vpop.f32.mrf.mxu3  ;;  %4049 = vmatpush.msra.mxu3 %v1395_v20 }
 0x60a   :  { %v3441_v58 = vadd.f32 %v3440_v47, %v3376_v34  ;;  %v1855_v47 = vld [vmem:[%s8048_s1 + $0xde0] sm:$0xff] }
 0x60b   :  { %v7594_v26 = vadd.f32 %v3564_v23, %v3500_v5  ;;  %v1440_v23 = vld [vmem:[%s8048_s1 + $0xe8] sm:$0xff] }
 0x60c   :  { %3699 = vmatmul.f32.gmra.mxu1 %v1852_v52  ;;  %v7596_v40 = vpop.f32.mrf.mxu0  ;;  %v3379_v52 = vadd.f32 %v7356_v50, %v7354_v38  ;;  %v1918_v50 = vld [vmem:[%s8048_s1 + $0xfd8] sm:$0xff] }
 0x60d   :  { %3761 = vmatmul.f32.gmra.mxu2 %v1821_v9 }
 0x60e   :  { %3826 = vmatmul.f32.gmra.mxu3 %v1822_v13 }
 0x60f   :  { %3888 = vmatmul.f32.gmra.mxu0 %v1791_v12  ;;  %v1887_v12 = vld [vmem:[%s8048_s1 + $0xee0] sm:$0xff] }
 0x610   :  { %v3502_v43 = vpop.f32.mrf.mxu2 }
 0x611   :  { %v3443_v39 = vpop.f32.mrf.mxu1  ;;  %v3503_v0 = vadd.f32 %v3502_v43, %v3438_v56  ;;  %v3567_v24 = vpop.f32.mrf.mxu3  ;;  %v1472_v43 = vld [vmem:[%s8048_s1 + $0x1e8] sm:$0xff] }
 0x612   :  { %v3444_v5 = vadd.f32 %v3443_v39, %v3379_v52  ;;  %v3600_v52 = vadd.f32 %v7410_v16, %v7408_v3  ;;  %v1505_v3 = vld [vmem:[%s8048_s1 + $0x2f0] sm:$0xff] }
 0x613   :  { %v7612_v21 = vadd.f32 %v3567_v24, %v3503_v0  ;;  %v1441_v0 = vld [vmem:[%s8048_s1 + $0xf0] sm:$0xff] }
 0x614   :  { %3702 = vmatmul.f32.gmra.mxu1 %v1884_v49  ;;  %v7614_v60 = vpop.f32.mrf.mxu0 }
 0x615   :  { %3764 = vmatmul.f32.gmra.mxu2 %v1853_v1  ;;  %v1919_v1 = vld [vmem:[%s8048_s1 + $0xfe0] sm:$0xff] }
 0x616   :  { %3829 = vmatmul.f32.gmra.mxu3 %v1854_v53  ;;  %v1442_v53 = vld [vmem:[%s8048_s1 + $0xf8] sm:$0xff] }
 0x617   :  { %3891 = vmatmul.f32.gmra.mxu0 %v1823_v19  ;;  %v3597_v19 = vadd.f32 %v7392_v42, %v7390_v45  ;;  %v1473_v45 = vld [vmem:[%s8048_s1 + $0x1f0] sm:$0xff] }
 0x618   :  { %v3505_v28 = vpop.f32.mrf.mxu2 }
 0x619   :  { %v3446_v18 = vpop.f32.mrf.mxu1  ;;  %v3506_v2 = vadd.f32 %v3505_v28, %v3441_v58  ;;  %v3570_v25 = vpop.f32.mrf.mxu3  ;;  %v4144_v58 = vld [vmem:[%s8051_s4 + $0x68] sm:$0xff] }
 0x61a   :  { %v3447_v15 = vadd.f32 %v3446_v18, %v3382_v6  ;;  %4214 = vperm.xlu0 %4671, %v4144_v58   ;;  %v1506_v6 = vld [vmem:[%s8048_s1 + $0x2f8] sm:$0xff]  ;;  %v4145_v58 = vld [vmem:[%s8051_s4 + $0x70] sm:$0xff] }
 0x61b   :  { %v7630_v27 = vadd.f32 %v3570_v25, %v3506_v2  ;;  %4219 = vperm.xlu2 %4673, %v4145_v58   ;;  %v1634_v58 = vld [vmem:[%s8048_s1 + $0x6f8] sm:$0xff] }
 0x61c   :  { %3705 = vmatmul.f32.gmra.mxu1 %v1916_v61  ;;  %v7632_v51 = vpop.f32.mrf.mxu0  ;;  %v1504_v61 = vld [vmem:[%s8048_s1 + $0x2e8] sm:$0xff] }
 0x61d   :  { %3767 = vmatmul.f32.gmra.mxu2 %v1885_v17  ;;  %v4143_v17 = vld [vmem:[%s8051_s4 + $0x60] sm:$0xff] }
 0x61e   :  { %3832 = vmatmul.f32.gmra.mxu3 %v1886_v44  ;;  %4209 = vperm.xlu1 %4672, %v4143_v17  }
 0x61f   :  { %3894 = vmatmul.f32.gmra.mxu0 %v1855_v47  ;;  %v1474_v47 = vld [vmem:[%s8048_s1 + $0x1f8] sm:$0xff] }
 0x620   :  { %v3508_v55 = vpop.f32.mrf.mxu2 }
 0x621   :  { %v3661_v35 = vpop.f32.mrf.mxu1  ;;  %v3509_v9 = vadd.f32 %v3508_v55, %v3444_v5  ;;  %v3573_v8 = vpop.f32.mrf.mxu3  ;;  %v4141_v55 = vld [vmem:[%s8051_s4 + $0x50] sm:$0xff] }
 0x622   :  { %v3662_v34 = vadd.f32 %v3661_v35, %v3597_v19  ;;  %4199 = vperm.xlu0 %4671, %v4141_v55   ;;  %v1538_v19 = vld [vmem:[%s8048_s1 + $0x3f8] sm:$0xff]  ;;  %v3609_v55 = vadd.f32 %v7464_v46, %v7462_v63 }
 0x623   :  { %v7648_v13 = vadd.f32 %v3573_v8, %v3509_v9  ;;  %v1536_v9 = vld [vmem:[%s8048_s1 + $0x3e8] sm:$0xff] }
 0x624   :  { %3920 = vmatmul.f32.vlgmr.msra.gmra.mxu1 %v1440_v23  ;;  %v7650_v38 = vpop.f32.mrf.mxu0 }
 0x625   :  { %3770 = vmatmul.f32.gmra.mxu2 %v1917_v7 }
 0x626   :  { %3835 = vmatmul.f32.gmra.mxu3 %v1918_v50  ;;  %v4140_v50 = vld [vmem:[%s8051_s4 + $0x48] sm:$0xff] }
 0x627   :  { %3897 = vmatmul.f32.gmra.mxu0 %v1887_v12  ;;  %4194 = vperm.xlu1 %4672, %v4140_v50   ;;  %v1601_v50 = vld [vmem:[%s8048_s1 + $0x5f0] sm:$0xff] }
 0x628   :  { %v3511_v56 = vpop.f32.mrf.mxu2 }
 0x629   :  { %v3664_v20 = vpop.f32.mrf.mxu1  ;;  %v3512_v39 = vadd.f32 %v3511_v56, %v3447_v15  ;;  %v3576_v49 = vpop.f32.mrf.mxu3  ;;  %v3603_v15 = vadd.f32 %v7428_v14, %v7426_v59  ;;  %v1537_v59 = vld [vmem:[%s8048_s1 + $0x3f0] sm:$0xff] }
 0x62a   :  { %v3665_v5 = vadd.f32 %v3664_v20, %v3600_v52  ;;  %v4138_v20 = vld [vmem:[%s8051_s4 + $0x38] sm:$0xff] }
 0x62b   :  { %v7666_v24 = vadd.f32 %v3576_v49, %v3512_v39  ;;  %v1568_v49 = vld [vmem:[%s8048_s1 + $0x4e8] sm:$0xff]  ;;  %4184 = vperm.xlu0 %4671, %v4138_v20   ;;  %v1602_v20 = vld [vmem:[%s8048_s1 + $0x5f8] sm:$0xff] }
 0x62c   :  { %3923 = vmatmul.f32.gmra.mxu1 %v1472_v43  ;;  %v7671_v37 = vpop.f32.mrf.mxu0 }
 0x62d   :  { %3985 = vmatmul.f32.vlgmr.msra.gmra.mxu2 %v1441_v0 }
 0x62e   :  { %4050 = vmatmul.f32.vlgmr.msra.gmra.mxu3 %v1442_v53 }
 0x62f   :  { %3900 = vmatmul.f32.gmra.mxu0 %v1919_v1  ;;  %v4137_v1 = vld [vmem:[%s8051_s4 + $0x30] sm:$0xff] }
 0x630   :  { %v3726_v28 = vpop.f32.mrf.mxu2  ;;  %4179 = vperm.xlu1 %4672, %v4137_v1  }
 0x631   :  { %v3667_v18 = vpop.f32.mrf.mxu1  ;;  %v3727_v2 = vadd.f32 %v3726_v28, %v3662_v34  ;;  %v3791_v25 = vpop.f32.mrf.mxu3  ;;  %v3606_v34 = vadd.f32 %v7446_v29, %v7444_v30 }
 0x632   :  { %v3668_v56 = vadd.f32 %v3667_v18, %v3603_v15  ;;  %v4135_v18 = vld [vmem:[%s8051_s4 + $0x20] sm:$0xff] }
 0x633   :  { %v7690_v42 = vadd.f32 %v3791_v25, %v3727_v2  ;;  %v1600_v25 = vld [vmem:[%s8048_s1 + $0x5e8] sm:$0xff]  ;;  %4169 = vperm.xlu0 %4671, %v4135_v18   ;;  %v4131_v15 = vld [vmem:[%s8051_s4] sm:$0xff] }
 0x634   :  { %3926 = vmatmul.f32.gmra.mxu1 %v1504_v61  ;;  %v7695_v44 = vpop.f32.mrf.mxu0  ;;  %v4136_v18 = vld [vmem:[%s8051_s4 + $0x28] sm:$0xff] }
 0x635   :  { %3988 = vmatmul.f32.gmra.mxu2 %v1473_v45  ;;  %v1569_v45 = vld [vmem:[%s8048_s1 + $0x4f0] sm:$0xff] }
 0x636   :  { %4053 = vmatmul.f32.gmra.mxu3 %v1474_v47  ;;  %v4134_v47 = vld [vmem:[%s8051_s4 + $0x18] sm:$0xff] }
 0x638   :  { %v3729_v35 = vpop.f32.mrf.mxu2  ;;  %4164 = vperm.xlu1 %4672, %v4134_v47  }
 0x639   :  { %v3670_v23 = vpop.f32.mrf.mxu1  ;;  %v3730_v8 = vadd.f32 %v3729_v35, %v3665_v5  ;;  %v3794_v7 = vpop.f32.mrf.mxu3  ;;  %v1570_v5 = vld [vmem:[%s8048_s1 + $0x4f8] sm:$0xff] }
 0x63a   :  { %v3671_v28 = vadd.f32 %v3670_v23, %v3606_v34  ;;  %v4142_v35 = vld [vmem:[%s8051_s4 + $0x58] sm:$0xff] }
 0x63b   :  { %v7711_v16 = vadd.f32 %v3794_v7, %v3730_v8  ;;  %4204 = vperm.xlu2 %4673, %v4142_v35   ;;  %v4133_v35 = vld [vmem:[%s8051_s4 + $0x10] sm:$0xff] }
 0x63c   :  { %3929 = vmatmul.f32.gmra.mxu1 %v1536_v9  ;;  %v7716_v12 = vpop.f32.mrf.mxu0  ;;  %v4132_v9 = vld [vmem:[%s8051_s4 + $0x8] sm:$0xff] }
 0x63d   :  { %3991 = vmatmul.f32.gmra.mxu2 %v1505_v3  ;;  %v1632_v3 = vld [vmem:[%s8048_s1 + $0x6e8] sm:$0xff]  ;;  %4154 = vperm.xlu0 %4671, %v4132_v9  }
 0x63e   :  { %4056 = vmatmul.f32.gmra.mxu3 %v1506_v6 }
 0x640   :  { %v3732_v43 = vpop.f32.mrf.mxu2  ;;  %4149 = vperm.xlu1 %4672, %v4131_v15  }
 0x641   :  { %v3673_v39 = vpop.f32.mrf.mxu1  ;;  %v3733_v0 = vadd.f32 %v3732_v43, %v3668_v56  ;;  %v3797_v36 = vpop.f32.mrf.mxu3  ;;  %v3612_v43 = vadd.f32 %v7482_v11, %v7480_v62  ;;  %v1633_v62 = vld [vmem:[%s8048_s1 + $0x6f0] sm:$0xff] }
 0x642   :  { %v3674_v23 = vadd.f32 %v3673_v39, %v3609_v55  ;;  %v4139_v39 = vld [vmem:[%s8051_s4 + $0x40] sm:$0xff]  ;;  %v3618_v55 = vadd.f32 %v7518_v48, %v7516_v33  ;;  %v1697_v48 = vld [vmem:[%s8048_s1 + $0x8f0] sm:$0xff] }
 0x643   :  { %v7732_v14 = vadd.f32 %v3797_v36, %v3733_v0  ;;  %4189 = vperm.xlu2 %4673, %v4139_v39  }
 0x644   :  { %3932 = vmatmul.f32.gmra.mxu1 %v1568_v49  ;;  %v7737_v53 = vpop.f32.mrf.mxu0 }
 0x645   :  { %3994 = vmatmul.f32.gmra.mxu2 %v1537_v59  ;;  %v1664_v59 = vld [vmem:[%s8048_s1 + $0x7e8] sm:$0xff] }
 0x646   :  { %4059 = vmatmul.f32.gmra.mxu3 %v1538_v19 }
 0x648   :  { %v3735_v61 = vpop.f32.mrf.mxu2 }
 0x649   :  { %v3676_v2 = vpop.f32.mrf.mxu1  ;;  %v3736_v30 = vadd.f32 %v3735_v61, %v3671_v28  ;;  %v3800_v29 = vpop.f32.mrf.mxu3  ;;  %v3615_v28 = vadd.f32 %v7500_v10, %v7498_v54  ;;  %v1665_v54 = vld [vmem:[%s8048_s1 + $0x7f0] sm:$0xff] }
 0x64a   :  { %v3677_v49 = vadd.f32 %v3676_v2, %v3612_v43  ;;  %v3627_v43 = vadd.f32 %v7577_v31, %v7575_v57  ;;  %v1730_v57 = vld [vmem:[%s8048_s1 + $0x9f8] sm:$0xff] }
 0x64b   :  { %v7756_v17 = vadd.f32 %v3800_v29, %v3736_v30  ;;  %4174 = vperm.xlu2 %4673, %v4136_v18   ;;  %v1696_v30 = vld [vmem:[%s8048_s1 + $0x8e8] sm:$0xff] }
 0x64c   :  { %3935 = vmatmul.f32.gmra.mxu1 %v1600_v25  ;;  %v7761_v52 = vpop.f32.mrf.mxu0 }
 0x64d   :  { %3997 = vmatmul.f32.gmra.mxu2 %v1569_v45 }
 0x64e   :  { %4062 = vmatmul.f32.gmra.mxu3 %v1570_v5  ;;  %v1666_v5 = vld [vmem:[%s8048_s1 + $0x7f8] sm:$0xff] }
 0x650   :  { %v3738_v8 = vpop.f32.mrf.mxu2 }
 0x651   :  { %v3679_v7 = vpop.f32.mrf.mxu1  ;;  %v3739_v63 = vadd.f32 %v3738_v8, %v3674_v23  ;;  %v3803_v46 = vpop.f32.mrf.mxu3  ;;  %v3624_v23 = vadd.f32 %v7558_v4, %v7556_v41  ;;  %v1698_v41 = vld [vmem:[%s8048_s1 + $0x8f8] sm:$0xff]  ;;  %v3621_v4 = vadd.f32 %v7538_v32, %v7536_v22  ;;  %v1729_v22 = vld [vmem:[%s8048_s1 + $0x9f0] sm:$0xff] }
 0x652   :  { %v3680_v61 = vadd.f32 %v3679_v7, %v3615_v28 }
 0x653   :  { %v7780_v6 = vadd.f32 %v3803_v46, %v3739_v63  ;;  %4159 = vperm.xlu2 %4673, %v4133_v35  }
 0x654   :  { %3938 = vmatmul.f32.gmra.mxu1 %v1632_v3  ;;  %v7785_v56 = vpop.f32.mrf.mxu0  ;;  %v1728_v3 = vld [vmem:[%s8048_s1 + $0x9e8] sm:$0xff] }
 0x655   :  { %4000 = vmatmul.f32.gmra.mxu2 %v1601_v50 }
 0x656   :  { %4065 = vmatmul.f32.gmra.mxu3 %v1602_v20  ;;  %v4309_v20 = vld [vmem:[#allocation3] sm:$0x1] }
 0x658   :  { %v3741_v0 = vpop.f32.mrf.mxu2 }
 0x659   :  { %v3682_v36 = vpop.f32.mrf.mxu1  ;;  %v3742_v1 = vadd.f32 %v3741_v0, %v3677_v49  ;;  %v3806_v19 = vpop.f32.mrf.mxu3 }
 0x65a   :  { %v3683_v9 = vadd.f32 %v3682_v36, %v3618_v55  ;;  %v1760_v36 = vld [vmem:[%s8048_s1 + $0xae8] sm:$0xff] }
 0x65b   :  { %v7801_v11 = vadd.f32 %v3806_v19, %v3742_v1  ;;  %4312 = vperm.xlu2 %4673, %v4309_v20   ;;  %v1824_v55 = vld [vmem:[%s8048_s1 + $0xce8] sm:$0xff] }
 0x65c   :  { %3941 = vmatmul.f32.gmra.mxu1 %v1664_v59  ;;  %v7803_v34 = vpop.f32.mrf.mxu0 }
 0x65d   :  { %4003 = vmatmul.f32.gmra.mxu2 %v1633_v62 }
 0x65e   :  { %4068 = vmatmul.f32.gmra.mxu3 %v1634_v58  ;;  %v3630_v58 = vadd.f32 %v7596_v40, %v7594_v26  ;;  %v1762_v26 = vld [vmem:[%s8048_s1 + $0xaf8] sm:$0xff]  ;;  %v3633_v40 = vadd.f32 %v7614_v60, %v7612_v21  ;;  %v3636_v60 = vadd.f32 %v7632_v51, %v7630_v27  ;;  %v3639_v51 = vadd.f32 %v7650_v38, %v7648_v13 }
 0x65f   :  { %v1794_v21 = vld [vmem:[%s8048_s1 + $0xbf8] sm:$0xff]  ;;  %v3642_v38 = vadd.f32 %v7671_v37, %v7666_v24  ;;  %v3857_v37 = vadd.f32 %v7695_v44, %v7690_v42  ;;  %v3860_v42 = vadd.f32 %v7716_v12, %v7711_v16  ;;  %v3866_v16 = vadd.f32 %v7761_v52, %v7756_v17 }
 0x660   :  { %v3744_v2 = vpop.f32.mrf.mxu2  ;;  %v1826_v27 = vld [vmem:[%s8048_s1 + $0xcf8] sm:$0xff]  ;;  %v3872_v17 = vadd.f32 %v7803_v34, %v7801_v11 }
 0x661   :  { %v3685_v25 = vpop.f32.mrf.mxu1  ;;  %v3745_v29 = vadd.f32 %v3744_v2, %v3680_v61  ;;  %v3809_v45 = vpop.f32.mrf.mxu3  ;;  %v1792_v61 = vld [vmem:[%s8048_s1 + $0xbe8] sm:$0xff]  ;;  %v1858_v13 = vld [vmem:[%s8048_s1 + $0xdf8] sm:$0xff] }
 0x662   :  { %v3686_v39 = vadd.f32 %v3685_v25, %v3621_v4  ;;  %v1825_v4 = vld [vmem:[%s8048_s1 + $0xcf0] sm:$0xff]  ;;  %v1890_v24 = vld [vmem:[%s8048_s1 + $0xef8] sm:$0xff] }
 0x663   :  { %v7819_v10 = vadd.f32 %v3809_v45, %v3745_v29  ;;  %v1761_v29 = vld [vmem:[%s8048_s1 + $0xaf0] sm:$0xff] }
 0x664   :  { %3944 = vmatmul.f32.gmra.mxu1 %v1696_v30  ;;  %v7821_v47 = vpop.f32.mrf.mxu0 }
 0x665   :  { %4006 = vmatmul.f32.gmra.mxu2 %v1665_v54 }
 0x666   :  { %4071 = vmatmul.f32.gmra.mxu3 %v1666_v5 }
 0x668   :  { %v3747_v8 = vpop.f32.mrf.mxu2 }
 0x669   :  { %v3688_v7 = vpop.f32.mrf.mxu1  ;;  %v3748_v63 = vadd.f32 %v3747_v8, %v3683_v9  ;;  %v3812_v33 = vpop.f32.mrf.mxu3  ;;  %v1793_v8 = vld [vmem:[%s8048_s1 + $0xbf0] sm:$0xff] }
 0x66a   :  { %v3689_v46 = vadd.f32 %v3688_v7, %v3624_v23 }
 0x66b   :  { %v7839_v50 = vadd.f32 %v3812_v33, %v3748_v63 }
 0x66c   :  { %3947 = vmatmul.f32.gmra.mxu1 %v1728_v3  ;;  %v7841_v15 = vpop.f32.mrf.mxu0 }
 0x66d   :  { %4009 = vmatmul.f32.gmra.mxu2 %v1697_v48  ;;  %v3878_v11 = vadd.f32 %v7841_v15, %v7839_v50 }
 0x66e   :  { %4074 = vmatmul.f32.gmra.mxu3 %v1698_v41 }
 0x670   :  { %v3750_v49 = vpop.f32.mrf.mxu2 }
 0x671   :  { %v3691_v0 = vpop.f32.mrf.mxu1  ;;  %v3751_v59 = vadd.f32 %v3750_v49, %v3686_v39  ;;  %v3815_v19 = vpop.f32.mrf.mxu3  ;;  %v1888_v49 = vld [vmem:[%s8048_s1 + $0xee8] sm:$0xff] }
 0x672   :  { %v3692_v1 = vadd.f32 %v3691_v0, %v3627_v43 }
 0x673   :  { %v3816_v32 = vadd.f32 %v3815_v19, %v3751_v59 }
 0x674   :  { %3950 = vmatmul.f32.gmra.mxu1 %v1760_v36  ;;  %v3880_v62 = vpop.f32.mrf.mxu0 }
 0x675   :  { %v7859_v31 = vadd.f32 %v3880_v62, %v3816_v32  ;;  %4012 = vmatmul.f32.gmra.mxu2 %v1729_v22  ;;  %v1920_v62 = vld [vmem:[%s8048_s1 + $0xfe8] sm:$0xff] }
 0x676   :  { %4077 = vmatmul.f32.gmra.mxu3 %v1730_v57 }
 0x678   :  { %v3753_v28 = vpop.f32.mrf.mxu2 }
 0x679   :  { %v3694_v18 = vpop.f32.mrf.mxu1  ;;  %v3754_v2 = vadd.f32 %v3753_v28, %v3689_v46  ;;  %v3818_v30 = vpop.f32.mrf.mxu3  ;;  %v1856_v46 = vld [vmem:[%s8048_s1 + $0xde8] sm:$0xff] }
 0x67a   :  { %v3695_v25 = vadd.f32 %v3694_v18, %v3630_v58  ;;  %v1889_v18 = vld [vmem:[%s8048_s1 + $0xef0] sm:$0xff] }
 0x67b   :  { %v7869_v45 = vadd.f32 %v3818_v30, %v3754_v2 }
 0x67c   :  { %3953 = vmatmul.f32.gmra.mxu1 %v1792_v61 }
 0x67d   :  { %4015 = vmatmul.f32.gmra.mxu2 %v1761_v29 }
 0x67e   :  { %4080 = vmatmul.f32.gmra.mxu3 %v1762_v26 }
 0x680   :  { %v3756_v54 = vpop.f32.mrf.mxu2 }
 0x681   :  { %v3697_v5 = vpop.f32.mrf.mxu1  ;;  %v3757_v35 = vadd.f32 %v3756_v54, %v3692_v1  ;;  %v3821_v9 = vpop.f32.mrf.mxu3  ;;  %v1857_v1 = vld [vmem:[%s8048_s1 + $0xdf0] sm:$0xff] }
 0x682   :  { %v3698_v23 = vadd.f32 %v3697_v5, %v3633_v40  ;;  %v1921_v40 = vld [vmem:[%s8048_s1 + $0xff0] sm:$0xff]  ;;  %v1922_v5 = vld [vmem:[%s8048_s1 + $0xff8] sm:$0xff] }
 0x683   :  { %v7882_v7 = vadd.f32 %v3821_v9, %v3757_v35 }
 0x684   :  { %3956 = vmatmul.f32.gmra.mxu1 %v1824_v55 }
 0x685   :  { %4018 = vmatmul.f32.gmra.mxu2 %v1793_v8 }
 0x686   :  { %4083 = vmatmul.f32.gmra.mxu3 %v1794_v21  ;;  %v3863_v21 = vadd.f32 %v7737_v53, %v7732_v14  ;;  %v3869_v14 = vadd.f32 %v7785_v56, %v7780_v6  ;;  %v3875_v6 = vadd.f32 %v7821_v47, %v7819_v10 }
 0x688   :  { %v3759_v3 = vpop.f32.mrf.mxu2 }
 0x689   :  { %v3700_v63 = vpop.f32.mrf.mxu1  ;;  %v3760_v33 = vadd.f32 %v3759_v3, %v3695_v25  ;;  %v3824_v41 = vpop.f32.mrf.mxu3 }
 0x68a   :  { %v3701_v48 = vadd.f32 %v3700_v63, %v3636_v60 }
 0x68b   :  { %v7895_v20 = vadd.f32 %v3824_v41, %v3760_v33 }
 0x68c   :  { %3959 = vmatmul.f32.gmra.mxu1 %v1856_v46 }
 0x68d   :  { %4021 = vmatmul.f32.gmra.mxu2 %v1825_v4 }
 0x68e   :  { %4086 = vmatmul.f32.gmra.mxu3 %v1826_v27 }
 0x690   :  { %v3762_v43 = vpop.f32.mrf.mxu2 }
 0x691   :  { %v3703_v39 = vpop.f32.mrf.mxu1  ;;  %v3763_v0 = vadd.f32 %v3762_v43, %v3698_v23  ;;  %v3827_v59 = vpop.f32.mrf.mxu3 }
 0x692   :  { %v3704_v36 = vadd.f32 %v3703_v39, %v3639_v51 }
 0x693   :  { %v7908_v19 = vadd.f32 %v3827_v59, %v3763_v0 }
 0x694   :  { %3962 = vmatmul.f32.gmra.mxu1 %v1888_v49 }
 0x695   :  { %4024 = vmatmul.f32.gmra.mxu2 %v1857_v1 }
 0x696   :  { %4089 = vmatmul.f32.gmra.mxu3 %v1858_v13 }
 0x698   :  { %v3765_v22 = vpop.f32.mrf.mxu2 }
 0x699   :  { %v3706_v32 = vpop.f32.mrf.mxu1  ;;  %v3766_v57 = vadd.f32 %v3765_v22, %v3701_v48  ;;  %v3830_v28 = vpop.f32.mrf.mxu3 }
 0x69a   :  { %v3707_v58 = vadd.f32 %v3706_v32, %v3642_v38 }
 0x69b   :  { %v7921_v61 = vadd.f32 %v3830_v28, %v3766_v57 }
 0x69c   :  { %3965 = vmatmul.f32.gmra.mxu1 %v1920_v62 }
 0x69d   :  { %4027 = vmatmul.f32.gmra.mxu2 %v1889_v18 }
 0x69e   :  { %4092 = vmatmul.f32.gmra.mxu3 %v1890_v24 }
 0x6a0   :  { %v3768_v2 = vpop.f32.mrf.mxu2 }
 0x6a1   :  { %v3921_v25 = vpop.f32.mrf.mxu1  ;;  %v3769_v30 = vadd.f32 %v3768_v2, %v3704_v36  ;;  %v3833_v26 = vpop.f32.mrf.mxu3 }
 0x6a2   :  { %v3922_v29 = vadd.f32 %v3921_v25, %v3857_v37 }
 0x6a3   :  { %v7931_v54 = vadd.f32 %v3833_v26, %v3769_v30 }
 0x6a5   :  { %4030 = vmatmul.f32.gmra.mxu2 %v1921_v40 }
 0x6a6   :  { %4095 = vmatmul.f32.gmra.mxu3 %v1922_v5 }
 0x6a8   :  { %v3771_v44 = vpop.f32.mrf.mxu2 }
 0x6a9   :  { %v3924_v55 = vpop.f32.mrf.mxu1  ;;  %v3772_v35 = vadd.f32 %v3771_v44, %v3707_v58  ;;  %v3836_v9 = vpop.f32.mrf.mxu3 }
 0x6aa   :  { %v3925_v23 = vadd.f32 %v3924_v55, %v3860_v42  ;;  %v3883_v42 = vpop.f32.mrf.mxu0 }
 0x6ab   :  { %v7938_v8 = vadd.f32 %v3836_v9, %v3772_v35 }
 0x6b0   :  { %v3986_v60 = vpop.f32.mrf.mxu2 }
 0x6b1   :  { %v3927_v3 = vpop.f32.mrf.mxu1  ;;  %v3987_v63 = vadd.f32 %v3986_v60, %v3922_v29  ;;  %v4051_v33 = vpop.f32.mrf.mxu3 }
 0x6b2   :  { %v3928_v46 = vadd.f32 %v3927_v3, %v3863_v21 }
 0x6b3   :  { %v7942_v48 = vadd.f32 %v4051_v33, %v3987_v63 }
 0x6b8   :  { %v3989_v12 = vpop.f32.mrf.mxu2 }
 0x6b9   :  { %v3930_v41 = vpop.f32.mrf.mxu1  ;;  %v3990_v4 = vadd.f32 %v3989_v12, %v3925_v23  ;;  %v4054_v51 = vpop.f32.mrf.mxu3 }
 0x6ba   :  { %v3931_v27 = vadd.f32 %v3930_v41, %v3866_v16  ;;  %v3886_v23 = vpop.f32.mrf.mxu0 }
 0x6bb   :  { %v7946_v43 = vadd.f32 %v4054_v51, %v3990_v4 }
 0x6c0   :  { %v3992_v53 = vpop.f32.mrf.mxu2 }
 0x6c1   :  { %v3933_v39 = vpop.f32.mrf.mxu1  ;;  %v3993_v49 = vadd.f32 %v3992_v53, %v3928_v46  ;;  %v4057_v36 = vpop.f32.mrf.mxu3 }
 0x6c2   :  { %v3934_v0 = vadd.f32 %v3933_v39, %v3869_v14  ;;  %v3889_v33 = vpop.f32.mrf.mxu0 }
 0x6c3   :  { %v7950_v59 = vadd.f32 %v4057_v36, %v3993_v49 }
 0x6c8   :  { %v3995_v52 = vpop.f32.mrf.mxu2 }
 0x6c9   :  { %v3936_v1 = vpop.f32.mrf.mxu1  ;;  %v3996_v13 = vadd.f32 %v3995_v52, %v3931_v27  ;;  %v4060_v22 = vpop.f32.mrf.mxu3 }
 0x6ca   :  { %v3937_v38 = vadd.f32 %v3936_v1, %v3872_v17  ;;  %v3892_v4 = vpop.f32.mrf.mxu0 }
 0x6cb   :  { %v7954_v32 = vadd.f32 %v4060_v22, %v3996_v13 }
 0x6d0   :  { %v3998_v56 = vpop.f32.mrf.mxu2 }
 0x6d1   :  { %v3939_v62 = vpop.f32.mrf.mxu1  ;;  %v3999_v57 = vadd.f32 %v3998_v56, %v3934_v0  ;;  %v4063_v28 = vpop.f32.mrf.mxu3 }
 0x6d2   :  { %v3940_v58 = vadd.f32 %v3939_v62, %v3875_v6  ;;  %v3895_v53 = vpop.f32.mrf.mxu0 }
 0x6d3   :  { %v7958_v18 = vadd.f32 %v4063_v28, %v3999_v57  ;;  %v3896_v62 = vadd.f32 %v3895_v53, %v7921_v61  ;;  %v3893_v28 = vadd.f32 %v3892_v4, %v7908_v19 }
 0x6d8   :  { %v4001_v34 = vpop.f32.mrf.mxu2 }
 0x6d9   :  { %v3942_v24 = vpop.f32.mrf.mxu1  ;;  %v4002_v37 = vadd.f32 %v4001_v34, %v3937_v38  ;;  %v4066_v25 = vpop.f32.mrf.mxu3 }
 0x6da   :  { %v3943_v2 = vadd.f32 %v3942_v24, %v3878_v11  ;;  %v3898_v36 = vpop.f32.mrf.mxu0 }
 0x6db   :  { %v7962_v30 = vadd.f32 %v4066_v25, %v4002_v37  ;;  %v3899_v6 = vadd.f32 %v3898_v36, %v7931_v54  ;;  %v4125_v36 = vld [vmem:[%s8050_s3 + $0x50] sm:$0xff] }
 0x6e0   :  { %v4004_v29 = vpop.f32.mrf.mxu2 }
 0x6e1   :  { %v3945_v26 = vpop.f32.mrf.mxu1  ;;  %v4005_v10 = vadd.f32 %v4004_v29, %v3940_v58  ;;  %v4069_v40 = vpop.f32.mrf.mxu3 }
 0x6e2   :  { %v3946_v47 = vadd.f32 %v3945_v26, %v7859_v31  ;;  %v3901_v38 = vpop.f32.mrf.mxu0 }
 0x6e3   :  { %v7965_v5 = vadd.f32 %v4069_v40, %v4005_v10  ;;  %v3902_v57 = vadd.f32 %v3901_v38, %v7938_v8  ;;  %v3887_v10 = vadd.f32 %v3886_v23, %v7882_v7  ;;  %v3884_v8 = vadd.f32 %v3883_v42, %v7869_v45  ;;  %v4130_v38 = vld [vmem:[%s8050_s3 + $0x78] sm:$0xff] }
 0x6e8   :  { %v4007_v44 = vpop.f32.mrf.mxu2 }
 0x6e9   :  { %v3948_v55 = vpop.f32.mrf.mxu1  ;;  %v4008_v35 = vadd.f32 %v4007_v44, %v3943_v2  ;;  %v4072_v50 = vpop.f32.mrf.mxu3  ;;  %v3890_v2 = vadd.f32 %v3889_v33, %v7895_v20 }
 0x6eb   :  { %v7967_v15 = vadd.f32 %v4072_v50, %v4008_v35 }
 0x6f0   :  { %v4010_v9 = vpop.f32.mrf.mxu2 }
 0x6f1   :  { %v4011_v21 = vadd.f32 %v4010_v9, %v3946_v47  ;;  %v3951_v60 = vpop.f32.mrf.mxu1  ;;  %v4075_v3 = vpop.f32.mrf.mxu3 }
 0x6f2   :  { %v3952_v35 = vadd.f32 %v3951_v60, %v3887_v10  ;;  %v4106_v60 = vmax.f32 %v7967_v15, 0.0  ;;  %v4099_v15 = vmax.f32 %v7942_v48, 0.0  ;;  %v4118_v48 = vld [vmem:[%s8050_s3 + $0x18] sm:$0xff] }
 0x6f3   :  { %v7969_v63 = vadd.f32 %v4075_v3, %v4011_v21  ;;  %v3949_v21 = vadd.f32 %v3948_v55, %v3884_v8 }
 0x6f5   :  { %v4107_v55 = vmax.f32 %v7969_v63, 0.0  ;;  %v4100_v63 = vmax.f32 %v7946_v43, 0.0  ;;  %v4119_v43 = vld [vmem:[%s8050_s3 + $0x20] sm:$0xff] }
 0x6f8   :  { %v4013_v46 = vpop.f32.mrf.mxu2 }
 0x6f9   :  { %v4078_v31 = vpop.f32.mrf.mxu3  ;;  %v3954_v16 = vpop.f32.mrf.mxu1  ;;  %v4014_v33 = vadd.f32 %v4013_v46, %v3949_v21  ;;  %v4105_v46 = vmax.f32 %v7965_v5, 0.0  ;;  %v4121_v5 = vld [vmem:[%s8050_s3 + $0x30] sm:$0xff] }
 0x6fa   :  { %v3955_v47 = vadd.f32 %v3954_v16, %v3890_v2 }
 0x6fb   :  { %v4079_v16 = vadd.f32 %v4078_v31, %v4014_v33  ;;  %v4103_v31 = vmax.f32 %v7958_v18, 0.0  ;;  %v4120_v18 = vld [vmem:[%s8050_s3 + $0x28] sm:$0xff] }
 0x6fd   :  { %v4108_v42 = vmax.f32 %v4079_v16, 0.0 }
 0x700   :  { %v4016_v12 = vpop.f32.mrf.mxu2 }
 0x701   :  { %v4081_v41 = vpop.f32.mrf.mxu3  ;;  %v3957_v27 = vpop.f32.mrf.mxu1  ;;  %v4017_v3 = vadd.f32 %v4016_v12, %v3952_v35  ;;  %v4104_v12 = vmax.f32 %v7962_v30, 0.0  ;;  %v4115_v30 = vld [vmem:[%s8050_s3] sm:$0xff] }
 0x702   :  { %v3958_v25 = vadd.f32 %v3957_v27, %v3893_v28 }
 0x703   :  { %v4082_v7 = vadd.f32 %v4081_v41, %v4017_v3  ;;  %v4102_v41 = vmax.f32 %v7954_v32, 0.0  ;;  %v4116_v32 = vld [vmem:[%s8050_s3 + $0x8] sm:$0xff] }
 0x705   :  { %v4109_v45 = vmax.f32 %v4082_v7, 0.0 }
 0x708   :  { %v4019_v51 = vpop.f32.mrf.mxu2 }
 0x709   :  { %v4084_v14 = vpop.f32.mrf.mxu3  ;;  %v3960_v39 = vpop.f32.mrf.mxu1  ;;  %v4020_v19 = vadd.f32 %v4019_v51, %v3955_v47  ;;  %v4101_v51 = vmax.f32 %v7950_v59, 0.0  ;;  %v4117_v59 = vld [vmem:[%s8050_s3 + $0x10] sm:$0xff] }
 0x70a   :  { %v3961_v11 = vadd.f32 %v3960_v39, %v3896_v62 }
 0x70b   :  { %v4085_v27 = vadd.f32 %v4084_v14, %v4020_v19  ;;  %v4122_v14 = vld [vmem:[%s8050_s3 + $0x38] sm:$0xff] }
 0x70d   :  { %v4110_v39 = vmax.f32 %v4085_v27, 0.0 }
 0x710   :  { %v4022_v49 = vpop.f32.mrf.mxu2 }
 0x711   :  { %v4087_v0 = vpop.f32.mrf.mxu3  ;;  %v3963_v52 = vpop.f32.mrf.mxu1  ;;  %v4023_v40 = vadd.f32 %v4022_v49, %v3958_v25  ;;  %v4123_v49 = vld [vmem:[%s8050_s3 + $0x40] sm:$0xff] }
 0x712   :  { %v3964_v58 = vadd.f32 %v3963_v52, %v3899_v6  ;;  %v4127_v52 = vld [vmem:[%s8050_s3 + $0x60] sm:$0xff] }
 0x713   :  { %v4088_v4 = vadd.f32 %v4087_v0, %v4023_v40  ;;  %v4124_v0 = vld [vmem:[%s8050_s3 + $0x48] sm:$0xff] }
 0x715   :  { %v4111_v23 = vmax.f32 %v4088_v4, 0.0 }
 0x718   :  { %v4025_v17 = vpop.f32.mrf.mxu2 }
 0x719   :  { %v4090_v1 = vpop.f32.mrf.mxu3  ;;  %v3966_v56 = vpop.f32.mrf.mxu1  ;;  %v4026_v29 = vadd.f32 %v4025_v17, %v3961_v11  ;;  %v4126_v17 = vld [vmem:[%s8050_s3 + $0x58] sm:$0xff] }
 0x71a   :  { %v3967_v34 = vadd.f32 %v3966_v56, %v3902_v57 }
 0x71b   :  { %v4091_v50 = vadd.f32 %v4090_v1, %v4026_v29  ;;  %v4128_v1 = vld [vmem:[%s8050_s3 + $0x68] sm:$0xff]  ;;  %v4225_v29 = vpop.permute.xlu1 %4224 }
 0x71d   :  { %v4112_v53 = vmax.f32 %v4091_v50, 0.0 }
 0x720   :  { %v4028_v13 = vpop.f32.mrf.mxu2 }
 0x721   :  { %v4093_v22 = vpop.f32.mrf.mxu3  ;;  %v4029_v24 = vadd.f32 %v4028_v13, %v3964_v58  ;;  %v4129_v13 = vld [vmem:[%s8050_s3 + $0x70] sm:$0xff] }
 0x723   :  { %v4094_v61 = vadd.f32 %v4093_v22, %v4029_v24  ;;  %v4210_v47 = vpop.permute.xlu1 %4209 }
 0x725   :  { %v4113_v20 = vmax.f32 %v4094_v61, 0.0 }
 0x728   :  { %v4031_v37 = vpop.f32.mrf.mxu2 }
 0x729   :  { %v4032_v26 = vadd.f32 %v4031_v37, %v3967_v34  ;;  %v4096_v54 = vpop.f32.mrf.mxu3 }
 0x72b   :  { %v4097_v44 = vadd.f32 %v4096_v54, %v4032_v26  ;;  %v4220_v26 = vpop.permute.xlu2 %4219  ;;  %v4215_v54 = vpop.permute.xlu0 %4214 }
 0x72c   :  { %v4195_v8 = vpop.permute.xlu1 %4194 }
 0x72d   :  { %v4114_v9 = vmax.f32 %v4097_v44, 0.0 }
 0x72f   :  { %4227 = vmatpush.msra.mxu0 %v4114_v9 }
 0x731   :  { %4228 = vmatpush.msra.mxu0 %v4113_v20 }
 0x733   :  { %4229 = vmatpush.msra.mxu0 %v4112_v53  ;;  %v4205_v61 = vpop.permute.xlu2 %4204  ;;  %v4200_v44 = vpop.permute.xlu0 %4199 }
 0x734   :  { %v4180_v7 = vpop.permute.xlu1 %4179 }
 0x735   :  { %4230 = vmatpush.msra.mxu0 %v4111_v23 }
 0x737   :  { %4231 = vmatpush.msra.mxu0 %v4110_v39 }
 0x739   :  { %4232 = vmatpush.msra.mxu0 %v4109_v45 }
 0x73b   :  { %4233 = vmatpush.msra.mxu0 %v4108_v42  ;;  %v4190_v3 = vpop.permute.xlu2 %4189  ;;  %v4185_v33 = vpop.permute.xlu0 %4184 }
 0x73d   :  { %4234 = vmatpush.msra.mxu0 %v4107_v55 }
 0x73f   :  { %4235 = vmatpush.msra.mxu0 %v4106_v60 }
 0x741   :  { %4236 = vmatpush.msra.mxu0 %v4105_v46 }
 0x743   :  { %4237 = vmatpush.msra.mxu0 %v4104_v12  ;;  %v4175_v60 = vpop.permute.xlu2 %4174 }
 0x745   :  { %4238 = vmatpush.msra.mxu0 %v4103_v31  ;;  %v4170_v31 = vpop.permute.xlu0 %4169 }
 0x747   :  { %4239 = vmatpush.msra.mxu0 %v4102_v41 }
 0x749   :  { %4240 = vmatpush.msra.mxu0 %v4101_v51 }
 0x74b   :  { %4241 = vmatpush.msra.mxu0 %v4100_v63  ;;  %v4165_v63 = vpop.permute.xlu1 %4164 }
 0x74d   :  { %4242 = vmatpush.msra.mxu0 %v4099_v15 }
 0x74e   :  { %4243 = vmatmul.f32.vlgmr.msra.gmra.mxu0 %v4115_v30 }
 0x756   :  { %4246 = vmatmul.f32.gmra.mxu0 %v4116_v32 }
 0x75e   :  { %4249 = vmatmul.f32.gmra.mxu0 %v4117_v59 }
 0x766   :  { %4252 = vmatmul.f32.gmra.mxu0 %v4118_v48 }
 0x76e   :  { %4255 = vmatmul.f32.gmra.mxu0 %v4119_v43 }
 0x776   :  { %4258 = vmatmul.f32.gmra.mxu0 %v4120_v18  ;;  %v4160_v18 = vpop.permute.xlu2 %4159 }
 0x77e   :  { %4261 = vmatmul.f32.gmra.mxu0 %v4121_v5 }
 0x786   :  { %4264 = vmatmul.f32.gmra.mxu0 %v4122_v14 }
 0x78e   :  { %4267 = vmatmul.f32.gmra.mxu0 %v4123_v49  ;;  %v4155_v49 = vpop.permute.xlu0 %4154 }
 0x796   :  { %4270 = vmatmul.f32.gmra.mxu0 %v4124_v0 }
 0x79e   :  { %4273 = vmatmul.f32.gmra.mxu0 %v4125_v36 }
 0x7a6   :  { %4276 = vmatmul.f32.gmra.mxu0 %v4126_v17  ;;  %v4150_v17 = vpop.permute.xlu1 %4149 }
 0x7ae   :  { %4279 = vmatmul.f32.gmra.mxu0 %v4127_v52 }
 0x7b6   :  { %4282 = vmatmul.f32.gmra.mxu0 %v4128_v1 }
 0x7be   :  { %4285 = vmatmul.f32.gmra.mxu0 %v4129_v13 }
 0x7c6   :  { %4288 = vmatmul.f32.gmra.mxu0 %v4130_v38 }
 0x7cb   :  { %v8035_v22 = vpop.f32.mrf.mxu0 }
 0x7cc   :  { %v4245_v52 = vadd.f32 %v8035_v22, %v4150_v17 }
 0x7ce   :  { %v4292_v38 = vmax.f32 %v4245_v52, 0.0 }
 0x7d3   :  { %v8037_v6 = vpop.f32.mrf.mxu0 }
 0x7d4   :  { %v4248_v0 = vadd.f32 %v8037_v6, %v4155_v49 }
 0x7d6   :  { %v4293_v13 = vmax.f32 %v4248_v0, 0.0 }
 0x7db   :  { %v4250_v56 = vpop.f32.mrf.mxu0 }
 0x7dc   :  { %v4251_v5 = vadd.f32 %v4250_v56, %v4160_v18  ;;  %v4308_v56 = vld [vmem:[%s8052_s5] sm:$0x1]  ;;  %s4769_s5 = smov [#allocation4]  }
 0x7dd   :  { %s4362_s8 = sshll.u32 %s4769_s5, 4  ;;  %s4363_s8 = int_to_ptr.vmem [resolvable:$true] %s4362_s8 }
 0x7de   :  { %v4294_v1 = vmax.f32 %v4251_v5, 0.0 }
 0x7e3   :  { %v4253_v62 = vpop.f32.mrf.mxu0 }
 0x7e4   :  { %v4254_v48 = vadd.f32 %v4253_v62, %v4165_v63  ;;  %v4313_v62 = vpop.permute.xlu2 %4312 }
 0x7e6   :  { %v4295_v36 = vmax.f32 %v4254_v48, 0.0 }
 0x7eb   :  { %v4256_v57 = vpop.f32.mrf.mxu0 }
 0x7ec   :  { %v4257_v32 = vadd.f32 %v4256_v57, %v4170_v31  ;;  %v4315_v57 = vperm.slane %v4313_v62, 0 }
 0x7ee   :  { %v4296_v14 = vmax.f32 %v4257_v32, 0.0 }
 0x7f3   :  { %v4259_v58 = vpop.f32.mrf.mxu0 }
 0x7f4   :  { %v4260_v15 = vadd.f32 %v4259_v58, %v4175_v60 }
 0x7f6   :  { %v4297_v43 = vmax.f32 %v4260_v15, 0.0 }
 0x7fb   :  { %v4262_v28 = vpop.f32.mrf.mxu0 }
 0x7fc   :  { %v4263_v41 = vadd.f32 %v4262_v28, %v4180_v7 }
 0x7fe   :  { %v4298_v59 = vmax.f32 %v4263_v41, 0.0 }
 0x803   :  { %v4265_v11 = vpop.f32.mrf.mxu0 }
 0x804   :  { %v4266_v46 = vadd.f32 %v4265_v11, %v4185_v33 }
 0x806   :  { %v4299_v30 = vmax.f32 %v4266_v46, 0.0 }
 0x80b   :  { %v4268_v34 = vpop.f32.mrf.mxu0 }
 0x80c   :  { %v4269_v42 = vadd.f32 %v4268_v34, %v4190_v3 }
 0x80e   :  { %v4300_v51 = vmax.f32 %v4269_v42, 0.0 }
 0x813   :  { %v4271_v24 = vpop.f32.mrf.mxu0 }
 0x814   :  { %v4272_v39 = vadd.f32 %v4271_v24, %v4195_v8 }
 0x816   :  { %v4301_v12 = vmax.f32 %v4272_v39, 0.0 }
 0x81b   :  { %v4274_v37 = vpop.f32.mrf.mxu0 }
 0x81c   :  { %v4275_v23 = vadd.f32 %v4274_v37, %v4200_v44 }
 0x81e   :  { %v4302_v55 = vmax.f32 %v4275_v23, 0.0 }
 0x823   :  { %v4277_v2 = vpop.f32.mrf.mxu0 }
 0x824   :  { %v4278_v27 = vadd.f32 %v4277_v2, %v4205_v61 }
 0x826   :  { %v4303_v45 = vmax.f32 %v4278_v27, 0.0 }
 0x82b   :  { %v4280_v25 = vpop.f32.mrf.mxu0 }
 0x82c   :  { %v4281_v4 = vadd.f32 %v4280_v25, %v4210_v47 }
 0x82e   :  { %v4304_v16 = vmax.f32 %v4281_v4, 0.0 }
 0x833   :  { %v4283_v10 = vpop.f32.mrf.mxu0 }
 0x834   :  { %v4284_v9 = vadd.f32 %v4283_v10, %v4215_v54 }
 0x836   :  { %v4305_v53 = vmax.f32 %v4284_v9, 0.0 }
 0x83b   :  { %v4286_v40 = vpop.f32.mrf.mxu0 }
 0x83c   :  { %v4287_v19 = vadd.f32 %v4286_v40, %v4220_v26 }
 0x83e   :  { %v4306_v20 = vmax.f32 %v4287_v19, 0.0 }
 0x843   :  { %v4289_v35 = vpop.f32.mrf.mxu0 }
 0x844   :  { %v4290_v50 = vadd.f32 %v4289_v35, %v4225_v29 }
 0x846   :  { %v4307_v21 = vmax.f32 %v4290_v50, 0.0 }
 0x848   :  { %4316 = vmatpush.msrb.mxu1 %v4307_v21 }
 0x84a   :  { %4317 = vmatpush.msrb.mxu1 %v4306_v20 }
 0x84c   :  { %4318 = vmatpush.msrb.mxu1 %v4305_v53 }
 0x84e   :  { %4319 = vmatpush.msrb.mxu1 %v4304_v16 }
 0x850   :  { %4320 = vmatpush.msrb.mxu1 %v4303_v45 }
 0x852   :  { %4321 = vmatpush.msrb.mxu1 %v4302_v55 }
 0x854   :  { %4322 = vmatpush.msrb.mxu1 %v4301_v12 }
 0x856   :  { %4323 = vmatpush.msrb.mxu1 %v4300_v51 }
 0x858   :  { %4324 = vmatpush.msrb.mxu1 %v4299_v30 }
 0x85a   :  { %4325 = vmatpush.msrb.mxu1 %v4298_v59 }
 0x85c   :  { %4326 = vmatpush.msrb.mxu1 %v4297_v43 }
 0x85e   :  { %4327 = vmatpush.msrb.mxu1 %v4296_v14 }
 0x860   :  { %4328 = vmatpush.msrb.mxu1 %v4295_v36 }
 0x862   :  { %4329 = vmatpush.msrb.mxu1 %v4294_v1 }
 0x864   :  { %4330 = vmatpush.msrb.mxu1 %v4293_v13 }
 0x866   :  { %4331 = vmatpush.msrb.mxu1 %v4292_v38 }
 0x867   :  { %4332 = vmatmul.f32.vlgmr.msrb.gmra.mxu1 %v4308_v56 }
 0x8e4   :  { %v4333_v6 = vpop.f32.mrf.mxu1 }
 0x8e5   :  { %v4334_v58 = vadd.f32 %v4333_v6, %v4315_v57 }
 0x8e7   :  { %v4336_v28 = vsub.f32 0.0, %v4334_v58 }
 0x8e9   :  { %v4337_v11 = vmul.f32 1.442695, %v4336_v28 }
 0x8eb   :  { %4674 = vpow2.f32 %v4337_v11 }
 0x8f1   :  { %v4675_v22 = vpop.eup %4674 }
 0x8f2   :  { %v4339_v34 = vadd.f32 1.0, %v4675_v22 }
 0x8f4   :  { %4676 = vrcp.f32 %v4339_v34  ;;  %v4351_v25 = vand.u32 2147483648, %v4339_v34  ;;  %v4349_v26 = vand.u32 2147483647, %v4339_v34  ;;  %vm4345_vm12 = vweird.f32 %v4339_v34 }
 0x8f6   :  { %v4352_v54 = vor.u32 1.1754944e-38, %v4351_v25  ;;  %vm4350_vm15 = vcmp.eq.f32.partialorder %v4349_v26, 8.507059e+37 }
 0x8fa   :  { %v4677_v24 = vpop.eup %4676 }
 0x8fb   :  { %v4341_v37 = vmul.f32 %v4677_v24, %v4339_v34  ;;  %vm4346_vm0 = vweird.f32 %v4677_v24 }
 0x8fc   :  { %vm4347_vm13 = vmor %vm4345_vm12, %vm4346_vm0 }
 0x8fd   :  { %v4342_v2 = vsub.f32 1.0, %v4341_v37 }
 0x8ff   :  { %v4343_v29 = vmul.f32 %v4677_v24, %v4342_v2 }
 0x901   :  { %v4344_v10 = vadd.f32 %v4677_v24, %v4343_v29 }
 0x903   :  { %v4348_v47 = vsel %vm4347_vm13, %v4677_v24, %v4344_v10 }
 0x904   :  { %v4353_v40 = vsel %vm4350_vm15, %v4352_v54, %v4348_v47 }
 0x905   :  { %4356 = vst.msk [vmem:[#allocation4] sm:$0x1] %vm4355_vm14, %v4353_v40 }
 0x906   :  { %4367 = dma.vmem_to_hbm [thread:$0]  %s4363_s8, 16, %s4365_s11, [#allocation5]  }
 0x907   :  { %4734 = dma.done.wait [#allocation5], 16  }
 0x908   :  { %4735 = vsyncadd [#allocation5], 4294967280 }
 0x909   :  { %4372 = vsyncpa [#allocation5], 1 }

</bundles_post_ra>
